<compile_context>
chip_gen: v6e
topology: v6e:2x2x1
jax: 0.10.0
libtpu: 0.0.40
codegen_flags: <defaults>
</compile_context>

<pallas_src>
import math
import functools
import numpy as np

import jax
import jax.numpy as jnp
from jax.experimental import pallas as pl
from jax.experimental.pallas import tpu as pltpu


# ------------------------------- helpers ------------------------------------

def _round_up(x, m):
    return (x + m - 1) // m * m


# ----------------------------- fused Pallas kernel ---------------------------

def _fused_kernel(x_ref, coefs_ref, wsin_ref, wcos_ref, bproj_ref,
                  wsq_ref, b2_ref, fw2_ref, fb2_ref, fw3_ref, fb3_ref,
                  out_ref, *, n_blocks, hidden, scale, mxu_dtype):
    """Entire FourierNet forward for one batch tile.

    x_ref     (TN, CUT)               x tiled in kron column order, kept columns only
    coefs_ref (1, CUT)                2**l * pi per kept column
    wsin_ref  (CUT, (n_blocks+1)*H)   sin-rows of all 7 ffm-side fc1 weights, hstacked
    wcos_ref  (CUT, (n_blocks+1)*H)   cos-rows, same column layout
    bproj_ref (1, (n_blocks+1)*H)     all 7 fc1 biases, hstacked
    wsq_ref   (2*n_blocks, H, H)      [blk0.w2, blk1.w1h, blk1.w2, ..., final.w1h]
    b2_ref    (n_blocks, H)           fc2 bias of each block
    fw2_ref   (H, H//2), fb2_ref (1, H//2)
    fw3_ref   (H//2, O_PAD), fb3_ref (1, O_PAD)   zero-padded to 128 lanes
    out_ref   (TN, O_PAD)
    """
    H = hidden

    def dot(a, b):
        return jnp.dot(a.astype(mxu_dtype), b, preferred_element_type=jnp.float32)

    # ---- FFM: arg[:, l*D+d] = coefs[l] * x[:, d] on the kept (< cutoff) columns only ----
    arg = x_ref[...] * coefs_ref[...]                       # (TN, CUT)  f32
    sinv = jnp.sin(arg)
    cosv = jnp.cos(arg)

    # ---- all 7 ffm-side fc1 projections (+ their biases) as one wide matmul pair ----
    proj = (dot(sinv, wsin_ref[...]) + dot(cosv, wcos_ref[...])
            + bproj_ref[...])                               # (TN, (n_blocks+1)*H)  f32

    b2_all = b2_ref[...]                                    # (n_blocks, H)  f32

    # ---- block 0: fc1 input is ffm alone (its proj segment), then fc2 ----
    h = jnp.maximum(proj[:, 0:H], 0.0)
    h = jnp.maximum(dot(h, wsq_ref[0]) + b2_all[0:1, :], 0.0)

    # ---- blocks 1 .. n_blocks-1: fc1 input is cat(h, ffm) -> split matmul + proj seg ----
    for b in range(1, n_blocks):
        h = jnp.maximum(dot(h, wsq_ref[2 * b - 1]) + proj[:, b * H:(b + 1) * H], 0.0)
        h = jnp.maximum(dot(h, wsq_ref[2 * b]) + b2_all[b:b + 1, :], 0.0)

    # ---- final block: cat(h, ffm) -> fc1 relu fc2 relu fc3 (lane-padded), * scale ----
    h = jnp.maximum(dot(h, wsq_ref[2 * n_blocks - 1])
                    + proj[:, n_blocks * H:(n_blocks + 1) * H], 0.0)
    h = jnp.maximum(dot(h, fw2_ref[...]) + fb2_ref[...], 0.0)
    out_ref[...] = (dot(h, fw3_ref[...]) + fb3_ref[...]) * scale


# ------------------------------ parameters ----------------------------------

def _linear_params(key, fan_in, fan_out):
    # matches torch.nn.Linear default init scale (uniform +-1/sqrt(fan_in));
    # weight stored transposed as (fan_in, fan_out) so kernels compute x @ W.
    k1, k2 = jax.random.split(key)
    bound = 1.0 / math.sqrt(fan_in)
    w = jax.random.uniform(k1, (fan_in, fan_out), jnp.float32, -bound, bound)
    b = jax.random.uniform(k2, (1, fan_out), jnp.float32, -bound, bound)
    return w, b


def init_params(key, in_features, hidden_features, hidden_blocks, out_features, L):
    D, H = in_features, hidden_features
    ffm_exp = 2 * D * L

    params = {"coefs": (2.0 ** jnp.arange(L, dtype=jnp.float32)) * math.pi}

    n_linear = 2 * hidden_blocks + 3
    keys = iter(jax.random.split(key, n_linear))

    blocks = []
    w1, b1 = _linear_params(next(keys), ffm_exp, H)
    w2, b2 = _linear_params(next(keys), H, H)
    blocks.append((w1, b1, w2, b2))
    for _ in range(hidden_blocks - 1):
        w1, b1 = _linear_params(next(keys), H + ffm_exp, H)
        w2, b2 = _linear_params(next(keys), H, H)
        blocks.append((w1, b1, w2, b2))
    params["blocks"] = blocks

    fw1, fb1 = _linear_params(next(keys), H + ffm_exp, H)
    fw2, fb2 = _linear_params(next(keys), H, H // 2)
    fw3, fb3 = _linear_params(next(keys), H // 2, out_features)
    params["final"] = (fw1, fb1, fw2, fb2, fw3, fb3)
    return params


# ------------------------------ forward pass ---------------------------------

def fourier_net_forward(params, x, L, frac=1.0, scale=1.0, batch_tile=2048,
                        mxu_dtype=jnp.float32):
    N, D = x.shape
    LD = L * D
    H = params["blocks"][0][0].shape[1]
    O = params["final"][4].shape[1]
    n_blocks = len(params["blocks"])
    SEG = (n_blocks + 1) * H          # merged ffm-projection width (unpadded, 1 MXU pass)
    O_PAD = _round_up(O, 128)         # lane-dense output

    # Static column-index cutoff, exactly as in torch: out[:, round(L*frac):] = 0
    cutoff = int(np.round(L * frac))
    cutoff = max(0, min(cutoff, LD))
    CUT = max(cutoff, 1)                                          # static kept-column count
    valid = (np.arange(CUT) < cutoff).astype(np.float32)[:, None]  # only != 1 when cutoff==0

    # ---- tiny wrapper-side glue: kron column order + static-cutoff truncation ----
    x_rep = jnp.tile(x, (1, L))[:, :CUT]                          # (N, CUT)
    coefs_rep = jnp.repeat(params["coefs"], D)[None, :CUT]        # (1, CUT)

    # ---- pack weights: sin/cos halves merged across blocks, square weights stacked ----
    def sincos_split(w_ffm):          # rows of a (2*LD, H) ffm-consuming weight
        return w_ffm[:CUT] * valid, w_ffm[LD:LD + CUT] * valid

    sin_cols, cos_cols, b1_cols, sq, b2_rows = [], [], [], [], []
    w1, b1, w2, b2 = params["blocks"][0]
    s, c = sincos_split(w1)
    sin_cols.append(s); cos_cols.append(c); b1_cols.append(b1)
    sq.append(w2); b2_rows.append(b2)
    for (w1, b1, w2, b2) in params["blocks"][1:]:
        s, c = sincos_split(w1[H:])
        sin_cols.append(s); cos_cols.append(c); b1_cols.append(b1)
        sq.append(w1[:H]); sq.append(w2); b2_rows.append(b2)
    fw1, fb1, fw2, fb2, fw3, fb3 = params["final"]
    s, c = sincos_split(fw1[H:])
    sin_cols.append(s); cos_cols.append(c); b1_cols.append(fb1)
    sq.append(fw1[:H])

    wsin = jnp.concatenate(sin_cols, axis=1).astype(mxu_dtype)    # (CUT, SEG)
    wcos = jnp.concatenate(cos_cols, axis=1).astype(mxu_dtype)    # (CUT, SEG)
    bproj = jnp.concatenate(b1_cols, axis=1)                      # (1, SEG)      f32
    wsq = jnp.stack(sq, axis=0).astype(mxu_dtype)                 # (2*n_blocks, H, H)
    b2_all = jnp.concatenate(b2_rows, axis=0)                     # (n_blocks, H) f32
    fw2 = fw2.astype(mxu_dtype)
    fw3p = jnp.pad(fw3, ((0, 0), (0, O_PAD - O))).astype(mxu_dtype)
    fb3p = jnp.pad(fb3, ((0, 0), (0, O_PAD - O)))                 # f32

    # ---- batch tiling: big tiles, >= 2 grid steps whenever possible (v7x megacore) ----
    N8 = _round_up(max(N, 1), 8)
    if N8 <= 8:
        TN = N8
    else:
        TN = min(batch_tile, _round_up(pl.cdiv(N8, 2), 8))
    TN = max(TN, 8)
    N_pad = _round_up(N8, TN)
    if N_pad != N:
        x_rep = jnp.pad(x_rep, ((0, N_pad - N), (0, 0)))

    kernel = functools.partial(_fused_kernel, n_blocks=n_blocks, hidden=H,
                               scale=float(scale), mxu_dtype=mxu_dtype)

    in_specs = [
        pl.BlockSpec((TN, CUT), lambda i: (i, 0)),                 # x_rep (batch-blocked)
        pl.BlockSpec((1, CUT), lambda i: (0, 0)),                  # coefs
        pl.BlockSpec((CUT, SEG), lambda i: (0, 0)),                # merged sin weights
        pl.BlockSpec((CUT, SEG), lambda i: (0, 0)),                # merged cos weights
        pl.BlockSpec((1, SEG), lambda i: (0, 0)),                  # merged fc1 biases
        pl.BlockSpec((2 * n_blocks, H, H), lambda i: (0, 0, 0)),   # square-weight slab
        pl.BlockSpec((n_blocks, H), lambda i: (0, 0)),             # fc2-bias slab
        pl.BlockSpec((H, H // 2), lambda i: (0, 0)),               # final fc2 weight
        pl.BlockSpec((1, H // 2), lambda i: (0, 0)),               # final fc2 bias
        pl.BlockSpec((H // 2, O_PAD), lambda i: (0, 0)),           # final fc3 weight (padded)
        pl.BlockSpec((1, O_PAD), lambda i: (0, 0)),                # final fc3 bias (padded)
    ]

    out = pl.pallas_call(
        kernel,
        out_shape=jax.ShapeDtypeStruct((N_pad, O_PAD), jnp.float32),
        grid=(N_pad // TN,),
        in_specs=in_specs,
        out_specs=pl.BlockSpec((TN, O_PAD), lambda i: (i, 0)),
        compiler_params=pltpu.CompilerParams(
            dimension_semantics=("parallel",),        # shard batch tiles on v7x's 2 TCs
            vmem_limit_bytes=48 * 1024 * 1024),       # headroom for large tiles on v5e
    )(x_rep, coefs_rep, wsin, wcos, bproj, wsq, b2_all, fw2, fb2, fw3p, fb3p)
    return out[:N, :O]


# ------------------------------ pure-JAX reference ---------------------------

def _ref_forward(params, x, L, frac=1.0, scale=1.0):
    N, D = x.shape
    LD = L * D
    arg = jnp.tile(x, (1, L)) * jnp.repeat(params["coefs"], D)[None, :]
    cutoff = int(np.round(L * frac))
    keep = (np.arange(LD) < cutoff)[None, :]
    ffm = jnp.concatenate([jnp.where(keep, jnp.sin(arg), 0.0),
                           jnp.where(keep, jnp.cos(arg), 0.0)], axis=1)

    h = ffm
    for (w1, b1, w2, b2) in params["blocks"]:
        h = jnp.maximum(h @ w1 + b1, 0.0)
        h = jnp.maximum(h @ w2 + b2, 0.0)
        h = jnp.concatenate([h, ffm], axis=1)
    fw1, fb1, fw2, fb2, fw3, fb3 = params["final"]
    h = jnp.maximum(h @ fw1 + fb1, 0.0)
    h = jnp.maximum(h @ fw2 + fb2, 0.0)
    return (h @ fw3 + fb3) * scale


# ---------------------------------- main -------------------------------------

if __name__ == "__main__":
    in_features, hidden_features, hidden_blocks, out_features, L = 2, 32, 6, 1, 10
    scale = 1.0
    N = 300   # exercises batch padding (-> 304 rows) and a 2-step "parallel" grid

    key = jax.random.PRNGKey(0)
    kp, kx = jax.random.split(key)
    params = init_params(kp, in_features, hidden_features, hidden_blocks, out_features, L)
    x = jax.random.uniform(kx, (N, in_features), jnp.float32, -1.0, 1.0)

    fwd = jax.jit(functools.partial(fourier_net_forward, L=L, frac=1.0, scale=scale))
    y = jax.block_until_ready(fwd(params, x))

    y_ref = _ref_forward(params, x, L, frac=1.0, scale=scale)
    # Tolerance looser than machine eps: FFM arguments reach 2**(L-1)*pi ~ 1.6e3 and the
    # in-kernel vs XLA sin/cos argument reductions may differ by a few ULP.
    np.testing.assert_allclose(np.asarray(y), np.asarray(y_ref), rtol=2e-3, atol=5e-3)
    assert y.shape == (N, out_features)

    print("KERNEL_OK")
</pallas_src>

<mosaic_0001>
module attributes {stable_mosaic.version = 11 : i64} {
  func.func @_fused_kernel(%arg0: i32, %arg1: memref<152x10xf32, #tpu.memory_space<vmem>>, %arg2: memref<1x10xf32, #tpu.memory_space<vmem>>, %arg3: memref<10x224xf32, #tpu.memory_space<vmem>>, %arg4: memref<10x224xf32, #tpu.memory_space<vmem>>, %arg5: memref<1x224xf32, #tpu.memory_space<vmem>>, %arg6: memref<12x32x32xf32, #tpu.memory_space<vmem>>, %arg7: memref<6x32xf32, #tpu.memory_space<vmem>>, %arg8: memref<32x16xf32, #tpu.memory_space<vmem>>, %arg9: memref<1x16xf32, #tpu.memory_space<vmem>>, %arg10: memref<16x128xf32, #tpu.memory_space<vmem>>, %arg11: memref<1x128xf32, #tpu.memory_space<vmem>>, %arg12: memref<152x128xf32, #tpu.memory_space<vmem>>) attributes {dimension_semantics = [#tpu.dimension_semantics<parallel>], iteration_bounds = array<i64: 2>, scalar_prefetch = 0 : i64, scratch_operands = 0 : i64, tpu.core_type = #tpu.core_type<tc>, window_params = [{transform_indices = @transform_0, window_bounds = array<i64: 152, 10>}, {pipeline_mode = #tpu.pipeline_mode<synchronous>, transform_indices = @transform_1, window_bounds = array<i64: 1, 10>}, {pipeline_mode = #tpu.pipeline_mode<synchronous>, transform_indices = @transform_2, window_bounds = array<i64: 10, 224>}, {pipeline_mode = #tpu.pipeline_mode<synchronous>, transform_indices = @transform_3, window_bounds = array<i64: 10, 224>}, {pipeline_mode = #tpu.pipeline_mode<synchronous>, transform_indices = @transform_4, window_bounds = array<i64: 1, 224>}, {pipeline_mode = #tpu.pipeline_mode<synchronous>, transform_indices = @transform_5, window_bounds = array<i64: 12, 32, 32>}, {pipeline_mode = #tpu.pipeline_mode<synchronous>, transform_indices = @transform_6, window_bounds = array<i64: 6, 32>}, {pipeline_mode = #tpu.pipeline_mode<synchronous>, transform_indices = @transform_7, window_bounds = array<i64: 32, 16>}, {pipeline_mode = #tpu.pipeline_mode<synchronous>, transform_indices = @transform_8, window_bounds = array<i64: 1, 16>}, {pipeline_mode = #tpu.pipeline_mode<synchronous>, transform_indices = @transform_9, window_bounds = array<i64: 16, 128>}, {pipeline_mode = #tpu.pipeline_mode<synchronous>, transform_indices = @transform_10, window_bounds = array<i64: 1, 128>}, {transform_indices = @transform_11, window_bounds = array<i64: 152, 128>}]} {
    %c0 = arith.constant 0 : index
    %c0_0 = arith.constant 0 : index
    %0 = vector.load %arg1[%c0, %c0_0] : memref<152x10xf32, #tpu.memory_space<vmem>>, vector<152x10xf32>
    %c0_1 = arith.constant 0 : index
    %c0_2 = arith.constant 0 : index
    %1 = vector.load %arg2[%c0_1, %c0_2] : memref<1x10xf32, #tpu.memory_space<vmem>>, vector<1x10xf32>
    %2 = vector.broadcast %1 : vector<1x10xf32> to vector<152x10xf32>
    %3 = arith.mulf %0, %2 : vector<152x10xf32>
    %4 = math.sin %3 : vector<152x10xf32>
    %5 = math.cos %3 : vector<152x10xf32>
    %c0_3 = arith.constant 0 : index
    %c0_4 = arith.constant 0 : index
    %6 = vector.load %arg3[%c0_3, %c0_4] : memref<10x224xf32, #tpu.memory_space<vmem>>, vector<10x224xf32>
    %cst = arith.constant dense<0.000000e+00> : vector<152x224xf32>
    %7 = tpu.matmul %4, %6, %cst {dimension_numbers = #tpu.dot_dimension_numbers<[1], [0], [0], [1], [0, 0, 1, 1], [], []>} : vector<152x10xf32>, vector<10x224xf32>, vector<152x224xf32> -> vector<152x224xf32>
    %c0_5 = arith.constant 0 : index
    %c0_6 = arith.constant 0 : index
    %8 = vector.load %arg4[%c0_5, %c0_6] : memref<10x224xf32, #tpu.memory_space<vmem>>, vector<10x224xf32>
    %cst_7 = arith.constant dense<0.000000e+00> : vector<152x224xf32>
    %9 = tpu.matmul %5, %8, %cst_7 {dimension_numbers = #tpu.dot_dimension_numbers<[1], [0], [0], [1], [0, 0, 1, 1], [], []>} : vector<152x10xf32>, vector<10x224xf32>, vector<152x224xf32> -> vector<152x224xf32>
    %10 = arith.addf %7, %9 : vector<152x224xf32>
    %c0_8 = arith.constant 0 : index
    %c0_9 = arith.constant 0 : index
    %11 = vector.load %arg5[%c0_8, %c0_9] : memref<1x224xf32, #tpu.memory_space<vmem>>, vector<1x224xf32>
    %12 = vector.broadcast %11 : vector<1x224xf32> to vector<152x224xf32>
    %13 = arith.addf %10, %12 : vector<152x224xf32>
    %c0_10 = arith.constant 0 : index
    %c0_11 = arith.constant 0 : index
    %14 = vector.load %arg7[%c0_10, %c0_11] : memref<6x32xf32, #tpu.memory_space<vmem>>, vector<6x32xf32>
    %15 = vector.extract_strided_slice %13 {offsets = [0, 0], sizes = [152, 32], strides = [1, 1]} : vector<152x224xf32> to vector<152x32xf32>
    %cst_12 = arith.constant 0.000000e+00 : f32
    %16 = vector.broadcast %cst_12 : f32 to vector<152x32xf32>
    %17 = arith.maximumf %15, %16 : vector<152x32xf32>
    %c0_13 = arith.constant 0 : index
    %c0_14 = arith.constant 0 : index
    %c0_15 = arith.constant 0 : index
    %18 = vector.load %arg6[%c0_13, %c0_14, %c0_15] : memref<12x32x32xf32, #tpu.memory_space<vmem>>, vector<1x32x32xf32>
    %19 = vector.shape_cast %18 : vector<1x32x32xf32> to vector<32x32xf32>
    %cst_16 = arith.constant dense<0.000000e+00> : vector<152x32xf32>
    %20 = tpu.matmul %17, %19, %cst_16 {dimension_numbers = #tpu.dot_dimension_numbers<[1], [0], [0], [1], [0, 0, 1, 1], [], []>} : vector<152x32xf32>, vector<32x32xf32>, vector<152x32xf32> -> vector<152x32xf32>
    %21 = vector.extract_strided_slice %14 {offsets = [0, 0], sizes = [1, 32], strides = [1, 1]} : vector<6x32xf32> to vector<1x32xf32>
    %22 = vector.broadcast %21 : vector<1x32xf32> to vector<152x32xf32>
    %23 = arith.addf %20, %22 : vector<152x32xf32>
    %cst_17 = arith.constant 0.000000e+00 : f32
    %24 = vector.broadcast %cst_17 : f32 to vector<152x32xf32>
    %25 = arith.maximumf %23, %24 : vector<152x32xf32>
    %c1 = arith.constant 1 : index
    %c0_18 = arith.constant 0 : index
    %c0_19 = arith.constant 0 : index
    %26 = vector.load %arg6[%c1, %c0_18, %c0_19] : memref<12x32x32xf32, #tpu.memory_space<vmem>>, vector<1x32x32xf32>
    %27 = vector.shape_cast %26 : vector<1x32x32xf32> to vector<32x32xf32>
    %cst_20 = arith.constant dense<0.000000e+00> : vector<152x32xf32>
    %28 = tpu.matmul %25, %27, %cst_20 {dimension_numbers = #tpu.dot_dimension_numbers<[1], [0], [0], [1], [0, 0, 1, 1], [], []>} : vector<152x32xf32>, vector<32x32xf32>, vector<152x32xf32> -> vector<152x32xf32>
    %29 = vector.extract_strided_slice %13 {offsets = [0, 32], sizes = [152, 32], strides = [1, 1]} : vector<152x224xf32> to vector<152x32xf32>
    %30 = arith.addf %28, %29 : vector<152x32xf32>
    %cst_21 = arith.constant 0.000000e+00 : f32
    %31 = vector.broadcast %cst_21 : f32 to vector<152x32xf32>
    %32 = arith.maximumf %30, %31 : vector<152x32xf32>
    %c2 = arith.constant 2 : index
    %c0_22 = arith.constant 0 : index
    %c0_23 = arith.constant 0 : index
    %33 = vector.load %arg6[%c2, %c0_22, %c0_23] : memref<12x32x32xf32, #tpu.memory_space<vmem>>, vector<1x32x32xf32>
    %34 = vector.shape_cast %33 : vector<1x32x32xf32> to vector<32x32xf32>
    %cst_24 = arith.constant dense<0.000000e+00> : vector<152x32xf32>
    %35 = tpu.matmul %32, %34, %cst_24 {dimension_numbers = #tpu.dot_dimension_numbers<[1], [0], [0], [1], [0, 0, 1, 1], [], []>} : vector<152x32xf32>, vector<32x32xf32>, vector<152x32xf32> -> vector<152x32xf32>
    %36 = vector.extract_strided_slice %14 {offsets = [1, 0], sizes = [1, 32], strides = [1, 1]} : vector<6x32xf32> to vector<1x32xf32>
    %37 = vector.broadcast %36 : vector<1x32xf32> to vector<152x32xf32>
    %38 = arith.addf %35, %37 : vector<152x32xf32>
    %cst_25 = arith.constant 0.000000e+00 : f32
    %39 = vector.broadcast %cst_25 : f32 to vector<152x32xf32>
    %40 = arith.maximumf %38, %39 : vector<152x32xf32>
    %c3 = arith.constant 3 : index
    %c0_26 = arith.constant 0 : index
    %c0_27 = arith.constant 0 : index
    %41 = vector.load %arg6[%c3, %c0_26, %c0_27] : memref<12x32x32xf32, #tpu.memory_space<vmem>>, vector<1x32x32xf32>
    %42 = vector.shape_cast %41 : vector<1x32x32xf32> to vector<32x32xf32>
    %cst_28 = arith.constant dense<0.000000e+00> : vector<152x32xf32>
    %43 = tpu.matmul %40, %42, %cst_28 {dimension_numbers = #tpu.dot_dimension_numbers<[1], [0], [0], [1], [0, 0, 1, 1], [], []>} : vector<152x32xf32>, vector<32x32xf32>, vector<152x32xf32> -> vector<152x32xf32>
    %44 = vector.extract_strided_slice %13 {offsets = [0, 64], sizes = [152, 32], strides = [1, 1]} : vector<152x224xf32> to vector<152x32xf32>
    %45 = arith.addf %43, %44 : vector<152x32xf32>
    %cst_29 = arith.constant 0.000000e+00 : f32
    %46 = vector.broadcast %cst_29 : f32 to vector<152x32xf32>
    %47 = arith.maximumf %45, %46 : vector<152x32xf32>
    %c4 = arith.constant 4 : index
    %c0_30 = arith.constant 0 : index
    %c0_31 = arith.constant 0 : index
    %48 = vector.load %arg6[%c4, %c0_30, %c0_31] : memref<12x32x32xf32, #tpu.memory_space<vmem>>, vector<1x32x32xf32>
    %49 = vector.shape_cast %48 : vector<1x32x32xf32> to vector<32x32xf32>
    %cst_32 = arith.constant dense<0.000000e+00> : vector<152x32xf32>
    %50 = tpu.matmul %47, %49, %cst_32 {dimension_numbers = #tpu.dot_dimension_numbers<[1], [0], [0], [1], [0, 0, 1, 1], [], []>} : vector<152x32xf32>, vector<32x32xf32>, vector<152x32xf32> -> vector<152x32xf32>
    %51 = vector.extract_strided_slice %14 {offsets = [2, 0], sizes = [1, 32], strides = [1, 1]} : vector<6x32xf32> to vector<1x32xf32>
    %52 = vector.broadcast %51 : vector<1x32xf32> to vector<152x32xf32>
    %53 = arith.addf %50, %52 : vector<152x32xf32>
    %cst_33 = arith.constant 0.000000e+00 : f32
    %54 = vector.broadcast %cst_33 : f32 to vector<152x32xf32>
    %55 = arith.maximumf %53, %54 : vector<152x32xf32>
    %c5 = arith.constant 5 : index
    %c0_34 = arith.constant 0 : index
    %c0_35 = arith.constant 0 : index
    %56 = vector.load %arg6[%c5, %c0_34, %c0_35] : memref<12x32x32xf32, #tpu.memory_space<vmem>>, vector<1x32x32xf32>
    %57 = vector.shape_cast %56 : vector<1x32x32xf32> to vector<32x32xf32>
    %cst_36 = arith.constant dense<0.000000e+00> : vector<152x32xf32>
    %58 = tpu.matmul %55, %57, %cst_36 {dimension_numbers = #tpu.dot_dimension_numbers<[1], [0], [0], [1], [0, 0, 1, 1], [], []>} : vector<152x32xf32>, vector<32x32xf32>, vector<152x32xf32> -> vector<152x32xf32>
    %59 = vector.extract_strided_slice %13 {offsets = [0, 96], sizes = [152, 32], strides = [1, 1]} : vector<152x224xf32> to vector<152x32xf32>
    %60 = arith.addf %58, %59 : vector<152x32xf32>
    %cst_37 = arith.constant 0.000000e+00 : f32
    %61 = vector.broadcast %cst_37 : f32 to vector<152x32xf32>
    %62 = arith.maximumf %60, %61 : vector<152x32xf32>
    %c6 = arith.constant 6 : index
    %c0_38 = arith.constant 0 : index
    %c0_39 = arith.constant 0 : index
    %63 = vector.load %arg6[%c6, %c0_38, %c0_39] : memref<12x32x32xf32, #tpu.memory_space<vmem>>, vector<1x32x32xf32>
    %64 = vector.shape_cast %63 : vector<1x32x32xf32> to vector<32x32xf32>
    %cst_40 = arith.constant dense<0.000000e+00> : vector<152x32xf32>
    %65 = tpu.matmul %62, %64, %cst_40 {dimension_numbers = #tpu.dot_dimension_numbers<[1], [0], [0], [1], [0, 0, 1, 1], [], []>} : vector<152x32xf32>, vector<32x32xf32>, vector<152x32xf32> -> vector<152x32xf32>
    %66 = vector.extract_strided_slice %14 {offsets = [3, 0], sizes = [1, 32], strides = [1, 1]} : vector<6x32xf32> to vector<1x32xf32>
    %67 = vector.broadcast %66 : vector<1x32xf32> to vector<152x32xf32>
    %68 = arith.addf %65, %67 : vector<152x32xf32>
    %cst_41 = arith.constant 0.000000e+00 : f32
    %69 = vector.broadcast %cst_41 : f32 to vector<152x32xf32>
    %70 = arith.maximumf %68, %69 : vector<152x32xf32>
    %c7 = arith.constant 7 : index
    %c0_42 = arith.constant 0 : index
    %c0_43 = arith.constant 0 : index
    %71 = vector.load %arg6[%c7, %c0_42, %c0_43] : memref<12x32x32xf32, #tpu.memory_space<vmem>>, vector<1x32x32xf32>
    %72 = vector.shape_cast %71 : vector<1x32x32xf32> to vector<32x32xf32>
    %cst_44 = arith.constant dense<0.000000e+00> : vector<152x32xf32>
    %73 = tpu.matmul %70, %72, %cst_44 {dimension_numbers = #tpu.dot_dimension_numbers<[1], [0], [0], [1], [0, 0, 1, 1], [], []>} : vector<152x32xf32>, vector<32x32xf32>, vector<152x32xf32> -> vector<152x32xf32>
    %74 = vector.extract_strided_slice %13 {offsets = [0, 128], sizes = [152, 32], strides = [1, 1]} : vector<152x224xf32> to vector<152x32xf32>
    %75 = arith.addf %73, %74 : vector<152x32xf32>
    %cst_45 = arith.constant 0.000000e+00 : f32
    %76 = vector.broadcast %cst_45 : f32 to vector<152x32xf32>
    %77 = arith.maximumf %75, %76 : vector<152x32xf32>
    %c8 = arith.constant 8 : index
    %c0_46 = arith.constant 0 : index
    %c0_47 = arith.constant 0 : index
    %78 = vector.load %arg6[%c8, %c0_46, %c0_47] : memref<12x32x32xf32, #tpu.memory_space<vmem>>, vector<1x32x32xf32>
    %79 = vector.shape_cast %78 : vector<1x32x32xf32> to vector<32x32xf32>
    %cst_48 = arith.constant dense<0.000000e+00> : vector<152x32xf32>
    %80 = tpu.matmul %77, %79, %cst_48 {dimension_numbers = #tpu.dot_dimension_numbers<[1], [0], [0], [1], [0, 0, 1, 1], [], []>} : vector<152x32xf32>, vector<32x32xf32>, vector<152x32xf32> -> vector<152x32xf32>
    %81 = vector.extract_strided_slice %14 {offsets = [4, 0], sizes = [1, 32], strides = [1, 1]} : vector<6x32xf32> to vector<1x32xf32>
    %82 = vector.broadcast %81 : vector<1x32xf32> to vector<152x32xf32>
    %83 = arith.addf %80, %82 : vector<152x32xf32>
    %cst_49 = arith.constant 0.000000e+00 : f32
    %84 = vector.broadcast %cst_49 : f32 to vector<152x32xf32>
    %85 = arith.maximumf %83, %84 : vector<152x32xf32>
    %c9 = arith.constant 9 : index
    %c0_50 = arith.constant 0 : index
    %c0_51 = arith.constant 0 : index
    %86 = vector.load %arg6[%c9, %c0_50, %c0_51] : memref<12x32x32xf32, #tpu.memory_space<vmem>>, vector<1x32x32xf32>
    %87 = vector.shape_cast %86 : vector<1x32x32xf32> to vector<32x32xf32>
    %cst_52 = arith.constant dense<0.000000e+00> : vector<152x32xf32>
    %88 = tpu.matmul %85, %87, %cst_52 {dimension_numbers = #tpu.dot_dimension_numbers<[1], [0], [0], [1], [0, 0, 1, 1], [], []>} : vector<152x32xf32>, vector<32x32xf32>, vector<152x32xf32> -> vector<152x32xf32>
    %89 = vector.extract_strided_slice %13 {offsets = [0, 160], sizes = [152, 32], strides = [1, 1]} : vector<152x224xf32> to vector<152x32xf32>
    %90 = arith.addf %88, %89 : vector<152x32xf32>
    %cst_53 = arith.constant 0.000000e+00 : f32
    %91 = vector.broadcast %cst_53 : f32 to vector<152x32xf32>
    %92 = arith.maximumf %90, %91 : vector<152x32xf32>
    %c10 = arith.constant 10 : index
    %c0_54 = arith.constant 0 : index
    %c0_55 = arith.constant 0 : index
    %93 = vector.load %arg6[%c10, %c0_54, %c0_55] : memref<12x32x32xf32, #tpu.memory_space<vmem>>, vector<1x32x32xf32>
    %94 = vector.shape_cast %93 : vector<1x32x32xf32> to vector<32x32xf32>
    %cst_56 = arith.constant dense<0.000000e+00> : vector<152x32xf32>
    %95 = tpu.matmul %92, %94, %cst_56 {dimension_numbers = #tpu.dot_dimension_numbers<[1], [0], [0], [1], [0, 0, 1, 1], [], []>} : vector<152x32xf32>, vector<32x32xf32>, vector<152x32xf32> -> vector<152x32xf32>
    %96 = vector.extract_strided_slice %14 {offsets = [5, 0], sizes = [1, 32], strides = [1, 1]} : vector<6x32xf32> to vector<1x32xf32>
    %97 = vector.broadcast %96 : vector<1x32xf32> to vector<152x32xf32>
    %98 = arith.addf %95, %97 : vector<152x32xf32>
    %cst_57 = arith.constant 0.000000e+00 : f32
    %99 = vector.broadcast %cst_57 : f32 to vector<152x32xf32>
    %100 = arith.maximumf %98, %99 : vector<152x32xf32>
    %c11 = arith.constant 11 : index
    %c0_58 = arith.constant 0 : index
    %c0_59 = arith.constant 0 : index
    %101 = vector.load %arg6[%c11, %c0_58, %c0_59] : memref<12x32x32xf32, #tpu.memory_space<vmem>>, vector<1x32x32xf32>
    %102 = vector.shape_cast %101 : vector<1x32x32xf32> to vector<32x32xf32>
    %cst_60 = arith.constant dense<0.000000e+00> : vector<152x32xf32>
    %103 = tpu.matmul %100, %102, %cst_60 {dimension_numbers = #tpu.dot_dimension_numbers<[1], [0], [0], [1], [0, 0, 1, 1], [], []>} : vector<152x32xf32>, vector<32x32xf32>, vector<152x32xf32> -> vector<152x32xf32>
    %104 = vector.extract_strided_slice %13 {offsets = [0, 192], sizes = [152, 32], strides = [1, 1]} : vector<152x224xf32> to vector<152x32xf32>
    %105 = arith.addf %103, %104 : vector<152x32xf32>
    %cst_61 = arith.constant 0.000000e+00 : f32
    %106 = vector.broadcast %cst_61 : f32 to vector<152x32xf32>
    %107 = arith.maximumf %105, %106 : vector<152x32xf32>
    %c0_62 = arith.constant 0 : index
    %c0_63 = arith.constant 0 : index
    %108 = vector.load %arg8[%c0_62, %c0_63] : memref<32x16xf32, #tpu.memory_space<vmem>>, vector<32x16xf32>
    %cst_64 = arith.constant dense<0.000000e+00> : vector<152x16xf32>
    %109 = tpu.matmul %107, %108, %cst_64 {dimension_numbers = #tpu.dot_dimension_numbers<[1], [0], [0], [1], [0, 0, 1, 1], [], []>} : vector<152x32xf32>, vector<32x16xf32>, vector<152x16xf32> -> vector<152x16xf32>
    %c0_65 = arith.constant 0 : index
    %c0_66 = arith.constant 0 : index
    %110 = vector.load %arg9[%c0_65, %c0_66] : memref<1x16xf32, #tpu.memory_space<vmem>>, vector<1x16xf32>
    %111 = vector.broadcast %110 : vector<1x16xf32> to vector<152x16xf32>
    %112 = arith.addf %109, %111 : vector<152x16xf32>
    %cst_67 = arith.constant 0.000000e+00 : f32
    %113 = vector.broadcast %cst_67 : f32 to vector<152x16xf32>
    %114 = arith.maximumf %112, %113 : vector<152x16xf32>
    %c0_68 = arith.constant 0 : index
    %c0_69 = arith.constant 0 : index
    %115 = vector.load %arg10[%c0_68, %c0_69] : memref<16x128xf32, #tpu.memory_space<vmem>>, vector<16x128xf32>
    %cst_70 = arith.constant dense<0.000000e+00> : vector<152x128xf32>
    %116 = tpu.matmul %114, %115, %cst_70 {dimension_numbers = #tpu.dot_dimension_numbers<[1], [0], [0], [1], [0, 0, 1, 1], [], []>} : vector<152x16xf32>, vector<16x128xf32>, vector<152x128xf32> -> vector<152x128xf32>
    %c0_71 = arith.constant 0 : index
    %c0_72 = arith.constant 0 : index
    %117 = vector.load %arg11[%c0_71, %c0_72] : memref<1x128xf32, #tpu.memory_space<vmem>>, vector<1x128xf32>
    %118 = vector.broadcast %117 : vector<1x128xf32> to vector<152x128xf32>
    %119 = arith.addf %116, %118 : vector<152x128xf32>
    %cst_73 = arith.constant 1.000000e+00 : f32
    %120 = vector.broadcast %cst_73 : f32 to vector<152x128xf32>
    %121 = arith.mulf %119, %120 : vector<152x128xf32>
    %c0_74 = arith.constant 0 : index
    %c0_75 = arith.constant 0 : index
    %122 = vector.load %arg12[%c0_74, %c0_75] : memref<152x128xf32, #tpu.memory_space<vmem>>, vector<152x128xf32>
    tpu.vector_store %arg12[%c0_74, %c0_75], %121 {strides = array<i32>} : memref<152x128xf32, #tpu.memory_space<vmem>>, vector<152x128xf32>,
    return
  }
  func.func @transform_0(%arg0: i32) -> (i32, i32) {
    %c0_i32 = arith.constant 0 : i32
    %c0_i32_0 = arith.constant 0 : i32
    return %arg0, %c0_i32 : i32, i32
  }
  func.func @transform_1(%arg0: i32) -> (i32, i32) {
    %c0_i32 = arith.constant 0 : i32
    %c0_i32_0 = arith.constant 0 : i32
    %c0_i32_1 = arith.constant 0 : i32
    return %c0_i32, %c0_i32_0 : i32, i32
  }
  func.func @transform_2(%arg0: i32) -> (i32, i32) {
    %c0_i32 = arith.constant 0 : i32
    %c0_i32_0 = arith.constant 0 : i32
    %c0_i32_1 = arith.constant 0 : i32
    return %c0_i32, %c0_i32_0 : i32, i32
  }
  func.func @transform_3(%arg0: i32) -> (i32, i32) {
    %c0_i32 = arith.constant 0 : i32
    %c0_i32_0 = arith.constant 0 : i32
    %c0_i32_1 = arith.constant 0 : i32
    return %c0_i32, %c0_i32_0 : i32, i32
  }
  func.func @transform_4(%arg0: i32) -> (i32, i32) {
    %c0_i32 = arith.constant 0 : i32
    %c0_i32_0 = arith.constant 0 : i32
    %c0_i32_1 = arith.constant 0 : i32
    return %c0_i32, %c0_i32_0 : i32, i32
  }
  func.func @transform_5(%arg0: i32) -> (i32, i32, i32) {
    %c0_i32 = arith.constant 0 : i32
    %c0_i32_0 = arith.constant 0 : i32
    %c0_i32_1 = arith.constant 0 : i32
    %c0_i32_2 = arith.constant 0 : i32
    return %c0_i32, %c0_i32_0, %c0_i32_1 : i32, i32, i32
  }
  func.func @transform_6(%arg0: i32) -> (i32, i32) {
    %c0_i32 = arith.constant 0 : i32
    %c0_i32_0 = arith.constant 0 : i32
    %c0_i32_1 = arith.constant 0 : i32
    return %c0_i32, %c0_i32_0 : i32, i32
  }
  func.func @transform_7(%arg0: i32) -> (i32, i32) {
    %c0_i32 = arith.constant 0 : i32
    %c0_i32_0 = arith.constant 0 : i32
    %c0_i32_1 = arith.constant 0 : i32
    return %c0_i32, %c0_i32_0 : i32, i32
  }
  func.func @transform_8(%arg0: i32) -> (i32, i32) {
    %c0_i32 = arith.constant 0 : i32
    %c0_i32_0 = arith.constant 0 : i32
    %c0_i32_1 = arith.constant 0 : i32
    return %c0_i32, %c0_i32_0 : i32, i32
  }
  func.func @transform_9(%arg0: i32) -> (i32, i32) {
    %c0_i32 = arith.constant 0 : i32
    %c0_i32_0 = arith.constant 0 : i32
    %c0_i32_1 = arith.constant 0 : i32
    return %c0_i32, %c0_i32_0 : i32, i32
  }
  func.func @transform_10(%arg0: i32) -> (i32, i32) {
    %c0_i32 = arith.constant 0 : i32
    %c0_i32_0 = arith.constant 0 : i32
    %c0_i32_1 = arith.constant 0 : i32
    return %c0_i32, %c0_i32_0 : i32, i32
  }
  func.func @transform_11(%arg0: i32) -> (i32, i32) {
    %c0_i32 = arith.constant 0 : i32
    %c0_i32_0 = arith.constant 0 : i32
    return %arg0, %c0_i32 : i32, i32
  }
}

</mosaic_0001>

<bundles_post_ra>
// kernel: tile.9
= control target key start
LH: loop header
LB: loop body
LE: loop exit
PB: predicated region body
PF: predicated region fallthrough
CT: control target
= control target key end

     0   :  { %vm153_vm0 = vcmask 359424   ;;  %s565_s0 = inlined_call_operand.vmem [shape: f32[300,10,2], index: 0, kind: input, shape index: {}]   ;;  %s566_s1 = inlined_call_operand.vmem [shape: f32[300,20], index: 1, kind: output, shape index: {}]  }
   0x1   :  { %v307_v0 = vld [vmem:[%s565_s0 + $0x3a] sm:$0x3]  ;;  %v308_v1 = vld [vmem:[%s565_s0 + $0x38] sm:$0x3]  ;;  %v309_v2 = vld [vmem:[%s565_s0 + $0x36] sm:$0x3] }
   0x2   :  { %9 = vst [vmem:[#allocation0 + $0x38] sm:$0x3] %v307_v0  ;;  %14 = vst [vmem:[#allocation0 + $0xe8] sm:$0x3] %v308_v1  ;;  %v310_v3 = vld [vmem:[%s565_s0 + $0x34] sm:$0x3] }
   0x3   :  { %19 = vst [vmem:[#allocation0 + $0x10] sm:$0x3] %v309_v2  ;;  %v311_v4 = vld [vmem:[%s565_s0 + $0x32] sm:$0x3]  ;;  %v312_v5 = vld [vmem:[%s565_s0 + $0x30] sm:$0x3] }
   0x4   :  { %24 = vst [vmem:[#allocation0 + $0xd0] sm:$0x3] %v310_v3  ;;  %29 = vst [vmem:[#allocation0 + $0x98] sm:$0x3] %v311_v4  ;;  %v313_v6 = vld [vmem:[%s565_s0 + $0x2e] sm:$0x3] }
   0x5   :  { %34 = vst [vmem:[#allocation0 + $0x80] sm:$0x3] %v312_v5  ;;  %v314_v7 = vld [vmem:[%s565_s0 + $0x2c] sm:$0x3]  ;;  %v315_v8 = vld [vmem:[%s565_s0 + $0x2a] sm:$0x3] }
   0x6   :  { %39 = vst [vmem:[#allocation0 + $0xb8] sm:$0x3] %v313_v6  ;;  %44 = vst [vmem:[#allocation0 + $0xa0] sm:$0x3] %v314_v7  ;;  %v316_v9 = vld [vmem:[%s565_s0 + $0x28] sm:$0x3] }
   0x7   :  { %49 = vst [vmem:[#allocation0 + $0x68] sm:$0x3] %v315_v8  ;;  %v317_v10 = vld [vmem:[%s565_s0 + $0x26] sm:$0x3]  ;;  %v318_v11 = vld [vmem:[%s565_s0 + $0x24] sm:$0x3] }
   0x8   :  { %54 = vst [vmem:[#allocation0 + $0x60] sm:$0x3] %v316_v9  ;;  %59 = vst [vmem:[#allocation0] sm:$0x3] %v317_v10  ;;  %v319_v12 = vld [vmem:[%s565_s0 + $0x22] sm:$0x3] }
   0x9   :  { %64 = vst [vmem:[#allocation0 + $0x30] sm:$0x3] %v318_v11  ;;  %v320_v13 = vld [vmem:[%s565_s0 + $0x20] sm:$0x3]  ;;  %v321_v14 = vld [vmem:[%s565_s0 + $0x1e] sm:$0x3] }
   0xa   :  { %69 = vst [vmem:[#allocation0 + $0x88] sm:$0x3] %v319_v12  ;;  %74 = vst [vmem:[#allocation0 + $0x40] sm:$0x3] %v320_v13  ;;  %v322_v15 = vld [vmem:[%s565_s0 + $0x1c] sm:$0x3] }
   0xb   :  { %79 = vst [vmem:[#allocation0 + $0x78] sm:$0x3] %v321_v14  ;;  %v323_v16 = vld [vmem:[%s565_s0 + $0x1a] sm:$0x3]  ;;  %v324_v17 = vld [vmem:[%s565_s0 + $0x18] sm:$0x3] }
   0xc   :  { %84 = vst [vmem:[#allocation0 + $0xa8] sm:$0x3] %v322_v15  ;;  %89 = vst [vmem:[#allocation0 + $0xe0] sm:$0x3] %v323_v16  ;;  %v325_v18 = vld [vmem:[%s565_s0 + $0x16] sm:$0x3] }
   0xd   :  { %94 = vst [vmem:[#allocation0 + $0x70] sm:$0x3] %v324_v17  ;;  %v326_v19 = vld [vmem:[%s565_s0 + $0x14] sm:$0x3]  ;;  %v327_v20 = vld [vmem:[%s565_s0 + $0x12] sm:$0x3] }
   0xe   :  { %99 = vst [vmem:[#allocation0 + $0x28] sm:$0x3] %v325_v18  ;;  %104 = vst [vmem:[#allocation0 + $0xd8] sm:$0x3] %v326_v19  ;;  %v328_v21 = vld [vmem:[%s565_s0 + $0x10] sm:$0x3] }
   0xf   :  { %109 = vst [vmem:[#allocation0 + $0xb0] sm:$0x3] %v327_v20  ;;  %v329_v22 = vld [vmem:[%s565_s0 + $0xe] sm:$0x3]  ;;  %v330_v23 = vld [vmem:[%s565_s0 + $0xc] sm:$0x3] }
  0x10   :  { %114 = vst [vmem:[#allocation0 + $0xc0] sm:$0x3] %v328_v21  ;;  %119 = vst [vmem:[#allocation0 + $0x58] sm:$0x3] %v329_v22  ;;  %v331_v24 = vld [vmem:[%s565_s0 + $0xa] sm:$0x3] }
  0x11   :  { %124 = vst [vmem:[#allocation0 + $0x48] sm:$0x3] %v330_v23  ;;  %v332_v25 = vld [vmem:[%s565_s0 + $0x8] sm:$0x3]  ;;  %v333_v26 = vld [vmem:[%s565_s0 + $0x6] sm:$0x3] }
  0x12   :  { %129 = vst [vmem:[#allocation0 + $0x90] sm:$0x3] %v331_v24  ;;  %134 = vst [vmem:[#allocation0 + $0x18] sm:$0x3] %v332_v25  ;;  %v334_v27 = vld [vmem:[%s565_s0 + $0x4] sm:$0x3] }
  0x13   :  { %139 = vst [vmem:[#allocation0 + $0x50] sm:$0x3] %v333_v26  ;;  %v335_v28 = vld [vmem:[%s565_s0 + $0x2] sm:$0x3]  ;;  %v149_v29 = vld [vmem:[%s565_s0] sm:$0x3] }
  0x14   :  { %144 = vst [vmem:[#allocation0 + $0x20] sm:$0x3] %v334_v27  ;;  %148 = vst [vmem:[#allocation0 + $0x8] sm:$0x3] %v335_v28  ;;  %v187_v30 = vld [vmem:[#allocation0 + $0xb8] sm:$0x3]  }
  0x15   :  { %150 = vst [vmem:[#allocation0 + $0xc8] sm:$0x3] %v149_v29  ;;  %v192_v31 = vld [vmem:[#allocation0 + $0xd0] sm:$0x3]   ;;  %v182_v32 = vld [vmem:[#allocation0 + $0x60] sm:$0x3]  }
  0x16   :  { %343 = vst.msk [vmem:[%s566_s1 + $0x2e] sm:$0x3] %vm153_vm0, %v187_v30   ;;  %344 = vst.msk [vmem:[%s566_s1 + $0x40] sm:$0x3] %vm153_vm0, %v192_v31   ;;  %v197_v33 = vld [vmem:[#allocation0 + $0x38] sm:$0x3]  }
  0x17   :  { %v248_v34 = vld [vmem:[#allocation0 + $0x30] sm:$0x3]   ;;  %v177_v35 = vld [vmem:[#allocation0 + $0x88] sm:$0x3]   ;;  %342 = vst.msk [vmem:[%s566_s1 + $0x2c] sm:$0x3] %vm153_vm0, %v182_v32  }
  0x18   :  { %345 = vst.msk [vmem:[%s566_s1 + $0x42] sm:$0x3] %vm153_vm0, %v197_v33   ;;  %v240_v36 = vld [vmem:[#allocation0 + $0x78] sm:$0x3]   ;;  %v244_v37 = vld [vmem:[#allocation0 + $0x40] sm:$0x3]  }
  0x19   :  { %357 = vst [vmem:[%s566_s1 + $0x1c] sm:$0x3] %v248_v34   ;;  %v172_v38 = vld [vmem:[#allocation0 + $0xa8] sm:$0x3]   ;;  %341 = vst.msk [vmem:[%s566_s1 + $0x2a] sm:$0x3] %vm153_vm0, %v177_v35  }
  0x1a   :  { %v232_v39 = vld [vmem:[#allocation0 + $0x70] sm:$0x3]   ;;  %v236_v40 = vld [vmem:[#allocation0 + $0xe0] sm:$0x3]   ;;  %355 = vst [vmem:[%s566_s1 + $0x1a] sm:$0x3] %v240_v36  }
  0x1b   :  { %356 = vst [vmem:[%s566_s1 + $0x22] sm:$0x3] %v244_v37   ;;  %v167_v41 = vld [vmem:[#allocation0 + $0x28] sm:$0x3]   ;;  %340 = vst.msk [vmem:[%s566_s1 + $0x28] sm:$0x3] %vm153_vm0, %v172_v38  }
  0x1c   :  { %v224_v42 = vld [vmem:[#allocation0 + $0xb0] sm:$0x3]   ;;  %v228_v43 = vld [vmem:[#allocation0 + $0xd8] sm:$0x3]   ;;  %353 = vst [vmem:[%s566_s1 + $0x18] sm:$0x3] %v232_v39  }
  0x1d   :  { %354 = vst [vmem:[%s566_s1 + $0x20] sm:$0x3] %v236_v40   ;;  %v162_v44 = vld [vmem:[#allocation0 + $0xc0] sm:$0x3]   ;;  %339 = vst.msk [vmem:[%s566_s1 + $0x16] sm:$0x3] %vm153_vm0, %v167_v41  }
  0x1e   :  { %v216_v45 = vld [vmem:[#allocation0 + $0x48] sm:$0x3]   ;;  %v220_v46 = vld [vmem:[#allocation0 + $0x58] sm:$0x3]   ;;  %351 = vst [vmem:[%s566_s1 + $0x6] sm:$0x3] %v224_v42  }
  0x1f   :  { %352 = vst [vmem:[%s566_s1 + $0xe] sm:$0x3] %v228_v43   ;;  %v157_v47 = vld [vmem:[#allocation0 + $0x90] sm:$0x3]   ;;  %338 = vst.msk [vmem:[%s566_s1 + $0x14] sm:$0x3] %vm153_vm0, %v162_v44  }
  0x20   :  { %v208_v48 = vld [vmem:[#allocation0 + $0x50] sm:$0x3]   ;;  %v212_v49 = vld [vmem:[#allocation0 + $0x18] sm:$0x3]   ;;  %349 = vst [vmem:[%s566_s1 + $0x4] sm:$0x3] %v216_v45  }
  0x21   :  { %350 = vst [vmem:[%s566_s1 + $0xc] sm:$0x3] %v220_v46   ;;  %v152_v50 = vld [vmem:[#allocation0 + $0x20] sm:$0x3]   ;;  %337 = vst.msk [vmem:[%s566_s1 + $0x12] sm:$0x3] %vm153_vm0, %v157_v47  }
  0x22   :  { %v201_v51 = vld [vmem:[#allocation0 + $0xc8] sm:$0x3]   ;;  %347 = vst [vmem:[%s566_s1 + $0x2] sm:$0x3] %v208_v48   ;;  %348 = vst [vmem:[%s566_s1 + $0xa] sm:$0x3] %v212_v49  }
  0x23   :  { %v204_v52 = vld [vmem:[#allocation0 + $0x8] sm:$0x3]   ;;  %336 = vst.msk [vmem:[%s566_s1 + $0x10] sm:$0x3] %vm153_vm0, %v152_v50   ;;  %202 = vst [vmem:[%s566_s1] sm:$0x3] %v201_v51  }
  0x24   :  { %346 = vst [vmem:[%s566_s1 + $0x8] sm:$0x3] %v204_v52   ;;  %v252_v53 = vld [vmem:[#allocation0] sm:$0x3]   ;;  %v256_v54 = vld [vmem:[#allocation0 + $0x68] sm:$0x3]  }
  0x25   :  { %v260_v55 = vld [vmem:[#allocation0 + $0xa0] sm:$0x3]   ;;  %358 = vst [vmem:[%s566_s1 + $0x24] sm:$0x3] %v252_v53   ;;  %359 = vst [vmem:[%s566_s1 + $0x1e] sm:$0x3] %v256_v54  }
  0x26   :  { %360 = vst [vmem:[%s566_s1 + $0x26] sm:$0x3] %v260_v55   ;;  %v264_v56 = vld [vmem:[#allocation0 + $0x80] sm:$0x3]   ;;  %v268_v57 = vld [vmem:[#allocation0 + $0x98] sm:$0x3]  }
  0x27   :  { %v272_v58 = vld [vmem:[#allocation0 + $0x10] sm:$0x3]   ;;  %361 = vst [vmem:[%s566_s1 + $0x30] sm:$0x3] %v264_v56   ;;  %362 = vst [vmem:[%s566_s1 + $0x38] sm:$0x3] %v268_v57  }
  0x28   :  { %363 = vst [vmem:[%s566_s1 + $0x32] sm:$0x3] %v272_v58   ;;  %v276_v59 = vld [vmem:[#allocation0 + $0xe8] sm:$0x3]  }
  0x29   :  { %364 = vst [vmem:[%s566_s1 + $0x3a] sm:$0x3] %v276_v59  }

// kernel: fourier_net_forward.1
= control target key start
LH: loop header
LB: loop body
LE: loop exit
PB: predicated region body
PF: predicated region fallthrough
CT: control target
= control target key end

     0   :  { %s10717_s17 = smov 0   ;;  %s14545_s0 = inlined_call_operand.vmem [shape: f32[304,10], index: 0, kind: input, shape index: {}]   ;;  %s14546_s1 = inlined_call_operand.vmem [shape: f32[1,10], index: 1, kind: input, shape index: {}]   ;;  %s14547_s2 = inlined_call_operand.vmem [shape: f32[10,224], index: 2, kind: input, shape index: {}]   ;;  %s14548_s3 = inlined_call_operand.vmem [shape: f32[10,224], index: 3, kind: input, shape index: {}]   ;;  %s14549_s4 = inlined_call_operand.vmem [shape: f32[1,224], index: 4, kind: input, shape index: {}]   ;;  %s14550_s5 = inlined_call_operand.vmem [shape: f32[12,32,32], index: 5, kind: input, shape index: {}]   ;;  %s14551_s6 = inlined_call_operand.vmem [shape: f32[6,32], index: 6, kind: input, shape index: {}]   ;;  %s14552_s7 = inlined_call_operand.vmem [shape: f32[32,16], index: 7, kind: input, shape index: {}]   ;;  %s14553_s8 = inlined_call_operand.vmem [shape: f32[1,16], index: 8, kind: input, shape index: {}]   ;;  %s14554_s9 = inlined_call_operand.vmem [shape: f32[16,128], index: 9, kind: input, shape index: {}]   ;;  %s14555_s10 = inlined_call_operand.vmem [shape: f32[1,128], index: 10, kind: input, shape index: {}]   ;;  %s14556_s11 = inlined_call_operand.vmem [shape: f32[304,128], index: 11, kind: output, shape index: {}]  }
   0x1 LB: > { %s8720_s18 = sadd.s32 4294967295, %s10644_s17   ;;  %p8724_p0 = scmp.ge.s32.totalorder %s10644_s17, 1  ;;  %s10644_s17 = sphi %s10717_s17, %s21_s17  }
   0x2   : > { %p338_p1 = scmp.lt.s32.totalorder %s10644_s17, 3 }
   0x4   : > { %p339_p2 = pnand %p8724_p0, %p338_p1 }
   0x6   : > { %342 = sbr.rel (%p339_p2) target bundleno = 3525 (0xdc5), region = 64 }
   0xb   : > { %v4375_v0 = vld [vmem:[%s14548_s3 + $0x18] sm:$0x3]  ;;  %vm4434_vm0 = vcmask 1041408   ;;  %v4373_v2 = vld [vmem:[%s14548_s3 + $0x8] sm:$0xff]  ;;  %v4374_v3 = vld [vmem:[%s14548_s3 + $0x10] sm:$0x3] }
   0xc   : > { %v4371_v1 = vld [vmem:[%s14547_s2 + $0x18] sm:$0x3]  ;;  %8880 = vmatprep.subr.msk.mxu0 %vm4434_vm0, %v4375_v0  ;;  %v4370_v4 = vld [vmem:[%s14547_s2 + $0x10] sm:$0x3]  ;;  %v4369_v5 = vld [vmem:[%s14547_s2 + $0x8] sm:$0xff]  ;;  %s378_s16 = smul.u32 19, %s8720_s18 }
   0xd   : > { %8901 = vmatprep.subr.msk.mxu1 %vm4434_vm0, %v4371_v1  ;;  %8881 = vmatpush1.msk.msra.mxu0 %vm4434_vm0, %v4374_v3  ;;  %v4372_v6 = vld [vmem:[%s14548_s3] sm:$0xff]  ;;  %v14557_v8 = vmov 0.0   ;;  %v10647_v44 = vmov 683565275   ;;  %v10648_v46 = vmov 2475754826  }
   0xe   : > { %8902 = vmatpush1.msk.msra.mxu1 %vm4434_vm0, %v4370_v4  ;;  %v4368_v7 = vld [vmem:[%s14547_s2] sm:$0xff]  ;;  %4471 = vmatprep.subr.mxu0 %v4373_v2  ;;  %p379_p3 = scmp.lt.s32.totalorder %s378_s16, 37  ;;  %v10649_v48 = vmov 2131351028   ;;  %v10650_v50 = vmov 2102212464  }
   0xf   : > { %4713 = vmatprep.subr.mxu1 %v4369_v5  ;;  %4472 = vmatpush1.msra.mxu0 %v4372_v6  ;;  %v10759_v9 = vld [vmem:[%s14546_s1] ss:$0 sm:$0xff]  ;;  %v10651_v52 = vmov 920167782   ;;  %v10652_v60 = vmov 1326507024  }
  0x10   : > { %4505 = vmatprep.mubr.f32.mxu0 %v14557_v8  ;;  %4714 = vmatpush1.msra.mxu1 %v4368_v7  ;;  %s14608_s16 = smov (!%p379_p3, %s378_s16), 37  ;;  %s10653_s24 = smov 96  }
  0x11   : > { %4747 = vmatprep.mubr.f32.mxu1 %v14557_v8  ;;  %9556 = vmatprep.subr.mxu0 %v14557_v8  ;;  %s8725_s19 = sshll.u32 %s14608_s16, 3  ;;  %s10655_s14 = smov 64  }
  0x12   : > { %9621 = vmatprep.subr.mxu1 %v14557_v8  ;;  %s10766_s23 = scalar_lea.vmem %s14545_s0, %s8725_s19  ;;  %s10656_s20 = smov 32  }
  0x13   : > { %v390_v10 = vld [vmem:[%s10766_s23] sm:$0xff]  ;;  %v391_v11 = vld [vmem:[%s10766_s23 + $0x8] sm:$0xff]  ;;  %v392_v12 = vld [vmem:[%s10766_s23 + $0x10] sm:$0xff]  ;;  %s14501_s27 = scalar_lea.vmem %s14556_s11, %s8725_s19 }
  0x14   : > { %v10772_v13 = vmul.f32 %v10759_v9, %v390_v10  ;;  %v10775_v14 = vmul.f32 %v10759_v9, %v391_v11  ;;  %v10778_v15 = vmul.f32 %v10759_v9, %v392_v12  ;;  %v393_v33 = vld [vmem:[%s10766_s23 + $0x18] sm:$0xff] }
  0x15   : > { %v10791_v38 = vmul.f32 %v10759_v9, %v393_v33 }
  0x16   : > { %v435_v16 = vand.u32 2147483647, %v10772_v13  ;;  %v438_v17 = vand.u32 2139095040, %v10772_v13  ;;  %v539_v18 = vand.u32 2147483647, %v10775_v14  ;;  %v542_v19 = vand.u32 2139095040, %v10775_v14 }
  0x17   : > { %v646_v24 = vand.u32 2139095040, %v10778_v15  ;;  %vm437_vm14 = vcmp.lt.s32.totalorder %v10772_v13, 0 }
  0x18   : > { %v439_v20 = vshrl.u32 %v438_v17, 23  ;;  %v442_v21 = vand.u32 8388607, %v435_v16  ;;  %v543_v22 = vshrl.u32 %v542_v19, 23  ;;  %v546_v23 = vand.u32 8388607, %v539_v18 }
  0x19   : > { %v647_v27 = vshrl.u32 %v646_v24, 23 }
  0x1a   : > { %v8728_v25 = vadd.s32 4294967169, %v439_v20  ;;  %v8732_v26 = vadd.s32 4294967169, %v543_v22  ;;  %v443_v29 = vor.u32 8388608, %v442_v21  ;;  %v547_v30 = vor.u32 8388608, %v546_v23 }
  0x1b   : > { %v8736_v32 = vadd.s32 4294967169, %v647_v27 }
  0x1c   : > { %v445_v28 = vadd.s32 1, %v8728_v25  ;;  %v549_v31 = vadd.s32 1, %v8732_v26  ;;  %v10793_v39 = vshll.u32 %v443_v29, 8  ;;  %v10795_v41 = vshll.u32 %v547_v30, 8 }
  0x1d   : > { %v10797_v42 = vadd.s32 1, %v8736_v32 }
  0x1e   : > { %vm446_vm1 = vcmp.gt.s32.totalorder %v445_v28, 0  ;;  %vm550_vm2 = vcmp.gt.s32.totalorder %v549_v31, 0 }
  0x1f   : > { %v447_v34 = vsel %vm446_vm1, %v445_v28, 0  ;;  %v551_v37 = vsel %vm550_vm2, %v549_v31, 0  ;;  %vm654_vm7 = vcmp.gt.s32.totalorder %v10797_v42, 0  ;;  %vm10899_vm1 = vcmp.le.f32.partialorder %v435_v16, 0.7853982 }
  0x20   : > { %v448_v35 = vshrl.u32 %v447_v34, 5  ;;  %v449_v36 = vand.u32 31, %v447_v34  ;;  %v553_v40 = vand.u32 31, %v551_v37  ;;  %v10804_v54 = vshrl.u32 %v551_v37, 5 }
  0x22   : > { %v450_v43 = vsub.s32 32, %v449_v36  ;;  %v452_v45 = vshll.u32 %v10647_v44, %v449_v36  ;;  %v455_v47 = vshll.u32 %v10648_v46, %v449_v36  ;;  %v458_v49 = vshll.u32 %v10649_v48, %v449_v36 }
  0x23   : > { %v461_v51 = vshll.u32 %v10650_v50, %v449_v36  ;;  %v464_v53 = vshll.u32 %v10651_v52, %v449_v36  ;;  %vm467_vm3 = vcmp.lt.s32.totalorder %v448_v35, 1  ;;  %vm468_vm4 = vcmp.lt.s32.totalorder %v448_v35, 2 }
  0x24   : > { %v451_v55 = vshrl.u32 %v10647_v44, %v450_v43  ;;  %v453_v56 = vshrl.u32 %v10648_v46, %v450_v43  ;;  %v456_v57 = vshrl.u32 %v10649_v48, %v450_v43  ;;  %v459_v58 = vshrl.u32 %v10650_v50, %v450_v43 }
  0x25   : > { %v462_v59 = vshrl.u32 %v10651_v52, %v450_v43  ;;  %v465_v61 = vshrl.u32 %v10652_v60, %v450_v43  ;;  %vm470_vm5 = vcmp.lt.s32.totalorder %v448_v35, 4  ;;  %v554_v1 = vsub.s32 32, %v553_v40 }
  0x26   : > { %v454_v62 = vor.u32 %v453_v56, %v452_v45  ;;  %v457_v63 = vor.u32 %v456_v57, %v455_v47  ;;  %v460_v0 = vor.u32 %v459_v58, %v458_v49  ;;  %vm469_vm6 = vcmp.lt.s32.totalorder %v448_v35, 3 }
  0x27   : > { %v463_v2 = vor.u32 %v462_v59, %v461_v51  ;;  %v466_v3 = vor.u32 %v465_v61, %v464_v53  ;;  %v556_v4 = vshll.u32 %v10647_v44, %v553_v40  ;;  %v559_v19 = vshll.u32 %v10648_v46, %v553_v40 }
  0x28   : > { %v471_v5 = vsel %vm467_vm3, %v451_v55, %v454_v62  ;;  %v472_v6 = vsel %vm470_vm5, %v460_v0, 2102212464  ;;  %v475_v7 = vsel %vm467_vm3, %v454_v62, %v457_v63  ;;  %v479_v10 = vsel %vm467_vm3, %v457_v63, %v460_v0 }
  0x29   : > { %v473_v11 = vsel %vm469_vm6, %v457_v63, %v472_v6  ;;  %v476_v12 = vsel %vm470_vm5, %v463_v2, 920167782  ;;  %v480_v17 = vsel %vm470_vm5, %v466_v3, 1326507024  ;;  %v555_v22 = vshrl.u32 %v10647_v44, %v554_v1 }
  0x2a   : > { %v477_v20 = vsel %vm469_vm6, %v460_v0, %v476_v12  ;;  %v481_v21 = vsel %vm469_vm6, %v463_v2, %v480_v17  ;;  %v557_v23 = vshrl.u32 %v10648_v46, %v554_v1  ;;  %v474_v24 = vsel %vm468_vm4, %v471_v5, %v473_v11 }
  0x2b   : > { %v478_v25 = vsel %vm468_vm4, %v475_v7, %v477_v20  ;;  %v482_v26 = vsel %vm468_vm4, %v479_v10, %v481_v21  ;;  %v560_v27 = vshrl.u32 %v10649_v48, %v554_v1  ;;  %v562_v34 = vshll.u32 %v10649_v48, %v553_v40 }
  0x2c   : > { %v10825_v28 = vmul.u32.u64.low %v10793_v39, %v482_v26  ;;  %v10826_v29 = vmul.u32.u64.high %v10793_v39, %v482_v26, %v10825_v28  ;;  %v10829_v30 = vmul.u32.u64.low %v10793_v39, %v478_v25  ;;  %v10830_v31 = vmul.u32.u64.high %v10793_v39, %v478_v25, %v10829_v30 }
  0x2d   : > { %v558_v32 = vor.u32 %v557_v23, %v556_v4  ;;  %v561_v33 = vor.u32 %v560_v27, %v559_v19  ;;  %v563_v36 = vshrl.u32 %v10650_v50, %v554_v1  ;;  %v565_v35 = vshll.u32 %v10650_v50, %v553_v40 }
  0x2e   : > { %v566_v37 = vshrl.u32 %v10651_v52, %v554_v1  ;;  %v568_v43 = vshll.u32 %v10651_v52, %v553_v40  ;;  %v569_v45 = vshrl.u32 %v10652_v60, %v554_v1  ;;  %v490_v47 = vmul.u32 %v10793_v39, %v474_v24  ;;  %v394_v24 = vld [vmem:[%s10766_s23 + $0x20] sm:$0xff] }
  0x2f   : > { %v564_v49 = vor.u32 %v563_v36, %v562_v34  ;;  %vm571_vm8 = vcmp.lt.s32.totalorder %v10804_v54, 1  ;;  %vm572_vm9 = vcmp.lt.s32.totalorder %v10804_v54, 2  ;;  %vm492_vm10 = vc.u32 %v10826_v29, %v10829_v30 }
  0x30   : > { %v493_v51 = vadd.s32 1, %v10830_v31  ;;  %v567_v53 = vor.u32 %v566_v37, %v565_v35  ;;  %vm573_vm11 = vcmp.lt.s32.totalorder %v10804_v54, 3  ;;  %v570_v55 = vor.u32 %v569_v45, %v568_v43 }
  0x31   : > { %vm574_vm12 = vcmp.lt.s32.totalorder %v10804_v54, 4  ;;  %v575_v40 = vsel %vm571_vm8, %v555_v22, %v558_v32  ;;  %v579_v56 = vsel %vm571_vm8, %v558_v32, %v561_v33  ;;  %v583_v59 = vsel %vm571_vm8, %v561_v33, %v564_v49 }
  0x32   : > { %v494_v39 = vsel %vm492_vm10, %v493_v51, %v10830_v31  ;;  %v576_v57 = vsel %vm574_vm12, %v564_v49, 2102212464  ;;  %v580_v58 = vsel %vm574_vm12, %v567_v53, 920167782  ;;  %v584_v0 = vsel %vm574_vm12, %v570_v55, 1326507024 }
  0x33   : > { %v495_v61 = vadd.s32 %v494_v39, %v490_v47  ;;  %v577_v62 = vsel %vm573_vm11, %v561_v33, %v576_v57  ;;  %v581_v63 = vsel %vm573_vm11, %v564_v49, %v580_v58  ;;  %v585_v3 = vsel %vm573_vm11, %v567_v53, %v584_v0 }
  0x34   : > { %v578_v1 = vsel %vm572_vm9, %v575_v40, %v577_v62  ;;  %v582_v2 = vsel %vm572_vm9, %v579_v56, %v581_v63  ;;  %v655_v4 = vsel %vm654_vm7, %v10797_v42, 0  ;;  %v586_v6 = vsel %vm572_vm9, %v583_v59, %v585_v3 }
  0x35   : > { %v496_v5 = vadd.s32 536870912, %v495_v61  ;;  %v10858_v7 = vmul.u32.u64.low %v10795_v41, %v582_v2  ;;  %v10859_v10 = vmul.u32.u64.high %v10795_v41, %v582_v2, %v10858_v7  ;;  %v643_v17 = vand.u32 2147483647, %v10778_v15 }
  0x36   : > { %v10863_v11 = vmul.u32.u64.low %v10795_v41, %v586_v6  ;;  %v10864_v12 = vmul.u32.u64.high %v10795_v41, %v586_v6, %v10863_v11  ;;  %v657_v20 = vand.u32 31, %v655_v4  ;;  %v594_v21 = vmul.u32 %v10795_v41, %v578_v1 }
  0x37   : > { %v497_v19 = vshrl.u32 %v496_v5, 30  ;;  %v597_v22 = vadd.s32 1, %v10859_v10  ;;  %v750_v54 = vand.u32 2139095040, %v10791_v38  ;;  %v650_v23 = vand.u32 8388607, %v643_v17 }
  0x38   : > { %vm596_vm13 = vc.u32 %v10864_v12, %v10858_v7  ;;  %v658_v27 = vsub.s32 32, %v657_v20  ;;  %v10877_v41 = vmul.f32 %v10759_v9, %v394_v24  ;;  %v10879_v36 = vshrl.u32 %v655_v4, 5 }
  0x39   : > { %v498_v42 = vshll.u32 %v497_v19, 30  ;;  %v598_v26 = vsel %vm596_vm13, %v597_v22, %v10859_v10  ;;  %v751_v32 = vshrl.u32 %v750_v54, 23  ;;  %v651_v34 = vor.u32 8388608, %v650_v23 }
  0x3a   : > { %v599_v28 = vadd.s32 %v598_v26, %v594_v21  ;;  %v660_v35 = vshll.u32 %v10647_v44, %v657_v20  ;;  %v661_v43 = vshrl.u32 %v10648_v46, %v658_v27  ;;  %v663_v45 = vshll.u32 %v10648_v46, %v657_v20 }
  0x3b   : > { %v499_v25 = vsub.s32 %v495_v61, %v498_v42  ;;  %v664_v47 = vshrl.u32 %v10649_v48, %v658_v27  ;;  %v666_v51 = vshll.u32 %v10649_v48, %v657_v20  ;;  %v667_v53 = vshrl.u32 %v10650_v50, %v658_v27 }
  0x3c   : > { %v600_v33 = vadd.s32 536870912, %v599_v28  ;;  %v669_v55 = vshll.u32 %v10650_v50, %v657_v20  ;;  %v491_v40 = vadd.s32 %v10829_v30, %v10826_v29  ;;  %v670_v39 = vshrl.u32 %v10651_v52, %v658_v27 }
  0x3d   : > { %v501_v31 = vsub.s32 0, %v499_v25  ;;  %v8740_v57 = vadd.s32 4294967169, %v751_v32  ;;  %v521_v58 = vsub.s32 4, %v497_v19  ;;  %vm675_vm15 = vcmp.lt.s32.totalorder %v10879_v36, 1 }
  0x3e   : > { %v10886_v49 = vshrl.u32 %v600_v33, 30  ;;  %vm678_vm0 = vcmp.lt.s32.totalorder %v10879_v36, 4  ;;  %v671_v63 = vor.u32 %v670_v39, %v669_v55  ;;  %v672_v29 = vshll.u32 %v10651_v52, %v657_v20 }
  0x3f   : > { %v8729_v37 = vmin.u32 %v501_v31, %v499_v25  ;;  %v673_v30 = vshrl.u32 %v10652_v60, %v658_v27  ;;  %v662_v1 = vor.u32 %v661_v43, %v660_v35  ;;  %v665_v2 = vor.u32 %v664_v47, %v663_v45 }
  0x40   : > { %v602_v59 = vshll.u32 %v10886_v49, 30  ;;  %v668_v3 = vor.u32 %v667_v53, %v666_v51  ;;  %v659_v4 = vshrl.u32 %v10647_v44, %v658_v27  ;;  %vm677_vm3 = vcmp.lt.s32.totalorder %v10879_v36, 3 }
  0x41   : > { %v503_v56 = vclz %v8729_v37  ;;  %v684_v16 = vsel %vm678_vm0, %v671_v63, 920167782  ;;  %vm676_vm4 = vcmp.lt.s32.totalorder %v10879_v36, 2  ;;  %v674_v42 = vor.u32 %v673_v30, %v672_v29 }
  0x42   : > { %v10905_v0 = vsub.s32 %v599_v28, %v602_v59  ;;  %v680_v10 = vsel %vm678_vm0, %v668_v3, 2102212464  ;;  %v522_v22 = vsel %vm437_vm14, %v521_v58, %v497_v19  ;;  %v683_v23 = vsel %vm675_vm15, %v662_v1, %v665_v2 }
  0x43   : > { %v8730_v62 = vadd.s32 4294967294, %v503_v56  ;;  %v685_v24 = vsel %vm677_vm3, %v668_v3, %v684_v16  ;;  %v679_v28 = vsel %vm675_vm15, %v659_v4, %v662_v1  ;;  %v687_v19 = vsel %vm675_vm15, %v665_v2, %v668_v3 }
  0x44   : > { %v605_v6 = vsub.s32 0, %v10905_v0  ;;  %v691_v32 = vshll.u32 %v651_v34, 8  ;;  %v747_v33 = vand.u32 2147483647, %v10791_v38  ;;  %v686_v43 = vsel %vm676_vm4, %v683_v23, %v685_v24 }
  0x45   : > { %vm8731_vm2 = vcmp.lt.s32.totalorder %v8730_v62, 0  ;;  %v688_v45 = vsel %vm678_vm0, %v674_v42, 1326507024  ;;  %v524_v47 = vsel %vm10899_vm1, 0, %v522_v22  ;;  %v595_v51 = vadd.s32 %v10858_v7, %v10864_v12 }
  0x46   : > { %v506_v5 = vsel %vm8731_vm2, 0, %v8730_v62  ;;  %v8733_v54 = vmin.u32 %v605_v6, %v10905_v0  ;;  %v689_v56 = vsel %vm677_vm3, %v671_v63, %v688_v45  ;;  %v757_v39 = vadd.s32 1, %v8740_v57 }
  0x47   : > { %v507_v11 = vsub.s32 32, %v506_v5  ;;  %v508_v20 = vshll.u32 %v499_v25, %v506_v5  ;;  %v511_v21 = vsub.s32 4294967266, %v506_v5  ;;  %v681_v25 = vsel %vm677_vm3, %v665_v2, %v680_v10 }
  0x48   : > { %v607_v31 = vclz %v8733_v54  ;;  %v682_v34 = vsel %vm676_vm4, %v679_v28, %v681_v25  ;;  %v690_v58 = vsel %vm676_vm4, %v687_v19, %v689_v56  ;;  %vm758_vm6 = vcmp.gt.s32.totalorder %v757_v39, 0 }
  0x49   : > { %v509_v26 = vshrl.u32 %v491_v40, %v507_v11  ;;  %v512_v27 = vadd.s32 127, %v511_v21  ;;  %v10943_v59 = vmul.u32.u64.low %v691_v32, %v686_v43  ;;  %v10944_v62 = vmul.u32.u64.high %v691_v32, %v686_v43, %v10943_v59 }
  0x4a   : > { %v8734_v53 = vadd.s32 4294967294, %v607_v31  ;;  %v10947_v12 = vmul.u32.u64.low %v691_v32, %v690_v58  ;;  %v10948_v30 = vmul.u32.u64.high %v691_v32, %v690_v58, %v10947_v12  ;;  %v625_v57 = vsub.s32 4, %v10886_v49 }
  0x4b   : > { %v510_v35 = vor.u32 %v509_v26, %v508_v20  ;;  %v513_v37 = vshll.u32 %v512_v27, 23  ;;  %v698_v4 = vmul.u32 %v691_v32, %v682_v34  ;;  %v759_v36 = vsel %vm758_vm6, %v757_v39, 0 }
  0x4c   : > { %vm8735_vm5 = vcmp.lt.s32.totalorder %v8734_v53, 0  ;;  %vm541_vm7 = vcmp.lt.s32.totalorder %v10775_v14, 0  ;;  %v701_v6 = vadd.s32 1, %v10944_v62  ;;  %vm700_vm8 = vc.u32 %v10948_v30, %v10943_v59 }
  0x4d   : > { %v514_v55 = vor.u32 4788187, %v513_v37  ;;  %v517_v40 = vcvt.s32.f32 %v510_v35  ;;  %v610_v7 = vsel %vm8735_vm5, 0, %v8734_v53  ;;  %v761_v11 = vand.u32 31, %v759_v36 }
  0x4e   : > { %v611_v1 = vsub.s32 32, %v610_v7  ;;  %v612_v2 = vshll.u32 %v10905_v0, %v610_v7  ;;  %v615_v3 = vsub.s32 4294967266, %v610_v7  ;;  %v10958_v0 = vand.u32 8388607, %v747_v33 }
  0x4f   : > { %v515_v29 = vand.u32 2147483647, %v514_v55  ;;  %v528_v20 = vadd.s32 3, %v524_v47  ;;  %v702_v22 = vsel %vm700_vm8, %v701_v6, %v10944_v62  ;;  %v626_v23 = vsel %vm541_vm7, %v625_v57, %v10886_v49 }
  0x50   : > { %v613_v16 = vshrl.u32 %v595_v51, %v611_v1  ;;  %v616_v5 = vadd.s32 127, %v615_v3  ;;  %v703_v24 = vadd.s32 %v702_v22, %v698_v4  ;;  %v762_v26 = vsub.s32 32, %v761_v11 }
  0x51   : > { %v518_v63 = vmul.f32 %v517_v40, %v515_v29  ;;  %vm10971_vm9 = vcmp.le.f32.partialorder %v539_v18, 0.7853982  ;;  %v10975_v19 = vand.u32 3, %v524_v47  ;;  %v755_v49 = vor.u32 8388608, %v10958_v0 }
  0x52   : > { %v614_v21 = vor.u32 %v613_v16, %v612_v2  ;;  %v617_v42 = vshll.u32 %v616_v5, 23  ;;  %v704_v32 = vadd.s32 536870912, %v703_v24  ;;  %v10978_v35 = vand.u32 3, %v528_v20 }
  0x53   : > { %v519_v10 = vxor.u32 2147483648, %v518_v63  ;;  %v628_v61 = vsel %vm10971_vm9, 0, %v626_v23  ;;  %v767_v18 = vshll.u32 %v10648_v46, %v761_v11  ;;  %v768_v45 = vshrl.u32 %v10649_v48, %v762_v26 }
  0x54   : > { %v618_v25 = vor.u32 4788187, %v617_v42  ;;  %v621_v31 = vcvt.s32.f32 %v614_v21  ;;  %v10982_v43 = vshrl.u32 %v704_v32, 30  ;;  %v770_v51 = vshll.u32 %v10649_v48, %v761_v11 }
  0x55   : > { %v520_v54 = vsel %vm437_vm14, %v519_v10, %v518_v63  ;;  %v771_v53 = vshrl.u32 %v10650_v50, %v762_v26  ;;  %v773_v34 = vshll.u32 %v10650_v50, %v761_v11  ;;  %v774_v55 = vshrl.u32 %v10651_v52, %v762_v26 }
  0x56   : > { %v523_v27 = vsel %vm10899_vm1, %v10772_v13, %v520_v54  ;;  %v619_v37 = vand.u32 2147483647, %v618_v25  ;;  %v706_v40 = vshll.u32 %v10982_v43, 30  ;;  %v10991_v56 = vshrl.u32 %v759_v36, 5 }
  0x57   : > { %10557 = vcosq.f32 %v523_v27  ;;  %v776_v39 = vshll.u32 %v10651_v52, %v761_v11  ;;  %v777_v58 = vshrl.u32 %v10652_v60, %v762_v26  ;;  %vm2509_vm10 = vcmp.eq.s32.totalorder %v10975_v19, 2 }
  0x58   : > { %10559 = vsinq.f32 %v523_v27  ;;  %v622_v47 = vmul.f32 %v621_v31, %v619_v37  ;;  %v764_v29 = vshll.u32 %v10647_v44, %v761_v11  ;;  %v765_v7 = vshrl.u32 %v10648_v46, %v762_v26 }
  0x59   : > { %vm2506_vm11 = vcmp.eq.s32.totalorder %v10975_v19, 0  ;;  %vm531_vm12 = vcmp.eq.s32.totalorder %v10978_v35, 0  ;;  %vm534_vm13 = vcmp.eq.s32.totalorder %v10978_v35, 2  ;;  %v632_v12 = vadd.s32 3, %v628_v61 }
  0x5a   : > { %v623_v62 = vxor.u32 2147483648, %v622_v47  ;;  %v11001_v1 = vsub.s32 %v703_v24, %v706_v40  ;;  %vm2505_vm14 = vcmp.lt.s32.totalorder %v10975_v19, 2  ;;  %vm530_vm15 = vcmp.lt.s32.totalorder %v10978_v35, 2 }
  0x5b   : > { %v769_v3 = vor.u32 %v768_v45, %v767_v18  ;;  %v772_v63 = vor.u32 %v771_v53, %v770_v51  ;;  %v775_v57 = vor.u32 %v774_v55, %v773_v34  ;;  %vm527_vm0 = vweird.f32 %v10772_v13 }
  0x5c   : > { %v624_v2 = vsel %vm541_vm7, %v623_v62, %v622_v47  ;;  %v709_v36 = vsub.s32 0, %v11001_v1  ;;  %v778_v16 = vor.u32 %v777_v58, %v776_v39  ;;  %vm782_vm1 = vcmp.lt.s32.totalorder %v10991_v56, 4 }
  0x5d   : > { %v627_v4 = vsel %vm10971_vm9, %v10775_v14, %v624_v2  ;;  %vm4376_vm2 = vcmask 80896   ;;  %v763_v5 = vshrl.u32 %v10647_v44, %v762_v26  ;;  %v766_v6 = vor.u32 %v765_v7, %v764_v29 }
  0x5e   : > { %10561 = vcosq.f32 %v627_v4  ;;  %vm779_vm3 = vcmp.lt.s32.totalorder %v10991_v56, 1  ;;  %v8737_v10 = vmin.u32 %v709_v36, %v11001_v1  ;;  %vm781_vm4 = vcmp.lt.s32.totalorder %v10991_v56, 3 }
  0x5f   : > { %10563 = vsinq.f32 %v627_v4  ;;  %v784_v0 = vsel %vm782_vm1, %v772_v63, 2102212464  ;;  %v11019_v11 = vand.u32 3, %v628_v61  ;;  %vm780_vm5 = vcmp.lt.s32.totalorder %v10991_v56, 2 }
  0x60   : > { %v788_v20 = vsel %vm782_vm1, %v775_v57, 920167782  ;;  %v11024_v21 = vshll.u32 %v755_v49, 8  ;;  %v11026_v42 = vand.u32 3, %v632_v12  ;;  %v711_v22 = vclz %v8737_v10 }
  0x61   : > { %v791_v54 = vsel %vm779_vm3, %v769_v3, %v772_v63  ;;  %v792_v23 = vsel %vm782_vm1, %v778_v16, 1326507024  ;;  %v783_v26 = vsel %vm779_vm3, %v763_v5, %v766_v6  ;;  %v785_v27 = vsel %vm781_vm4, %v769_v3, %v784_v0 }
  0x62   : > { %v787_v28 = vsel %vm779_vm3, %v766_v6, %v769_v3  ;;  %v793_v25 = vsel %vm781_vm4, %v775_v57, %v792_v23  ;;  %v8738_v49 = vadd.s32 4294967294, %v711_v22  ;;  %v789_v37 = vsel %vm781_vm4, %v772_v63, %v788_v20 }
  0x63   : > { %v794_v61 = vsel %vm780_vm5, %v791_v54, %v793_v25  ;;  %v699_v45 = vadd.s32 %v10943_v59, %v10948_v30  ;;  %vm2608_vm6 = vcmp.lt.s32.totalorder %v11019_v11, 2  ;;  %v786_v55 = vsel %vm780_vm5, %v783_v26, %v785_v27 }
  0x64   : > { %v10558_v24 = vpop.eup %10557  ;;  %v11047_v51 = vmul.u32.u64.low %v11024_v21, %v794_v61  ;;  %v11048_v47 = vmul.u32.u64.high %v11024_v21, %v794_v61, %v11047_v51  ;;  %vm8739_vm7 = vcmp.lt.s32.totalorder %v8738_v49, 0  ;;  %vm631_vm8 = vweird.f32 %v10775_v14 }
  0x65   : > { %v10560_v31 = vpop.eup %10559  ;;  %v535_v32 = vxor.u32 2147483648, %v10558_v24  ;;  %vm645_vm9 = vcmp.lt.s32.totalorder %v10778_v15, 0  ;;  %v714_v30 = vsel %vm8739_vm7, 0, %v8738_v49  ;;  %v790_v39 = vsel %vm780_vm5, %v787_v28, %v789_v37 }
  0x66   : > { %v532_v18 = vxor.u32 2147483648, %v10560_v31  ;;  %v715_v29 = vsub.s32 32, %v714_v30  ;;  %v716_v7 = vshll.u32 %v11001_v1, %v714_v30  ;;  %v719_v3 = vsub.s32 4294967266, %v714_v30 }
  0x67   : > { %v2511_v53 = vsel %vm2509_vm10, %v535_v32, %v10560_v31  ;;  %v536_v34 = vsel %vm534_vm13, %v535_v32, %v10560_v31  ;;  %v854_v63 = vand.u32 2139095040, %v10877_v41  ;;  %vm2609_vm10 = vcmp.eq.s32.totalorder %v11019_v11, 0 }
  0x68   : > { %v2508_v40 = vsel %vm2506_vm11, %v10558_v24, %v532_v18  ;;  %v533_v59 = vsel %vm531_vm12, %v10558_v24, %v532_v18  ;;  %v717_v19 = vshrl.u32 %v699_v45, %v715_v29  ;;  %vm2612_vm11 = vcmp.eq.s32.totalorder %v11019_v11, 2 }
  0x69   : > { %v2512_v58 = vsel %vm2505_vm14, %v2508_v40, %v2511_v53  ;;  %v537_v62 = vsel %vm530_vm15, %v533_v59, %v536_v34  ;;  %v11079_v35 = vmul.u32.u64.low %v11024_v21, %v790_v39  ;;  %v11080_v56 = vmul.u32.u64.high %v11024_v21, %v790_v39, %v11079_v35  ;;  %v395_v34 = vld [vmem:[%s10766_s23 + $0x28] sm:$0xff] }
  0x6a   : > { %v2513_v12 = vsel %vm527_vm0, nan, %v2512_v58  ;;  %v538_v2 = vsel %vm527_vm0, nan, %v537_v62  ;;  %vm635_vm12 = vcmp.eq.s32.totalorder %v11026_v42, 0  ;;  %v720_v13 = vadd.s32 127, %v719_v3 }
  0x6b   : > { %8882 = vmatmul.mubr.msk.f32.vlgmr.msra.gmra.mxu0 %vm4376_vm2, %v2513_v12  ;;  %8903 = vmatmul.mubr.msk.f32.vlgmr.msra.gmra.mxu1 %vm4376_vm2, %v538_v2  ;;  %v855_v1 = vshrl.u32 %v854_v63, 23  ;;  %v10562_v57 = vpop.eup %10561  ;;  %vm638_vm13 = vcmp.eq.s32.totalorder %v11026_v42, 2  ;;  %v718_v4 = vor.u32 %v717_v19, %v716_v7  ;;  %v729_v36 = vsub.s32 4, %v10982_v43 }
  0x6c   : > { %4511 = vmatprep.mubr.f32.mxu0 %v14557_v8  ;;  %4753 = vmatprep.mubr.f32.mxu1 %v14557_v8  ;;  %v802_v16 = vmul.u32 %v11024_v21, %v786_v55  ;;  %v10564_v5 = vpop.eup %10563  ;;  %v639_v6 = vxor.u32 2147483648, %v10562_v57  ;;  %v721_v10 = vshll.u32 %v720_v13, 23  ;;  %vm804_vm14 = vc.u32 %v11048_v47, %v11079_v35 }
  0x6d   : > { %v8744_v0 = vadd.s32 4294967169, %v855_v1  ;;  %v636_v20 = vxor.u32 2147483648, %v10564_v5  ;;  %vm634_vm15 = vcmp.lt.s32.totalorder %v11026_v42, 2  ;;  %v725_v22 = vcvt.s32.f32 %v718_v4 }
  0x6e   : > { %v805_v54 = vadd.s32 1, %v11080_v56  ;;  %v2614_v23 = vsel %vm2612_vm11, %v639_v6, %v10564_v5  ;;  %v640_v24 = vsel %vm638_vm13, %v639_v6, %v10564_v5  ;;  %v722_v26 = vor.u32 4788187, %v721_v10 }
  0x6f   : > { %v861_v27 = vadd.s32 1, %v8744_v0  ;;  %v2611_v21 = vsel %vm2609_vm10, %v10562_v57, %v636_v20  ;;  %v637_v28 = vsel %vm635_vm12, %v10562_v57, %v636_v20  ;;  %v730_v25 = vsel %vm645_vm9, %v729_v36, %v10982_v43 }
  0x70   : > { %v806_v31 = vsel %vm804_vm14, %v805_v54, %v11080_v56  ;;  %v2615_v32 = vsel %vm2608_vm6, %v2611_v21, %v2614_v23  ;;  %v641_v49 = vsel %vm634_vm15, %v637_v28, %v640_v24  ;;  %v723_v37 = vand.u32 2147483647, %v722_v26 }
  0x71   : > { %v807_v61 = vadd.s32 %v806_v31, %v802_v16  ;;  %v2616_v18 = vsel %vm631_vm8, nan, %v2615_v32  ;;  %v642_v42 = vsel %vm631_vm8, nan, %v641_v49  ;;  %vm11112_vm0 = vcmp.le.f32.partialorder %v643_v17, 0.7853982 }
  0x72   : > { %vm862_vm1 = vcmp.gt.s32.totalorder %v861_v27, 0  ;;  %8883 = vmatmul.mubr.msk.f32.gmra.mxu0 %vm4376_vm2, %v2616_v18  ;;  %8904 = vmatmul.mubr.msk.f32.gmra.mxu1 %vm4376_vm2, %v642_v42  ;;  %v726_v43 = vmul.f32 %v725_v22, %v723_v37  ;;  %v851_v51 = vand.u32 2147483647, %v10877_v41  ;;  %v732_v14 = vsel %vm11112_vm0, 0, %v730_v25 }
  0x73   : > { %v808_v11 = vadd.s32 536870912, %v807_v61  ;;  %v863_v53 = vsel %vm862_vm1, %v861_v27, 0  ;;  %4517 = vmatprep.mubr.f32.mxu0 %v14557_v8  ;;  %4759 = vmatprep.mubr.f32.mxu1 %v14557_v8  ;;  %v11126_v59 = vand.u32 3, %v732_v14  ;;  %v11129_v39 = vmul.f32 %v10759_v9, %v395_v34 }
  0x74   : > { %v865_v17 = vand.u32 31, %v863_v53  ;;  %v727_v55 = vxor.u32 2147483648, %v726_v43  ;;  %v736_v62 = vadd.s32 3, %v732_v14  ;;  %v858_v7 = vand.u32 8388607, %v851_v51 }
  0x75   : > { %v11124_v40 = vshrl.u32 %v808_v11, 30  ;;  %v864_v2 = vshrl.u32 %v863_v53, 5  ;;  %v958_v6 = vand.u32 2139095040, %v11129_v39  ;;  %vm2715_vm3 = vcmp.eq.s32.totalorder %v11126_v59, 2 }
  0x76   : > { %v866_v30 = vsub.s32 32, %v865_v17  ;;  %v728_v58 = vsel %vm645_vm9, %v727_v55, %v726_v43  ;;  %v868_v3 = vshll.u32 %v10647_v44, %v865_v17  ;;  %v871_v63 = vshll.u32 %v10648_v46, %v865_v17 }
  0x77   : > { %v810_v29 = vshll.u32 %v11124_v40, 30  ;;  %v731_v12 = vsel %vm11112_vm0, %v10778_v15, %v728_v58  ;;  %v874_v1 = vshll.u32 %v10649_v48, %v865_v17  ;;  %v877_v4 = vshll.u32 %v10650_v50, %v865_v17 }
  0x78   : > { %10565 = vcosq.f32 %v731_v12  ;;  %v869_v56 = vshrl.u32 %v10648_v46, %v866_v30  ;;  %v872_v13 = vshrl.u32 %v10649_v48, %v866_v30  ;;  %v875_v57 = vshrl.u32 %v10650_v50, %v866_v30 }
  0x79   : > { %v11141_v19 = vsub.s32 %v807_v61, %v810_v29  ;;  %10567 = vsinq.f32 %v731_v12  ;;  %v11148_v36 = vand.u32 3, %v736_v62  ;;  %v859_v5 = vor.u32 8388608, %v858_v7 }
  0x7a   : > { %v867_v10 = vshrl.u32 %v10647_v44, %v866_v30  ;;  %v878_v0 = vshrl.u32 %v10651_v52, %v866_v30  ;;  %v880_v20 = vshll.u32 %v10651_v52, %v865_v17  ;;  %v881_v22 = vshrl.u32 %v10652_v60, %v866_v30 }
  0x7b   : > { %v813_v16 = vsub.s32 0, %v11141_v19  ;;  %v870_v23 = vor.u32 %v869_v56, %v868_v3  ;;  %v873_v24 = vor.u32 %v872_v13, %v871_v63  ;;  %v876_v26 = vor.u32 %v875_v57, %v874_v1 }
  0x7c   : > { %v879_v27 = vor.u32 %v878_v0, %v877_v4  ;;  %v882_v21 = vor.u32 %v881_v22, %v880_v20  ;;  %vm883_vm4 = vcmp.lt.s32.totalorder %v864_v2, 1  ;;  %vm2712_vm5 = vcmp.eq.s32.totalorder %v11126_v59, 0 }
  0x7d   : > { %v8741_v54 = vmin.u32 %v813_v16, %v11141_v19  ;;  %vm885_vm6 = vcmp.lt.s32.totalorder %v864_v2, 3  ;;  %vm886_vm7 = vcmp.lt.s32.totalorder %v864_v2, 4  ;;  %v11159_v25 = vshll.u32 %v859_v5, 8 }
  0x7e   : > { %vm2711_vm8 = vcmp.lt.s32.totalorder %v11126_v59, 2  ;;  %vm738_vm9 = vcmp.lt.s32.totalorder %v11148_v36, 2  ;;  %vm884_vm10 = vcmp.lt.s32.totalorder %v864_v2, 2  ;;  %v887_v31 = vsel %vm883_vm4, %v867_v10, %v870_v23 }
  0x7f   : > { %v815_v28 = vclz %v8741_v54  ;;  %v888_v32 = vsel %vm886_vm7, %v876_v26, 2102212464  ;;  %v959_v49 = vshrl.u32 %v958_v6, 23  ;;  %vm735_vm11 = vweird.f32 %v10778_v15 }
  0x80   : > { %v889_v61 = vsel %vm885_vm6, %v873_v24, %v888_v32  ;;  %v891_v18 = vsel %vm883_vm4, %v870_v23, %v873_v24  ;;  %v892_v42 = vsel %vm886_vm7, %v879_v27, 920167782  ;;  %v803_v45 = vadd.s32 %v11079_v35, %v11048_v47 }
  0x81   : > { %v8742_v37 = vadd.s32 4294967294, %v815_v28  ;;  %v893_v43 = vsel %vm885_vm6, %v876_v26, %v892_v42  ;;  %v895_v11 = vsel %vm883_vm4, %v873_v24, %v876_v26  ;;  %v896_v53 = vsel %vm886_vm7, %v882_v21, 1326507024 }
  0x82   : > { %v890_v34 = vsel %vm884_vm10, %v887_v31, %v889_v61  ;;  %v894_v14 = vsel %vm884_vm10, %v891_v18, %v893_v43  ;;  %v897_v17 = vsel %vm885_vm6, %v879_v27, %v896_v53  ;;  %vm749_vm13 = vcmp.lt.s32.totalorder %v10791_v38, 0 }
  0x83   : > { %vm8743_vm12 = vcmp.lt.s32.totalorder %v8742_v37, 0  ;;  %v898_v30 = vsel %vm884_vm10, %v895_v11, %v897_v17  ;;  %v11180_v47 = vmul.u32.u64.low %v11159_v25, %v894_v14  ;;  %v11181_v35 = vmul.u32.u64.high %v11159_v25, %v894_v14, %v11180_v47 }
  0x84   : > { %v818_v55 = vsel %vm8743_vm12, 0, %v8742_v37  ;;  %v8748_v7 = vadd.s32 4294967169, %v959_v49  ;;  %vm739_vm14 = vcmp.eq.s32.totalorder %v11148_v36, 0  ;;  %vm742_vm15 = vcmp.eq.s32.totalorder %v11148_v36, 2  ;;  %v396_v37 = vld [vmem:[%s10766_s23 + $0x30] sm:$0xff] }
  0x85   : > { %v819_v58 = vsub.s32 32, %v818_v55  ;;  %v820_v62 = vshll.u32 %v11141_v19, %v818_v55  ;;  %v823_v29 = vsub.s32 4294967266, %v818_v55  ;;  %v10566_v12 = vpop.eup %10565  ;;  %v833_v57 = vsub.s32 4, %v11124_v40 }
  0x86   : > { %v11188_v3 = vmul.u32.u64.low %v11159_v25, %v898_v30  ;;  %v11189_v63 = vmul.u32.u64.high %v11159_v25, %v898_v30, %v11188_v3  ;;  %v10568_v2 = vpop.eup %10567  ;;  %v743_v56 = vxor.u32 2147483648, %v10566_v12  ;;  %v906_v19 = vmul.u32 %v11159_v25, %v890_v34 }
  0x87   : > { %v821_v13 = vshrl.u32 %v803_v45, %v819_v58  ;;  %v824_v1 = vadd.s32 127, %v823_v29  ;;  %v740_v4 = vxor.u32 2147483648, %v10568_v2  ;;  %v909_v16 = vadd.s32 1, %v11181_v35 }
  0x88   : > { %v965_v5 = vadd.s32 1, %v8748_v7  ;;  %v2717_v6 = vsel %vm2715_vm3, %v743_v56, %v10568_v2  ;;  %v744_v10 = vsel %vm742_vm15, %v743_v56, %v10568_v2  ;;  %vm908_vm0 = vc.u32 %v11189_v63, %v11180_v47 }
  0x89   : > { %v822_v0 = vor.u32 %v821_v13, %v820_v62  ;;  %v825_v20 = vshll.u32 %v824_v1, 23  ;;  %v2714_v22 = vsel %vm2712_vm5, %v10566_v12, %v740_v4  ;;  %v741_v54 = vsel %vm739_vm14, %v10566_v12, %v740_v4 }
  0x8a   : > { %v955_v23 = vand.u32 2147483647, %v11129_v39  ;;  %v2718_v24 = vsel %vm2711_vm8, %v2714_v22, %v2717_v6  ;;  %v745_v26 = vsel %vm738_vm9, %v741_v54, %v744_v10  ;;  %v910_v31 = vsel %vm908_vm0, %v909_v16, %v11181_v35 }
  0x8b   : > { %v826_v27 = vor.u32 4788187, %v825_v20  ;;  %v829_v21 = vcvt.s32.f32 %v822_v0  ;;  %v2719_v28 = vsel %vm735_vm11, nan, %v2718_v24  ;;  %v746_v25 = vsel %vm735_vm11, nan, %v745_v26 }
  0x8c   : > { %vm966_vm1 = vcmp.gt.s32.totalorder %v965_v5, 0  ;;  %8884 = vmatmul.mubr.msk.f32.gmra.mxu0 %vm4376_vm2, %v2719_v28  ;;  %8905 = vmatmul.mubr.msk.f32.gmra.mxu1 %vm4376_vm2, %v746_v25  ;;  %v834_v36 = vsel %vm749_vm13, %v833_v57, %v11124_v40  ;;  %v911_v32 = vadd.s32 %v910_v31, %v906_v19  ;;  %vm11222_vm3 = vcmp.le.f32.partialorder %v747_v33, 0.7853982 }
  0x8d   : > { %v827_v59 = vand.u32 2147483647, %v826_v27  ;;  %v967_v49 = vsel %vm966_vm1, %v965_v5, 0  ;;  %4523 = vmatprep.mubr.f32.mxu0 %v14557_v8  ;;  %4765 = vmatprep.mubr.f32.mxu1 %v14557_v8  ;;  %v962_v45 = vand.u32 8388607, %v955_v23  ;;  %v836_v40 = vsel %vm11222_vm3, 0, %v834_v36 }
  0x8e   : > { %v969_v15 = vand.u32 31, %v967_v49  ;;  %v912_v42 = vadd.s32 536870912, %v911_v32  ;;  %v11230_v43 = vshrl.u32 %v967_v49, 5  ;;  %v11233_v53 = vmul.f32 %v10759_v9, %v396_v37 }
  0x8f   : > { %v830_v18 = vmul.f32 %v829_v21, %v827_v59  ;;  %v840_v3 = vadd.s32 3, %v836_v40  ;;  %v963_v2 = vor.u32 8388608, %v962_v45  ;;  %v11256_v5 = vand.u32 3, %v836_v40 }
  0x90   : > { %v970_v11 = vsub.s32 32, %v969_v15  ;;  %v11235_v14 = vshrl.u32 %v912_v42, 30  ;;  %v972_v33 = vshll.u32 %v10647_v44, %v969_v15  ;;  %v975_v17 = vshll.u32 %v10648_v46, %v969_v15 }
  0x91   : > { %v831_v34 = vxor.u32 2147483648, %v830_v18  ;;  %v978_v35 = vshll.u32 %v10649_v48, %v969_v15  ;;  %v981_v58 = vshll.u32 %v10650_v50, %v969_v15  ;;  %v1062_v56 = vand.u32 2139095040, %v11233_v53 }
  0x92   : > { %v973_v55 = vshrl.u32 %v10648_v46, %v970_v11  ;;  %v976_v30 = vshrl.u32 %v10649_v48, %v970_v11  ;;  %v914_v9 = vshll.u32 %v11235_v14, 30  ;;  %v979_v29 = vshrl.u32 %v10650_v50, %v970_v11 }
  0x93   : > { %v832_v62 = vsel %vm749_vm13, %v831_v34, %v830_v18  ;;  %v982_v7 = vshrl.u32 %v10651_v52, %v970_v11  ;;  %v984_v57 = vshll.u32 %v10651_v52, %v969_v15  ;;  %v985_v16 = vshrl.u32 %v10652_v60, %v970_v11 }
  0x94   : > { %v835_v12 = vsel %vm11222_vm3, %v10791_v38, %v832_v62  ;;  %v11252_v13 = vsub.s32 %v911_v32, %v914_v9  ;;  %v974_v1 = vor.u32 %v973_v55, %v972_v33  ;;  %v977_v4 = vor.u32 %v976_v30, %v975_v17 }
  0x95   : > { %10569 = vcosq.f32 %v835_v12  ;;  %v983_v19 = vor.u32 %v982_v7, %v981_v58  ;;  %v980_v10 = vor.u32 %v979_v29, %v978_v35  ;;  %vm987_vm4 = vcmp.lt.s32.totalorder %v11230_v43, 1 }
  0x96   : > { %10571 = vsinq.f32 %v835_v12  ;;  %v917_v6 = vsub.s32 0, %v11252_v13  ;;  %v11260_v0 = vand.u32 3, %v840_v3  ;;  %v971_v20 = vshrl.u32 %v10647_v44, %v970_v11 }
  0x97   : > { %vm989_vm5 = vcmp.lt.s32.totalorder %v11230_v43, 3  ;;  %vm990_vm6 = vcmp.lt.s32.totalorder %v11230_v43, 4  ;;  %v986_v54 = vor.u32 %v985_v16, %v984_v57  ;;  %v11266_v24 = vshll.u32 %v963_v2, 8 }
  0x98   : > { %v8745_v22 = vmin.u32 %v917_v6, %v11252_v13  ;;  %v1063_v26 = vshrl.u32 %v1062_v56, 23  ;;  %vm988_vm7 = vcmp.lt.s32.totalorder %v11230_v43, 2  ;;  %v992_v27 = vsel %vm990_vm6, %v980_v10, 2102212464 }
  0x99   : > { %v995_v21 = vsel %vm987_vm4, %v974_v1, %v977_v4  ;;  %v996_v28 = vsel %vm990_vm6, %v983_v19, 920167782  ;;  %vm2815_vm8 = vcmp.eq.s32.totalorder %v11256_v5, 0  ;;  %vm2818_vm9 = vcmp.eq.s32.totalorder %v11256_v5, 2 }
  0x9a   : > { %v919_v25 = vclz %v8745_v22  ;;  %v997_v31 = vsel %vm989_vm5, %v980_v10, %v996_v28  ;;  %vm2814_vm10 = vcmp.lt.s32.totalorder %v11256_v5, 2  ;;  %vm842_vm11 = vcmp.lt.s32.totalorder %v11260_v0, 2 }
  0x9b   : > { %v991_v59 = vsel %vm987_vm4, %v971_v20, %v974_v1  ;;  %v999_v36 = vsel %vm987_vm4, %v977_v4, %v980_v10  ;;  %v1059_v32 = vand.u32 2147483647, %v11233_v53  ;;  %vm839_vm12 = vweird.f32 %v10791_v38 }
  0x9c   : > { %v8746_v49 = vadd.s32 4294967294, %v919_v25  ;;  %v993_v37 = vsel %vm989_vm5, %v977_v4, %v992_v27  ;;  %v998_v15 = vsel %vm988_vm7, %v995_v21, %v997_v31  ;;  %v1000_v61 = vsel %vm990_vm6, %v986_v54, 1326507024 }
  0x9d   : > { %v1001_v18 = vsel %vm989_vm5, %v983_v19, %v1000_v61  ;;  %v11296_v42 = vmul.u32.u64.low %v11266_v24, %v998_v15  ;;  %v11297_v45 = vmul.u32.u64.high %v11266_v24, %v998_v15, %v11296_v42  ;;  %v8752_v40 = vadd.s32 4294967169, %v1063_v26  ;;  %v397_v61 = vld [vmem:[%s10766_s23 + $0x38] sm:$0xff] }
  0x9e   : > { %vm843_vm13 = vcmp.eq.s32.totalorder %v11260_v0, 0  ;;  %v907_v11 = vadd.s32 %v11180_v47, %v11189_v63  ;;  %vm8747_vm14 = vcmp.lt.s32.totalorder %v8746_v49, 0  ;;  %v1002_v34 = vsel %vm988_vm7, %v999_v36, %v1001_v18 }
  0x9f   : > { %vm853_vm15 = vcmp.lt.s32.totalorder %v10877_v41, 0  ;;  %v922_v33 = vsel %vm8747_vm14, 0, %v8746_v49  ;;  %v11307_v17 = vmul.u32.u64.low %v11266_v24, %v1002_v34  ;;  %v11308_v55 = vmul.u32.u64.high %v11266_v24, %v1002_v34, %v11307_v17 }
  0xa0   : > { %v1069_v30 = vadd.s32 1, %v8752_v40  ;;  %v923_v35 = vsub.s32 32, %v922_v33  ;;  %v924_v58 = vshll.u32 %v11252_v13, %v922_v33  ;;  %v927_v62 = vsub.s32 4294967266, %v922_v33 }
  0xa1   : > { %v994_v9 = vsel %vm988_vm7, %v991_v59, %v993_v37  ;;  %vm846_vm0 = vcmp.eq.s32.totalorder %v11260_v0, 2  ;;  %v1013_v63 = vadd.s32 1, %v11297_v45  ;;  %v11317_v29 = vand.u32 8388607, %v1059_v32 }
  0xa2   : > { %v10570_v47 = vpop.eup %10569  ;;  %vm1070_vm1 = vcmp.gt.s32.totalorder %v1069_v30, 0  ;;  %v925_v3 = vshrl.u32 %v907_v11, %v923_v35  ;;  %v928_v2 = vadd.s32 127, %v927_v62  ;;  %v937_v1 = vsub.s32 4, %v11235_v14  ;;  %v11369_v62 = vld [vmem:[%s14546_s1] ss:$0 sm:$0xff] }
  0xa3   : > { %v10572_v7 = vpop.eup %10571  ;;  %v847_v12 = vxor.u32 2147483648, %v10570_v47  ;;  %v1071_v56 = vsel %vm1070_vm1, %v1069_v30, 0  ;;  %v1010_v43 = vmul.u32 %v11266_v24, %v994_v9  ;;  %vm1012_vm3 = vc.u32 %v11308_v55, %v11296_v42 }
  0xa4   : > { %v844_v13 = vxor.u32 2147483648, %v10572_v7  ;;  %v926_v19 = vor.u32 %v925_v3, %v924_v58  ;;  %v929_v16 = vshll.u32 %v928_v2, 23  ;;  %v1014_v20 = vsel %vm1012_vm3, %v1013_v63, %v11297_v45 }
  0xa5   : > { %v2820_v57 = vsel %vm2818_vm9, %v847_v12, %v10572_v7  ;;  %v848_v4 = vsel %vm846_vm0, %v847_v12, %v10572_v7  ;;  %v1073_v22 = vand.u32 31, %v1071_v56  ;;  %v1015_v25 = vadd.s32 %v1014_v20, %v1010_v43 }
  0xa6   : > { %v2817_v6 = vsel %vm2815_vm8, %v10570_v47, %v844_v13  ;;  %v845_v10 = vsel %vm843_vm13, %v10570_v47, %v844_v13  ;;  %v930_v26 = vor.u32 4788187, %v929_v16  ;;  %v933_v27 = vcvt.s32.f32 %v926_v19 }
  0xa7   : > { %v2821_v54 = vsel %vm2814_vm10, %v2817_v6, %v2820_v57  ;;  %v849_v24 = vsel %vm842_vm11, %v845_v10, %v848_v4  ;;  %v1074_v31 = vsub.s32 32, %v1073_v22  ;;  %v938_v0 = vsel %vm853_vm15, %v937_v1, %v11235_v14 }
  0xa8   : > { %v2822_v21 = vsel %vm839_vm12, nan, %v2821_v54  ;;  %v850_v28 = vsel %vm839_vm12, nan, %v849_v24  ;;  %v931_v5 = vand.u32 2147483647, %v930_v26  ;;  %v1076_v59 = vshll.u32 %v10647_v44, %v1073_v22 }
  0xa9   : > { %8885 = vmatmul.mubr.msk.f32.gmra.mxu0 %vm4376_vm2, %v2822_v21  ;;  %8906 = vmatmul.mubr.msk.f32.gmra.mxu1 %vm4376_vm2, %v850_v28  ;;  %v1079_v36 = vshll.u32 %v10648_v46, %v1073_v22  ;;  %v1016_v38 = vadd.s32 536870912, %v1015_v25  ;;  %v1077_v49 = vshrl.u32 %v10648_v46, %v1074_v31  ;;  %v1080_v37 = vshrl.u32 %v10649_v48, %v1074_v31 }
  0xaa   : > { %4529 = vmatprep.mubr.f32.mxu0 %v14557_v8  ;;  %4771 = vmatprep.mubr.f32.mxu1 %v14557_v8  ;;  %v1082_v15 = vshll.u32 %v10649_v48, %v1073_v22  ;;  %v934_v18 = vmul.f32 %v933_v27, %v931_v5  ;;  %v1083_v45 = vshrl.u32 %v10650_v50, %v1074_v31  ;;  %vm11356_vm4 = vcmp.le.f32.partialorder %v851_v51, 0.7853982 }
  0xab   : > { %v1085_v14 = vshll.u32 %v10650_v50, %v1073_v22  ;;  %v1086_v40 = vshrl.u32 %v10651_v52, %v1074_v31  ;;  %v11360_v34 = vshrl.u32 %v1016_v38, 30  ;;  %v1072_v33 = vshrl.u32 %v1071_v56, 5 }
  0xac   : > { %v1088_v17 = vshll.u32 %v10651_v52, %v1073_v22  ;;  %v935_v30 = vxor.u32 2147483648, %v934_v18  ;;  %v940_v35 = vsel %vm11356_vm4, 0, %v938_v0  ;;  %v1089_v58 = vshrl.u32 %v10652_v60, %v1074_v31 }
  0xad   : > { %v11372_v51 = vmul.f32 %v11369_v62, %v397_v61  ;;  %v1018_v9 = vshll.u32 %v11360_v34, 30  ;;  %v1067_v47 = vor.u32 8388608, %v11317_v29  ;;  %v1078_v63 = vor.u32 %v1077_v49, %v1076_v59 }
  0xae   : > { %v1081_v7 = vor.u32 %v1080_v37, %v1079_v36  ;;  %v936_v12 = vsel %vm853_vm15, %v935_v30, %v934_v18  ;;  %v1084_v3 = vor.u32 %v1083_v45, %v1082_v15  ;;  %v1087_v2 = vor.u32 %v1086_v40, %v1085_v14 }
  0xaf   : > { %v1090_v56 = vor.u32 %v1089_v58, %v1088_v17  ;;  %v939_v13 = vsel %vm11356_vm4, %v10877_v41, %v936_v12  ;;  %v11381_v1 = vsub.s32 %v1015_v25, %v1018_v9  ;;  %vm1091_vm5 = vcmp.lt.s32.totalorder %v1072_v33, 1 }
  0xb0   : > { %vm1094_vm6 = vcmp.lt.s32.totalorder %v1072_v33, 4  ;;  %10573 = vcosq.f32 %v939_v13  ;;  %v944_v43 = vadd.s32 3, %v940_v35  ;;  %v1075_v29 = vshrl.u32 %v10647_v44, %v1074_v31 }
  0xb1   : > { %vm1092_vm7 = vcmp.lt.s32.totalorder %v1072_v33, 2  ;;  %10575 = vsinq.f32 %v939_v13  ;;  %v1021_v57 = vsub.s32 0, %v11381_v1  ;;  %vm1093_vm8 = vcmp.lt.s32.totalorder %v1072_v33, 3 }
  0xb2   : > { %v1096_v4 = vsel %vm1094_vm6, %v1084_v3, 2102212464  ;;  %v1099_v19 = vsel %vm1091_vm5, %v1078_v63, %v1081_v7  ;;  %v1100_v16 = vsel %vm1094_vm6, %v1087_v2, 920167782  ;;  %v1103_v6 = vsel %vm1091_vm5, %v1081_v7, %v1084_v3 }
  0xb3   : > { %v1104_v10 = vsel %vm1094_vm6, %v1090_v56, 1326507024  ;;  %v8749_v20 = vmin.u32 %v1021_v57, %v11381_v1  ;;  %v1107_v22 = vshll.u32 %v1067_v47, 8  ;;  %v2916_v54 = vand.u32 3, %v940_v35 }
  0xb4   : > { %v1095_v24 = vsel %vm1091_vm5, %v1075_v29, %v1078_v63  ;;  %v1101_v26 = vsel %vm1093_vm8, %v1084_v3, %v1100_v16  ;;  %v1105_v27 = vsel %vm1093_vm8, %v1087_v2, %v1104_v10  ;;  %v1097_v28 = vsel %vm1093_vm8, %v1081_v7, %v1096_v4 }
  0xb5   : > { %v1023_v21 = vclz %v8749_v20  ;;  %v1102_v25 = vsel %vm1092_vm7, %v1099_v19, %v1101_v26  ;;  %v1106_v31 = vsel %vm1092_vm7, %v1103_v6, %v1105_v27  ;;  %v945_v5 = vand.u32 3, %v944_v43 }
  0xb6   : > { %v1166_v0 = vand.u32 2139095040, %v11372_v51  ;;  %vm957_vm9 = vcmp.lt.s32.totalorder %v11129_v39, 0  ;;  %v11393_v36 = vmul.u32.u64.low %v1107_v22, %v1106_v31  ;;  %v11394_v38 = vmul.u32.u64.high %v1107_v22, %v1106_v31, %v11393_v36 }
  0xb7   : > { %v8750_v59 = vadd.s32 4294967294, %v1023_v21  ;;  %vm943_vm10 = vweird.f32 %v10877_v41  ;;  %v1098_v49 = vsel %vm1092_vm7, %v1095_v24, %v1097_v28  ;;  %vm2917_vm11 = vcmp.lt.s32.totalorder %v2916_v54, 2 }
  0xb8   : > { %v11398_v37 = vmul.u32.u64.low %v1107_v22, %v1102_v25  ;;  %v11399_v15 = vmul.u32.u64.high %v1107_v22, %v1102_v25, %v11398_v37  ;;  %v1167_v61 = vshrl.u32 %v1166_v0, 23  ;;  %vm2918_vm12 = vcmp.eq.s32.totalorder %v2916_v54, 0 }
  0xb9   : > { %v1011_v18 = vadd.s32 %v11296_v42, %v11308_v55  ;;  %vm8751_vm13 = vcmp.lt.s32.totalorder %v8750_v59, 0  ;;  %vm2921_vm14 = vcmp.eq.s32.totalorder %v2916_v54, 2  ;;  %vm946_vm15 = vcmp.lt.s32.totalorder %v945_v5, 2 }
  0xba   : > { %v1026_v45 = vsel %vm8751_vm13, 0, %v8750_v59  ;;  %v8756_v14 = vadd.s32 4294967169, %v1167_v61  ;;  %v1114_v17 = vmul.u32 %v1107_v22, %v1098_v49  ;;  %v1041_v30 = vsub.s32 4, %v11360_v34  ;;  %v398_v49 = vld [vmem:[%s10766_s23 + $0x40] sm:$0xff] }
  0xbb   : > { %v1027_v40 = vsub.s32 32, %v1026_v45  ;;  %v1028_v11 = vshll.u32 %v11381_v1, %v1026_v45  ;;  %v1031_v33 = vsub.s32 4294967266, %v1026_v45  ;;  %vm1116_vm0 = vc.u32 %v11394_v38, %v11398_v37 }
  0xbc   : > { %v1117_v35 = vadd.s32 1, %v11399_v15  ;;  %v1173_v58 = vadd.s32 1, %v8756_v14  ;;  %vm947_vm1 = vcmp.eq.s32.totalorder %v945_v5, 0  ;;  %vm950_vm3 = vcmp.eq.s32.totalorder %v945_v5, 2 }
  0xbd   : > { %v10574_v9 = vpop.eup %10573  ;;  %v1029_v42 = vshrl.u32 %v1011_v18, %v1027_v40  ;;  %v1032_v55 = vadd.s32 127, %v1031_v33  ;;  %v1163_v12 = vand.u32 2147483647, %v11372_v51  ;;  %v1042_v29 = vsel %vm957_vm9, %v1041_v30, %v11360_v34 }
  0xbe   : > { %v10576_v47 = vpop.eup %10575  ;;  %v951_v63 = vxor.u32 2147483648, %v10574_v9  ;;  %v1118_v7 = vsel %vm1116_vm0, %v1117_v35, %v11399_v15  ;;  %vm1174_vm4 = vcmp.gt.s32.totalorder %v1173_v58, 0  ;;  %vm11421_vm5 = vcmp.le.f32.partialorder %v955_v23, 0.7853982 }
  0xbf   : > { %v948_v3 = vxor.u32 2147483648, %v10576_v47  ;;  %v1030_v2 = vor.u32 %v1029_v42, %v1028_v11  ;;  %v1033_v56 = vshll.u32 %v1032_v55, 23  ;;  %v1119_v13 = vadd.s32 %v1118_v7, %v1114_v17 }
  0xc0   : > { %v2923_v1 = vsel %vm2921_vm14, %v951_v63, %v10576_v47  ;;  %v952_v43 = vsel %vm950_vm3, %v951_v63, %v10576_v47  ;;  %v1175_v57 = vsel %vm1174_vm4, %v1173_v58, 0  ;;  %v1044_v23 = vsel %vm11421_vm5, 0, %v1042_v29 }
  0xc1   : > { %v2920_v4 = vsel %vm2918_vm12, %v10574_v9, %v948_v3  ;;  %v949_v19 = vsel %vm947_vm1, %v10574_v9, %v948_v3  ;;  %v1034_v16 = vor.u32 4788187, %v1033_v56  ;;  %v1037_v6 = vcvt.s32.f32 %v1030_v2 }
  0xc2   : > { %v2924_v10 = vsel %vm2917_vm11, %v2920_v4, %v2923_v1  ;;  %v953_v20 = vsel %vm946_vm15, %v949_v19, %v952_v43  ;;  %v1120_v24 = vadd.s32 536870912, %v1119_v13  ;;  %v1177_v21 = vand.u32 31, %v1175_v57 }
  0xc3   : > { %v2925_v34 = vsel %vm943_vm10, nan, %v2924_v10  ;;  %v954_v26 = vsel %vm943_vm10, nan, %v953_v20  ;;  %v1035_v27 = vand.u32 2147483647, %v1034_v16  ;;  %v11437_v25 = vand.u32 3, %v1044_v23 }
  0xc4   : > { %8886 = vmatmul.mubr.msk.f32.gmra.mxu0 %vm4376_vm2, %v2925_v34  ;;  %8907 = vmatmul.mubr.msk.f32.gmra.mxu1 %vm4376_vm2, %v954_v26  ;;  %v11433_v54 = vshrl.u32 %v1120_v24, 30  ;;  %v1170_v41 = vand.u32 8388607, %v1163_v12  ;;  %v1178_v31 = vsub.s32 32, %v1177_v21  ;;  %v1176_v0 = vshrl.u32 %v1175_v57, 5 }
  0xc5   : > { %4535 = vmatprep.mubr.f32.mxu0 %v14557_v8  ;;  %4777 = vmatprep.mubr.f32.mxu1 %v14557_v8  ;;  %v1038_v28 = vmul.f32 %v1037_v6, %v1035_v27  ;;  %v1180_v59 = vshll.u32 %v10647_v44, %v1177_v21  ;;  %v1183_v36 = vshll.u32 %v10648_v46, %v1177_v21  ;;  %v1048_v30 = vadd.s32 3, %v1044_v23 }
  0xc6   : > { %v1122_v5 = vshll.u32 %v11433_v54, 30  ;;  %v1181_v61 = vshrl.u32 %v10648_v46, %v1178_v31  ;;  %v1184_v18 = vshrl.u32 %v10649_v48, %v1178_v31  ;;  %v1186_v45 = vshll.u32 %v10649_v48, %v1177_v21 }
  0xc7   : > { %v1039_v15 = vxor.u32 2147483648, %v1038_v28  ;;  %v1187_v40 = vshrl.u32 %v10650_v50, %v1178_v31  ;;  %v1189_v11 = vshll.u32 %v10650_v50, %v1177_v21  ;;  %v1190_v33 = vshrl.u32 %v10651_v52, %v1178_v31 }
  0xc8   : > { %v11448_v14 = vsub.s32 %v1119_v13, %v1122_v5  ;;  %v1171_v35 = vor.u32 8388608, %v1170_v41  ;;  %v11456_v58 = vmul.f32 %v11369_v62, %v398_v49  ;;  %v1179_v55 = vshrl.u32 %v10647_v44, %v1178_v31 }
  0xc9   : > { %v1040_v17 = vsel %vm957_vm9, %v1039_v15, %v1038_v28  ;;  %vm1195_vm6 = vcmp.lt.s32.totalorder %v1176_v0, 1  ;;  %v1182_v47 = vor.u32 %v1181_v61, %v1180_v59  ;;  %v1185_v63 = vor.u32 %v1184_v18, %v1183_v36 }
  0xca   : > { %v1043_v9 = vsel %vm11421_vm5, %v11129_v39, %v1040_v17  ;;  %v1125_v42 = vsub.s32 0, %v11448_v14  ;;  %v1192_v7 = vshll.u32 %v10651_v52, %v1177_v21  ;;  %v1188_v2 = vor.u32 %v1187_v40, %v1186_v45 }
  0xcb   : > { %10577 = vcosq.f32 %v1043_v9  ;;  %v1191_v56 = vor.u32 %v1190_v33, %v1189_v11  ;;  %v11465_v13 = vand.u32 3, %v1048_v30  ;;  %v1193_v1 = vshrl.u32 %v10652_v60, %v1178_v31 }
  0xcc   : > { %10579 = vsinq.f32 %v1043_v9  ;;  %v8753_v3 = vmin.u32 %v1125_v42, %v11448_v14  ;;  %vm1198_vm7 = vcmp.lt.s32.totalorder %v1176_v0, 4  ;;  %v1270_v43 = vand.u32 2139095040, %v11456_v58 }
  0xcd   : > { %vm1197_vm8 = vcmp.lt.s32.totalorder %v1176_v0, 3  ;;  %v1200_v57 = vsel %vm1198_vm7, %v1188_v2, 2102212464  ;;  %v1211_v4 = vshll.u32 %v1171_v35, 8  ;;  %v1194_v19 = vor.u32 %v1193_v1, %v1192_v7 }
  0xce   : > { %v1127_v29 = vclz %v8753_v3  ;;  %vm1196_vm9 = vcmp.lt.s32.totalorder %v1176_v0, 2  ;;  %v1199_v16 = vsel %vm1195_vm6, %v1179_v55, %v1182_v47  ;;  %v1203_v6 = vsel %vm1195_vm6, %v1182_v47, %v1185_v63 }
  0xcf   : > { %v1201_v20 = vsel %vm1197_vm8, %v1185_v63, %v1200_v57  ;;  %v1204_v22 = vsel %vm1198_vm7, %v1191_v56, 920167782  ;;  %v1207_v24 = vsel %vm1195_vm6, %v1185_v63, %v1188_v2  ;;  %v1115_v34 = vadd.s32 %v11398_v37, %v11394_v38 }
  0xd0   : > { %v8754_v10 = vadd.s32 4294967294, %v1127_v29  ;;  %v1205_v26 = vsel %vm1197_vm8, %v1188_v2, %v1204_v22  ;;  %v1208_v27 = vsel %vm1198_vm7, %v1194_v19, 1326507024  ;;  %v1271_v21 = vshrl.u32 %v1270_v43, 23 }
  0xd1   : > { %vm1061_vm10 = vcmp.lt.s32.totalorder %v11233_v53, 0  ;;  %v1202_v23 = vsel %vm1196_vm9, %v1199_v16, %v1201_v20  ;;  %v1206_v28 = vsel %vm1196_vm9, %v1203_v6, %v1205_v26  ;;  %v1209_v41 = vsel %vm1197_vm8, %v1191_v56, %v1208_v27  ;;  %v399_v16 = vld [vmem:[%s10766_s23 + $0x48] sm:$0xff] }
  0xd2   : > { %vm8755_vm11 = vcmp.lt.s32.totalorder %v8754_v10, 0  ;;  %vm1047_vm12 = vweird.f32 %v11129_v39  ;;  %v1210_v5 = vsel %vm1196_vm9, %v1207_v24, %v1209_v41  ;;  %v8760_v15 = vadd.s32 4294967169, %v1271_v21 }
  0xd3   : > { %v1130_v31 = vsel %vm8755_vm11, 0, %v8754_v10  ;;  %v11485_v38 = vmul.u32.u64.low %v1211_v4, %v1206_v28  ;;  %v11486_v37 = vmul.u32.u64.high %v1211_v4, %v1206_v28, %v11485_v38  ;;  %vm3020_vm13 = vcmp.lt.s32.totalorder %v11437_v25, 2 }
  0xd4   : > { %v1131_v59 = vsub.s32 32, %v1130_v31  ;;  %v1132_v36 = vshll.u32 %v11448_v14, %v1130_v31  ;;  %v1135_v49 = vsub.s32 4294967266, %v1130_v31  ;;  %vm3021_vm14 = vcmp.eq.s32.totalorder %v11437_v25, 0 }
  0xd5   : > { %v11492_v61 = vmul.u32.u64.low %v1211_v4, %v1210_v5  ;;  %v11493_v18 = vmul.u32.u64.high %v1211_v4, %v1210_v5, %v11492_v61  ;;  %vm3024_vm15 = vcmp.eq.s32.totalorder %v11437_v25, 2  ;;  %v1277_v40 = vadd.s32 1, %v8760_v15 }
  0xd6   : > { %v1133_v0 = vshrl.u32 %v1115_v34, %v1131_v59  ;;  %v1136_v45 = vadd.s32 127, %v1135_v49  ;;  %vm1050_vm0 = vcmp.lt.s32.totalorder %v11465_v13, 2  ;;  %v1145_v11 = vsub.s32 4, %v11433_v54 }
  0xd7   : > { %v1218_v33 = vmul.u32 %v1211_v4, %v1202_v23  ;;  %v1221_v14 = vadd.s32 1, %v11486_v37  ;;  %vm1054_vm1 = vcmp.eq.s32.totalorder %v11465_v13, 2  ;;  %vm1278_vm3 = vcmp.gt.s32.totalorder %v1277_v40, 0 }
  0xd8   : > { %v10578_v17 = vpop.eup %10577  ;;  %v1134_v30 = vor.u32 %v1133_v0, %v1132_v36  ;;  %v1137_v35 = vshll.u32 %v1136_v45, 23  ;;  %vm1051_vm4 = vcmp.eq.s32.totalorder %v11465_v13, 0  ;;  %vm1220_vm5 = vc.u32 %v11493_v18, %v11485_v38 }
  0xd9   : > { %v10580_v9 = vpop.eup %10579  ;;  %v1055_v42 = vxor.u32 2147483648, %v10578_v17  ;;  %v1279_v55 = vsel %vm1278_vm3, %v1277_v40, 0  ;;  %v1222_v3 = vsel %vm1220_vm5, %v1221_v14, %v11486_v37  ;;  %v1146_v1 = vsel %vm1061_vm10, %v1145_v11, %v11433_v54 }
  0xda   : > { %v1052_v47 = vxor.u32 2147483648, %v10580_v9  ;;  %v1138_v63 = vor.u32 4788187, %v1137_v35  ;;  %v1141_v7 = vcvt.s32.f32 %v1134_v30  ;;  %v1223_v43 = vadd.s32 %v1222_v3, %v1218_v33 }
  0xdb   : > { %v3026_v2 = vsel %vm3024_vm15, %v1055_v42, %v10580_v9  ;;  %v1056_v56 = vsel %vm1054_vm1, %v1055_v42, %v10580_v9  ;;  %v1281_v19 = vand.u32 31, %v1279_v55  ;;  %vm11518_vm6 = vcmp.le.f32.partialorder %v1059_v32, 0.7853982 }
  0xdc   : > { %v3023_v29 = vsel %vm3021_vm14, %v10578_v17, %v1052_v47  ;;  %v1053_v57 = vsel %vm1051_vm4, %v10578_v17, %v1052_v47  ;;  %v1139_v4 = vand.u32 2147483647, %v1138_v63  ;;  %v1224_v54 = vadd.s32 536870912, %v1223_v43 }
  0xdd   : > { %v3027_v6 = vsel %vm3020_vm13, %v3023_v29, %v3026_v2  ;;  %v1057_v10 = vsel %vm1050_vm0, %v1053_v57, %v1056_v56  ;;  %v1282_v26 = vsub.s32 32, %v1281_v19  ;;  %v1148_v25 = vsel %vm11518_vm6, 0, %v1146_v1 }
  0xde   : > { %v3028_v22 = vsel %vm1047_vm12, nan, %v3027_v6  ;;  %v1058_v24 = vsel %vm1047_vm12, nan, %v1057_v10  ;;  %v1142_v34 = vmul.f32 %v1141_v7, %v1139_v4  ;;  %v11530_v32 = vshrl.u32 %v1224_v54, 30 }
  0xdf   : > { %8887 = vmatmul.mubr.msk.f32.gmra.mxu0 %vm4376_vm2, %v3028_v22  ;;  %8908 = vmatmul.mubr.msk.f32.gmra.mxu1 %vm4376_vm2, %v1058_v24  ;;  %v1267_v13 = vand.u32 2147483647, %v11456_v58  ;;  %v11534_v27 = vmul.f32 %v11369_v62, %v399_v16  ;;  %v11538_v21 = vshrl.u32 %v1279_v55, 5  ;;  %v1284_v23 = vshll.u32 %v10647_v44, %v1281_v19 }
  0xe0   : > { %4541 = vmatprep.mubr.f32.mxu0 %v14557_v8  ;;  %4783 = vmatprep.mubr.f32.mxu1 %v14557_v8  ;;  %v1143_v39 = vxor.u32 2147483648, %v1142_v34  ;;  %v1287_v28 = vshll.u32 %v10648_v46, %v1281_v19  ;;  %v1226_v41 = vshll.u32 %v11530_v32, 30  ;;  %v1285_v31 = vshrl.u32 %v10648_v46, %v1282_v26 }
  0xe1   : > { %v1290_v5 = vshll.u32 %v10649_v48, %v1281_v19  ;;  %v1293_v37 = vshll.u32 %v10650_v50, %v1281_v19  ;;  %v1288_v36 = vshrl.u32 %v10649_v48, %v1282_v26  ;;  %v1291_v49 = vshrl.u32 %v10650_v50, %v1282_v26 }
  0xe2   : > { %v1144_v59 = vsel %vm1061_vm10, %v1143_v39, %v1142_v34  ;;  %v1294_v15 = vshrl.u32 %v10651_v52, %v1282_v26  ;;  %v1152_v0 = vadd.s32 3, %v1148_v25  ;;  %v11554_v45 = vsub.s32 %v1223_v43, %v1226_v41 }
  0xe3   : > { %v1147_v61 = vsel %vm11518_vm6, %v11233_v53, %v1144_v59  ;;  %v1274_v40 = vand.u32 8388607, %v1267_v13  ;;  %v11558_v11 = vand.u32 3, %v1148_v25  ;;  %v1283_v33 = vshrl.u32 %v10647_v44, %v1282_v26 }
  0xe4   : > { %10581 = vcosq.f32 %v1147_v61  ;;  %v1296_v14 = vshll.u32 %v10651_v52, %v1281_v19  ;;  %v1229_v17 = vsub.s32 0, %v11554_v45  ;;  %v1286_v30 = vor.u32 %v1285_v31, %v1284_v23 }
  0xe5   : > { %10583 = vsinq.f32 %v1147_v61  ;;  %v1295_v35 = vor.u32 %v1294_v15, %v1293_v37  ;;  %v1289_v9 = vor.u32 %v1288_v36, %v1287_v28  ;;  %v1292_v42 = vor.u32 %v1291_v49, %v1290_v5 }
  0xe6   : > { %v1297_v55 = vshrl.u32 %v10652_v60, %v1282_v26  ;;  %vm1302_vm7 = vcmp.lt.s32.totalorder %v11538_v21, 4  ;;  %v11565_v47 = vand.u32 3, %v1152_v0  ;;  %v8757_v63 = vmin.u32 %v1229_v17, %v11554_v45 }
  0xe7   : > { %v1275_v7 = vor.u32 8388608, %v1274_v40  ;;  %vm1299_vm8 = vcmp.lt.s32.totalorder %v11538_v21, 1  ;;  %vm1165_vm9 = vcmp.lt.s32.totalorder %v11372_v51, 0  ;;  %vm1301_vm10 = vcmp.lt.s32.totalorder %v11538_v21, 3 }
  0xe8   : > { %v1298_v3 = vor.u32 %v1297_v55, %v1296_v14  ;;  %v1304_v2 = vsel %vm1302_vm7, %v1292_v42, 2102212464  ;;  %v1374_v56 = vand.u32 2139095040, %v11534_v27  ;;  %vm3127_vm11 = vcmp.eq.s32.totalorder %v11558_v11, 2 }
  0xe9   : > { %v1231_v1 = vclz %v8757_v63  ;;  %v1308_v43 = vsel %vm1302_vm7, %v1295_v35, 920167782  ;;  %v1371_v29 = vand.u32 2147483647, %v11534_v27  ;;  %vm3124_vm12 = vcmp.eq.s32.totalorder %v11558_v11, 0 }
  0xea   : > { %vm1300_vm13 = vcmp.lt.s32.totalorder %v11538_v21, 2  ;;  %v1303_v57 = vsel %vm1299_vm8, %v1283_v33, %v1286_v30  ;;  %v1305_v4 = vsel %vm1301_vm10, %v1289_v9, %v1304_v2  ;;  %v1307_v19 = vsel %vm1299_vm8, %v1286_v30, %v1289_v9 }
  0xeb   : > { %vm3123_vm14 = vcmp.lt.s32.totalorder %v11558_v11, 2  ;;  %vm1154_vm15 = vcmp.lt.s32.totalorder %v11565_v47, 2  ;;  %v8758_v16 = vadd.s32 4294967294, %v1231_v1  ;;  %v1309_v6 = vsel %vm1301_vm10, %v1292_v42, %v1308_v43 }
  0xec   : > { %v1311_v10 = vsel %vm1299_vm8, %v1289_v9, %v1292_v42  ;;  %v1312_v20 = vsel %vm1302_vm7, %v1298_v3, 1326507024  ;;  %vm1151_vm0 = vweird.f32 %v11233_v53  ;;  %v1219_v54 = vadd.s32 %v11485_v38, %v11493_v18 }
  0xed   : > { %v1313_v22 = vsel %vm1301_vm10, %v1295_v35, %v1312_v20  ;;  %v1315_v24 = vshll.u32 %v1275_v7, 8  ;;  %v1375_v34 = vshrl.u32 %v1374_v56, 23  ;;  %vm8759_vm1 = vcmp.lt.s32.totalorder %v8758_v16, 0  ;;  %v400_v56 = vld [vmem:[%s10766_s23 + $0x50] sm:$0xff] }
  0xee   : > { %v1249_v26 = vsub.s32 4, %v11530_v32  ;;  %v1310_v25 = vsel %vm1300_vm13, %v1307_v19, %v1309_v6  ;;  %v1314_v39 = vsel %vm1300_vm13, %v1311_v10, %v1313_v22  ;;  %v1234_v23 = vsel %vm8759_vm1, 0, %v8758_v16 }
  0xef   : > { %v1306_v28 = vsel %vm1300_vm13, %v1303_v57, %v1305_v4  ;;  %v11606_v41 = vmul.u32.u64.low %v1315_v24, %v1314_v39  ;;  %v11607_v38 = vmul.u32.u64.high %v1315_v24, %v1314_v39, %v11606_v41  ;;  %v1235_v18 = vsub.s32 32, %v1234_v23 }
  0xf0   : > { %v1236_v31 = vshll.u32 %v11554_v45, %v1234_v23  ;;  %v1239_v5 = vsub.s32 4294967266, %v1234_v23  ;;  %v8764_v37 = vadd.s32 4294967169, %v1375_v34  ;;  %vm1155_vm3 = vcmp.eq.s32.totalorder %v11565_v47, 0 }
  0xf1   : > { %vm1158_vm4 = vcmp.eq.s32.totalorder %v11565_v47, 2  ;;  %v11612_v59 = vmul.u32.u64.low %v1315_v24, %v1310_v25  ;;  %v11613_v36 = vmul.u32.u64.high %v1315_v24, %v1310_v25, %v11612_v59  ;;  %v10582_v49 = vpop.eup %10581  ;;  %v1237_v15 = vshrl.u32 %v1219_v54, %v1235_v18 }
  0xf2   : > { %v1240_v21 = vadd.s32 127, %v1239_v5  ;;  %v1250_v61 = vsel %vm1165_vm9, %v1249_v26, %v11530_v32  ;;  %v1381_v0 = vadd.s32 1, %v8764_v37  ;;  %v10584_v40 = vpop.eup %10583  ;;  %v1159_v45 = vxor.u32 2147483648, %v10582_v49 }
  0xf3   : > { %v1322_v33 = vmul.u32 %v1315_v24, %v1306_v28  ;;  %vm1324_vm5 = vc.u32 %v11607_v38, %v11612_v59  ;;  %v11623_v14 = vand.u32 8388607, %v1371_v29  ;;  %v1156_v17 = vxor.u32 2147483648, %v10584_v40 }
  0xf4   : > { %v1238_v30 = vor.u32 %v1237_v15, %v1236_v31  ;;  %v1241_v35 = vshll.u32 %v1240_v21, 23  ;;  %vm1382_vm6 = vcmp.gt.s32.totalorder %v1381_v0, 0  ;;  %v3129_v9 = vsel %vm3127_vm11, %v1159_v45, %v10584_v40 }
  0xf5   : > { %v1160_v32 = vsel %vm1158_vm4, %v1159_v45, %v10584_v40  ;;  %v1325_v42 = vadd.s32 1, %v11613_v36  ;;  %v1383_v55 = vsel %vm1382_vm6, %v1381_v0, 0  ;;  %v3126_v63 = vsel %vm3124_vm12, %v10582_v49, %v1156_v17 }
  0xf6   : > { %v1157_v7 = vsel %vm1155_vm3, %v10582_v49, %v1156_v17  ;;  %v1242_v3 = vor.u32 4788187, %v1241_v35  ;;  %v1245_v2 = vcvt.s32.f32 %v1238_v30  ;;  %v3130_v1 = vsel %vm3123_vm14, %v3126_v63, %v3129_v9 }
  0xf7   : > { %v1161_v43 = vsel %vm1154_vm15, %v1157_v7, %v1160_v32  ;;  %v1326_v57 = vsel %vm1324_vm5, %v1325_v42, %v11613_v36  ;;  %v11643_v4 = vshrl.u32 %v1383_v55, 5  ;;  %v3131_v19 = vsel %vm1151_vm0, nan, %v3130_v1 }
  0xf8   : > { %v1162_v16 = vsel %vm1151_vm0, nan, %v1161_v43  ;;  %v1243_v6 = vand.u32 2147483647, %v1242_v3  ;;  %v1327_v10 = vadd.s32 %v1326_v57, %v1322_v33  ;;  %8888 = vmatmul.mubr.msk.f32.gmra.mxu0 %vm4376_vm2, %v3131_v19  ;;  %vm11653_vm7 = vcmp.le.f32.partialorder %v1163_v12, 0.7853982 }
  0xf9   : > { %8909 = vmatmul.mubr.msk.f32.gmra.mxu1 %vm4376_vm2, %v1162_v16  ;;  %v1385_v47 = vand.u32 31, %v1383_v55  ;;  %v11658_v20 = vmul.f32 %v11369_v62, %v400_v56  ;;  %4547 = vmatprep.mubr.f32.mxu0 %v14557_v8  ;;  %v1252_v54 = vsel %vm11653_vm7, 0, %v1250_v61  ;;  %v1379_v24 = vor.u32 8388608, %v11623_v14 }
  0xfa   : > { %4789 = vmatprep.mubr.f32.mxu1 %v14557_v8  ;;  %v1246_v53 = vmul.f32 %v1245_v2, %v1243_v6  ;;  %v1328_v22 = vadd.s32 536870912, %v1327_v10  ;;  %vm1403_vm8 = vcmp.lt.s32.totalorder %v11643_v4, 1  ;;  %vm1406_vm10 = vcmp.lt.s32.totalorder %v11643_v4, 4 }
  0xfb   : > { %v1386_v34 = vsub.s32 32, %v1385_v47  ;;  %v1388_v12 = vshll.u32 %v10647_v44, %v1385_v47  ;;  %v1391_v26 = vshll.u32 %v10648_v46, %v1385_v47  ;;  %v1394_v23 = vshll.u32 %v10649_v48, %v1385_v47 }
  0xfc   : > { %v1247_v25 = vxor.u32 2147483648, %v1246_v53  ;;  %v1329_v39 = vshrl.u32 %v1328_v22, 30  ;;  %v1397_v28 = vshll.u32 %v10650_v50, %v1385_v47  ;;  %v1400_v49 = vshll.u32 %v10651_v52, %v1385_v47 }
  0xfd   : > { %v1389_v41 = vshrl.u32 %v10648_v46, %v1386_v34  ;;  %v1392_v18 = vshrl.u32 %v10649_v48, %v1386_v34  ;;  %v1395_v31 = vshrl.u32 %v10650_v50, %v1386_v34  ;;  %v1398_v36 = vshrl.u32 %v10651_v52, %v1386_v34 }
  0xfe   : > { %v1248_v5 = vsel %vm1165_vm9, %v1247_v25, %v1246_v53  ;;  %v1330_v37 = vshll.u32 %v1329_v39, 30  ;;  %v1387_v21 = vshrl.u32 %v10647_v44, %v1386_v34  ;;  %v11684_v14 = vand.u32 3, %v1252_v54 }
  0xff   : > { %v1251_v15 = vsel %vm11653_vm7, %v11372_v51, %v1248_v5  ;;  %v1390_v61 = vor.u32 %v1389_v41, %v1388_v12  ;;  %v1393_v0 = vor.u32 %v1392_v18, %v1391_v26  ;;  %v1396_v45 = vor.u32 %v1395_v31, %v1394_v23 }
 0x100   : > { %10585 = vcosq.f32 %v1251_v15  ;;  %v11682_v40 = vsub.s32 %v1327_v10, %v1330_v37  ;;  %v1399_v33 = vor.u32 %v1398_v36, %v1397_v28  ;;  %v1256_v17 = vadd.s32 3, %v1252_v54 }
 0x101   : > { %10587 = vsinq.f32 %v1251_v15  ;;  %v1401_v30 = vshrl.u32 %v10652_v60, %v1386_v34  ;;  %vm1404_vm9 = vcmp.lt.s32.totalorder %v11643_v4, 2  ;;  %vm1405_vm11 = vcmp.lt.s32.totalorder %v11643_v4, 3 }
 0x102   : > { %v1333_v35 = vsub.s32 0, %v11682_v40  ;;  %v1408_v9 = vsel %vm1406_vm10, %v1396_v45, 2102212464  ;;  %v1353_v32 = vsub.s32 4, %v1329_v39  ;;  %v1411_v55 = vsel %vm1403_vm8, %v1390_v61, %v1393_v0 }
 0x103   : > { %v1402_v42 = vor.u32 %v1401_v30, %v1400_v49  ;;  %v1412_v63 = vsel %vm1406_vm10, %v1399_v33, 920167782  ;;  %v1407_v3 = vsel %vm1403_vm8, %v1387_v21, %v1390_v61  ;;  %v1409_v2 = vsel %vm1405_vm11, %v1393_v0, %v1408_v9 }
 0x104   : > { %v8761_v7 = vmin.u32 %v1333_v35, %v11682_v40  ;;  %v1419_v56 = vshll.u32 %v1379_v24, 8  ;;  %vm11703_vm12 = vcmp.le.f32.partialorder %v1267_v13, 0.7853982  ;;  %vm1269_vm13 = vcmp.lt.s32.totalorder %v11456_v58, 0 }
 0x105   : > { %v1413_v43 = vsel %vm1405_vm11, %v1396_v45, %v1412_v63  ;;  %v1415_v57 = vsel %vm1403_vm8, %v1393_v0, %v1396_v45  ;;  %v1257_v19 = vand.u32 3, %v1256_v17  ;;  %v1416_v10 = vsel %vm1406_vm10, %v1402_v42, 1326507024 }
 0x106   : > { %v1335_v16 = vclz %v8761_v7  ;;  %v1414_v6 = vsel %vm1404_vm9, %v1411_v55, %v1413_v43  ;;  %vm3226_vm14 = vcmp.lt.s32.totalorder %v11684_v14, 2  ;;  %vm3227_vm15 = vcmp.eq.s32.totalorder %v11684_v14, 0 }
 0x107   : > { %v1354_v13 = vsel %vm1269_vm13, %v1353_v32, %v1329_v39  ;;  %v1410_v11 = vsel %vm1404_vm9, %v1407_v3, %v1409_v2  ;;  %v1417_v47 = vsel %vm1405_vm11, %v1399_v33, %v1416_v10  ;;  %vm1255_vm0 = vweird.f32 %v11372_v51  ;;  %v401_v10 = vld [vmem:[%s10766_s23 + $0x58] sm:$0xff] }
 0x108   : > { %v8762_v53 = vadd.s32 4294967294, %v1335_v16  ;;  %v1418_v54 = vsel %vm1404_vm9, %v1415_v57, %v1417_v47  ;;  %v11727_v22 = vmul.u32.u64.low %v1419_v56, %v1414_v6  ;;  %v11728_v24 = vmul.u32.u64.high %v1419_v56, %v1414_v6, %v11727_v22 }
 0x109   : > { %vm3230_vm1 = vcmp.eq.s32.totalorder %v11684_v14, 2  ;;  %v11732_v34 = vmul.u32.u64.low %v1419_v56, %v1418_v54  ;;  %v11733_v12 = vmul.u32.u64.high %v1419_v56, %v1418_v54, %v11732_v34  ;;  %v1478_v26 = vand.u32 2139095040, %v11658_v20 }
 0x10a   : > { %vm1258_vm3 = vcmp.lt.s32.totalorder %v1257_v19, 2  ;;  %vm1259_vm4 = vcmp.eq.s32.totalorder %v1257_v19, 0  ;;  %v1323_v25 = vadd.s32 %v11612_v59, %v11607_v38  ;;  %vm8763_vm5 = vcmp.lt.s32.totalorder %v8762_v53, 0 }
 0x10b   : > { %v1338_v39 = vsel %vm8763_vm5, 0, %v8762_v53  ;;  %v1356_v4 = vsel %vm11703_vm12, 0, %v1354_v13  ;;  %v1426_v23 = vmul.u32 %v1419_v56, %v1410_v11  ;;  %v1479_v28 = vshrl.u32 %v1478_v26, 23 }
 0x10c   : > { %v1339_v41 = vsub.s32 32, %v1338_v39  ;;  %v1340_v18 = vshll.u32 %v11682_v40, %v1338_v39  ;;  %v1343_v31 = vsub.s32 4294967266, %v1338_v39  ;;  %v1429_v5 = vadd.s32 1, %v11728_v24 }
 0x10d   : > { %v10586_v37 = vpop.eup %10585  ;;  %vm1262_vm6 = vcmp.eq.s32.totalorder %v1257_v19, 2  ;;  %vm1428_vm7 = vc.u32 %v11733_v12, %v11727_v22  ;;  %v1475_v38 = vand.u32 2147483647, %v11658_v20  ;;  %v8768_v59 = vadd.s32 4294967169, %v1479_v28 }
 0x10e   : > { %v10588_v36 = vpop.eup %10587  ;;  %v1263_v49 = vxor.u32 2147483648, %v10586_v37  ;;  %v1341_v15 = vshrl.u32 %v1323_v25, %v1339_v41  ;;  %v1344_v21 = vadd.s32 127, %v1343_v31  ;;  %v1430_v61 = vsel %vm1428_vm7, %v1429_v5, %v11728_v24 }
 0x10f   : > { %v1260_v0 = vxor.u32 2147483648, %v10588_v36  ;;  %v1360_v45 = vadd.s32 3, %v1356_v4  ;;  %v1431_v40 = vadd.s32 %v1430_v61, %v1426_v23  ;;  %v1485_v33 = vadd.s32 1, %v8768_v59 }
 0x110   : > { %v3232_v17 = vsel %vm3230_vm1, %v1263_v49, %v10588_v36  ;;  %v1264_v30 = vsel %vm1262_vm6, %v1263_v49, %v10588_v36  ;;  %v1342_v35 = vor.u32 %v1341_v15, %v1340_v18  ;;  %v1345_v9 = vshll.u32 %v1344_v21, 23 }
 0x111   : > { %v3229_v32 = vsel %vm3227_vm15, %v10586_v37, %v1260_v0  ;;  %v1261_v42 = vsel %vm1259_vm4, %v10586_v37, %v1260_v0  ;;  %v1432_v55 = vadd.s32 536870912, %v1431_v40  ;;  %vm1486_vm8 = vcmp.gt.s32.totalorder %v1485_v33, 0 }
 0x112   : > { %v3233_v63 = vsel %vm3226_vm14, %v3229_v32, %v3232_v17  ;;  %v1265_v7 = vsel %vm1258_vm3, %v1261_v42, %v1264_v30  ;;  %v1346_v3 = vor.u32 4788187, %v1345_v9  ;;  %v1349_v2 = vcvt.s32.f32 %v1342_v35 }
 0x113   : > { %v3234_v56 = vsel %vm1255_vm0, nan, %v3233_v63  ;;  %v1266_v43 = vsel %vm1255_vm0, nan, %v1265_v7  ;;  %v11758_v57 = vshrl.u32 %v1432_v55, 30  ;;  %v1487_v16 = vsel %vm1486_vm8, %v1485_v33, 0 }
 0x114   : > { %8889 = vmatmul.mubr.msk.f32.gmra.mxu0 %vm4376_vm2, %v3234_v56  ;;  %8910 = vmatmul.mubr.msk.f32.gmra.mxu1 %vm4376_vm2, %v1266_v43  ;;  %v1347_v6 = vand.u32 2147483647, %v1346_v3  ;;  %v1489_v14 = vand.u32 31, %v1487_v16  ;;  %v1482_v51 = vand.u32 8388607, %v1475_v38  ;;  %v11768_v47 = vand.u32 3, %v1356_v4 }
 0x115   : > { %4553 = vmatprep.mubr.f32.mxu0 %v14557_v8  ;;  %4795 = vmatprep.mubr.f32.mxu1 %v14557_v8  ;;  %v1434_v19 = vshll.u32 %v11758_v57, 30  ;;  %v11770_v53 = vand.u32 3, %v1360_v45  ;;  %v11775_v24 = vmul.f32 %v11369_v62, %v401_v10  ;;  %v1488_v36 = vshrl.u32 %v1487_v16, 5 }
 0x116   : > { %v1350_v13 = vmul.f32 %v1349_v2, %v1347_v6  ;;  %v1490_v11 = vsub.s32 32, %v1489_v14  ;;  %v1492_v26 = vshll.u32 %v10647_v44, %v1489_v14  ;;  %v1495_v39 = vshll.u32 %v10648_v46, %v1489_v14 }
 0x117   : > { %v11772_v54 = vsub.s32 %v1431_v40, %v1434_v19  ;;  %v1483_v28 = vor.u32 8388608, %v1482_v51  ;;  %v1501_v41 = vshll.u32 %v10650_v50, %v1489_v14  ;;  %v1498_v62 = vshll.u32 %v10649_v48, %v1489_v14 }
 0x118   : > { %v1351_v34 = vxor.u32 2147483648, %v1350_v13  ;;  %v1493_v25 = vshrl.u32 %v10648_v46, %v1490_v11  ;;  %v1496_v4 = vshrl.u32 %v10649_v48, %v1490_v11  ;;  %v1499_v31 = vshrl.u32 %v10650_v50, %v1490_v11 }
 0x119   : > { %v1437_v23 = vsub.s32 0, %v11772_v54  ;;  %v1502_v5 = vshrl.u32 %v10651_v52, %v1490_v11  ;;  %v1582_v49 = vand.u32 2139095040, %v11775_v24  ;;  %v1579_v61 = vand.u32 2147483647, %v11775_v24 }
 0x11a   : > { %v1352_v18 = vsel %vm1269_vm13, %v1351_v34, %v1350_v13  ;;  %v1494_v15 = vor.u32 %v1493_v25, %v1492_v26  ;;  %v1497_v21 = vor.u32 %v1496_v4, %v1495_v39  ;;  %v1427_v0 = vadd.s32 %v11727_v22, %v11733_v12 }
 0x11b   : > { %v1355_v37 = vsel %vm11703_vm12, %v11456_v58, %v1352_v18  ;;  %v8765_v59 = vmin.u32 %v1437_v23, %v11772_v54  ;;  %v1503_v40 = vor.u32 %v1502_v5, %v1501_v41  ;;  %v1491_v33 = vshrl.u32 %v10647_v44, %v1490_v11 }
 0x11c   : > { %10589 = vcosq.f32 %v1355_v37  ;;  %v1500_v1 = vor.u32 %v1499_v31, %v1498_v62  ;;  %v1504_v17 = vshll.u32 %v10651_v52, %v1489_v14  ;;  %v11798_v30 = vshll.u32 %v1483_v28, 8 }
 0x11d   : > { %10591 = vsinq.f32 %v1355_v37  ;;  %v1439_v45 = vclz %v8765_v59  ;;  %v1505_v9 = vshrl.u32 %v10652_v60, %v1490_v11  ;;  %vm1507_vm10 = vcmp.lt.s32.totalorder %v1488_v36, 1 }
 0x11e   : > { %v1583_v32 = vshrl.u32 %v1582_v49, 23  ;;  %vm1508_vm9 = vcmp.lt.s32.totalorder %v1488_v36, 2  ;;  %vm1509_vm11 = vcmp.lt.s32.totalorder %v1488_v36, 3  ;;  %vm1510_vm12 = vcmp.lt.s32.totalorder %v1488_v36, 4 }
 0x11f   : > { %v8766_v35 = vadd.s32 4294967294, %v1439_v45  ;;  %v1515_v42 = vsel %vm1507_vm10, %v1494_v15, %v1497_v21  ;;  %vm3333_vm13 = vcmp.eq.s32.totalorder %v11768_v47, 2  ;;  %v1506_v22 = vor.u32 %v1505_v9, %v1504_v17 }
 0x120   : > { %v1512_v12 = vsel %vm1510_vm12, %v1500_v1, 2102212464  ;;  %v1516_v55 = vsel %vm1510_vm12, %v1503_v40, 920167782  ;;  %vm3330_vm15 = vcmp.eq.s32.totalorder %v11768_v47, 0  ;;  %vm1373_vm0 = vcmp.lt.s32.totalorder %v11534_v27, 0 }
 0x121   : > { %vm8767_vm14 = vcmp.lt.s32.totalorder %v8766_v35, 0  ;;  %v1511_v7 = vsel %vm1507_vm10, %v1491_v33, %v1494_v15  ;;  %v1513_v3 = vsel %vm1509_vm11, %v1497_v21, %v1512_v12  ;;  %v1517_v2 = vsel %vm1509_vm11, %v1500_v1, %v1516_v55 }
 0x122   : > { %v1442_v63 = vsel %vm8767_vm14, 0, %v8766_v35  ;;  %vm3329_vm1 = vcmp.lt.s32.totalorder %v11768_v47, 2  ;;  %v1519_v6 = vsel %vm1507_vm10, %v1497_v21, %v1500_v1  ;;  %vm1359_vm3 = vweird.f32 %v11456_v58 }
 0x123   : > { %v1443_v56 = vsub.s32 32, %v1442_v63  ;;  %v1444_v43 = vshll.u32 %v11772_v54, %v1442_v63  ;;  %v1447_v16 = vsub.s32 4294967266, %v1442_v63  ;;  %v1457_v14 = vsub.s32 4, %v11758_v57 }
 0x124   : > { %v1518_v10 = vsel %vm1508_vm9, %v1515_v42, %v1517_v2  ;;  %v1520_v19 = vsel %vm1510_vm12, %v1506_v22, 1326507024  ;;  %v8772_v51 = vadd.s32 4294967169, %v1583_v32  ;;  %vm11819_vm4 = vcmp.le.f32.partialorder %v1371_v29, 0.7853982 }
 0x125   : > { %v1445_v11 = vshrl.u32 %v1427_v0, %v1443_v56  ;;  %v1448_v54 = vadd.s32 127, %v1447_v16  ;;  %v1514_v34 = vsel %vm1508_vm9, %v1511_v7, %v1513_v3  ;;  %v1521_v26 = vsel %vm1509_vm11, %v1503_v40, %v1520_v19 }
 0x126   : > { %v1522_v25 = vsel %vm1508_vm9, %v1519_v6, %v1521_v26  ;;  %v11827_v39 = vmul.u32.u64.low %v11798_v30, %v1518_v10  ;;  %v11828_v23 = vmul.u32.u64.high %v11798_v30, %v1518_v10, %v11827_v39  ;;  %v1589_v28 = vadd.s32 1, %v8772_v51 }
 0x127   : > { %v1446_v4 = vor.u32 %v1445_v11, %v1444_v43  ;;  %v1449_v41 = vshll.u32 %v1448_v54, 23  ;;  %v11832_v29 = vmul.u32.u64.low %v11798_v30, %v1522_v25  ;;  %v11833_v18 = vmul.u32.u64.high %v11798_v30, %v1522_v25, %v11832_v29 }
 0x128   : > { %vm1362_vm5 = vcmp.lt.s32.totalorder %v11770_v53, 2  ;;  %vm1363_vm6 = vcmp.eq.s32.totalorder %v11770_v53, 0  ;;  %vm1366_vm7 = vcmp.eq.s32.totalorder %v11770_v53, 2  ;;  %vm1590_vm8 = vcmp.gt.s32.totalorder %v1589_v28, 0 }
 0x129   : > { %v10590_v62 = vpop.eup %10589  ;;  %v1450_v31 = vor.u32 4788187, %v1449_v41  ;;  %v1453_v5 = vcvt.s32.f32 %v1446_v4  ;;  %v1530_v37 = vmul.u32 %v11798_v30, %v1514_v34  ;;  %v1591_v59 = vsel %vm1590_vm8, %v1589_v28, 0 }
 0x12a   : > { %v10592_v36 = vpop.eup %10591  ;;  %v1367_v49 = vxor.u32 2147483648, %v10590_v62  ;;  %v1533_v15 = vadd.s32 1, %v11828_v23  ;;  %v11842_v21 = vand.u32 8388607, %v1579_v61  ;;  %v1593_v0 = vand.u32 31, %v1591_v59 }
 0x12b   : > { %v1364_v45 = vxor.u32 2147483648, %v10592_v36  ;;  %v1451_v40 = vand.u32 2147483647, %v1450_v31  ;;  %v1458_v33 = vsel %vm1373_vm0, %v1457_v14, %v11758_v57  ;;  %vm1532_vm10 = vc.u32 %v11833_v18, %v11827_v39 }
 0x12c   : > { %v3335_v1 = vsel %vm3333_vm13, %v1367_v49, %v10592_v36  ;;  %v1368_v17 = vsel %vm1366_vm7, %v1367_v49, %v10592_v36  ;;  %v1534_v30 = vsel %vm1532_vm10, %v1533_v15, %v11828_v23  ;;  %v1594_v35 = vsub.s32 32, %v1593_v0  ;;  %v402_v49 = vld [vmem:[%s10766_s23 + $0x60] sm:$0xff] }
 0x12d   : > { %v3332_v9 = vsel %vm3330_vm15, %v10590_v62, %v1364_v45  ;;  %v1365_v32 = vsel %vm1363_vm6, %v10590_v62, %v1364_v45  ;;  %v1454_v42 = vmul.f32 %v1453_v5, %v1451_v40  ;;  %v1535_v57 = vadd.s32 %v1534_v30, %v1530_v37 }
 0x12e   : > { %v3336_v22 = vsel %vm3329_vm1, %v3332_v9, %v3335_v1  ;;  %v1369_v12 = vsel %vm1362_vm5, %v1365_v32, %v1368_v17  ;;  %v1460_v55 = vsel %vm11819_vm4, 0, %v1458_v33  ;;  %v1596_v63 = vshll.u32 %v10647_v44, %v1593_v0  ;;  %v11927_v9 = vld [vmem:[%s14546_s1] ss:$0 sm:$0xff] }
 0x12f   : > { %v3337_v7 = vsel %vm1359_vm3, nan, %v3336_v22  ;;  %v1370_v3 = vsel %vm1359_vm3, nan, %v1369_v12  ;;  %v1455_v2 = vxor.u32 2147483648, %v1454_v42  ;;  %v1536_v56 = vadd.s32 536870912, %v1535_v57 }
 0x130   : > { %8890 = vmatmul.mubr.msk.f32.gmra.mxu0 %vm4376_vm2, %v3337_v7  ;;  %8911 = vmatmul.mubr.msk.f32.gmra.mxu1 %vm4376_vm2, %v1370_v3  ;;  %v11871_v47 = vshrl.u32 %v1591_v59, 5  ;;  %v1597_v53 = vshrl.u32 %v10648_v46, %v1594_v35  ;;  %v1599_v43 = vshll.u32 %v10648_v46, %v1593_v0  ;;  %v1600_v16 = vshrl.u32 %v10649_v48, %v1594_v35 }
 0x131   : > { %4559 = vmatprep.mubr.f32.mxu0 %v14557_v8  ;;  %4801 = vmatprep.mubr.f32.mxu1 %v14557_v8  ;;  %v1456_v58 = vsel %vm1373_vm0, %v1455_v2, %v1454_v42  ;;  %v11880_v6 = vshrl.u32 %v1536_v56, 30  ;;  %v1602_v14 = vshll.u32 %v10649_v48, %v1593_v0  ;;  %v1603_v10 = vshrl.u32 %v10650_v50, %v1594_v35 }
 0x132   : > { %v1459_v19 = vsel %vm11819_vm4, %v11534_v27, %v1456_v58  ;;  %v11887_v51 = vand.u32 3, %v1460_v55  ;;  %v1605_v11 = vshll.u32 %v10650_v50, %v1593_v0  ;;  %v1598_v34 = vor.u32 %v1597_v53, %v1596_v63 }
 0x133   : > { %10593 = vcosq.f32 %v1459_v19  ;;  %v1538_v54 = vshll.u32 %v11880_v6, 30  ;;  %v1601_v26 = vor.u32 %v1600_v16, %v1599_v43  ;;  %v1606_v25 = vshrl.u32 %v10651_v52, %v1594_v35 }
 0x134   : > { %10595 = vsinq.f32 %v1459_v19  ;;  %v1608_v23 = vshll.u32 %v10651_v52, %v1593_v0  ;;  %v1609_v28 = vshrl.u32 %v10652_v60, %v1594_v35  ;;  %v1587_v13 = vor.u32 8388608, %v11842_v21 }
 0x135   : > { %v11894_v4 = vsub.s32 %v1535_v57, %v1538_v54  ;;  %v1604_v41 = vor.u32 %v1603_v10, %v1602_v14  ;;  %vm1611_vm9 = vcmp.lt.s32.totalorder %v11871_v47, 1  ;;  %v1464_v29 = vadd.s32 3, %v1460_v55 }
 0x136   : > { %v1607_v62 = vor.u32 %v1606_v25, %v1605_v11  ;;  %v1610_v31 = vor.u32 %v1609_v28, %v1608_v23  ;;  %vm1614_vm11 = vcmp.lt.s32.totalorder %v11871_v47, 4  ;;  %vm1477_vm12 = vcmp.lt.s32.totalorder %v11658_v20, 0 }
 0x137   : > { %v1541_v5 = vsub.s32 0, %v11894_v4  ;;  %vm1613_vm13 = vcmp.lt.s32.totalorder %v11871_v47, 3  ;;  %v1595_v37 = vshrl.u32 %v10647_v44, %v1594_v35  ;;  %vm1612_vm14 = vcmp.lt.s32.totalorder %v11871_v47, 2 }
 0x138   : > { %v1619_v59 = vsel %vm1611_vm9, %v1598_v34, %v1601_v26  ;;  %v1620_v36 = vsel %vm1614_vm11, %v1607_v62, 920167782  ;;  %v1616_v21 = vsel %vm1614_vm11, %v1604_v41, 2102212464  ;;  %v1623_v0 = vsel %vm1611_vm9, %v1601_v26, %v1604_v41 }
 0x139   : > { %v8769_v15 = vmin.u32 %v1541_v5, %v11894_v4  ;;  %v1627_v45 = vshll.u32 %v1587_v13, 8  ;;  %vm3432_vm15 = vcmp.lt.s32.totalorder %v11887_v51, 2  ;;  %v1465_v40 = vand.u32 3, %v1464_v29 }
 0x13a   : > { %v1621_v33 = vsel %vm1613_vm13, %v1604_v41, %v1620_v36  ;;  %v1624_v1 = vsel %vm1614_vm11, %v1610_v31, 1326507024  ;;  %vm1463_vm0 = vweird.f32 %v11534_v27  ;;  %v11930_v32 = vmul.f32 %v11927_v9, %v402_v49 }
 0x13b   : > { %v1543_v17 = vclz %v8769_v15  ;;  %v1622_v30 = vsel %vm1612_vm14, %v1619_v59, %v1621_v33  ;;  %v1625_v35 = vsel %vm1613_vm13, %v1607_v62, %v1624_v1  ;;  %v1561_v42 = vsub.s32 4, %v11880_v6 }
 0x13c   : > { %v1615_v57 = vsel %vm1611_vm9, %v1595_v37, %v1598_v34  ;;  %v1617_v22 = vsel %vm1613_vm13, %v1601_v26, %v1616_v21  ;;  %v1626_v12 = vsel %vm1612_vm14, %v1623_v0, %v1625_v35  ;;  %vm3433_vm1 = vcmp.eq.s32.totalorder %v11887_v51, 0  ;;  %v403_v37 = vld [vmem:[%s10766_s23 + $0x68] sm:$0xff] }
 0x13d   : > { %v8770_v55 = vadd.s32 4294967294, %v1543_v17  ;;  %v11940_v63 = vmul.u32.u64.low %v1627_v45, %v1626_v12  ;;  %v11941_v7 = vmul.u32.u64.high %v1627_v45, %v1626_v12, %v11940_v63  ;;  %vm3436_vm3 = vcmp.eq.s32.totalorder %v11887_v51, 2 }
 0x13e   : > { %vm1466_vm4 = vcmp.lt.s32.totalorder %v1465_v40, 2  ;;  %v11944_v3 = vmul.u32.u64.low %v1627_v45, %v1622_v30  ;;  %v11945_v2 = vmul.u32.u64.high %v1627_v45, %v1622_v30, %v11944_v3  ;;  %vm1467_vm5 = vcmp.eq.s32.totalorder %v1465_v40, 0 }
 0x13f   : > { %v1531_v56 = vadd.s32 %v11827_v39, %v11833_v18  ;;  %vm8771_vm6 = vcmp.lt.s32.totalorder %v8770_v55, 0  ;;  %v1618_v53 = vsel %vm1612_vm14, %v1615_v57, %v1617_v22  ;;  %vm1470_vm7 = vcmp.eq.s32.totalorder %v1465_v40, 2  ;;  %v404_v22 = vld [vmem:[%s10766_s23 + $0x70] sm:$0xff] }
 0x140   : > { %v10594_v43 = vpop.eup %10593  ;;  %v1546_v16 = vsel %vm8771_vm6, 0, %v8770_v55  ;;  %v1562_v58 = vsel %vm1477_vm12, %v1561_v42, %v11880_v6  ;;  %v1686_v14 = vand.u32 2139095040, %v11930_v32  ;;  %v1634_v18 = vmul.u32 %v1627_v45, %v1618_v53 }
 0x141   : > { %v10596_v10 = vpop.eup %10595  ;;  %v1471_v19 = vxor.u32 2147483648, %v10594_v43  ;;  %v1547_v11 = vsub.s32 32, %v1546_v16  ;;  %v1548_v54 = vshll.u32 %v11894_v4, %v1546_v16  ;;  %v1551_v34 = vsub.s32 4294967266, %v1546_v16 }
 0x142   : > { %v1468_v39 = vxor.u32 2147483648, %v10596_v10  ;;  %vm1636_vm8 = vc.u32 %v11941_v7, %v11944_v3  ;;  %v1637_v47 = vadd.s32 1, %v11945_v2  ;;  %v1687_v41 = vshrl.u32 %v1686_v14, 23 }
 0x143   : > { %v3438_v26 = vsel %vm3436_vm3, %v1471_v19, %v10596_v10  ;;  %v1472_v6 = vsel %vm1470_vm7, %v1471_v19, %v10596_v10  ;;  %v1549_v25 = vshrl.u32 %v1531_v56, %v1547_v11  ;;  %v1552_v23 = vadd.s32 127, %v1551_v34 }
 0x144   : > { %v3435_v28 = vsel %vm3433_vm1, %v10594_v43, %v1468_v39  ;;  %v1469_v4 = vsel %vm1467_vm5, %v10594_v43, %v1468_v39  ;;  %v1638_v13 = vsel %vm1636_vm8, %v1637_v47, %v11945_v2  ;;  %v8776_v15 = vadd.s32 4294967169, %v1687_v41 }
 0x145   : > { %v3439_v29 = vsel %vm3432_vm15, %v3435_v28, %v3438_v26  ;;  %v1473_v62 = vsel %vm1466_vm4, %v1469_v4, %v1472_v6  ;;  %v1550_v31 = vor.u32 %v1549_v25, %v1548_v54  ;;  %v1553_v5 = vshll.u32 %v1552_v23, 23 }
 0x146   : > { %v3440_v59 = vsel %vm1463_vm0, nan, %v3439_v29  ;;  %v1474_v36 = vsel %vm1463_vm0, nan, %v1473_v62  ;;  %v1639_v49 = vadd.s32 %v1638_v13, %v1634_v18  ;;  %vm11978_vm10 = vcmp.le.f32.partialorder %v1475_v38, 0.7853982 }
 0x147   : > { %8891 = vmatmul.mubr.msk.f32.gmra.mxu0 %vm4376_vm2, %v3440_v59  ;;  %8912 = vmatmul.mubr.msk.f32.gmra.mxu1 %vm4376_vm2, %v1474_v36  ;;  %v1554_v21 = vor.u32 4788187, %v1553_v5  ;;  %v1557_v0 = vcvt.s32.f32 %v1550_v31  ;;  %v1683_v45 = vand.u32 2147483647, %v11930_v32  ;;  %v1564_v27 = vsel %vm11978_vm10, 0, %v1562_v58 }
 0x148   : > { %4565 = vmatprep.mubr.f32.mxu0 %v14557_v8  ;;  %4807 = vmatprep.mubr.f32.mxu1 %v14557_v8  ;;  %v1640_v40 = vadd.s32 536870912, %v1639_v49  ;;  %v1693_v33 = vadd.s32 1, %v8776_v15  ;;  %v11988_v1 = vmul.f32 %v11927_v9, %v403_v37  ;;  %v1568_v35 = vadd.s32 3, %v1564_v27 }
 0x149   : > { %v1555_v38 = vand.u32 2147483647, %v1554_v21  ;;  %v1690_v42 = vand.u32 8388607, %v1683_v45  ;;  %v12000_v43 = vmul.f32 %v11927_v9, %v404_v22  ;;  %v12004_v58 = vand.u32 3, %v1564_v27 }
 0x14a   : > { %v11990_v17 = vshrl.u32 %v1640_v40, 30  ;;  %vm1694_vm9 = vcmp.gt.s32.totalorder %v1693_v33, 0  ;;  %v1790_v63 = vand.u32 2139095040, %v11988_v1  ;;  %v12006_v14 = vand.u32 3, %v1568_v35 }
 0x14b   : > { %v1558_v30 = vmul.f32 %v1557_v0, %v1555_v38  ;;  %v1695_v57 = vsel %vm1694_vm9, %v1693_v33, 0  ;;  %v1691_v10 = vor.u32 8388608, %v1690_v42  ;;  %v1787_v25 = vand.u32 2147483647, %v11988_v1 }
 0x14c   : > { %v1642_v12 = vshll.u32 %v11990_v17, 30  ;;  %v1697_v55 = vand.u32 31, %v1695_v57  ;;  %v1791_v34 = vshrl.u32 %v1790_v63, 23  ;;  %v1635_v23 = vadd.s32 %v11944_v3, %v11941_v7 }
 0x14d   : > { %v1559_v2 = vxor.u32 2147483648, %v1558_v30  ;;  %v1696_v28 = vshrl.u32 %v1695_v57, 5  ;;  %v12022_v13 = vshll.u32 %v1691_v10, 8  ;;  %vm3539_vm11 = vcmp.eq.s32.totalorder %v12004_v58, 2 }
 0x14e   : > { %v11997_v56 = vsub.s32 %v1639_v49, %v1642_v12  ;;  %v1698_v53 = vsub.s32 32, %v1697_v55  ;;  %v1700_v54 = vshll.u32 %v10647_v44, %v1697_v55  ;;  %v1703_v18 = vshll.u32 %v10648_v46, %v1697_v55 }
 0x14f   : > { %v1560_v16 = vsel %vm1477_vm12, %v1559_v2, %v1558_v30  ;;  %v1706_v6 = vshll.u32 %v10649_v48, %v1697_v55  ;;  %v1709_v62 = vshll.u32 %v10650_v50, %v1697_v55  ;;  %v1712_v59 = vshll.u32 %v10651_v52, %v1697_v55 }
 0x150   : > { %v1563_v19 = vsel %vm11978_vm10, %v11658_v20, %v1560_v16  ;;  %v1645_v11 = vsub.s32 0, %v11997_v56  ;;  %v1701_v39 = vshrl.u32 %v10648_v46, %v1698_v53  ;;  %v1704_v47 = vshrl.u32 %v10649_v48, %v1698_v53 }
 0x151   : > { %10597 = vcosq.f32 %v1563_v19  ;;  %v1699_v4 = vshrl.u32 %v10647_v44, %v1698_v53  ;;  %v1707_v29 = vshrl.u32 %v10650_v50, %v1698_v53  ;;  %v1710_v31 = vshrl.u32 %v10651_v52, %v1698_v53 }
 0x152   : > { %10599 = vsinq.f32 %v1563_v19  ;;  %v8773_v26 = vmin.u32 %v1645_v11, %v11997_v56  ;;  %v1702_v5 = vor.u32 %v1701_v39, %v1700_v54  ;;  %v1705_v37 = vor.u32 %v1704_v47, %v1703_v18 }
 0x153   : > { %v8780_v36 = vadd.s32 4294967169, %v1791_v34  ;;  %vm1574_vm12 = vcmp.eq.s32.totalorder %v12006_v14, 2  ;;  %v1708_v3 = vor.u32 %v1707_v29, %v1706_v6  ;;  %v1711_v49 = vor.u32 %v1710_v31, %v1709_v62 }
 0x154   : > { %v1647_v41 = vclz %v8773_v26  ;;  %v1713_v15 = vshrl.u32 %v10652_v60, %v1698_v53  ;;  %vm3536_vm13 = vcmp.eq.s32.totalorder %v12004_v58, 0  ;;  %vm1571_vm14 = vcmp.eq.s32.totalorder %v12006_v14, 0 }
 0x155   : > { %vm1715_vm15 = vcmp.lt.s32.totalorder %v1696_v28, 1  ;;  %vm1716_vm0 = vcmp.lt.s32.totalorder %v1696_v28, 2  ;;  %vm1717_vm1 = vcmp.lt.s32.totalorder %v1696_v28, 3  ;;  %vm1718_vm3 = vcmp.lt.s32.totalorder %v1696_v28, 4 }
 0x156   : > { %v8774_v7 = vadd.s32 4294967294, %v1647_v41  ;;  %vm3535_vm4 = vcmp.lt.s32.totalorder %v12004_v58, 2  ;;  %vm1570_vm5 = vcmp.lt.s32.totalorder %v12006_v14, 2  ;;  %v1714_v51 = vor.u32 %v1713_v15, %v1712_v59 }
 0x157   : > { %v1719_v21 = vsel %vm1715_vm15, %v1699_v4, %v1702_v5  ;;  %v1720_v0 = vsel %vm1718_vm3, %v1708_v3, 2102212464  ;;  %vm1567_vm7 = vweird.f32 %v11658_v20  ;;  %vm1581_vm8 = vcmp.lt.s32.totalorder %v11775_v24, 0 }
 0x158   : > { %vm8775_vm6 = vcmp.lt.s32.totalorder %v8774_v7, 0  ;;  %v1721_v40 = vsel %vm1717_vm1, %v1705_v37, %v1720_v0  ;;  %v1723_v33 = vsel %vm1715_vm15, %v1702_v5, %v1705_v37  ;;  %v1724_v38 = vsel %vm1718_vm3, %v1711_v49, 920167782 }
 0x159   : > { %v1650_v27 = vsel %vm8775_vm6, 0, %v8774_v7  ;;  %v1665_v57 = vsub.s32 4, %v11990_v17  ;;  %v1722_v22 = vsel %vm1716_vm0, %v1719_v21, %v1721_v40  ;;  %v1725_v12 = vsel %vm1717_vm1, %v1708_v3, %v1724_v38 }
 0x15a   : > { %v1651_v30 = vsub.s32 32, %v1650_v27  ;;  %v1652_v35 = vshll.u32 %v11997_v56, %v1650_v27  ;;  %v1655_v42 = vsub.s32 4294967266, %v1650_v27  ;;  %v1727_v55 = vsel %vm1715_vm15, %v1705_v37, %v1708_v3 }
 0x15b   : > { %v1728_v63 = vsel %vm1718_vm3, %v1714_v51, 1326507024  ;;  %v1726_v16 = vsel %vm1716_vm0, %v1723_v33, %v1725_v12  ;;  %v1797_v54 = vadd.s32 1, %v8780_v36  ;;  %vm12058_vm10 = vcmp.le.f32.partialorder %v1579_v61, 0.7853982 }
 0x15c   : > { %v1653_v2 = vshrl.u32 %v1635_v23, %v1651_v30  ;;  %v1656_v53 = vadd.s32 127, %v1655_v42  ;;  %v1729_v10 = vsel %vm1717_vm1, %v1711_v49, %v1728_v63  ;;  %v12068_v4 = vand.u32 8388607, %v1787_v25 }
 0x15d   : > { %v1730_v19 = vsel %vm1716_vm0, %v1727_v55, %v1729_v10  ;;  %v12052_v56 = vmul.u32.u64.low %v12022_v13, %v1726_v16  ;;  %v12053_v11 = vmul.u32.u64.high %v12022_v13, %v1726_v16, %v12052_v56  ;;  %vm1798_vm9 = vcmp.gt.s32.totalorder %v1797_v54, 0 }
 0x15e   : > { %v10598_v34 = vpop.eup %10597  ;;  %v1654_v18 = vor.u32 %v1653_v2, %v1652_v35  ;;  %v1657_v47 = vshll.u32 %v1656_v53, 23  ;;  %v12063_v26 = vmul.u32.u64.low %v12022_v13, %v1730_v19  ;;  %v12064_v6 = vmul.u32.u64.high %v12022_v13, %v1730_v19, %v12063_v26 }
 0x15f   : > { %v10600_v23 = vpop.eup %10599  ;;  %v1575_v28 = vxor.u32 2147483648, %v10598_v34  ;;  %v1894_v41 = vand.u32 2139095040, %v12000_v43  ;;  %v1799_v31 = vsel %vm1798_vm9, %v1797_v54, 0  ;;  %v1738_v59 = vmul.u32 %v12022_v13, %v1722_v22 }
 0x160   : > { %v1572_v29 = vxor.u32 2147483648, %v10600_v23  ;;  %v1658_v61 = vor.u32 4788187, %v1657_v47  ;;  %v1661_v62 = vcvt.s32.f32 %v1654_v18  ;;  %v1741_v36 = vadd.s32 1, %v12053_v11 }
 0x161   : > { %v3541_v5 = vsel %vm3539_vm11, %v1575_v28, %v10600_v23  ;;  %v1576_v37 = vsel %vm1574_vm12, %v1575_v28, %v10600_v23  ;;  %v1666_v15 = vsel %vm1581_vm8, %v1665_v57, %v11990_v17  ;;  %vm1740_vm11 = vc.u32 %v12064_v6, %v12052_v56 }
 0x162   : > { %v3538_v7 = vsel %vm3536_vm13, %v10598_v34, %v1572_v29  ;;  %v1573_v3 = vsel %vm1571_vm14, %v10598_v34, %v1572_v29  ;;  %v1659_v49 = vand.u32 2147483647, %v1658_v61  ;;  %v1801_v13 = vand.u32 31, %v1799_v31 }
 0x163   : > { %v3542_v51 = vsel %vm3535_vm4, %v3538_v7, %v3541_v5  ;;  %v1577_v21 = vsel %vm1570_vm5, %v1573_v3, %v1576_v37  ;;  %v1742_v33 = vsel %vm1740_vm11, %v1741_v36, %v12053_v11  ;;  %v12097_v58 = vshrl.u32 %v1799_v31, 5 }
 0x164   : > { %v3543_v0 = vsel %vm1567_vm7, nan, %v3542_v51  ;;  %v1578_v27 = vsel %vm1567_vm7, nan, %v1577_v21  ;;  %v1662_v40 = vmul.f32 %v1661_v62, %v1659_v49  ;;  %v1743_v17 = vadd.s32 %v1742_v33, %v1738_v59 }
 0x165   : > { %8892 = vmatmul.mubr.msk.f32.gmra.mxu0 %vm4376_vm2, %v3543_v0  ;;  %8913 = vmatmul.mubr.msk.f32.gmra.mxu1 %vm4376_vm2, %v1578_v27  ;;  %v1802_v14 = vsub.s32 32, %v1801_v13  ;;  %v1804_v38 = vshll.u32 %v10647_v44, %v1801_v13  ;;  %v1807_v20 = vshll.u32 %v10648_v46, %v1801_v13  ;;  %v1810_v35 = vshll.u32 %v10649_v48, %v1801_v13 }
 0x166   : > { %4571 = vmatprep.mubr.f32.mxu0 %v14557_v8  ;;  %4813 = vmatprep.mubr.f32.mxu1 %v14557_v8  ;;  %v1663_v30 = vxor.u32 2147483648, %v1662_v40  ;;  %v1813_v42 = vshll.u32 %v10650_v50, %v1801_v13  ;;  %v1744_v57 = vadd.s32 536870912, %v1743_v17  ;;  %v1816_v55 = vshll.u32 %v10651_v52, %v1801_v13 }
 0x167   : > { %v1805_v22 = vshrl.u32 %v10648_v46, %v1802_v14  ;;  %v1808_v12 = vshrl.u32 %v10649_v48, %v1802_v14  ;;  %v1811_v2 = vshrl.u32 %v10650_v50, %v1802_v14  ;;  %v1814_v53 = vshrl.u32 %v10651_v52, %v1802_v14 }
 0x168   : > { %v1664_v63 = vsel %vm1581_vm8, %v1663_v30, %v1662_v40  ;;  %v1817_v16 = vshrl.u32 %v10652_v60, %v1802_v14  ;;  %v12116_v19 = vshrl.u32 %v1744_v57, 30  ;;  %v1795_v11 = vor.u32 8388608, %v12068_v4 }
 0x169   : > { %v1667_v10 = vsel %vm12058_vm10, %v11775_v24, %v1664_v63  ;;  %v1668_v54 = vsel %vm12058_vm10, 0, %v1666_v15  ;;  %v1815_v34 = vor.u32 %v1814_v53, %v1813_v42  ;;  %v1895_v18 = vshrl.u32 %v1894_v41, 23 }
 0x16a   : > { %10601 = vcosq.f32 %v1667_v10  ;;  %v1746_v47 = vshll.u32 %v12116_v19, 30  ;;  %v1806_v26 = vor.u32 %v1805_v22, %v1804_v38  ;;  %v1809_v23 = vor.u32 %v1808_v12, %v1807_v20 }
 0x16b   : > { %10603 = vsinq.f32 %v1667_v10  ;;  %v1812_v28 = vor.u32 %v1811_v2, %v1810_v35  ;;  %v1818_v29 = vor.u32 %v1817_v16, %v1816_v55  ;;  %vm1819_vm12 = vcmp.lt.s32.totalorder %v12097_v58, 1 }
 0x16c   : > { %vm1822_vm13 = vcmp.lt.s32.totalorder %v12097_v58, 4  ;;  %v1672_v61 = vadd.s32 3, %v1668_v54  ;;  %v12124_v62 = vsub.s32 %v1743_v17, %v1746_v47  ;;  %vm1821_vm14 = vcmp.lt.s32.totalorder %v12097_v58, 3 }
 0x16d   : > { %v3637_v39 = vand.u32 3, %v1668_v54  ;;  %v1828_v4 = vsel %vm1822_vm13, %v1815_v34, 920167782  ;;  %v12129_v41 = vshll.u32 %v1795_v11, 8  ;;  %v1803_v5 = vshrl.u32 %v10647_v44, %v1802_v14 }
 0x16e   : > { %v1749_v31 = vsub.s32 0, %v12124_v62  ;;  %vm1820_vm15 = vcmp.lt.s32.totalorder %v12097_v58, 2  ;;  %v1827_v37 = vsel %vm1819_vm12, %v1806_v26, %v1809_v23  ;;  %v1829_v59 = vsel %vm1821_vm14, %v1812_v28, %v1828_v4 }
 0x16f   : > { %v1831_v36 = vsel %vm1819_vm12, %v1809_v23, %v1812_v28  ;;  %v1832_v7 = vsel %vm1822_vm13, %v1818_v29, 1326507024  ;;  %v8784_v3 = vadd.s32 4294967169, %v1895_v18  ;;  %v1673_v49 = vand.u32 3, %v1672_v61 }
 0x170   : > { %v8777_v15 = vmin.u32 %v1749_v31, %v12124_v62  ;;  %v1824_v51 = vsel %vm1822_vm13, %v1812_v28, 2102212464  ;;  %v1891_v21 = vand.u32 2147483647, %v12000_v43  ;;  %vm1671_vm0 = vweird.f32 %v11775_v24 }
 0x171   : > { %vm3638_vm1 = vcmp.lt.s32.totalorder %v3637_v39, 2  ;;  %vm3639_vm3 = vcmp.eq.s32.totalorder %v3637_v39, 0  ;;  %v1830_v13 = vsel %vm1820_vm15, %v1827_v37, %v1829_v59  ;;  %v1833_v0 = vsel %vm1821_vm14, %v1815_v34, %v1832_v7 }
 0x172   : > { %v1751_v27 = vclz %v8777_v15  ;;  %v1834_v40 = vsel %vm1820_vm15, %v1831_v36, %v1833_v0  ;;  %v12154_v33 = vmul.u32.u64.low %v12129_v41, %v1830_v13  ;;  %v12155_v17 = vmul.u32.u64.high %v12129_v41, %v1830_v13, %v12154_v33 }
 0x173   : > { %vm3642_vm4 = vcmp.eq.s32.totalorder %v3637_v39, 2  ;;  %v1823_v14 = vsel %vm1819_vm12, %v1803_v5, %v1806_v26  ;;  %v1825_v38 = vsel %vm1821_vm14, %v1809_v23, %v1824_v51  ;;  %v1901_v30 = vadd.s32 1, %v8784_v3 }
 0x174   : > { %vm1674_vm5 = vcmp.lt.s32.totalorder %v1673_v49, 2  ;;  %vm1685_vm6 = vcmp.lt.s32.totalorder %v11930_v32, 0  ;;  %v8778_v20 = vadd.s32 4294967294, %v1751_v27  ;;  %vm1675_vm7 = vcmp.eq.s32.totalorder %v1673_v49, 0 }
 0x175   : > { %v12164_v35 = vmul.u32.u64.low %v12129_v41, %v1834_v40  ;;  %v12165_v42 = vmul.u32.u64.high %v12129_v41, %v1834_v40, %v12164_v35  ;;  %vm1678_vm8 = vcmp.eq.s32.totalorder %v1673_v49, 2  ;;  %v1739_v57 = vadd.s32 %v12052_v56, %v12064_v6 }
 0x176   : > { %vm1902_vm10 = vcmp.gt.s32.totalorder %v1901_v30, 0  ;;  %vm8779_vm9 = vcmp.lt.s32.totalorder %v8778_v20, 0  ;;  %v1769_v12 = vsub.s32 4, %v12116_v19  ;;  %v1826_v55 = vsel %vm1820_vm15, %v1823_v14, %v1825_v38 }
 0x177   : > { %v10602_v22 = vpop.eup %10601  ;;  %v1903_v63 = vsel %vm1902_vm10, %v1901_v30, 0  ;;  %v1754_v16 = vsel %vm8779_vm9, 0, %v8778_v20  ;;  %v1845_v10 = vadd.s32 1, %v12155_v17  ;;  %vm12175_vm11 = vcmp.le.f32.partialorder %v1683_v45, 0.7853982 }
 0x178   : > { %v10604_v2 = vpop.eup %10603  ;;  %v1679_v53 = vxor.u32 2147483648, %v10602_v22  ;;  %v1905_v11 = vand.u32 31, %v1903_v63  ;;  %v1755_v6 = vsub.s32 32, %v1754_v16  ;;  %v1756_v34 = vshll.u32 %v12124_v62, %v1754_v16 }
 0x179   : > { %v1676_v54 = vxor.u32 2147483648, %v10604_v2  ;;  %v1759_v18 = vsub.s32 4294967266, %v1754_v16  ;;  %v1842_v26 = vmul.u32 %v12129_v41, %v1826_v55  ;;  %vm1844_vm12 = vc.u32 %v12165_v42, %v12154_v33 }
 0x17a   : > { %v3644_v58 = vsel %vm3642_vm4, %v1679_v53, %v10604_v2  ;;  %v1680_v47 = vsel %vm1678_vm8, %v1679_v53, %v10604_v2  ;;  %v1757_v28 = vshrl.u32 %v1739_v57, %v1755_v6  ;;  %v1846_v4 = vsel %vm1844_vm12, %v1845_v10, %v12155_v17 }
 0x17b   : > { %v3641_v23 = vsel %vm3639_vm3, %v10602_v22, %v1676_v54  ;;  %v1677_v45 = vsel %vm1675_vm7, %v10602_v22, %v1676_v54  ;;  %v1760_v29 = vadd.s32 127, %v1759_v18  ;;  %v1906_v31 = vsub.s32 32, %v1905_v11 }
 0x17c   : > { %v3645_v61 = vsel %vm3638_vm1, %v3641_v23, %v3644_v58  ;;  %v1681_v62 = vsel %vm1674_vm5, %v1677_v45, %v1680_v47  ;;  %v1758_v37 = vor.u32 %v1757_v28, %v1756_v34  ;;  %v1770_v39 = vsel %vm1685_vm6, %v1769_v12, %v12116_v19  ;;  %v405_v23 = vld [vmem:[%s10766_s23 + $0x78] sm:$0xff] }
 0x17d   : > { %v3646_v5 = vsel %vm1671_vm0, nan, %v3645_v61  ;;  %v1682_v41 = vsel %vm1671_vm0, nan, %v1681_v62  ;;  %v1761_v59 = vshll.u32 %v1760_v29, 23  ;;  %v1847_v36 = vadd.s32 %v1846_v4, %v1842_v26 }
 0x17e   : > { %8893 = vmatmul.mubr.msk.f32.gmra.mxu0 %vm4376_vm2, %v3646_v5  ;;  %8914 = vmatmul.mubr.msk.f32.gmra.mxu1 %vm4376_vm2, %v1682_v41  ;;  %v1898_v7 = vand.u32 8388607, %v1891_v21  ;;  %v1904_v3 = vshrl.u32 %v1903_v63, 5  ;;  %v1765_v49 = vcvt.s32.f32 %v1758_v37  ;;  %v1908_v15 = vshll.u32 %v10647_v44, %v1905_v11 }
 0x17f   : > { %4577 = vmatprep.mubr.f32.mxu0 %v14557_v8  ;;  %4819 = vmatprep.mubr.f32.mxu1 %v14557_v8  ;;  %v1762_v24 = vor.u32 4788187, %v1761_v59  ;;  %v1909_v51 = vshrl.u32 %v10648_v46, %v1906_v31  ;;  %v1848_v13 = vadd.s32 536870912, %v1847_v36  ;;  %v1911_v0 = vshll.u32 %v10648_v46, %v1905_v11 }
 0x180   : > { %v1912_v19 = vshrl.u32 %v10649_v48, %v1906_v31  ;;  %v1914_v27 = vshll.u32 %v10649_v48, %v1905_v11  ;;  %v1915_v17 = vshrl.u32 %v10650_v50, %v1906_v31  ;;  %v1917_v14 = vshll.u32 %v10650_v50, %v1905_v11 }
 0x181   : > { %v1763_v40 = vand.u32 2147483647, %v1762_v24  ;;  %v1918_v38 = vshrl.u32 %v10651_v52, %v1906_v31  ;;  %v1772_v30 = vsel %vm12175_vm11, 0, %v1770_v39  ;;  %v1849_v20 = vshrl.u32 %v1848_v13, 30 }
 0x182   : > { %v1899_v35 = vor.u32 8388608, %v1898_v7  ;;  %v1920_v57 = vshll.u32 %v10651_v52, %v1905_v11  ;;  %v12214_v12 = vand.u32 3, %v1772_v30  ;;  %v1921_v63 = vshrl.u32 %v10652_v60, %v1906_v31 }
 0x183   : > { %v1766_v22 = vmul.f32 %v1765_v49, %v1763_v40  ;;  %v1919_v55 = vor.u32 %v1918_v38, %v1917_v14  ;;  %v1850_v2 = vshll.u32 %v1849_v20, 30  ;;  %v1910_v53 = vor.u32 %v1909_v51, %v1908_v15 }
 0x184   : > { %v1913_v16 = vor.u32 %v1912_v19, %v1911_v0  ;;  %vm1926_vm13 = vcmp.lt.s32.totalorder %v1904_v3, 4  ;;  %v1916_v54 = vor.u32 %v1915_v17, %v1914_v27  ;;  %v1922_v6 = vor.u32 %v1921_v63, %v1920_v57 }
 0x185   : > { %v1767_v10 = vxor.u32 2147483648, %v1766_v22  ;;  %vm1923_vm14 = vcmp.lt.s32.totalorder %v1904_v3, 1  ;;  %v1776_v34 = vadd.s32 3, %v1772_v30  ;;  %v12217_v18 = vsub.s32 %v1847_v36, %v1850_v2 }
 0x186   : > { %vm1925_vm15 = vcmp.lt.s32.totalorder %v1904_v3, 3  ;;  %v1939_v11 = vshll.u32 %v1899_v35, 8  ;;  %v1907_v47 = vshrl.u32 %v10647_v44, %v1906_v31  ;;  %vm1924_vm0 = vcmp.lt.s32.totalorder %v1904_v3, 2 }
 0x187   : > { %v1768_v58 = vsel %vm1685_vm6, %v1767_v10, %v1766_v22  ;;  %v1932_v26 = vsel %vm1926_vm13, %v1919_v55, 920167782  ;;  %v1853_v28 = vsub.s32 0, %v12217_v18  ;;  %v1928_v29 = vsel %vm1926_vm13, %v1916_v54, 2102212464 }
 0x188   : > { %v1771_v45 = vsel %vm12175_vm11, %v11930_v32, %v1768_v58  ;;  %v1931_v61 = vsel %vm1923_vm14, %v1910_v53, %v1913_v16  ;;  %v1933_v62 = vsel %vm1925_vm15, %v1916_v54, %v1932_v26  ;;  %v1935_v4 = vsel %vm1923_vm14, %v1913_v16, %v1916_v54 }
 0x189   : > { %10605 = vcosq.f32 %v1771_v45  ;;  %v1936_v31 = vsel %vm1926_vm13, %v1922_v6, 1326507024  ;;  %v8781_v5 = vmin.u32 %v1853_v28, %v12217_v18  ;;  %v1873_v41 = vsub.s32 4, %v1849_v20 }
 0x18a   : > { %10607 = vsinq.f32 %v1771_v45  ;;  %v12235_v56 = vmul.f32 %v11927_v9, %v405_v23  ;;  %v1927_v37 = vsel %vm1923_vm14, %v1907_v47, %v1910_v53  ;;  %v1929_v59 = vsel %vm1925_vm15, %v1913_v16, %v1928_v29 }
 0x18b   : > { %v1934_v39 = vsel %vm1924_vm0, %v1931_v61, %v1933_v62  ;;  %v1937_v36 = vsel %vm1925_vm15, %v1919_v55, %v1936_v31  ;;  %v1855_v7 = vclz %v8781_v5  ;;  %v1930_v13 = vsel %vm1924_vm0, %v1927_v37, %v1929_v59 }
 0x18c   : > { %v1938_v24 = vsel %vm1924_vm0, %v1935_v4, %v1937_v36  ;;  %v12242_v49 = vmul.u32.u64.low %v1939_v11, %v1934_v39  ;;  %v12243_v15 = vmul.u32.u64.high %v1939_v11, %v1934_v39, %v12242_v49  ;;  %v1777_v27 = vand.u32 3, %v1776_v34 }
 0x18d   : > { %v8782_v51 = vadd.s32 4294967294, %v1855_v7  ;;  %v12247_v0 = vmul.u32.u64.low %v1939_v11, %v1938_v24  ;;  %v12248_v19 = vmul.u32.u64.high %v1939_v11, %v1938_v24, %v12247_v0  ;;  %vm12252_vm1 = vcmp.le.f32.partialorder %v1787_v25, 0.7853982 }
 0x18e   : > { %vm1789_vm3 = vcmp.lt.s32.totalorder %v11988_v1, 0  ;;  %v1998_v17 = vand.u32 2139095040, %v12235_v56  ;;  %vm3741_vm4 = vcmp.lt.s32.totalorder %v12214_v12, 2  ;;  %v1843_v3 = vadd.s32 %v12154_v33, %v12165_v42  ;;  %v406_v33 = vld [vmem:[%s10766_s23 + $0x80] sm:$0xff] }
 0x18f   : > { %vm8783_vm5 = vcmp.lt.s32.totalorder %v8782_v51, 0  ;;  %v1874_v14 = vsel %vm1789_vm3, %v1873_v41, %v1849_v20  ;;  %v1949_v38 = vadd.s32 1, %v12243_v15  ;;  %vm1775_vm6 = vweird.f32 %v11930_v32 }
 0x190   : > { %vm3742_vm7 = vcmp.eq.s32.totalorder %v12214_v12, 0  ;;  %v1858_v25 = vsel %vm8783_vm5, 0, %v8782_v51  ;;  %v1946_v30 = vmul.u32 %v1939_v11, %v1930_v13  ;;  %v1999_v35 = vshrl.u32 %v1998_v17, 23 }
 0x191   : > { %vm3745_vm8 = vcmp.eq.s32.totalorder %v12214_v12, 2  ;;  %v1859_v57 = vsub.s32 32, %v1858_v25  ;;  %v1860_v22 = vshll.u32 %v12217_v18, %v1858_v25  ;;  %v1863_v55 = vsub.s32 4294967266, %v1858_v25 }
 0x192   : > { %v1876_v42 = vsel %vm12252_vm1, 0, %v1874_v14  ;;  %vm1948_vm10 = vc.u32 %v12248_v19, %v12242_v49  ;;  %v1995_v20 = vand.u32 2147483647, %v12235_v56  ;;  %v8788_v63 = vadd.s32 4294967169, %v1999_v35 }
 0x193   : > { %vm1778_vm9 = vcmp.lt.s32.totalorder %v1777_v27, 2  ;;  %v1861_v2 = vshrl.u32 %v1843_v3, %v1859_v57  ;;  %v1864_v53 = vadd.s32 127, %v1863_v55  ;;  %v1950_v16 = vsel %vm1948_vm10, %v1949_v38, %v12243_v15 }
 0x194   : > { %vm1779_vm11 = vcmp.eq.s32.totalorder %v1777_v27, 0  ;;  %v1951_v10 = vadd.s32 %v1950_v16, %v1946_v30  ;;  %v2005_v54 = vadd.s32 1, %v8788_v63  ;;  %v12276_v6 = vmul.f32 %v11927_v9, %v406_v33 }
 0x195   : > { %vm1782_vm12 = vcmp.eq.s32.totalorder %v1777_v27, 2  ;;  %v1862_v18 = vor.u32 %v1861_v2, %v1860_v22  ;;  %v1865_v11 = vshll.u32 %v1864_v53, 23  ;;  %v1880_v58 = vadd.s32 3, %v1876_v42 }
 0x196   : > { %v10606_v34 = vpop.eup %10605  ;;  %v1952_v23 = vadd.s32 536870912, %v1951_v10  ;;  %v2002_v45 = vand.u32 8388607, %v1995_v20  ;;  %vm2006_vm13 = vcmp.gt.s32.totalorder %v2005_v54, 0  ;;  %v2102_v5 = vand.u32 2139095040, %v12276_v6 }
 0x197   : > { %v10608_v47 = vpop.eup %10607  ;;  %v1783_v26 = vxor.u32 2147483648, %v10606_v34  ;;  %v1866_v29 = vor.u32 4788187, %v1865_v11  ;;  %v1869_v61 = vcvt.s32.f32 %v1862_v18  ;;  %v2007_v62 = vsel %vm2006_vm13, %v2005_v54, 0 }
 0x198   : > { %v1780_v28 = vxor.u32 2147483648, %v10608_v47  ;;  %v12282_v31 = vshrl.u32 %v1952_v23, 30  ;;  %v2009_v39 = vand.u32 31, %v2007_v62  ;;  %v12298_v17 = vand.u32 3, %v1876_v42 }
 0x199   : > { %v3747_v9 = vsel %vm3745_vm8, %v1783_v26, %v10608_v47  ;;  %v1784_v4 = vsel %vm1782_vm12, %v1783_v26, %v10608_v47  ;;  %v1867_v59 = vand.u32 2147483647, %v1866_v29  ;;  %v12304_v3 = vand.u32 3, %v1880_v58 }
 0x19a   : > { %v3744_v41 = vsel %vm3742_vm7, %v10606_v34, %v1780_v28  ;;  %v1781_v37 = vsel %vm1779_vm11, %v10606_v34, %v1780_v28  ;;  %v1954_v24 = vshll.u32 %v12282_v31, 30  ;;  %v2010_v0 = vsub.s32 32, %v2009_v39 }
 0x19b   : > { %v3748_v36 = vsel %vm3741_vm4, %v3744_v41, %v3747_v9  ;;  %v1785_v7 = vsel %vm1778_vm9, %v1781_v37, %v1784_v4  ;;  %v1870_v13 = vmul.f32 %v1869_v61, %v1867_v59  ;;  %v2003_v14 = vor.u32 8388608, %v2002_v45 }
 0x19c   : > { %v3749_v15 = vsel %vm1775_vm6, nan, %v3748_v36  ;;  %v1786_v51 = vsel %vm1775_vm6, nan, %v1785_v7  ;;  %v12300_v12 = vsub.s32 %v1951_v10, %v1954_v24  ;;  %v2103_v32 = vshrl.u32 %v2102_v5, 23 }
 0x19d   : > { %8894 = vmatmul.mubr.msk.f32.gmra.mxu0 %vm4376_vm2, %v3749_v15  ;;  %8915 = vmatmul.mubr.msk.f32.gmra.mxu1 %vm4376_vm2, %v1786_v51  ;;  %v1871_v27 = vxor.u32 2147483648, %v1870_v13  ;;  %v2008_v25 = vshrl.u32 %v2007_v62, 5  ;;  %v2012_v30 = vshll.u32 %v10647_v44, %v2009_v39  ;;  %v2099_v35 = vand.u32 2147483647, %v12276_v6 }
 0x19e   : > { %4583 = vmatprep.mubr.f32.mxu0 %v14557_v8  ;;  %4825 = vmatprep.mubr.f32.mxu1 %v14557_v8  ;;  %v1957_v38 = vsub.s32 0, %v12300_v12  ;;  %v2013_v22 = vshrl.u32 %v10648_v46, %v2010_v0  ;;  %v2015_v55 = vshll.u32 %v10648_v46, %v2009_v39  ;;  %v2016_v33 = vshrl.u32 %v10649_v48, %v2010_v0 }
 0x19f   : > { %v1872_v57 = vsel %vm1789_vm3, %v1871_v27, %v1870_v13  ;;  %v1947_v63 = vadd.s32 %v12242_v49, %v12248_v19  ;;  %v2018_v53 = vshll.u32 %v10649_v48, %v2009_v39  ;;  %v2011_v16 = vshrl.u32 %v10647_v44, %v2010_v0 }
 0x1a0   : > { %v1875_v42 = vsel %vm12252_vm1, %v11988_v1, %v1872_v57  ;;  %v8785_v2 = vmin.u32 %v1957_v38, %v12300_v12  ;;  %v12322_v10 = vshll.u32 %v2003_v14, 8  ;;  %v8792_v54 = vadd.s32 4294967169, %v2103_v32 }
 0x1a1   : > { %10609 = vcosq.f32 %v1875_v42  ;;  %v2019_v18 = vshrl.u32 %v10650_v50, %v2010_v0  ;;  %v2021_v40 = vshll.u32 %v10650_v50, %v2009_v39  ;;  %v2014_v11 = vor.u32 %v2013_v22, %v2012_v30 }
 0x1a2   : > { %10611 = vsinq.f32 %v1875_v42  ;;  %v1959_v34 = vclz %v8785_v2  ;;  %v2017_v58 = vor.u32 %v2016_v33, %v2015_v55  ;;  %v2022_v49 = vshrl.u32 %v10651_v52, %v2010_v0 }
 0x1a3   : > { %vm2027_vm14 = vcmp.lt.s32.totalorder %v2008_v25, 1  ;;  %v2020_v47 = vor.u32 %v2019_v18, %v2018_v53  ;;  %v2024_v26 = vshll.u32 %v10651_v52, %v2009_v39  ;;  %v2025_v23 = vshrl.u32 %v10652_v60, %v2010_v0 }
 0x1a4   : > { %v8786_v19 = vadd.s32 4294967294, %v1959_v34  ;;  %v2023_v45 = vor.u32 %v2022_v49, %v2021_v40  ;;  %vm2028_vm15 = vcmp.lt.s32.totalorder %v2008_v25, 2  ;;  %vm2029_vm0 = vcmp.lt.s32.totalorder %v2008_v25, 3 }
 0x1a5   : > { %vm2030_vm1 = vcmp.lt.s32.totalorder %v2008_v25, 4  ;;  %vm3848_vm3 = vcmp.eq.s32.totalorder %v12298_v17, 2  ;;  %v2026_v28 = vor.u32 %v2025_v23, %v2024_v26  ;;  %v2031_v29 = vsel %vm2027_vm14, %v2011_v16, %v2014_v11 }
 0x1a6   : > { %vm8787_vm4 = vcmp.lt.s32.totalorder %v8786_v19, 0  ;;  %v2032_v61 = vsel %vm2030_vm1, %v2020_v47, 2102212464  ;;  %vm3845_vm5 = vcmp.eq.s32.totalorder %v12298_v17, 0  ;;  %vm1893_vm6 = vcmp.lt.s32.totalorder %v12000_v43, 0 }
 0x1a7   : > { %v1962_v62 = vsel %vm8787_vm4, 0, %v8786_v19  ;;  %v2033_v9 = vsel %vm2029_vm0, %v2017_v58, %v2032_v61  ;;  %v2035_v4 = vsel %vm2027_vm14, %v2014_v11, %v2017_v58  ;;  %v2036_v5 = vsel %vm2030_vm1, %v2023_v45, 920167782 }
 0x1a8   : > { %vm3844_vm7 = vcmp.lt.s32.totalorder %v12298_v17, 2  ;;  %v1963_v41 = vsub.s32 32, %v1962_v62  ;;  %v1964_v37 = vshll.u32 %v12300_v12, %v1962_v62  ;;  %v1967_v59 = vsub.s32 4294967266, %v1962_v62 }
 0x1a9   : > { %v1977_v39 = vsub.s32 4, %v12282_v31  ;;  %vm1879_vm8 = vweird.f32 %v11988_v1  ;;  %v2034_v36 = vsel %vm2028_vm15, %v2031_v29, %v2033_v9  ;;  %v2037_v7 = vsel %vm2029_vm0, %v2020_v47, %v2036_v5 }
 0x1aa   : > { %v2039_v24 = vsel %vm2027_vm14, %v2017_v58, %v2020_v47  ;;  %v2040_v15 = vsel %vm2030_vm1, %v2026_v28, 1326507024  ;;  %vm12347_vm10 = vcmp.le.f32.partialorder %v1891_v21, 0.7853982  ;;  %v1965_v13 = vshrl.u32 %v1947_v63, %v1963_v41 }
 0x1ab   : > { %v1968_v0 = vadd.s32 127, %v1967_v59  ;;  %v2038_v12 = vsel %vm2028_vm15, %v2035_v4, %v2037_v7  ;;  %v2041_v27 = vsel %vm2029_vm0, %v2023_v45, %v2040_v15  ;;  %v2109_v30 = vadd.s32 1, %v8792_v54 }
 0x1ac   : > { %v2042_v14 = vsel %vm2028_vm15, %v2039_v24, %v2041_v27  ;;  %v12355_v32 = vmul.u32.u64.low %v12322_v10, %v2038_v12  ;;  %v12356_v38 = vmul.u32.u64.high %v12322_v10, %v2038_v12, %v12355_v32  ;;  %v1966_v57 = vor.u32 %v1965_v13, %v1964_v37  ;;  %v407_v37 = vld [vmem:[%s10766_s23 + $0x88] sm:$0xff]  ;;  %v12420_v12 = vld [vmem:[%s14546_s1] ss:$0 sm:$0xff] }
 0x1ad   : > { %v1969_v22 = vshll.u32 %v1968_v0, 23  ;;  %v12360_v21 = vmul.u32.u64.low %v12322_v10, %v2042_v14  ;;  %v12361_v55 = vmul.u32.u64.high %v12322_v10, %v2042_v14, %v12360_v21  ;;  %vm1882_vm9 = vcmp.lt.s32.totalorder %v12304_v3, 2 }
 0x1ae   : > { %vm1883_vm11 = vcmp.eq.s32.totalorder %v12304_v3, 0  ;;  %vm1886_vm12 = vcmp.eq.s32.totalorder %v12304_v3, 2  ;;  %vm2110_vm13 = vcmp.gt.s32.totalorder %v2109_v30, 0  ;;  %v10610_v25 = vpop.eup %10609  ;;  %v1973_v42 = vcvt.s32.f32 %v1966_v57 }
 0x1af   : > { %v1970_v33 = vor.u32 4788187, %v1969_v22  ;;  %v2050_v63 = vmul.u32 %v12322_v10, %v2034_v36  ;;  %v2111_v2 = vsel %vm2110_vm13, %v2109_v30, 0  ;;  %v10612_v53 = vpop.eup %10611  ;;  %v1887_v16 = vxor.u32 2147483648, %v10610_v25 }
 0x1b0   : > { %v2053_v54 = vadd.s32 1, %v12356_v38  ;;  %v12370_v34 = vand.u32 8388607, %v2099_v35  ;;  %v2113_v18 = vand.u32 31, %v2111_v2  ;;  %v1884_v40 = vxor.u32 2147483648, %v10612_v53 }
 0x1b1   : > { %v1971_v11 = vand.u32 2147483647, %v1970_v33  ;;  %v1978_v58 = vsel %vm1893_vm6, %v1977_v39, %v12282_v31  ;;  %vm2052_vm14 = vc.u32 %v12361_v55, %v12355_v32  ;;  %v3850_v10 = vsel %vm3848_vm3, %v1887_v16, %v10612_v53 }
 0x1b2   : > { %v1888_v49 = vsel %vm1886_vm12, %v1887_v16, %v10612_v53  ;;  %v2054_v19 = vsel %vm2052_vm14, %v2053_v54, %v12356_v38  ;;  %v2114_v47 = vsub.s32 32, %v2113_v18  ;;  %v3847_v26 = vsel %vm3845_vm5, %v10610_v25, %v1884_v40  ;;  %v4935_v53 = vld [vmem:[%s14550_s5 + $0x18] sm:$0xff]  ;;  %v4934_v16 = vld [vmem:[%s14550_s5 + $0x10] sm:$0xff] }
 0x1b3   : > { %v1885_v23 = vsel %vm1883_vm11, %v10610_v25, %v1884_v40  ;;  %v1974_v31 = vmul.f32 %v1973_v42, %v1971_v11  ;;  %v2055_v45 = vadd.s32 %v2054_v19, %v2050_v63  ;;  %v3851_v28 = vsel %vm3844_vm7, %v3847_v26, %v3850_v10  ;;  %9557 = vmatpush3.msra.mxu0 %v4935_v53  ;;  %v4933_v10 = vld [vmem:[%s14550_s5 + $0x8] sm:$0xff] }
 0x1b4   : > { %v1889_v29 = vsel %vm1882_vm9, %v1885_v23, %v1888_v49  ;;  %v1980_v61 = vsel %vm12347_vm10, 0, %v1978_v58  ;;  %v2116_v62 = vshll.u32 %v10647_v44, %v2113_v18  ;;  %v3852_v9 = vsel %vm1879_vm8, nan, %v3851_v28  ;;  %9558 = vmatprep.subr.mxu0 %v14557_v8 }
 0x1b5   : > { %v1890_v4 = vsel %vm1879_vm8, nan, %v1889_v29  ;;  %v1975_v5 = vxor.u32 2147483648, %v1974_v31  ;;  %v2056_v41 = vadd.s32 536870912, %v2055_v45  ;;  %8895 = vmatmul.mubr.msk.f32.gmra.mxu0 %vm4376_vm2, %v3852_v9  ;;  %v12400_v17 = vshrl.u32 %v2111_v2, 5  ;;  %v4932_v29 = vld [vmem:[%s14550_s5] sm:$0xff] }
 0x1b6   : > { %8916 = vmatmul.mubr.msk.f32.gmra.mxu1 %vm4376_vm2, %v1890_v4  ;;  %v2117_v3 = vshrl.u32 %v10648_v46, %v2114_v47  ;;  %v2119_v59 = vshll.u32 %v10648_v46, %v2113_v18  ;;  %v2120_v39 = vshrl.u32 %v10649_v48, %v2114_v47  ;;  %4589 = vmatprep.mubr.f32.mxu0 %v14557_v8  ;;  %v1984_v13 = vadd.s32 3, %v1980_v61 }
 0x1b7   : > { %4831 = vmatprep.mubr.f32.mxu1 %v14557_v8  ;;  %v1976_v1 = vsel %vm1893_vm6, %v1975_v5, %v1974_v31  ;;  %v12409_v36 = vshrl.u32 %v2056_v41, 30  ;;  %v2122_v7 = vshll.u32 %v10649_v48, %v2113_v18  ;;  %v2123_v24 = vshrl.u32 %v10650_v50, %v2114_v47  ;;  %9559 = vmatpush3.msra.mxu0 %v4934_v16 }
 0x1b8   : > { %v1979_v15 = vsel %vm12347_vm10, %v12000_v43, %v1976_v1  ;;  %v2125_v0 = vshll.u32 %v10650_v50, %v2113_v18  ;;  %v12423_v27 = vmul.f32 %v12420_v12, %v407_v37  ;;  %v2118_v38 = vor.u32 %v2117_v3, %v2116_v62  ;;  %9560 = vmatprep.subr.mxu0 %v14557_v8 }
 0x1b9   : > { %10613 = vcosq.f32 %v1979_v15  ;;  %v2058_v14 = vshll.u32 %v12409_v36, 30  ;;  %v2121_v30 = vor.u32 %v2120_v39, %v2119_v59  ;;  %v2126_v51 = vshrl.u32 %v10651_v52, %v2114_v47  ;;  %9561 = vmatpush3.msra.mxu0 %v4933_v10 }
 0x1ba   : > { %10615 = vsinq.f32 %v1979_v15  ;;  %v2128_v57 = vshll.u32 %v10651_v52, %v2113_v18  ;;  %v2129_v22 = vshrl.u32 %v10652_v60, %v2114_v47  ;;  %v2107_v25 = vor.u32 8388608, %v12370_v34  ;;  %9562 = vmatprep.subr.mxu0 %v14557_v8 }
 0x1bb   : > { %v12429_v21 = vsub.s32 %v2055_v45, %v2058_v14  ;;  %v2124_v33 = vor.u32 %v2123_v24, %v2122_v7  ;;  %vm2131_vm15 = vcmp.lt.s32.totalorder %v12400_v17, 1  ;;  %v2115_v42 = vshrl.u32 %v10647_v44, %v2114_v47  ;;  %9563 = vmatpush3.msra.mxu0 %v4932_v29 }
 0x1bc   : > { %v2127_v63 = vor.u32 %v2126_v51, %v2125_v0  ;;  %v2130_v2 = vor.u32 %v2129_v22, %v2128_v57  ;;  %vm2134_vm0 = vcmp.lt.s32.totalorder %v12400_v17, 4  ;;  %v12441_v54 = vand.u32 3, %v1980_v61  ;;  %9686 = vmatprep.subr.mxu0 %v14557_v8 }
 0x1bd   : > { %v12443_v34 = vand.u32 3, %v1984_v13  ;;  %vm1997_vm1 = vcmp.lt.s32.totalorder %v12235_v56, 0  ;;  %v2061_v18 = vsub.s32 0, %v12429_v21  ;;  %vm2133_vm3 = vcmp.lt.s32.totalorder %v12400_v17, 3 }
 0x1be   : > { %vm2132_vm4 = vcmp.lt.s32.totalorder %v12400_v17, 2  ;;  %v2136_v40 = vsel %vm2134_vm0, %v2124_v33, 2102212464  ;;  %v2139_v11 = vsel %vm2131_vm15, %v2118_v38, %v2121_v30  ;;  %v2140_v58 = vsel %vm2134_vm0, %v2127_v63, 920167782 }
 0x1bf   : > { %v8789_v49 = vmin.u32 %v2061_v18, %v12429_v21  ;;  %v2143_v19 = vsel %vm2131_vm15, %v2121_v30, %v2124_v33  ;;  %v12462_v47 = vshll.u32 %v2107_v25, 8  ;;  %v2206_v26 = vand.u32 2139095040, %v12423_v27  ;;  %v12518_v25 = vpop.f32.mrf.mxu0 }
 0x1c0   : > { %v2135_v23 = vsel %vm2131_vm15, %v2115_v42, %v2118_v38  ;;  %v2137_v31 = vsel %vm2133_vm3, %v2121_v30, %v2136_v40  ;;  %v2141_v45 = vsel %vm2133_vm3, %v2124_v33, %v2140_v58  ;;  %v2144_v28 = vsel %vm2134_vm0, %v2130_v2, 1326507024 }
 0x1c1   : > { %vm1983_vm5 = vweird.f32 %v12000_v43  ;;  %vm3947_vm6 = vcmp.lt.s32.totalorder %v12441_v54, 2  ;;  %vm12481_vm7 = vcmp.le.f32.partialorder %v1995_v20, 0.7853982  ;;  %v2063_v62 = vclz %v8789_v49 }
 0x1c2   : > { %v2142_v9 = vsel %vm2132_vm4, %v2139_v11, %v2141_v45  ;;  %v2145_v4 = vsel %vm2133_vm3, %v2127_v63, %v2144_v28  ;;  %vm3948_vm8 = vcmp.eq.s32.totalorder %v12441_v54, 0  ;;  %vm3951_vm10 = vcmp.eq.s32.totalorder %v12441_v54, 2 }
 0x1c3   : > { %v2081_v5 = vsub.s32 4, %v12409_v36  ;;  %v2146_v20 = vsel %vm2132_vm4, %v2143_v19, %v2145_v4  ;;  %v8790_v41 = vadd.s32 4294967294, %v2063_v62  ;;  %v2138_v37 = vsel %vm2132_vm4, %v2135_v23, %v2137_v31  ;;  %v12540_v19 = vpop.f32.mrf.mxu0 }
 0x1c4   : > { %v12498_v3 = vmul.u32.u64.low %v12462_v47, %v2146_v20  ;;  %v12499_v59 = vmul.u32.u64.high %v12462_v47, %v2146_v20, %v12498_v3  ;;  %vm1986_vm9 = vcmp.lt.s32.totalorder %v12443_v34, 2  ;;  %v2207_v7 = vshrl.u32 %v2206_v26, 23 }
 0x1c5   : > { %v12503_v39 = vmul.u32.u64.low %v12462_v47, %v2142_v9  ;;  %v12504_v1 = vmul.u32.u64.high %v12462_v47, %v2142_v9, %v12503_v39  ;;  %vm1987_vm11 = vcmp.eq.s32.totalorder %v12443_v34, 0  ;;  %vm1990_vm12 = vcmp.eq.s32.totalorder %v12443_v34, 2  ;;  %v12552_v43 = vpop.f32.mrf.mxu0 }
 0x1c6   : > { %v2051_v17 = vadd.s32 %v12355_v32, %v12361_v55  ;;  %vm8791_vm13 = vcmp.lt.s32.totalorder %v8790_v41, 0  ;;  %v10614_v24 = vpop.eup %10613  ;;  %v2082_v13 = vsel %vm1997_vm1, %v2081_v5, %v12409_v36  ;;  %v2154_v0 = vmul.u32 %v12462_v47, %v2138_v37  ;;  %v12520_v32 = vpop.f32.mrf.mxu1  ;;  %v408_v37 = vld [vmem:[%s10766_s23 + $0x90] sm:$0xff] }
 0x1c7   : > { %v2066_v15 = vsel %vm8791_vm13, 0, %v8790_v41  ;;  %v2203_v14 = vand.u32 2147483647, %v12423_v27  ;;  %v10616_v38 = vpop.eup %10615  ;;  %v1991_v30 = vxor.u32 2147483648, %v10614_v24  ;;  %vm2156_vm14 = vc.u32 %v12499_v59, %v12503_v39 }
 0x1c8   : > { %v2067_v51 = vsub.s32 32, %v2066_v15  ;;  %v2068_v57 = vshll.u32 %v12429_v21, %v2066_v15  ;;  %v2071_v22 = vsub.s32 4294967266, %v2066_v15  ;;  %v1988_v55 = vxor.u32 2147483648, %v10616_v38  ;;  %v12542_v47 = vpop.f32.mrf.mxu1 }
 0x1c9   : > { %v2157_v36 = vadd.s32 1, %v12504_v1  ;;  %v8796_v33 = vadd.s32 4294967169, %v2207_v7  ;;  %v3953_v42 = vsel %vm3951_vm10, %v1991_v30, %v10616_v38  ;;  %v1992_v63 = vsel %vm1990_vm12, %v1991_v30, %v10616_v38 }
 0x1ca   : > { %v2069_v2 = vshrl.u32 %v2051_v17, %v2067_v51  ;;  %v2072_v21 = vadd.s32 127, %v2071_v22  ;;  %v3950_v53 = vsel %vm3948_vm8, %v10614_v24, %v1988_v55  ;;  %v1989_v16 = vsel %vm1987_vm11, %v10614_v24, %v1988_v55  ;;  %v12554_v4 = vpop.f32.mrf.mxu1 }
 0x1cb   : > { %v2084_v18 = vsel %vm12481_vm7, 0, %v2082_v13  ;;  %v2158_v40 = vsel %vm2156_vm14, %v2157_v36, %v12504_v1  ;;  %v3954_v11 = vsel %vm3947_vm6, %v3950_v53, %v3953_v42  ;;  %v1993_v58 = vsel %vm1986_vm9, %v1989_v16, %v1992_v63 }
 0x1cc   : > { %v2070_v10 = vor.u32 %v2069_v2, %v2068_v57  ;;  %v2073_v49 = vshll.u32 %v2072_v21, 23  ;;  %v3955_v26 = vsel %vm1983_vm5, nan, %v3954_v11  ;;  %v1994_v23 = vsel %vm1983_vm5, nan, %v1993_v58  ;;  %v12571_v38 = vpop.f32.mrf.mxu1 }
 0x1cd   : > { %v2159_v31 = vadd.s32 %v2158_v40, %v2154_v0  ;;  %v2213_v45 = vadd.s32 1, %v8796_v33  ;;  %8896 = vmatmul.mubr.msk.f32.gmra.mxu0 %vm4376_vm2, %v3955_v26  ;;  %8917 = vmatmul.mubr.msk.f32.gmra.mxu1 %vm4376_vm2, %v1994_v23  ;;  %v2088_v62 = vadd.s32 3, %v2084_v18  ;;  %v2210_v20 = vand.u32 8388607, %v2203_v14  ;;  %v12569_v0 = vpop.f32.mrf.mxu0 }
 0x1ce   : > { %v2074_v54 = vor.u32 4788187, %v2073_v49  ;;  %v2077_v34 = vcvt.s32.f32 %v2070_v10  ;;  %4595 = vmatprep.mubr.f32.mxu0 %v14557_v8  ;;  %4837 = vmatprep.mubr.f32.mxu1 %v14557_v8  ;;  %v12562_v24 = vand.u32 3, %v2084_v18  ;;  %v12567_v13 = vmul.f32 %v12420_v12, %v408_v37  ;;  %v12595_v11 = vpop.f32.mrf.mxu1 }
 0x1cf   : > { %v2160_v28 = vadd.s32 536870912, %v2159_v31  ;;  %vm2214_vm15 = vcmp.gt.s32.totalorder %v2213_v45, 0  ;;  %v12564_v15 = vand.u32 3, %v2088_v62  ;;  %v2211_v51 = vor.u32 8388608, %v2210_v20  ;;  %v12593_v40 = vpop.f32.mrf.mxu0 }
 0x1d0   : > { %v2075_v29 = vand.u32 2147483647, %v2074_v54  ;;  %v2215_v9 = vsel %vm2214_vm15, %v2213_v45, 0  ;;  %v2155_v53 = vadd.s32 %v12503_v39, %v12499_v59  ;;  %v2310_v18 = vand.u32 2139095040, %v12567_v13  ;;  %v12609_v62 = vpop.f32.mrf.mxu1 }
 0x1d1   : > { %v12556_v5 = vshrl.u32 %v2160_v28, 30  ;;  %v2217_v41 = vand.u32 31, %v2215_v9  ;;  %v12575_v57 = vshrl.u32 %v2215_v9, 5  ;;  %v12599_v10 = vshll.u32 %v2211_v51, 8 }
 0x1d2   : > { %v2078_v3 = vmul.f32 %v2077_v34, %v2075_v29  ;;  %v2307_v34 = vand.u32 2147483647, %v12567_v13  ;;  %v2311_v28 = vshrl.u32 %v2310_v18, 23  ;;  %v12607_v29 = vpop.f32.mrf.mxu0  ;;  %vm4054_vm3 = vcmp.eq.s32.totalorder %v12562_v24, 2 }
 0x1d3   : > { %v2162_v1 = vshll.u32 %v12556_v5, 30  ;;  %v2218_v7 = vsub.s32 32, %v2217_v41  ;;  %v2220_v22 = vshll.u32 %v10647_v44, %v2217_v41  ;;  %v2223_v33 = vshll.u32 %v10648_v46, %v2217_v41 }
 0x1d4   : > { %v2079_v17 = vxor.u32 2147483648, %v2078_v3  ;;  %v2226_v2 = vshll.u32 %v10649_v48, %v2217_v41  ;;  %v2229_v16 = vshll.u32 %v10650_v50, %v2217_v41  ;;  %v2232_v59 = vshll.u32 %v10651_v52, %v2217_v41 }
 0x1d5   : > { %v12573_v30 = vsub.s32 %v2159_v31, %v2162_v1  ;;  %v2221_v36 = vshrl.u32 %v10648_v46, %v2218_v7  ;;  %v2224_v12 = vshrl.u32 %v10649_v48, %v2218_v7  ;;  %v2227_v21 = vshrl.u32 %v10650_v50, %v2218_v7 }
 0x1d6   : > { %v2080_v55 = vsel %vm1997_vm1, %v2079_v17, %v2078_v3  ;;  %v2219_v58 = vshrl.u32 %v10647_v44, %v2218_v7  ;;  %v2230_v23 = vshrl.u32 %v10651_v52, %v2218_v7  ;;  %v2233_v45 = vshrl.u32 %v10652_v60, %v2218_v7 }
 0x1d7   : > { %v2083_v42 = vsel %vm12481_vm7, %v12235_v56, %v2080_v55  ;;  %v2165_v63 = vsub.s32 0, %v12573_v30  ;;  %v2222_v49 = vor.u32 %v2221_v36, %v2220_v22  ;;  %v2225_v26 = vor.u32 %v2224_v12, %v2223_v33  ;;  %v12637_v12 = vpop.f32.mrf.mxu0 }
 0x1d8   : > { %10617 = vcosq.f32 %v2083_v42  ;;  %v2228_v31 = vor.u32 %v2227_v21, %v2226_v2  ;;  %vm2235_vm0 = vcmp.lt.s32.totalorder %v12575_v57, 1  ;;  %v2231_v54 = vor.u32 %v2230_v23, %v2229_v16 }
 0x1d9   : > { %10619 = vsinq.f32 %v2083_v42  ;;  %v8793_v61 = vmin.u32 %v2165_v63, %v12573_v30  ;;  %vm2236_vm1 = vcmp.lt.s32.totalorder %v12575_v57, 2  ;;  %v2234_v20 = vor.u32 %v2233_v45, %v2232_v59  ;;  %v12639_v42 = vpop.f32.mrf.mxu1 }
 0x1da   : > { %vm2237_vm4 = vcmp.lt.s32.totalorder %v12575_v57, 3  ;;  %vm2238_vm5 = vcmp.lt.s32.totalorder %v12575_v57, 4  ;;  %vm4051_vm6 = vcmp.eq.s32.totalorder %v12562_v24, 0  ;;  %vm2101_vm7 = vcmp.lt.s32.totalorder %v12276_v6, 0  ;;  %v12660_v57 = vpop.f32.mrf.mxu0 }
 0x1db   : > { %v2167_v39 = vclz %v8793_v61  ;;  %v2239_v41 = vsel %vm2235_vm0, %v2219_v58, %v2222_v49  ;;  %v2240_v37 = vsel %vm2238_vm5, %v2228_v31, 2102212464  ;;  %v2243_v3 = vsel %vm2235_vm0, %v2222_v49, %v2225_v26 }
 0x1dc   : > { %v2244_v1 = vsel %vm2238_vm5, %v2231_v54, 920167782  ;;  %vm4050_vm8 = vcmp.lt.s32.totalorder %v12562_v24, 2  ;;  %v2241_v7 = vsel %vm2237_vm4, %v2225_v26, %v2240_v37  ;;  %v2247_v51 = vsel %vm2235_vm0, %v2225_v26, %v2228_v31 }
 0x1dd   : > { %v8794_v9 = vadd.s32 4294967294, %v2167_v39  ;;  %v2245_v17 = vsel %vm2237_vm4, %v2228_v31, %v2244_v1  ;;  %vm2087_vm9 = vweird.f32 %v12235_v56  ;;  %v2185_v55 = vsub.s32 4, %v12556_v5  ;;  %v12662_v31 = vpop.f32.mrf.mxu1 }
 0x1de   : > { %v2246_v36 = vsel %vm2236_vm1, %v2243_v3, %v2245_v17  ;;  %v2248_v33 = vsel %vm2238_vm5, %v2234_v20, 1326507024  ;;  %v2242_v18 = vsel %vm2236_vm1, %v2239_v41, %v2241_v7  ;;  %vm2090_vm11 = vcmp.lt.s32.totalorder %v12564_v15, 2 }
 0x1df   : > { %vm8795_vm10 = vcmp.lt.s32.totalorder %v8794_v9, 0  ;;  %v2249_v16 = vsel %vm2237_vm4, %v2231_v54, %v2248_v33  ;;  %v12649_v58 = vmul.u32.u64.low %v12599_v10, %v2246_v36  ;;  %v12650_v49 = vmul.u32.u64.high %v12599_v10, %v2246_v36, %v12649_v58 }
 0x1e0   : > { %v2170_v22 = vsel %vm8795_vm10, 0, %v8794_v9  ;;  %v2250_v61 = vsel %vm2236_vm1, %v2247_v51, %v2249_v16  ;;  %vm2091_vm12 = vcmp.eq.s32.totalorder %v12564_v15, 0  ;;  %vm2094_vm13 = vcmp.eq.s32.totalorder %v12564_v15, 2 }
 0x1e1   : > { %v2171_v63 = vsub.s32 32, %v2170_v22  ;;  %v2172_v2 = vshll.u32 %v12573_v30, %v2170_v22  ;;  %v2175_v21 = vsub.s32 4294967266, %v2170_v22  ;;  %v8800_v39 = vadd.s32 4294967169, %v2311_v28 }
 0x1e2   : > { %v12654_v59 = vmul.u32.u64.low %v12599_v10, %v2250_v61  ;;  %v12655_v30 = vmul.u32.u64.high %v12599_v10, %v2250_v61, %v12654_v59  ;;  %v4864_v20 = vlaneseq  ;;  %v2258_v3 = vmul.u32 %v12599_v10, %v2242_v18  ;;  %v12679_v10 = vpop.f32.mrf.mxu0 }
 0x1e3   : > { %v2173_v26 = vshrl.u32 %v2155_v53, %v2171_v63  ;;  %v2176_v23 = vadd.s32 127, %v2175_v21  ;;  %v12666_v53 = vand.u32 8388607, %v2307_v34  ;;  %v2261_v1 = vadd.s32 1, %v12650_v49  ;;  %v12681_v63 = vpop.f32.mrf.mxu1 }
 0x1e4   : > { %v2317_v7 = vadd.s32 1, %v8800_v39  ;;  %v2186_v22 = vsel %vm2101_vm7, %v2185_v55, %v12556_v5  ;;  %vm2260_vm14 = vc.u32 %v12655_v30, %v12649_v58  ;;  %vm12700_vm0 = vcmp.le.f32.partialorder %v2099_v35, 0.7853982 }
 0x1e5   : > { %v10618_v45 = vpop.eup %10617  ;;  %v2174_v54 = vor.u32 %v2173_v26, %v2172_v2  ;;  %v2177_v9 = vshll.u32 %v2176_v23, 23  ;;  %v2262_v21 = vsel %vm2260_vm14, %v2261_v1, %v12650_v49  ;;  %v12714_v35 = vadd.f32 %v12520_v32, %v12518_v25 }
 0x1e6   : > { %v10620_v41 = vpop.eup %10619  ;;  %v2095_v37 = vxor.u32 2147483648, %v10618_v45  ;;  %vm2318_vm15 = vcmp.gt.s32.totalorder %v2317_v7, 0  ;;  %v2263_v61 = vadd.s32 %v2262_v21, %v2258_v3  ;;  %v2315_v1 = vor.u32 8388608, %v12666_v53 }
 0x1e7   : > { %v2092_v28 = vxor.u32 2147483648, %v10620_v41  ;;  %v2178_v17 = vor.u32 4788187, %v2177_v9  ;;  %v2181_v51 = vcvt.s32.f32 %v2174_v54  ;;  %v2319_v26 = vsel %vm2318_vm15, %v2317_v7, 0  ;;  %v12706_v54 = vpop.f32.mrf.mxu1 }
 0x1e8   : > { %v4056_v36 = vsel %vm4054_vm3, %v2095_v37, %v10620_v41  ;;  %v2096_v33 = vsel %vm2094_vm13, %v2095_v37, %v10620_v41  ;;  %v2264_v15 = vadd.s32 536870912, %v2263_v61  ;;  %v2321_v49 = vand.u32 31, %v2319_v26 }
 0x1e9   : > { %v4053_v2 = vsel %vm4051_vm6, %v10618_v45, %v2092_v28  ;;  %v2093_v5 = vsel %vm2091_vm12, %v10618_v45, %v2092_v28  ;;  %v2179_v55 = vand.u32 2147483647, %v2178_v17  ;;  %v12704_v45 = vpop.f32.mrf.mxu0  ;;  %v2188_v9 = vsel %vm12700_vm0, 0, %v2186_v22 }
 0x1ea   : > { %v4057_v16 = vsel %vm4050_vm8, %v4053_v2, %v4056_v36  ;;  %v2097_v18 = vsel %vm2090_vm11, %v2093_v5, %v2096_v33  ;;  %v12716_v41 = vshrl.u32 %v4864_v20, 7  ;;  %v12718_v37 = vand.u32 3, %v2188_v9  ;;  %v12737_v33 = vpop.f32.mrf.mxu1 }
 0x1eb   : > { %v4058_v23 = vsel %vm2087_vm9, nan, %v4057_v16  ;;  %v2098_v59 = vsel %vm2087_vm9, nan, %v2097_v18  ;;  %v2182_v39 = vmul.f32 %v2181_v51, %v2179_v55  ;;  %v12720_v3 = vshrl.u32 %v2264_v15, 30  ;;  %v12735_v36 = vpop.f32.mrf.mxu0 }
 0x1ec   : > { %8897 = vmatmul.mubr.msk.f32.gmra.mxu0 %vm4376_vm2, %v4058_v23  ;;  %8918 = vmatmul.mubr.msk.f32.gmra.mxu1 %vm4376_vm2, %v2098_v59  ;;  %v2322_v7 = vsub.s32 32, %v2321_v49  ;;  %v12725_v17 = vshrl.u32 %v2319_v26, 5  ;;  %v2324_v51 = vshll.u32 %v10647_v44, %v2321_v49  ;;  %v2327_v22 = vshll.u32 %v10648_v46, %v2321_v49  ;;  %v12756_v15 = vpop.f32.mrf.mxu1 }
 0x1ed   : > { %4601 = vmatprep.mubr.f32.mxu0 %v14557_v8  ;;  %4843 = vmatprep.mubr.f32.mxu1 %v14557_v8  ;;  %v2183_v56 = vxor.u32 2147483648, %v2182_v39  ;;  %v2266_v32 = vshll.u32 %v12720_v3, 30  ;;  %v2330_v20 = vshll.u32 %v10649_v48, %v2321_v49  ;;  %v2333_v53 = vshll.u32 %v10650_v50, %v2321_v49 }
 0x1ee   : > { %v2325_v2 = vshrl.u32 %v10648_v46, %v2322_v7  ;;  %v2328_v5 = vshrl.u32 %v10649_v48, %v2322_v7  ;;  %v2331_v55 = vshrl.u32 %v10650_v50, %v2322_v7  ;;  %v2334_v16 = vshrl.u32 %v10651_v52, %v2322_v7  ;;  %v12750_v46 = vld [vmem:[%s14549_s4] sm:$0x3] }
 0x1ef   : > { %v2184_v28 = vsel %vm2101_vm7, %v2183_v56, %v2182_v39  ;;  %v12742_v21 = vsub.s32 %v2263_v61, %v2266_v32  ;;  %v4866_v18 = vsub.s32 0, %v12716_v41  ;;  %v2192_v26 = vadd.s32 3, %v2188_v9  ;;  %v12754_v61 = vpop.f32.mrf.mxu0 }
 0x1f0   : > { %v2187_v25 = vsel %vm12700_vm0, %v12276_v6, %v2184_v28  ;;  %v2326_v23 = vor.u32 %v2325_v2, %v2324_v51  ;;  %v2329_v59 = vor.u32 %v2328_v5, %v2327_v22  ;;  %v2336_v39 = vshll.u32 %v10651_v52, %v2321_v49 }
 0x1f1   : > { %10621 = vcosq.f32 %v2187_v25  ;;  %v2269_v48 = vsub.s32 0, %v12742_v21  ;;  %v2332_v50 = vor.u32 %v2331_v55, %v2330_v20  ;;  %v2335_v24 = vor.u32 %v2334_v16, %v2333_v53  ;;  %v12781_v32 = vpop.f32.mrf.mxu0  ;;  %v12783_v20 = vpop.f32.mrf.mxu1 }
 0x1f2   : > { %10623 = vsinq.f32 %v2187_v25  ;;  %vm2339_vm1 = vcmp.lt.s32.totalorder %v12725_v17, 1  ;;  %v2323_v56 = vshrl.u32 %v10647_v44, %v2322_v7  ;;  %v2337_v9 = vshrl.u32 %v10652_v60, %v2322_v7 }
 0x1f3   : > { %vm2341_vm3 = vcmp.lt.s32.totalorder %v12725_v17, 3  ;;  %vm2342_vm4 = vcmp.lt.s32.totalorder %v12725_v17, 4  ;;  %v8797_v52 = vmin.u32 %v2269_v48, %v12742_v21  ;;  %vm2340_vm5 = vcmp.lt.s32.totalorder %v12725_v17, 2 }
 0x1f4   : > { %v12764_v49 = vshll.u32 %v2315_v1, 8  ;;  %v12769_v28 = vrot.slane %v12750_v46, %v4866_v18  ;;  %v2338_v51 = vor.u32 %v2337_v9, %v2336_v39  ;;  %v2344_v44 = vsel %vm2342_vm4, %v2332_v50, 2102212464 }
 0x1f5   : > { %v2347_v60 = vsel %vm2339_vm1, %v2326_v23, %v2329_v59  ;;  %v2348_v7 = vsel %vm2342_vm4, %v2335_v24, 920167782  ;;  %vm4153_vm6 = vcmp.lt.s32.totalorder %v12718_v37, 2  ;;  %vm4154_vm7 = vcmp.eq.s32.totalorder %v12718_v37, 0 }
 0x1f6   : > { %v2193_v1 = vand.u32 3, %v2192_v26  ;;  %v2271_v22 = vclz %v8797_v52  ;;  %v2349_v25 = vsel %vm2341_vm3, %v2332_v50, %v2348_v7  ;;  %vm2191_vm8 = vweird.f32 %v12276_v6 }
 0x1f7   : > { %vm4157_vm10 = vcmp.eq.s32.totalorder %v12718_v37, 2  ;;  %v2343_v53 = vsel %vm2339_vm1, %v2323_v56, %v2326_v23  ;;  %v2351_v2 = vsel %vm2339_vm1, %v2329_v59, %v2332_v50  ;;  %v4756_v5 = vadd.f32 %v12554_v4, %v12552_v43  ;;  %v12814_v50 = vpop.f32.mrf.mxu0 }
 0x1f8   : > { %v8798_v55 = vadd.s32 4294967294, %v2271_v22  ;;  %v2345_v16 = vsel %vm2341_vm3, %v2329_v59, %v2344_v44  ;;  %v2350_v26 = vsel %vm2340_vm5, %v2347_v60, %v2349_v25  ;;  %v2352_v39 = vsel %vm2342_vm4, %v2338_v51, 1326507024 }
 0x1f9   : > { %v2353_v48 = vsel %vm2341_vm3, %v2335_v24, %v2352_v39  ;;  %v12802_v23 = vmul.u32.u64.low %v12764_v49, %v2350_v26  ;;  %v12803_v56 = vmul.u32.u64.high %v12764_v49, %v2350_v26, %v12802_v23  ;;  %v12808_v43 = vadd.f32 %v12769_v28, %v12714_v35  ;;  %v12816_v24 = vpop.f32.mrf.mxu1 }
 0x1fa   : > { %vm2198_vm9 = vcmp.eq.s32.totalorder %v2193_v1, 2  ;;  %v2259_v4 = vadd.s32 %v12649_v58, %v12655_v30  ;;  %vm8799_vm11 = vcmp.lt.s32.totalorder %v8798_v55, 0  ;;  %v2354_v59 = vsel %vm2340_vm5, %v2351_v2, %v2353_v48  ;;  %v4549_v48 = vpop.f32.mrf.mxu0 }
 0x1fb   : > { %v2274_v9 = vsel %vm8799_vm11, 0, %v8798_v55  ;;  %v12819_v52 = vmul.u32.u64.low %v12764_v49, %v2354_v59  ;;  %v12820_v51 = vmul.u32.u64.high %v12764_v49, %v2354_v59, %v12819_v52  ;;  %v12823_v35 = vadd.f32 %v12769_v28, %v4756_v5  ;;  %5201 = vrot.lane.b32.xlu0 %v12808_v43, %s10653_s24  ;;  %v4791_v59 = vpop.f32.mrf.mxu1 }
 0x1fc   : > { %v2275_v30 = vsub.s32 32, %v2274_v9  ;;  %v2276_v44 = vshll.u32 %v12742_v21, %v2274_v9  ;;  %v2279_v60 = vsub.s32 4294967266, %v2274_v9  ;;  %v2346_v7 = vsel %vm2340_vm5, %v2343_v53, %v2345_v16 }
 0x1fd   : > { %vm2194_vm12 = vcmp.lt.s32.totalorder %v2193_v1, 2  ;;  %vm2195_vm13 = vcmp.eq.s32.totalorder %v2193_v1, 0  ;;  %v2365_v2 = vadd.s32 1, %v12803_v56  ;;  %v4762_v39 = vadd.f32 %v12595_v11, %v12593_v40 }
 0x1fe   : > { %v10622_v58 = vpop.eup %10621  ;;  %v2277_v55 = vshrl.u32 %v2259_v4, %v2275_v30  ;;  %v2280_v26 = vadd.s32 127, %v2279_v60  ;;  %v2362_v53 = vmul.u32 %v12764_v49, %v2346_v7  ;;  %vm2364_vm14 = vc.u32 %v12820_v51, %v12802_v23 }
 0x1ff   : > { %v10624_v22 = vpop.eup %10623  ;;  %v2199_v25 = vxor.u32 2147483648, %v10622_v58  ;;  %5203 = vrot.lane.b32.xlu0 %v12823_v35, %s10653_s24  ;;  %v2366_v30 = vsel %vm2364_vm14, %v2365_v2, %v12803_v56  ;;  %v12848_v49 = vadd.f32 %v12769_v28, %v4762_v39  ;;  %v4768_v1 = vadd.f32 %v12639_v42, %v12637_v12 }
 0x200   : > { %v2196_v5 = vxor.u32 2147483648, %v10624_v22  ;;  %v2278_v40 = vor.u32 %v2277_v55, %v2276_v44  ;;  %v2281_v11 = vshll.u32 %v2280_v26, 23  ;;  %v12854_v44 = vpop.f32.mrf.mxu0  ;;  %v2367_v37 = vadd.s32 %v2366_v30, %v2362_v53 }
 0x201   : > { %v4159_v21 = vsel %vm4157_vm10, %v2199_v25, %v10624_v22  ;;  %v2200_v17 = vsel %vm2198_vm9, %v2199_v25, %v10624_v22  ;;  %v12856_v25 = vpop.f32.mrf.mxu1  ;;  %v4774_v56 = vadd.f32 %v12681_v63, %v12679_v10  ;;  %5205 = vrot.lane.b32.xlu1 %v12848_v49, %s10653_s24  ;;  %v4780_v12 = vadd.f32 %v12737_v33, %v12735_v36 }
 0x202   : > { %v4156_v16 = vsel %vm4154_vm7, %v10622_v58, %v2196_v5  ;;  %v2197_v4 = vsel %vm2195_vm13, %v10622_v58, %v2196_v5  ;;  %v2282_v22 = vor.u32 4788187, %v2281_v11  ;;  %v2285_v58 = vcvt.s32.f32 %v2278_v40  ;;  %v4555_v42 = vpop.f32.mrf.mxu0 }
 0x203   : > { %v4160_v9 = vsel %vm4153_vm6, %v4156_v16, %v4159_v21  ;;  %v2201_v52 = vsel %vm2194_vm12, %v2197_v4, %v2200_v17  ;;  %v2368_v2 = vadd.s32 536870912, %v2367_v37  ;;  %v12867_v5 = vadd.f32 %v12769_v28, %v4768_v1  ;;  %v4797_v39 = vpop.f32.mrf.mxu1 }
 0x204   : > { %v4161_v60 = vsel %vm2191_vm8, nan, %v4160_v9  ;;  %v2202_v7 = vsel %vm2191_vm8, nan, %v2201_v52  ;;  %v2283_v6 = vand.u32 2147483647, %v2282_v22  ;;  %v12872_v26 = vadd.f32 %v12769_v28, %v4774_v56  ;;  %v12899_v40 = vpop.f32.mrf.mxu0 }
 0x205   : > { %8898 = vmatmul.mubr.msk.f32.gmra.mxu0 %vm4376_vm2, %v4161_v60  ;;  %8919 = vmatmul.mubr.msk.f32.gmra.mxu1 %vm4376_vm2, %v2202_v7  ;;  %vm2205_vm15 = vcmp.lt.s32.totalorder %v12423_v27, 0  ;;  %v2289_v10 = vsub.s32 4, %v12720_v3  ;;  %v12878_v63 = vshrl.u32 %v2368_v2, 30  ;;  %vm12882_vm0 = vcmp.le.f32.partialorder %v2203_v14, 0.7853982  ;;  %v12901_v11 = vpop.f32.mrf.mxu1 }
 0x206   : > { %4607 = vmatprep.mubr.f32.mxu0 %v14557_v8  ;;  %4849 = vmatprep.mubr.f32.mxu1 %v14557_v8  ;;  %v2286_v55 = vmul.f32 %v2285_v58, %v2283_v6  ;;  %v4786_v36 = vadd.f32 %v12783_v20, %v12781_v32  ;;  %v12894_v53 = vadd.f32 %v12769_v28, %v4780_v12  ;;  %vm2295_vm10 = vweird.f32 %v12423_v27 }
 0x207   : > { %5209 = vrot.lane.b32.xlu0 %v12872_v26, %s10653_s24  ;;  %v2370_v33 = vshll.u32 %v12878_v63, 30  ;;  %5207 = vrot.lane.b32.xlu1 %v12867_v5, %s10653_s24  ;;  %v4792_v4 = vadd.f32 %v4791_v59, %v4549_v48  ;;  %v2290_v9 = vsel %vm2205_vm15, %v2289_v10, %v12720_v3  ;;  %v4798_v59 = vadd.f32 %v4797_v39, %v4555_v42  ;;  %v4561_v30 = vpop.f32.mrf.mxu0  ;;  %v4803_v60 = vpop.f32.mrf.mxu1 }
 0x208   : > { %v2287_v17 = vxor.u32 2147483648, %v2286_v55  ;;  %v12897_v14 = vadd.f32 %v12769_v28, %v4786_v36  ;;  %v2292_v3 = vsel %vm12882_vm0, 0, %v2290_v9  ;;  %v4804_v1 = vadd.f32 %v4803_v60, %v4561_v30 }
 0x209   : > { %v2371_v20 = vsub.s32 %v2367_v37, %v2370_v33  ;;  %v12912_v48 = vadd.f32 %v12769_v28, %v4792_v4  ;;  %v12917_v22 = vadd.f32 %v12769_v28, %v4798_v59  ;;  %v2296_v58 = vadd.s32 3, %v2292_v3 }
 0x20a   : > { %v2288_v16 = vsel %vm2205_vm15, %v2287_v17, %v2286_v55  ;;  %v12924_v56 = vadd.f32 %v12769_v28, %v4804_v1  ;;  %v4255_v2 = vand.u32 3, %v2292_v3  ;;  %v2363_v12 = vadd.s32 %v12802_v23, %v12820_v51 }
 0x20b   : > { %v2291_v32 = vsel %vm12882_vm0, %v12423_v27, %v2288_v16  ;;  %5213 = vrot.lane.b32.xlu0 %v12897_v14, %s10653_s24  ;;  %v2373_v52 = vsub.s32 0, %v2371_v20  ;;  %5211 = vrot.lane.b32.xlu1 %v12894_v53, %s10653_s24  ;;  %v2297_v55 = vand.u32 3, %v2296_v58  ;;  %vm2309_vm9 = vcmp.lt.s32.totalorder %v12567_v13, 0 }
 0x20c   : > { %10625 = vcosq.f32 %v2291_v32  ;;  %vm4260_vm3 = vcmp.eq.s32.totalorder %v4255_v2, 2  ;;  %vm4256_vm5 = vcmp.lt.s32.totalorder %v4255_v2, 2  ;;  %vm4257_vm6 = vcmp.eq.s32.totalorder %v4255_v2, 0  ;;  %v12935_v2 = vpop.f32.mrf.mxu1 }
 0x20d   : > { %10627 = vsinq.f32 %v2291_v32  ;;  %v8801_v7 = vmin.u32 %v2373_v52, %v2371_v20  ;;  %vm2302_vm4 = vcmp.eq.s32.totalorder %v2297_v55, 2  ;;  %vm2299_vm7 = vcmp.eq.s32.totalorder %v2297_v55, 0 }
 0x20e   : > { %vm2298_vm8 = vcmp.lt.s32.totalorder %v2297_v55, 2  ;;  %v2393_v55 = vsub.s32 4, %v12878_v63  ;;  %vm2308_vm11 = vcmp.le.f32.partialorder %v2307_v34, 0.7853982 }
 0x20f   : > { %v2375_v37 = vclz %v8801_v7  ;;  %5215 = vrot.lane.b32.xlu1 %v12912_v48, %s10653_s24  ;;  %5217 = vrot.lane.b32.xlu0 %v12917_v22, %s10653_s24 }
 0x211   : > { %v8802_v6 = vadd.s32 4294967294, %v2375_v37 }
 0x213   : > { %vm8803_vm1 = vcmp.lt.s32.totalorder %v8802_v6, 0  ;;  %5219 = vrot.lane.b32.xlu1 %v12924_v56, %s10653_s24 }
 0x214   : > { %v2378_v42 = vsel %vm8803_vm1, 0, %v8802_v6  ;;  %v12933_v6 = vpop.f32.mrf.mxu0 }
 0x215   : > { %v2379_v39 = vsub.s32 32, %v2378_v42  ;;  %v2380_v10 = vshll.u32 %v2371_v20, %v2378_v42  ;;  %v2383_v21 = vsub.s32 4294967266, %v2378_v42 }
 0x217   : > { %v2381_v36 = vshrl.u32 %v2363_v12, %v2379_v39  ;;  %v2384_v33 = vadd.s32 127, %v2383_v21 }
 0x219   : > { %v10626_v17 = vpop.eup %10625  ;;  %v2382_v23 = vor.u32 %v2381_v36, %v2380_v10  ;;  %v2385_v51 = vshll.u32 %v2384_v33, 23 }
 0x21a   : > { %v10628_v16 = vpop.eup %10627  ;;  %v2303_v4 = vxor.u32 2147483648, %v10626_v17 }
 0x21b   : > { %v2300_v9 = vxor.u32 2147483648, %v10628_v16  ;;  %v2386_v59 = vor.u32 4788187, %v2385_v51  ;;  %v2389_v30 = vcvt.s32.f32 %v2382_v23 }
 0x21c   : > { %v4262_v32 = vsel %vm4260_vm3, %v2303_v4, %v10628_v16  ;;  %v2304_v52 = vsel %vm2302_vm4, %v2303_v4, %v10628_v16  ;;  %vm2399_vm3 = vweird.f32 %v12567_v13  ;;  %vm10654_vm4 = vmmov 0  }
 0x21d   : > { %v4259_v20 = vsel %vm4257_vm6, %v10626_v17, %v2300_v9  ;;  %v2301_v3 = vsel %vm2299_vm7, %v10626_v17, %v2300_v9  ;;  %v2387_v1 = vand.u32 2147483647, %v2386_v59  ;;  %v2394_v17 = vsel %vm2309_vm9, %v2393_v55, %v12878_v63 }
 0x21e   : > { %v4263_v60 = vsel %vm4256_vm5, %v4259_v20, %v4262_v32  ;;  %v2305_v7 = vsel %vm2298_vm8, %v2301_v3, %v2304_v52  ;;  %v2396_v16 = vsel %vm2308_vm11, 0, %v2394_v17  ;;  %vm4940_vm5 = vcmask 261120  }
 0x21f   : > { %v4264_v58 = vsel %vm2295_vm10, nan, %v4263_v60  ;;  %v2306_v37 = vsel %vm2295_vm10, nan, %v2305_v7  ;;  %v2390_v27 = vmul.f32 %v2389_v30, %v2387_v1  ;;  %v2400_v4 = vadd.s32 3, %v2396_v16 }
 0x220   : > { %8899 = vmatmul.mubr.msk.f32.gmra.mxu0 %vm4376_vm2, %v4264_v58  ;;  %8920 = vmatmul.mubr.msk.f32.gmra.mxu1 %vm4376_vm2, %v2306_v37  ;;  %v4358_v34 = vand.u32 3, %v2396_v16  ;;  %v4917_v17 = vmax.f32 %v12872_v26, 0.0  ;;  %v4919_v16 = vmax.f32 %v12897_v14, 0.0 }
 0x221   : > { %4613 = vmatprep.mubr.f32.mxu0 %v14557_v8  ;;  %4855 = vmatprep.mubr.f32.mxu1 %v14557_v8  ;;  %v2391_v12 = vxor.u32 2147483648, %v2390_v27  ;;  %v2401_v9 = vand.u32 3, %v2400_v4  ;;  %v4920_v4 = vmax.f32 %v12912_v48, 0.0 }
 0x222   : > { %vm4363_vm12 = vcmp.eq.s32.totalorder %v4358_v34, 2  ;;  %vm4360_vm14 = vcmp.eq.s32.totalorder %v4358_v34, 0  ;;  %vm4359_vm0 = vcmp.lt.s32.totalorder %v4358_v34, 2 }
 0x223   : > { %v2392_v10 = vsel %vm2309_vm9, %v2391_v12, %v2390_v27  ;;  %vm2406_vm13 = vcmp.eq.s32.totalorder %v2401_v9, 2  ;;  %vm2403_vm15 = vcmp.eq.s32.totalorder %v2401_v9, 0  ;;  %vm2402_vm1 = vcmp.lt.s32.totalorder %v2401_v9, 2 }
 0x224   : > { %v2395_v36 = vsel %vm2308_vm11, %v12567_v13, %v2392_v10  ;;  %v4913_v27 = vmax.f32 %v12808_v43, 0.0  ;;  %v4915_v10 = vmax.f32 %v12848_v49, 0.0 }
 0x225   : > { %v4567_v42 = vpop.f32.mrf.mxu0  ;;  %v4809_v39 = vpop.f32.mrf.mxu1  ;;  %10629 = vcosq.f32 %v2395_v36 }
 0x226   : > { %v4810_v21 = vadd.f32 %v4809_v39, %v4567_v42  ;;  %10631 = vsinq.f32 %v2395_v36  ;;  %v4914_v42 = vmax.f32 %v12823_v35, 0.0  ;;  %v4918_v36 = vmax.f32 %v12894_v53, 0.0 }
 0x227   : > { %v12951_v7 = vpop.f32.mrf.mxu0  ;;  %v12953_v58 = vpop.f32.mrf.mxu1 }
 0x228   : > { %v12946_v33 = vadd.f32 %v12769_v28, %v4810_v21  ;;  %v4916_v21 = vmax.f32 %v12867_v5, 0.0 }
 0x22a   : > { %5221 = vrot.lane.b32.xlu0 %v12946_v33, %s10653_s24 }
 0x232   : > { %v10630_v23 = vpop.eup %10629 }
 0x233   : > { %v10632_v51 = vpop.eup %10631  ;;  %v2407_v32 = vxor.u32 2147483648, %v10630_v23 }
 0x234   : > { %v2404_v63 = vxor.u32 2147483648, %v10632_v51 }
 0x235   : > { %v4365_v52 = vsel %vm4363_vm12, %v2407_v32, %v10632_v51  ;;  %v2408_v20 = vsel %vm2406_vm13, %v2407_v32, %v10632_v51 }
 0x236   : > { %v4362_v3 = vsel %vm4360_vm14, %v10630_v23, %v2404_v63  ;;  %v2405_v59 = vsel %vm2403_vm15, %v10630_v23, %v2404_v63  ;;  %v4921_v23 = vmax.f32 %v12917_v22, 0.0 }
 0x237   : > { %v4366_v30 = vsel %vm4359_vm0, %v4362_v3, %v4365_v52  ;;  %v2409_v60 = vsel %vm2402_vm1, %v2405_v59, %v2408_v20  ;;  %v4922_v52 = vmax.f32 %v12924_v56, 0.0  ;;  %v4923_v3 = vmax.f32 %v12946_v33, 0.0 }
 0x238   : > { %v4367_v37 = vsel %vm2399_vm3, nan, %v4366_v30  ;;  %v2410_v1 = vsel %vm2399_vm3, nan, %v2409_v60 }
 0x239   : > { %8900 = vmatmul.mubr.msk.f32.gmra.mxu0 %vm4376_vm2, %v4367_v37  ;;  %8921 = vmatmul.mubr.msk.f32.gmra.mxu1 %vm4376_vm2, %v2410_v1  ;;  %vm8427_vm2 = vcmask 130048  }
 0x23a   : > { %9564 = vmatprep.mubr.msk.f32.mxu0 %vm10654_vm4, %v14557_v8  ;;  %9629 = vmatprep.mubr.msk.f32.mxu1 %vm10654_vm4, %v14557_v8 }
 0x23d   : > { %9565 = vmatmul.mubr.msk.f32.vlgmr.msra.gmra.mxu0 %vm4940_vm5, %v4913_v27 }
 0x23e   : > { %v4573_v13 = vpop.f32.mrf.mxu0  ;;  %v4815_v55 = vpop.f32.mrf.mxu1  ;;  %9567 = vmatprep.mubr.msk.f32.mxu0 %vm10654_vm4, %v14557_v8 }
 0x23f   : > { %v4816_v12 = vadd.f32 %v4815_v55, %v4573_v13 }
 0x240   : > { %v12995_v34 = vpop.f32.mrf.mxu0  ;;  %v12997_v9 = vpop.f32.mrf.mxu1 }
 0x241   : > { %v12967_v39 = vadd.f32 %v12769_v28, %v4816_v12  ;;  %9568 = vmatmul.mubr.msk.f32.gmra.mxu0 %vm4940_vm5, %v4914_v42 }
 0x242   : > { %9570 = vmatprep.mubr.msk.f32.mxu0 %vm10654_vm4, %v14557_v8 }
 0x243   : > { %5223 = vrot.lane.b32.xlu1 %v12967_v39, %s10653_s24  ;;  %v4924_v59 = vmax.f32 %v12967_v39, 0.0 }
 0x245   : > { %9571 = vmatmul.mubr.msk.f32.gmra.mxu0 %vm4940_vm5, %v4915_v10 }
 0x246   : > { %9573 = vmatprep.mubr.msk.f32.mxu0 %vm10654_vm4, %v14557_v8 }
 0x249   : > { %9574 = vmatmul.mubr.msk.f32.gmra.mxu0 %vm4940_vm5, %v4916_v21 }
 0x24a   : > { %9576 = vmatprep.mubr.msk.f32.mxu0 %vm10654_vm4, %v14557_v8 }
 0x24d   : > { %9577 = vmatmul.mubr.msk.f32.gmra.mxu0 %vm4940_vm5, %v4917_v17 }
 0x24e   : > { %9579 = vmatprep.mubr.msk.f32.mxu0 %vm10654_vm4, %v14557_v8 }
 0x251   : > { %9580 = vmatmul.mubr.msk.f32.gmra.mxu0 %vm4940_vm5, %v4918_v36 }
 0x252   : > { %9582 = vmatprep.mubr.msk.f32.mxu0 %vm10654_vm4, %v14557_v8 }
 0x255   : > { %9583 = vmatmul.mubr.msk.f32.gmra.mxu0 %vm4940_vm5, %v4919_v16 }
 0x256   : > { %9585 = vmatprep.mubr.msk.f32.mxu0 %vm10654_vm4, %v14557_v8 }
 0x259   : > { %9586 = vmatmul.mubr.msk.f32.gmra.mxu0 %vm4940_vm5, %v4920_v4 }
 0x25a   : > { %9588 = vmatprep.mubr.msk.f32.mxu0 %vm10654_vm4, %v14557_v8 }
 0x25d   : > { %v4579_v51 = vpop.f32.mrf.mxu0  ;;  %v4821_v32 = vpop.f32.mrf.mxu1  ;;  %9589 = vmatmul.mubr.msk.f32.gmra.mxu0 %vm4940_vm5, %v4921_v23 }
 0x25e   : > { %v4822_v63 = vadd.f32 %v4821_v32, %v4579_v51  ;;  %9591 = vmatprep.mubr.msk.f32.mxu0 %vm10654_vm4, %v14557_v8 }
 0x25f   : > { %v13027_v60 = vpop.f32.mrf.mxu0  ;;  %v13029_v37 = vpop.f32.mrf.mxu1 }
 0x260   : > { %v13006_v20 = vadd.f32 %v12769_v28, %v4822_v63 }
 0x261   : > { %9592 = vmatmul.mubr.msk.f32.gmra.mxu0 %vm4940_vm5, %v4922_v52 }
 0x262   : > { %5225 = vrot.lane.b32.xlu0 %v13006_v20, %s10653_s24  ;;  %9594 = vmatprep.mubr.msk.f32.mxu0 %vm10654_vm4, %v14557_v8  ;;  %v4925_v30 = vmax.f32 %v13006_v20, 0.0 }
 0x265   : > { %9595 = vmatmul.mubr.msk.f32.gmra.mxu0 %vm4940_vm5, %v4923_v3 }
 0x266   : > { %9597 = vmatprep.mubr.msk.f32.mxu0 %vm10654_vm4, %v14557_v8 }
 0x269   : > { %9598 = vmatmul.mubr.msk.f32.gmra.mxu0 %vm4940_vm5, %v4924_v59 }
 0x26a   : > { %9600 = vmatprep.mubr.msk.f32.mxu0 %vm10654_vm4, %v14557_v8 }
 0x26d   : > { %9601 = vmatmul.mubr.msk.f32.gmra.mxu0 %vm4940_vm5, %v4925_v30  ;;  %v8944_v30 = vld [vmem:[%s14550_s5 + $0x38] sm:$0xff] }
 0x26e   : > { %9603 = vmatprep.mubr.msk.f32.mxu0 %vm10654_vm4, %v14557_v8  ;;  %9622 = vmatpush3.msra.mxu1 %v8944_v30 }
 0x26f   : > { %9623 = vmatprep.subr.mxu1 %v14557_v8 }
 0x275   : > { %v4585_v1 = vpop.f32.mrf.mxu0 }
 0x276   : > { %v4827_v27 = vpop.f32.mrf.mxu1 }
 0x277   : > { %v4828_v13 = vadd.f32 %v4827_v27, %v4585_v1  ;;  %v13040_v42 = vpop.f32.mrf.mxu0 }
 0x278   : > { %v13042_v10 = vpop.f32.mrf.mxu1 }
 0x279   : > { %v13032_v55 = vadd.f32 %v12769_v28, %v4828_v13 }
 0x27b   : > { %5227 = vrot.lane.b32.xlu1 %v13032_v55, %s10653_s24  ;;  %v4926_v12 = vmax.f32 %v13032_v55, 0.0 }
 0x27d   : > { %9604 = vmatmul.mubr.msk.f32.gmra.mxu0 %vm4940_vm5, %v4926_v12 }
 0x27e   : > { %9606 = vmatprep.mubr.msk.f32.mxu0 %vm10654_vm4, %v14557_v8 }
 0x28d   : > { %v4591_v21 = vpop.f32.mrf.mxu0  ;;  %v4833_v17 = vpop.f32.mrf.mxu1 }
 0x28e   : > { %v4834_v36 = vadd.f32 %v4833_v17, %v4591_v21  ;;  %v8943_v17 = vld [vmem:[%s14550_s5 + $0x30] sm:$0xff] }
 0x28f   : > { %v13053_v23 = vpop.f32.mrf.mxu0  ;;  %v13055_v51 = vpop.f32.mrf.mxu1  ;;  %9624 = vmatpush3.msra.mxu1 %v8943_v17  ;;  %v8941_v17 = vld [vmem:[%s14550_s5 + $0x20] sm:$0xff] }
 0x290   : > { %v13045_v16 = vadd.f32 %v12769_v28, %v4834_v36  ;;  %9625 = vmatprep.subr.mxu1 %v14557_v8 }
 0x292   : > { %5229 = vrot.lane.b32.xlu0 %v13045_v16, %s10653_s24  ;;  %v4927_v4 = vmax.f32 %v13045_v16, 0.0 }
 0x294   : > { %9607 = vmatmul.mubr.msk.f32.gmra.mxu0 %vm4940_vm5, %v4927_v4 }
 0x295   : > { %9609 = vmatprep.mubr.msk.f32.mxu0 %vm10654_vm4, %v14557_v8 }
 0x2ac   : > { %v4597_v32 = vpop.f32.mrf.mxu0  ;;  %v4839_v63 = vpop.f32.mrf.mxu1 }
 0x2ad   : > { %v4840_v52 = vadd.f32 %v4839_v63, %v4597_v32  ;;  %v8942_v32 = vld [vmem:[%s14550_s5 + $0x28] sm:$0xff] }
 0x2ae   : > { %v13070_v1 = vpop.f32.mrf.mxu0  ;;  %v13072_v27 = vpop.f32.mrf.mxu1  ;;  %9626 = vmatpush3.msra.mxu1 %v8942_v32 }
 0x2af   : > { %v13058_v3 = vadd.f32 %v12769_v28, %v4840_v52  ;;  %14596 = vst [vmem:[#allocation2_spill] sm:$0xff] %v13070_v1  ;;  %14597 = vst [vmem:[#allocation3_spill] sm:$0xff] %v13072_v27  ;;  %9627 = vmatprep.subr.mxu1 %v14557_v8  ;;  %v14601_v1 = vmov 0.0  }
 0x2b0   : > { %9628 = vmatpush3.msra.mxu1 %v8941_v17 }
 0x2b1   : > { %5231 = vrot.lane.b32.xlu1 %v13058_v3, %s10653_s24  ;;  %v4928_v59 = vmax.f32 %v13058_v3, 0.0  ;;  %9751 = vmatprep.subr.mxu1 %v14557_v8 }
 0x2b3   : > { %9610 = vmatmul.mubr.msk.f32.gmra.mxu0 %vm4940_vm5, %v4928_v59 }
 0x2b4   : > { %9612 = vmatprep.mubr.msk.f32.mxu0 %vm10654_vm4, %v14557_v8 }
 0x2c5   : > { %v4603_v13 = vpop.f32.mrf.mxu0  ;;  %v4845_v12 = vpop.f32.mrf.mxu1 }
 0x2c6   : > { %v4846_v21 = vadd.f32 %v4845_v12, %v4603_v13 }
 0x2c7   : > { %v13091_v63 = vpop.f32.mrf.mxu0  ;;  %v13093_v52 = vpop.f32.mrf.mxu1 }
 0x2c8   : > { %v13078_v36 = vadd.f32 %v12769_v28, %v4846_v21 }
 0x2ca   : > { %5233 = vrot.lane.b32.xlu0 %v13078_v36, %s10653_s24  ;;  %v4929_v4 = vmax.f32 %v13078_v36, 0.0 }
 0x2cc   : > { %9613 = vmatmul.mubr.msk.f32.gmra.mxu0 %vm4940_vm5, %v4929_v4 }
 0x2cd   : > { %9615 = vmatprep.mubr.msk.f32.mxu0 %vm10654_vm4, %v14557_v8 }
 0x2e0   : > { %v4609_v59 = vpop.f32.mrf.mxu0  ;;  %v4851_v30 = vpop.f32.mrf.mxu1 }
 0x2e1   : > { %v4852_v13 = vadd.f32 %v4851_v30, %v4609_v59  ;;  %v13125_v59 = vld [vmem:[%s14551_s6] sm:$0x3f] }
 0x2e2   : > { %v13116_v4 = vpop.f32.mrf.mxu0  ;;  %v13118_v32 = vpop.f32.mrf.mxu1  ;;  %14600 = vst [vmem:[#allocation6_spill] sm:$0xff] %v13125_v59  ;;  %v13130_v17 = vrot.slane %v13125_v59, %v4866_v18 }
 0x2e3   : > { %v13096_v12 = vadd.f32 %v12769_v28, %v4852_v13  ;;  %14598 = vst [vmem:[#allocation4_spill] sm:$0xff] %v13116_v4  ;;  %14599 = vst [vmem:[#allocation5_spill] sm:$0xff] %v13118_v32 }
 0x2e5   : > { %5235 = vrot.lane.b32.xlu1 %v13096_v12, %s10653_s24  ;;  %v4930_v21 = vmax.f32 %v13096_v12, 0.0 }
 0x2e7   : > { %9616 = vmatmul.mubr.msk.f32.gmra.mxu0 %vm4940_vm5, %v4930_v21 }
 0x2e8   : > { %9618 = vmatprep.mubr.msk.f32.mxu0 %vm10654_vm4, %v14557_v8 }
 0x2e9   : > { %5744 = vrot.lane.b32.xlu1 %v12808_v43, %s10655_s14 }
 0x2ed   : > { %5748 = vrot.lane.b32.xlu1 %v12848_v49, %s10655_s14 }
 0x2f1   : > { %5752 = vrot.lane.b32.xlu1 %v12872_v26, %s10655_s14 }
 0x2f5   : > { %5756 = vrot.lane.b32.xlu1 %v12897_v14, %s10655_s14 }
 0x2f9   : > { %5760 = vrot.lane.b32.xlu1 %v12917_v22, %s10655_s14  ;;  %v4615_v30 = vpop.f32.mrf.mxu0  ;;  %v4857_v13 = vpop.f32.mrf.mxu1 }
 0x2fa   : > { %v4858_v21 = vadd.f32 %v4857_v13, %v4615_v30 }
 0x2fb   : > { %v13132_v8 = vpop.f32.mrf.mxu0 }
 0x2fc   : > { %v13137_v32 = vadd.f32 %v12769_v28, %v4858_v21 }
 0x2fd   : > { %5764 = vrot.lane.b32.xlu1 %v12946_v33, %s10655_s14  ;;  %v5064_v4 = vpop.f32.mrf.mxu0 }
 0x2fe   : > { %5237 = vrot.lane.b32.xlu0 %v13137_v32, %s10653_s24  ;;  %v4931_v27 = vmax.f32 %v13137_v32, 0.0  ;;  %v5065_v30 = vadd.f32 %v5064_v4, %v13130_v17 }
 0x2ff   : > { %v9566_v18 = vpop.f32.mrf.mxu0 }
 0x300   : > { %9619 = vmatmul.mubr.msk.f32.gmra.mxu0 %vm4940_vm5, %v4931_v27  ;;  %v5158_v13 = vmax.f32 %v5065_v30, 0.0 }
 0x301   : > { %5768 = vrot.lane.b32.xlu1 %v13006_v20, %s10655_s14  ;;  %v5069_v59 = vpop.f32.mrf.mxu0  ;;  %9694 = vmatprep.mubr.msk.f32.mxu0 %vm10654_vm4, %v14601_v1 }
 0x302   : > { %5746 = vrot.lane.b32.xlu0 %v12823_v35, %s10655_s14  ;;  %v5070_v28 = vadd.f32 %v5069_v59, %v13130_v17  ;;  %9630 = vmatmul.mubr.msk.f32.vlgmr.msra.gmra.mxu1 %vm4940_vm5, %v5158_v13 }
 0x303   : > { %v9569_v4 = vpop.f32.mrf.mxu0  ;;  %9632 = vmatprep.mubr.msk.f32.mxu1 %vm10654_vm4, %v14601_v1 }
 0x304   : > { %v5159_v27 = vmax.f32 %v5070_v28, 0.0 }
 0x305   : > { %5772 = vrot.lane.b32.xlu1 %v13045_v16, %s10655_s14  ;;  %v5074_v21 = vpop.f32.mrf.mxu0 }
 0x306   : > { %5750 = vrot.lane.b32.xlu0 %v12867_v5, %s10655_s14  ;;  %v5075_v30 = vadd.f32 %v5074_v21, %v13130_v17  ;;  %9633 = vmatmul.mubr.msk.f32.gmra.mxu1 %vm4940_vm5, %v5159_v27 }
 0x307   : > { %v9572_v59 = vpop.f32.mrf.mxu0  ;;  %9635 = vmatprep.mubr.msk.f32.mxu1 %vm10654_vm4, %v14601_v1 }
 0x308   : > { %v5160_v18 = vmax.f32 %v5075_v30, 0.0 }
 0x309   : > { %5776 = vrot.lane.b32.xlu1 %v13078_v36, %s10655_s14  ;;  %v5079_v13 = vpop.f32.mrf.mxu0 }
 0x30a   : > { %5754 = vrot.lane.b32.xlu0 %v12894_v53, %s10655_s14  ;;  %v5080_v28 = vadd.f32 %v5079_v13, %v13130_v17  ;;  %9636 = vmatmul.mubr.msk.f32.gmra.mxu1 %vm4940_vm5, %v5160_v18 }
 0x30b   : > { %v9575_v4 = vpop.f32.mrf.mxu0  ;;  %9638 = vmatprep.mubr.msk.f32.mxu1 %vm10654_vm4, %v14601_v1 }
 0x30c   : > { %v5161_v27 = vmax.f32 %v5080_v28, 0.0 }
 0x30d   : > { %5780 = vrot.lane.b32.xlu1 %v13137_v32, %s10655_s14  ;;  %v5084_v21 = vpop.f32.mrf.mxu0 }
 0x30e   : > { %5758 = vrot.lane.b32.xlu0 %v12912_v48, %s10655_s14  ;;  %v5085_v30 = vadd.f32 %v5084_v21, %v13130_v17  ;;  %9639 = vmatmul.mubr.msk.f32.gmra.mxu1 %vm4940_vm5, %v5161_v27 }
 0x30f   : > { %v9578_v59 = vpop.f32.mrf.mxu0  ;;  %9641 = vmatprep.mubr.msk.f32.mxu1 %vm10654_vm4, %v14601_v1 }
 0x310   : > { %v5162_v18 = vmax.f32 %v5085_v30, 0.0 }
 0x311   : > { %6289 = vrot.lane.b32.xlu1 %v12823_v35, %s10656_s20  ;;  %v5089_v13 = vpop.f32.mrf.mxu0 }
 0x312   : > { %5762 = vrot.lane.b32.xlu0 %v12924_v56, %s10655_s14  ;;  %v5090_v28 = vadd.f32 %v5089_v13, %v13130_v17  ;;  %9642 = vmatmul.mubr.msk.f32.gmra.mxu1 %vm4940_vm5, %v5162_v18 }
 0x313   : > { %v9581_v4 = vpop.f32.mrf.mxu0  ;;  %9644 = vmatprep.mubr.msk.f32.mxu1 %vm10654_vm4, %v14601_v1 }
 0x314   : > { %v5163_v35 = vmax.f32 %v5090_v28, 0.0 }
 0x315   : > { %6293 = vrot.lane.b32.xlu1 %v12867_v5, %s10656_s20  ;;  %v5094_v27 = vpop.f32.mrf.mxu0 }
 0x316   : > { %5766 = vrot.lane.b32.xlu0 %v12967_v39, %s10655_s14  ;;  %v5095_v21 = vadd.f32 %v5094_v27, %v13130_v17  ;;  %9645 = vmatmul.mubr.msk.f32.gmra.mxu1 %vm4940_vm5, %v5163_v35 }
 0x317   : > { %v9584_v30 = vpop.f32.mrf.mxu0  ;;  %9647 = vmatprep.mubr.msk.f32.mxu1 %vm10654_vm4, %v14601_v1 }
 0x318   : > { %v5164_v5 = vmax.f32 %v5095_v21, 0.0 }
 0x319   : > { %6297 = vrot.lane.b32.xlu1 %v12894_v53, %s10656_s20  ;;  %v5099_v59 = vpop.f32.mrf.mxu0 }
 0x31a   : > { %5770 = vrot.lane.b32.xlu0 %v13032_v55, %s10655_s14  ;;  %v5100_v18 = vadd.f32 %v5099_v59, %v13130_v17  ;;  %9648 = vmatmul.mubr.msk.f32.gmra.mxu1 %vm4940_vm5, %v5164_v5 }
 0x31b   : > { %v9587_v13 = vpop.f32.mrf.mxu0  ;;  %9650 = vmatprep.mubr.msk.f32.mxu1 %vm10654_vm4, %v14601_v1 }
 0x31c   : > { %v5165_v53 = vmax.f32 %v5100_v18, 0.0  ;;  %v4870_v13 = vsub.s32 1, %v12716_v41 }
 0x31d   : > { %6301 = vrot.lane.b32.xlu1 %v12912_v48, %s10656_s20  ;;  %v5104_v28 = vpop.f32.mrf.mxu0 }
 0x31e   : > { %5774 = vrot.lane.b32.xlu0 %v13058_v3, %s10655_s14  ;;  %v5105_v4 = vadd.f32 %v5104_v28, %v13130_v17  ;;  %9651 = vmatmul.mubr.msk.f32.gmra.mxu1 %vm4940_vm5, %v5165_v53 }
 0x31f   : > { %v9590_v35 = vpop.f32.mrf.mxu0  ;;  %9653 = vmatprep.mubr.msk.f32.mxu1 %vm10654_vm4, %v14601_v1 }
 0x320   : > { %v5166_v48 = vmax.f32 %v5105_v4, 0.0  ;;  %v4752_v4 = vadd.f32 %v12542_v47, %v12540_v19  ;;  %v13242_v35 = vrot.slane %v12750_v46, %v4870_v13  ;;  %v4764_v46 = vadd.f32 %v12609_v62, %v12607_v29 }
 0x321   : > { %6305 = vrot.lane.b32.xlu1 %v12924_v56, %s10656_s20  ;;  %v5109_v27 = vpop.f32.mrf.mxu0  ;;  %v4788_v62 = vadd.f32 %v12816_v24, %v12814_v50  ;;  %v4812_v24 = vadd.f32 %v12953_v58, %v12951_v7  ;;  %v4836_v58 = vadd.f32 %v13055_v51, %v13053_v23  ;;  %v4782_v23 = vadd.f32 %v12756_v15, %v12754_v61 }
 0x322   : > { %5778 = vrot.lane.b32.xlu0 %v13096_v12, %s10655_s14  ;;  %v5110_v21 = vadd.f32 %v5109_v27, %v13130_v17  ;;  %9654 = vmatmul.mubr.msk.f32.gmra.mxu1 %vm4940_vm5, %v5166_v48  ;;  %v13253_v47 = vadd.f32 %v13242_v35, %v4752_v4  ;;  %v4800_v27 = vadd.f32 %v12901_v11, %v12899_v40  ;;  %v8967_v4 = vld [vmem:[%s14550_s5 + $0x58] sm:$0xff] }
 0x323   : > { %v9593_v30 = vpop.f32.mrf.mxu0  ;;  %9656 = vmatprep.mubr.msk.f32.mxu1 %vm10654_vm4, %v14601_v1  ;;  %v13305_v40 = vadd.f32 %v13242_v35, %v4812_v24  ;;  %v4824_v11 = vadd.f32 %v13029_v37, %v13027_v60  ;;  %v4770_v60 = vadd.f32 %v12662_v31, %v12660_v57  ;;  %v4859_v37 = vpop.f32.mrf.mxu1  ;;  %v4794_v61 = vadd.f32 %v12856_v25, %v12854_v44 }
 0x324   : > { %v5167_v56 = vmax.f32 %v5110_v21, 0.0  ;;  %v13296_v50 = vadd.f32 %v13242_v35, %v4800_v27  ;;  %v4860_v31 = vadd.f32 %v4859_v37, %v13132_v8  ;;  %v4806_v44 = vadd.f32 %v12935_v2, %v12933_v6  ;;  %9687 = vmatpush3.msra.mxu0 %v8967_v4  ;;  %v5202_v27 = vpop.permute.xlu0 %5201 }
 0x325   : > { %6309 = vrot.lane.b32.xlu1 %v12967_v39, %s10656_s20  ;;  %v5114_v5 = vpop.f32.mrf.mxu0  ;;  %v13316_v7 = vadd.f32 %v13242_v35, %v4824_v11  ;;  %v13368_v8 = vadd.f32 %v13242_v35, %v4794_v61  ;;  %v4818_v30 = vadd.f32 %v12997_v9, %v12995_v34  ;;  %v4830_v2 = vadd.f32 %v13042_v10, %v13040_v42  ;;  %v14602_v9 = vld [vmem:[#allocation2_spill] sm:$0xff]  ;;  %v14604_v10 = vld [vmem:[#allocation4_spill] sm:$0xff] }
 0x326   : > { %6287 = vrot.lane.b32.xlu0 %v12808_v43, %s10656_s20  ;;  %v5115_v59 = vadd.f32 %v5114_v5, %v13130_v17  ;;  %9657 = vmatmul.mubr.msk.f32.gmra.mxu1 %vm4940_vm5, %v5167_v56  ;;  %v13377_v25 = vadd.f32 %v13242_v35, %v4806_v44  ;;  %v14603_v56 = vld [vmem:[#allocation3_spill] sm:$0xff] }
 0x327   : > { %v9596_v18 = vpop.f32.mrf.mxu0  ;;  %9659 = vmatprep.mubr.msk.f32.mxu1 %vm10654_vm4, %v14601_v1  ;;  %v13386_v6 = vadd.f32 %v13242_v35, %v4818_v30  ;;  %v13395_v34 = vadd.f32 %v13242_v35, %v4830_v2  ;;  %v4842_v5 = vadd.f32 %v14603_v56, %v14602_v9  ;;  %9688 = vmatprep.subr.mxu0 %v14601_v1 }
 0x328   : > { %v5168_v39 = vmax.f32 %v5115_v59, 0.0  ;;  %v14605_v59 = vld [vmem:[#allocation5_spill] sm:$0xff] }
 0x329   : > { %6313 = vrot.lane.b32.xlu1 %v13032_v55, %s10656_s20  ;;  %v5119_v53 = vpop.f32.mrf.mxu0  ;;  %v13404_v42 = vadd.f32 %v13242_v35, %v4842_v5  ;;  %v4854_v18 = vadd.f32 %v14605_v59, %v14604_v10 }
 0x32a   : > { %6291 = vrot.lane.b32.xlu0 %v12848_v49, %s10656_s20  ;;  %v5120_v43 = vadd.f32 %v5119_v53, %v13130_v17  ;;  %9660 = vmatmul.mubr.msk.f32.gmra.mxu1 %vm4940_vm5, %v5168_v39 }
 0x32b   : > { %v9599_v28 = vpop.f32.mrf.mxu0  ;;  %9662 = vmatprep.mubr.msk.f32.mxu1 %vm10654_vm4, %v14601_v1  ;;  %v13413_v39 = vadd.f32 %v13242_v35, %v4854_v18 }
 0x32c   : > { %v5169_v55 = vmax.f32 %v5120_v43, 0.0 }
 0x32d   : > { %6317 = vrot.lane.b32.xlu1 %v13058_v3, %s10656_s20  ;;  %v5124_v49 = vpop.f32.mrf.mxu0 }
 0x32e   : > { %6295 = vrot.lane.b32.xlu0 %v12872_v26, %s10656_s20  ;;  %v5125_v48 = vadd.f32 %v5124_v49, %v13130_v17  ;;  %9663 = vmatmul.mubr.msk.f32.gmra.mxu1 %vm4940_vm5, %v5169_v55  ;;  %v13265_v26 = vadd.f32 %v13242_v35, %v4764_v46  ;;  %v8966_v49 = vld [vmem:[%s14550_s5 + $0x50] sm:$0xff]  ;;  %v8964_v46 = vld [vmem:[%s14550_s5 + $0x40] sm:$0xff] }
 0x32f   : > { %v9602_v3 = vpop.f32.mrf.mxu0  ;;  %9665 = vmatprep.mubr.msk.f32.mxu1 %vm10654_vm4, %v14601_v1  ;;  %9689 = vmatpush3.msra.mxu0 %v8966_v49 }
 0x330   : > { %v5170_v19 = vmax.f32 %v5125_v48, 0.0  ;;  %v8965_v48 = vld [vmem:[%s14550_s5 + $0x48] sm:$0xff]  ;;  %9690 = vmatprep.subr.mxu0 %v14601_v1 }
 0x331   : > { %6321 = vrot.lane.b32.xlu1 %v13096_v12, %s10656_s20  ;;  %v4776_v12 = vadd.f32 %v12706_v54, %v12704_v45  ;;  %9691 = vmatpush3.msra.mxu0 %v8965_v48 }
 0x332   : > { %6299 = vrot.lane.b32.xlu0 %v12897_v14, %s10656_s20  ;;  %9666 = vmatmul.mubr.msk.f32.gmra.mxu1 %vm4940_vm5, %v5170_v19 }
 0x333   : > { %9668 = vmatprep.mubr.msk.f32.mxu1 %vm10654_vm4, %v14601_v1  ;;  %v13274_v29 = vadd.f32 %v13242_v35, %v4776_v12  ;;  %9692 = vmatprep.subr.mxu0 %v14601_v1 }
 0x334   : > { %9693 = vmatpush3.msra.mxu0 %v8964_v46 }
 0x335   : > { %7335 = vrot.lane.b32.xlu1 %v13253_v47, %s10653_s24  ;;  %9816 = vmatprep.subr.mxu0 %v14601_v1 }
 0x336   : > { %6303 = vrot.lane.b32.xlu0 %v12917_v22, %s10656_s20  ;;  %v13284_v22 = vadd.f32 %v13242_v35, %v4788_v62 }
 0x339   : > { %7339 = vrot.lane.b32.xlu1 %v13265_v26, %s10653_s24 }
 0x33a   : > { %6307 = vrot.lane.b32.xlu0 %v12946_v33, %s10656_s20  ;;  %v4758_v33 = vadd.f32 %v12571_v38, %v12569_v0  ;;  %v13330_v0 = vadd.f32 %v13242_v35, %v4836_v58  ;;  %v4848_v38 = vadd.f32 %v13093_v52, %v13091_v63  ;;  %v13353_v52 = vadd.f32 %v13242_v35, %v4782_v23  ;;  %v5204_v23 = vpop.permute.xlu0 %5203 }
 0x33c   : > { %v13344_v57 = vadd.f32 %v13242_v35, %v4848_v38 }
 0x33d   : > { %v5129_v14 = vpop.f32.mrf.mxu0  ;;  %7343 = vrot.lane.b32.xlu1 %v13274_v29, %s10653_s24 }
 0x33e   : > { %v5130_v45 = vadd.f32 %v5129_v14, %v13130_v17  ;;  %6311 = vrot.lane.b32.xlu0 %v13006_v20, %s10656_s20  ;;  %v13325_v20 = vadd.f32 %v13242_v35, %v4758_v33  ;;  %v5210_v59 = vpop.permute.xlu0 %5209 }
 0x33f   : > { %v9605_v54 = vpop.f32.mrf.mxu0 }
 0x340   : > { %v5171_v21 = vmax.f32 %v5130_v45, 0.0 }
 0x341   : > { %7347 = vrot.lane.b32.xlu1 %v13284_v22, %s10653_s24 }
 0x342   : > { %9669 = vmatmul.mubr.msk.f32.gmra.mxu1 %vm4940_vm5, %v5171_v21  ;;  %6315 = vrot.lane.b32.xlu0 %v13045_v16, %s10656_s20  ;;  %v13339_v16 = vadd.f32 %v13242_v35, %v4770_v60 }
 0x343   : > { %9671 = vmatprep.mubr.msk.f32.mxu1 %vm10654_vm4, %v14601_v1 }
 0x345   : > { %7351 = vrot.lane.b32.xlu1 %v13296_v50, %s10653_s24 }
 0x346   : > { %6319 = vrot.lane.b32.xlu0 %v13078_v36, %s10656_s20 }
 0x349   : > { %7355 = vrot.lane.b32.xlu1 %v13305_v40, %s10653_s24 }
 0x34a   : > { %6323 = vrot.lane.b32.xlu0 %v13137_v32, %s10656_s20  ;;  %v13358_v32 = vadd.f32 %v13242_v35, %v4860_v31 }
 0x34d   : > { %7359 = vrot.lane.b32.xlu1 %v13316_v7, %s10653_s24 }
 0x34e   : > { %7337 = vrot.lane.b32.xlu0 %v13325_v20, %s10653_s24 }
 0x351   : > { %7363 = vrot.lane.b32.xlu1 %v13330_v0, %s10653_s24 }
 0x352   : > { %7341 = vrot.lane.b32.xlu0 %v13339_v16, %s10653_s24 }
 0x354   : > { %v5134_v51 = vpop.f32.mrf.mxu0 }
 0x355   : > { %v5135_v36 = vadd.f32 %v5134_v51, %v13130_v17  ;;  %7367 = vrot.lane.b32.xlu1 %v13344_v57, %s10653_s24 }
 0x356   : > { %v9608_v63 = vpop.f32.mrf.mxu0  ;;  %7345 = vrot.lane.b32.xlu0 %v13353_v52, %s10653_s24 }
 0x357   : > { %v5172_v15 = vmax.f32 %v5135_v36, 0.0  ;;  %v5206_v36 = vpop.permute.xlu1 %5205 }
 0x359   : > { %9672 = vmatmul.mubr.msk.f32.gmra.mxu1 %vm4940_vm5, %v5172_v15  ;;  %7371 = vrot.lane.b32.xlu1 %v13358_v32, %s10653_s24 }
 0x35a   : > { %9674 = vmatprep.mubr.msk.f32.mxu1 %vm10654_vm4, %v14601_v1  ;;  %7349 = vrot.lane.b32.xlu0 %v13368_v8, %s10653_s24 }
 0x35b   : > { %v5208_v2 = vpop.permute.xlu1 %5207 }
 0x35d   : > { %7880 = vrot.lane.b32.xlu1 %v13325_v20, %s10655_s14 }
 0x35e   : > { %7353 = vrot.lane.b32.xlu0 %v13377_v25, %s10653_s24 }
 0x361   : > { %7884 = vrot.lane.b32.xlu1 %v13339_v16, %s10655_s14 }
 0x362   : > { %7357 = vrot.lane.b32.xlu0 %v13386_v6, %s10653_s24 }
 0x365   : > { %7888 = vrot.lane.b32.xlu1 %v13353_v52, %s10655_s14 }
 0x366   : > { %7361 = vrot.lane.b32.xlu0 %v13395_v34, %s10653_s24 }
 0x369   : > { %7892 = vrot.lane.b32.xlu1 %v13368_v8, %s10655_s14 }
 0x36a   : > { %7365 = vrot.lane.b32.xlu0 %v13404_v42, %s10653_s24 }
 0x36d   : > { %7896 = vrot.lane.b32.xlu1 %v13377_v25, %s10655_s14 }
 0x36e   : > { %7369 = vrot.lane.b32.xlu0 %v13413_v39, %s10653_s24 }
 0x371   : > { %7900 = vrot.lane.b32.xlu1 %v13386_v6, %s10655_s14 }
 0x372   : > { %7878 = vrot.lane.b32.xlu0 %v13253_v47, %s10655_s14 }
 0x373   : > { %v5139_v53 = vpop.f32.mrf.mxu0 }
 0x374   : > { %v5140_v43 = vadd.f32 %v5139_v53, %v13130_v17 }
 0x375   : > { %v9611_v28 = vpop.f32.mrf.mxu0  ;;  %7904 = vrot.lane.b32.xlu1 %v13395_v34, %s10655_s14 }
 0x376   : > { %v5173_v55 = vmax.f32 %v5140_v43, 0.0  ;;  %7882 = vrot.lane.b32.xlu0 %v13265_v26, %s10655_s14 }
 0x378   : > { %9675 = vmatmul.mubr.msk.f32.gmra.mxu1 %vm4940_vm5, %v5173_v55  ;;  %v5212_v55 = vpop.permute.xlu1 %5211 }
 0x379   : > { %9677 = vmatprep.mubr.msk.f32.mxu1 %vm10654_vm4, %v14601_v1  ;;  %7908 = vrot.lane.b32.xlu1 %v13404_v42, %s10655_s14 }
 0x37a   : > { %7886 = vrot.lane.b32.xlu0 %v13274_v29, %s10655_s14 }
 0x37d   : > { %7912 = vrot.lane.b32.xlu1 %v13413_v39, %s10655_s14 }
 0x37e   : > { %7890 = vrot.lane.b32.xlu0 %v13284_v22, %s10655_s14 }
 0x382   : > { %7894 = vrot.lane.b32.xlu0 %v13296_v50, %s10655_s14 }
 0x386   : > { %7898 = vrot.lane.b32.xlu0 %v13305_v40, %s10655_s14 }
 0x38a   : > { %7902 = vrot.lane.b32.xlu0 %v13316_v7, %s10655_s14 }
 0x38c   : > { %v5144_v35 = vpop.f32.mrf.mxu0 }
 0x38d   : > { %v5145_v3 = vadd.f32 %v5144_v35, %v13130_v17 }
 0x38e   : > { %v9614_v19 = vpop.f32.mrf.mxu0  ;;  %7906 = vrot.lane.b32.xlu0 %v13330_v0, %s10655_s14 }
 0x38f   : > { %v5174_v12 = vmax.f32 %v5145_v3, 0.0  ;;  %v5214_v3 = vpop.permute.xlu0 %5213 }
 0x391   : > { %9678 = vmatmul.mubr.msk.f32.gmra.mxu1 %vm4940_vm5, %v5174_v12 }
 0x392   : > { %9680 = vmatprep.mubr.msk.f32.mxu1 %vm10654_vm4, %v14601_v1  ;;  %7910 = vrot.lane.b32.xlu0 %v13344_v57, %s10655_s14 }
 0x396   : > { %7914 = vrot.lane.b32.xlu0 %v13358_v32, %s10655_s14 }
 0x3a7   : > { %v5149_v62 = vpop.f32.mrf.mxu0 }
 0x3a8   : > { %v5150_v14 = vadd.f32 %v5149_v62, %v13130_v17 }
 0x3a9   : > { %v9617_v45 = vpop.f32.mrf.mxu0 }
 0x3aa   : > { %v5175_v54 = vmax.f32 %v5150_v14, 0.0  ;;  %v5216_v14 = vpop.permute.xlu1 %5215 }
 0x3ac   : > { %9681 = vmatmul.mubr.msk.f32.gmra.mxu1 %vm4940_vm5, %v5175_v54 }
 0x3ad   : > { %9683 = vmatprep.mubr.msk.f32.mxu1 %vm10654_vm4, %v14601_v1 }
 0x3c0   : > { %v5154_v21 = vpop.f32.mrf.mxu0 }
 0x3c1   : > { %v5155_v24 = vadd.f32 %v5154_v21, %v13130_v17 }
 0x3c2   : > { %v9620_v11 = vpop.f32.mrf.mxu0  ;;  %v5381_v33 = vpop.f32.mrf.mxu1 }
 0x3c3   : > { %v5176_v58 = vmax.f32 %v5155_v24, 0.0  ;;  %v5382_v60 = vadd.f32 %v5381_v33, %v5202_v27  ;;  %v5218_v24 = vpop.permute.xlu0 %5217 }
 0x3c4   : > { %v9631_v38 = vpop.f32.mrf.mxu1 }
 0x3c5   : > { %9684 = vmatmul.mubr.msk.f32.gmra.mxu1 %vm4940_vm5, %v5176_v58  ;;  %v5475_v37 = vmax.f32 %v5382_v60, 0.0  ;;  %v5220_v38 = vpop.permute.xlu1 %5219 }
 0x3c6   : > { %v5386_v31 = vpop.f32.mrf.mxu1  ;;  %9759 = vmatprep.mubr.msk.f32.mxu1 %vm10654_vm4, %v14601_v1 }
 0x3c7   : > { %v5387_v51 = vadd.f32 %v5386_v31, %v5204_v23  ;;  %9695 = vmatmul.mubr.msk.f32.vlgmr.msra.gmra.mxu0 %vm4940_vm5, %v5475_v37 }
 0x3c8   : > { %v9634_v63 = vpop.f32.mrf.mxu1  ;;  %9697 = vmatprep.mubr.msk.f32.mxu0 %vm10654_vm4, %v14601_v1 }
 0x3c9   : > { %v5476_v17 = vmax.f32 %v5387_v51, 0.0 }
 0x3ca   : > { %v5391_v61 = vpop.f32.mrf.mxu1 }
 0x3cb   : > { %v5392_v15 = vadd.f32 %v5391_v61, %v5206_v36  ;;  %9698 = vmatmul.mubr.msk.f32.gmra.mxu0 %vm4940_vm5, %v5476_v17  ;;  %v5222_v36 = vpop.permute.xlu0 %5221 }
 0x3cc   : > { %v9637_v44 = vpop.f32.mrf.mxu1  ;;  %9700 = vmatprep.mubr.msk.f32.mxu0 %vm10654_vm4, %v14601_v1 }
 0x3cd   : > { %v5477_v30 = vmax.f32 %v5392_v15, 0.0  ;;  %v5224_v44 = vpop.permute.xlu1 %5223 }
 0x3ce   : > { %v5396_v9 = vpop.f32.mrf.mxu1 }
 0x3cf   : > { %v5397_v56 = vadd.f32 %v5396_v9, %v5208_v2  ;;  %9701 = vmatmul.mubr.msk.f32.gmra.mxu0 %vm4940_vm5, %v5477_v30 }
 0x3d0   : > { %v9640_v5 = vpop.f32.mrf.mxu1  ;;  %9703 = vmatprep.mubr.msk.f32.mxu0 %vm10654_vm4, %v14601_v1 }
 0x3d1   : > { %v5478_v10 = vmax.f32 %v5397_v56, 0.0  ;;  %v5226_v5 = vpop.permute.xlu0 %5225 }
 0x3d2   : > { %v5401_v18 = vpop.f32.mrf.mxu1 }
 0x3d3   : > { %v5402_v53 = vadd.f32 %v5401_v18, %v5210_v59  ;;  %9704 = vmatmul.mubr.msk.f32.gmra.mxu0 %vm4940_vm5, %v5478_v10 }
 0x3d4   : > { %v9643_v43 = vpop.f32.mrf.mxu1  ;;  %9706 = vmatprep.mubr.msk.f32.mxu0 %vm10654_vm4, %v14601_v1 }
 0x3d5   : > { %v5479_v28 = vmax.f32 %v5402_v53, 0.0  ;;  %v5228_v43 = vpop.permute.xlu1 %5227 }
 0x3d6   : > { %v5406_v4 = vpop.f32.mrf.mxu1 }
 0x3d7   : > { %v5407_v35 = vadd.f32 %v5406_v4, %v5212_v55  ;;  %9707 = vmatmul.mubr.msk.f32.gmra.mxu0 %vm4940_vm5, %v5479_v28 }
 0x3d8   : > { %v9646_v49 = vpop.f32.mrf.mxu1  ;;  %9709 = vmatprep.mubr.msk.f32.mxu0 %vm10654_vm4, %v14601_v1 }
 0x3d9   : > { %v5480_v48 = vmax.f32 %v5407_v35, 0.0  ;;  %v8990_v49 = vld [vmem:[%s14550_s5 + $0x78] sm:$0xff] }
 0x3da   : > { %v5411_v19 = vpop.f32.mrf.mxu1  ;;  %9752 = vmatpush3.msra.mxu1 %v8990_v49 }
 0x3db   : > { %v5412_v46 = vadd.f32 %v5411_v19, %v5214_v3  ;;  %9710 = vmatmul.mubr.msk.f32.gmra.mxu0 %vm4940_vm5, %v5480_v48  ;;  %v8989_v48 = vld [vmem:[%s14550_s5 + $0x70] sm:$0xff]  ;;  %9753 = vmatprep.subr.mxu1 %v14601_v1  ;;  %v8988_v3 = vld [vmem:[%s14550_s5 + $0x68] sm:$0xff]  ;;  %v8987_v19 = vld [vmem:[%s14550_s5 + $0x60] sm:$0xff] }
 0x3dc   : > { %v9649_v12 = vpop.f32.mrf.mxu1  ;;  %9712 = vmatprep.mubr.msk.f32.mxu0 %vm10654_vm4, %v14601_v1  ;;  %9754 = vmatpush3.msra.mxu1 %v8989_v48 }
 0x3dd   : > { %v5481_v62 = vmax.f32 %v5412_v46, 0.0  ;;  %9755 = vmatprep.subr.mxu1 %v14601_v1  ;;  %v5230_v46 = vpop.permute.xlu0 %5229 }
 0x3de   : > { %v5416_v45 = vpop.f32.mrf.mxu1  ;;  %9756 = vmatpush3.msra.mxu1 %v8988_v3 }
 0x3df   : > { %v5417_v54 = vadd.f32 %v5416_v45, %v5216_v14  ;;  %9713 = vmatmul.mubr.msk.f32.gmra.mxu0 %vm4940_vm5, %v5481_v62  ;;  %9757 = vmatprep.subr.mxu1 %v14601_v1 }
 0x3e0   : > { %v9652_v27 = vpop.f32.mrf.mxu1  ;;  %9715 = vmatprep.mubr.msk.f32.mxu0 %vm10654_vm4, %v14601_v1  ;;  %9758 = vmatpush3.msra.mxu1 %v8987_v19 }
 0x3e1   : > { %v5482_v21 = vmax.f32 %v5417_v54, 0.0  ;;  %9881 = vmatprep.subr.mxu1 %v14601_v1  ;;  %v5232_v54 = vpop.permute.xlu1 %5231 }
 0x3e2   : > { %v5421_v11 = vpop.f32.mrf.mxu1 }
 0x3e3   : > { %v5422_v33 = vadd.f32 %v5421_v11, %v5218_v24  ;;  %9716 = vmatmul.mubr.msk.f32.gmra.mxu0 %vm4940_vm5, %v5482_v21 }
 0x3e4   : > { %v9655_v58 = vpop.f32.mrf.mxu1  ;;  %9718 = vmatprep.mubr.msk.f32.mxu0 %vm10654_vm4, %v14601_v1 }
 0x3e5   : > { %v5483_v60 = vmax.f32 %v5422_v33, 0.0  ;;  %v5234_v33 = vpop.permute.xlu0 %5233 }
 0x3e6   : > { %v5426_v37 = vpop.f32.mrf.mxu1 }
 0x3e7   : > { %v5427_v23 = vadd.f32 %v5426_v37, %v5220_v38  ;;  %9719 = vmatmul.mubr.msk.f32.gmra.mxu0 %vm4940_vm5, %v5483_v60 }
 0x3e8   : > { %v9658_v31 = vpop.f32.mrf.mxu1  ;;  %9721 = vmatprep.mubr.msk.f32.mxu0 %vm10654_vm4, %v14601_v1 }
 0x3e9   : > { %v5484_v51 = vmax.f32 %v5427_v23, 0.0  ;;  %v5236_v23 = vpop.permute.xlu1 %5235 }
 0x3ea   : > { %v5431_v63 = vpop.f32.mrf.mxu1 }
 0x3eb   : > { %v5432_v17 = vadd.f32 %v5431_v63, %v5222_v36  ;;  %9722 = vmatmul.mubr.msk.f32.gmra.mxu0 %vm4940_vm5, %v5484_v51 }
 0x3ec   : > { %v9661_v61 = vpop.f32.mrf.mxu1  ;;  %9724 = vmatprep.mubr.msk.f32.mxu0 %vm10654_vm4, %v14601_v1 }
 0x3ed   : > { %v5485_v15 = vmax.f32 %v5432_v17, 0.0  ;;  %v14606_v17 = vld [vmem:[#allocation6_spill] sm:$0xff] }
 0x3ee   : > { %v5436_v30 = vpop.f32.mrf.mxu1  ;;  %v13550_v61 = vrot.slane %v14606_v17, %v4870_v13 }
 0x3ef   : > { %v5437_v2 = vadd.f32 %v5436_v30, %v5224_v44  ;;  %9725 = vmatmul.mubr.msk.f32.gmra.mxu0 %vm4940_vm5, %v5485_v15  ;;  %v5238_v15 = vpop.permute.xlu0 %5237 }
 0x3f0   : > { %v9664_v9 = vpop.f32.mrf.mxu1  ;;  %9727 = vmatprep.mubr.msk.f32.mxu0 %vm10654_vm4, %v14601_v1 }
 0x3f1   : > { %v5486_v56 = vmax.f32 %v5437_v2, 0.0 }
 0x3f2   : > { %v5441_v10 = vpop.f32.mrf.mxu1 }
 0x3f3   : > { %v5442_v59 = vadd.f32 %v5441_v10, %v5226_v5  ;;  %9728 = vmatmul.mubr.msk.f32.gmra.mxu0 %vm4940_vm5, %v5486_v56 }
 0x3f4   : > { %v9667_v18 = vpop.f32.mrf.mxu1  ;;  %9730 = vmatprep.mubr.msk.f32.mxu0 %vm10654_vm4, %v14601_v1 }
 0x3f5   : > { %v5487_v53 = vmax.f32 %v5442_v59, 0.0 }
 0x3f7   : > { %9731 = vmatmul.mubr.msk.f32.gmra.mxu0 %vm4940_vm5, %v5487_v53 }
 0x3f8   : > { %9733 = vmatprep.mubr.msk.f32.mxu0 %vm10654_vm4, %v14601_v1 }
 0x402   : > { %v5446_v28 = vpop.f32.mrf.mxu1 }
 0x403   : > { %v5447_v55 = vadd.f32 %v5446_v28, %v5228_v43 }
 0x404   : > { %v9670_v4 = vpop.f32.mrf.mxu1 }
 0x405   : > { %v5488_v35 = vmax.f32 %v5447_v55, 0.0 }
 0x407   : > { %9734 = vmatmul.mubr.msk.f32.gmra.mxu0 %vm4940_vm5, %v5488_v35 }
 0x408   : > { %9736 = vmatprep.mubr.msk.f32.mxu0 %vm10654_vm4, %v14601_v1 }
 0x419   : > { %v5451_v12 = vpop.f32.mrf.mxu1 }
 0x41a   : > { %v5452_v62 = vadd.f32 %v5451_v12, %v5230_v46 }
 0x41b   : > { %v9673_v14 = vpop.f32.mrf.mxu1 }
 0x41c   : > { %v5489_v45 = vmax.f32 %v5452_v62, 0.0 }
 0x41e   : > { %9737 = vmatmul.mubr.msk.f32.gmra.mxu0 %vm4940_vm5, %v5489_v45 }
 0x41f   : > { %9739 = vmatprep.mubr.msk.f32.mxu0 %vm10654_vm4, %v14601_v1 }
 0x438   : > { %v5456_v27 = vpop.f32.mrf.mxu1 }
 0x439   : > { %v5457_v21 = vadd.f32 %v5456_v27, %v5232_v54 }
 0x43a   : > { %v9676_v24 = vpop.f32.mrf.mxu1 }
 0x43b   : > { %v5490_v11 = vmax.f32 %v5457_v21, 0.0 }
 0x43d   : > { %9740 = vmatmul.mubr.msk.f32.gmra.mxu0 %vm4940_vm5, %v5490_v11 }
 0x43e   : > { %9742 = vmatprep.mubr.msk.f32.mxu0 %vm10654_vm4, %v14601_v1 }
 0x451   : > { %v5461_v58 = vpop.f32.mrf.mxu1 }
 0x452   : > { %v5462_v60 = vadd.f32 %v5461_v58, %v5234_v33 }
 0x453   : > { %v9679_v38 = vpop.f32.mrf.mxu1 }
 0x454   : > { %v5491_v37 = vmax.f32 %v5462_v60, 0.0 }
 0x456   : > { %9743 = vmatmul.mubr.msk.f32.gmra.mxu0 %vm4940_vm5, %v5491_v37 }
 0x457   : > { %9745 = vmatprep.mubr.msk.f32.mxu0 %vm10654_vm4, %v14601_v1 }
 0x46c   : > { %v5466_v31 = vpop.f32.mrf.mxu1 }
 0x46d   : > { %v5467_v51 = vadd.f32 %v5466_v31, %v5236_v23 }
 0x46e   : > { %v9682_v36 = vpop.f32.mrf.mxu1 }
 0x46f   : > { %v5492_v63 = vmax.f32 %v5467_v51, 0.0 }
 0x471   : > { %9746 = vmatmul.mubr.msk.f32.gmra.mxu0 %vm4940_vm5, %v5492_v63 }
 0x472   : > { %9748 = vmatprep.mubr.msk.f32.mxu0 %vm10654_vm4, %v14601_v1 }
 0x485   : > { %v5471_v44 = vpop.f32.mrf.mxu1 }
 0x486   : > { %v5472_v30 = vadd.f32 %v5471_v44, %v5238_v15 }
 0x487   : > { %v9685_v2 = vpop.f32.mrf.mxu1  ;;  %v5626_v9 = vpop.f32.mrf.mxu0 }
 0x488   : > { %v5493_v56 = vmax.f32 %v5472_v30, 0.0  ;;  %v5627_v5 = vadd.f32 %v5626_v9, %v13550_v61 }
 0x489   : > { %v9696_v10 = vpop.f32.mrf.mxu0 }
 0x48a   : > { %9749 = vmatmul.mubr.msk.f32.gmra.mxu0 %vm4940_vm5, %v5493_v56  ;;  %v5720_v59 = vmax.f32 %v5627_v5, 0.0 }
 0x48b   : > { %v5631_v18 = vpop.f32.mrf.mxu0  ;;  %9824 = vmatprep.mubr.msk.f32.mxu0 %vm10654_vm4, %v14601_v1 }
 0x48c   : > { %v5632_v53 = vadd.f32 %v5631_v18, %v13550_v61  ;;  %9760 = vmatmul.mubr.msk.f32.vlgmr.msra.gmra.mxu1 %vm4940_vm5, %v5720_v59 }
 0x48d   : > { %v9699_v13 = vpop.f32.mrf.mxu0  ;;  %9762 = vmatprep.mubr.msk.f32.mxu1 %vm10654_vm4, %v14601_v1 }
 0x48e   : > { %v5721_v43 = vmax.f32 %v5632_v53, 0.0 }
 0x48f   : > { %v5636_v28 = vpop.f32.mrf.mxu0 }
 0x490   : > { %v5637_v55 = vadd.f32 %v5636_v28, %v13550_v61  ;;  %9763 = vmatmul.mubr.msk.f32.gmra.mxu1 %vm4940_vm5, %v5721_v43 }
 0x491   : > { %v9702_v4 = vpop.f32.mrf.mxu0  ;;  %9765 = vmatprep.mubr.msk.f32.mxu1 %vm10654_vm4, %v14601_v1 }
 0x492   : > { %v5722_v35 = vmax.f32 %v5637_v55, 0.0 }
 0x493   : > { %v5641_v49 = vpop.f32.mrf.mxu0 }
 0x494   : > { %v5642_v48 = vadd.f32 %v5641_v49, %v13550_v61  ;;  %9766 = vmatmul.mubr.msk.f32.gmra.mxu1 %vm4940_vm5, %v5722_v35 }
 0x495   : > { %v9705_v3 = vpop.f32.mrf.mxu0  ;;  %9768 = vmatprep.mubr.msk.f32.mxu1 %vm10654_vm4, %v14601_v1 }
 0x496   : > { %v5723_v19 = vmax.f32 %v5642_v48, 0.0  ;;  %v9013_v3 = vld [vmem:[%s14550_s5 + $0x98] sm:$0xff] }
 0x497   : > { %v5646_v46 = vpop.f32.mrf.mxu0  ;;  %9817 = vmatpush3.msra.mxu0 %v9013_v3 }
 0x498   : > { %v5647_v12 = vadd.f32 %v5646_v46, %v13550_v61  ;;  %9769 = vmatmul.mubr.msk.f32.gmra.mxu1 %vm4940_vm5, %v5723_v19  ;;  %v9012_v19 = vld [vmem:[%s14550_s5 + $0x90] sm:$0xff]  ;;  %9818 = vmatprep.subr.mxu0 %v14601_v1  ;;  %v9011_v46 = vld [vmem:[%s14550_s5 + $0x88] sm:$0xff] }
 0x499   : > { %v9708_v62 = vpop.f32.mrf.mxu0  ;;  %9771 = vmatprep.mubr.msk.f32.mxu1 %vm10654_vm4, %v14601_v1  ;;  %9819 = vmatpush3.msra.mxu0 %v9012_v19 }
 0x49a   : > { %v5724_v14 = vmax.f32 %v5647_v12, 0.0  ;;  %9820 = vmatprep.subr.mxu0 %v14601_v1  ;;  %v9010_v12 = vld [vmem:[%s14550_s5 + $0x80] sm:$0xff] }
 0x49b   : > { %v5651_v45 = vpop.f32.mrf.mxu0  ;;  %9821 = vmatpush3.msra.mxu0 %v9011_v46 }
 0x49c   : > { %v5652_v54 = vadd.f32 %v5651_v45, %v13550_v61  ;;  %9772 = vmatmul.mubr.msk.f32.gmra.mxu1 %vm4940_vm5, %v5724_v14  ;;  %9822 = vmatprep.subr.mxu0 %v14601_v1 }
 0x49d   : > { %v9711_v27 = vpop.f32.mrf.mxu0  ;;  %9774 = vmatprep.mubr.msk.f32.mxu1 %vm10654_vm4, %v14601_v1  ;;  %9823 = vmatpush3.msra.mxu0 %v9010_v12 }
 0x49e   : > { %v5725_v21 = vmax.f32 %v5652_v54, 0.0  ;;  %9946 = vmatprep.subr.mxu0 %v14601_v1 }
 0x49f   : > { %v5656_v24 = vpop.f32.mrf.mxu0 }
 0x4a0   : > { %v5657_v11 = vadd.f32 %v5656_v24, %v13550_v61  ;;  %9775 = vmatmul.mubr.msk.f32.gmra.mxu1 %vm4940_vm5, %v5725_v21 }
 0x4a1   : > { %v9714_v33 = vpop.f32.mrf.mxu0  ;;  %9777 = vmatprep.mubr.msk.f32.mxu1 %vm10654_vm4, %v14601_v1 }
 0x4a2   : > { %v5726_v58 = vmax.f32 %v5657_v11, 0.0 }
 0x4a3   : > { %v5661_v60 = vpop.f32.mrf.mxu0 }
 0x4a4   : > { %v5662_v38 = vadd.f32 %v5661_v60, %v13550_v61  ;;  %9778 = vmatmul.mubr.msk.f32.gmra.mxu1 %vm4940_vm5, %v5726_v58 }
 0x4a5   : > { %v9717_v37 = vpop.f32.mrf.mxu0  ;;  %9780 = vmatprep.mubr.msk.f32.mxu1 %vm10654_vm4, %v14601_v1 }
 0x4a6   : > { %v5727_v23 = vmax.f32 %v5662_v38, 0.0 }
 0x4a7   : > { %v5666_v31 = vpop.f32.mrf.mxu0 }
 0x4a8   : > { %v5667_v51 = vadd.f32 %v5666_v31, %v13550_v61  ;;  %9781 = vmatmul.mubr.msk.f32.gmra.mxu1 %vm4940_vm5, %v5727_v23 }
 0x4a9   : > { %v9720_v36 = vpop.f32.mrf.mxu0  ;;  %9783 = vmatprep.mubr.msk.f32.mxu1 %vm10654_vm4, %v14601_v1 }
 0x4aa   : > { %v5728_v63 = vmax.f32 %v5667_v51, 0.0 }
 0x4ab   : > { %v5671_v17 = vpop.f32.mrf.mxu0 }
 0x4ac   : > { %v5672_v15 = vadd.f32 %v5671_v17, %v13550_v61  ;;  %9784 = vmatmul.mubr.msk.f32.gmra.mxu1 %vm4940_vm5, %v5728_v63  ;;  %v5745_v63 = vpop.permute.xlu1 %5744 }
 0x4ad   : > { %v9723_v44 = vpop.f32.mrf.mxu0  ;;  %9786 = vmatprep.mubr.msk.f32.mxu1 %vm10654_vm4, %v14601_v1 }
 0x4ae   : > { %v5729_v30 = vmax.f32 %v5672_v15, 0.0 }
 0x4af   : > { %v5676_v2 = vpop.f32.mrf.mxu0 }
 0x4b0   : > { %v5677_v9 = vadd.f32 %v5676_v2, %v13550_v61  ;;  %9787 = vmatmul.mubr.msk.f32.gmra.mxu1 %vm4940_vm5, %v5729_v30 }
 0x4b1   : > { %v9726_v56 = vpop.f32.mrf.mxu0  ;;  %9789 = vmatprep.mubr.msk.f32.mxu1 %vm10654_vm4, %v14601_v1 }
 0x4b2   : > { %v5730_v5 = vmax.f32 %v5677_v9, 0.0 }
 0x4b3   : > { %v5681_v10 = vpop.f32.mrf.mxu0 }
 0x4b4   : > { %v5682_v59 = vadd.f32 %v5681_v10, %v13550_v61  ;;  %9790 = vmatmul.mubr.msk.f32.gmra.mxu1 %vm4940_vm5, %v5730_v5  ;;  %v5747_v5 = vpop.permute.xlu0 %5746 }
 0x4b5   : > { %v9729_v18 = vpop.f32.mrf.mxu0  ;;  %9792 = vmatprep.mubr.msk.f32.mxu1 %vm10654_vm4, %v14601_v1 }
 0x4b6   : > { %v5731_v53 = vmax.f32 %v5682_v59, 0.0 }
 0x4b7   : > { %v5686_v13 = vpop.f32.mrf.mxu0 }
 0x4b8   : > { %v5687_v43 = vadd.f32 %v5686_v13, %v13550_v61  ;;  %9793 = vmatmul.mubr.msk.f32.gmra.mxu1 %vm4940_vm5, %v5731_v53  ;;  %v5749_v53 = vpop.permute.xlu1 %5748 }
 0x4b9   : > { %v9732_v28 = vpop.f32.mrf.mxu0  ;;  %9795 = vmatprep.mubr.msk.f32.mxu1 %vm10654_vm4, %v14601_v1 }
 0x4ba   : > { %v5732_v55 = vmax.f32 %v5687_v43, 0.0 }
 0x4bc   : > { %9796 = vmatmul.mubr.msk.f32.gmra.mxu1 %vm4940_vm5, %v5732_v55  ;;  %v5753_v19 = vpop.permute.xlu1 %5752 }
 0x4bd   : > { %9798 = vmatprep.mubr.msk.f32.mxu1 %vm10654_vm4, %v14601_v1 }
 0x4c7   : > { %v5691_v4 = vpop.f32.mrf.mxu0 }
 0x4c8   : > { %v5692_v35 = vadd.f32 %v5691_v4, %v13550_v61  ;;  %v5751_v4 = vpop.permute.xlu0 %5750 }
 0x4c9   : > { %v9735_v49 = vpop.f32.mrf.mxu0 }
 0x4ca   : > { %v5733_v48 = vmax.f32 %v5692_v35, 0.0 }
 0x4cc   : > { %9799 = vmatmul.mubr.msk.f32.gmra.mxu1 %vm4940_vm5, %v5733_v48 }
 0x4cd   : > { %9801 = vmatprep.mubr.msk.f32.mxu1 %vm10654_vm4, %v14601_v1 }
 0x4de   : > { %v5696_v62 = vpop.f32.mrf.mxu0 }
 0x4df   : > { %v5697_v14 = vadd.f32 %v5696_v62, %v13550_v61 }
 0x4e0   : > { %v9738_v45 = vpop.f32.mrf.mxu0 }
 0x4e1   : > { %v5734_v54 = vmax.f32 %v5697_v14, 0.0  ;;  %v5755_v45 = vpop.permute.xlu0 %5754 }
 0x4e3   : > { %9802 = vmatmul.mubr.msk.f32.gmra.mxu1 %vm4940_vm5, %v5734_v54 }
 0x4e4   : > { %9804 = vmatprep.mubr.msk.f32.mxu1 %vm10654_vm4, %v14601_v1 }
 0x4fd   : > { %v5701_v27 = vpop.f32.mrf.mxu0 }
 0x4fe   : > { %v5702_v21 = vadd.f32 %v5701_v27, %v13550_v61 }
 0x4ff   : > { %v9741_v24 = vpop.f32.mrf.mxu0 }
 0x500   : > { %v5735_v11 = vmax.f32 %v5702_v21, 0.0 }
 0x502   : > { %9805 = vmatmul.mubr.msk.f32.gmra.mxu1 %vm4940_vm5, %v5735_v11  ;;  %v5757_v11 = vpop.permute.xlu1 %5756 }
 0x503   : > { %9807 = vmatprep.mubr.msk.f32.mxu1 %vm10654_vm4, %v14601_v1 }
 0x516   : > { %v5706_v33 = vpop.f32.mrf.mxu0 }
 0x517   : > { %v5707_v58 = vadd.f32 %v5706_v33, %v13550_v61 }
 0x518   : > { %v9744_v60 = vpop.f32.mrf.mxu0 }
 0x519   : > { %v5736_v38 = vmax.f32 %v5707_v58, 0.0 }
 0x51b   : > { %9808 = vmatmul.mubr.msk.f32.gmra.mxu1 %vm4940_vm5, %v5736_v38 }
 0x51c   : > { %9810 = vmatprep.mubr.msk.f32.mxu1 %vm10654_vm4, %v14601_v1 }
 0x531   : > { %v5711_v37 = vpop.f32.mrf.mxu0 }
 0x532   : > { %v5712_v23 = vadd.f32 %v5711_v37, %v13550_v61  ;;  %v5759_v37 = vpop.permute.xlu0 %5758 }
 0x533   : > { %v9747_v31 = vpop.f32.mrf.mxu0 }
 0x534   : > { %v5737_v51 = vmax.f32 %v5712_v23, 0.0 }
 0x536   : > { %9811 = vmatmul.mubr.msk.f32.gmra.mxu1 %vm4940_vm5, %v5737_v51 }
 0x537   : > { %9813 = vmatprep.mubr.msk.f32.mxu1 %vm10654_vm4, %v14601_v1 }
 0x54a   : > { %v5716_v36 = vpop.f32.mrf.mxu0 }
 0x54b   : > { %v5717_v17 = vadd.f32 %v5716_v36, %v13550_v61 }
 0x54c   : > { %v9750_v15 = vpop.f32.mrf.mxu0  ;;  %v5924_v44 = vpop.f32.mrf.mxu1 }
 0x54d   : > { %v5738_v30 = vmax.f32 %v5717_v17, 0.0  ;;  %v5925_v2 = vadd.f32 %v5924_v44, %v5745_v63  ;;  %v5761_v63 = vpop.permute.xlu1 %5760 }
 0x54e   : > { %v9761_v9 = vpop.f32.mrf.mxu1 }
 0x54f   : > { %9814 = vmatmul.mubr.msk.f32.gmra.mxu1 %vm4940_vm5, %v5738_v30  ;;  %v6018_v56 = vmax.f32 %v5925_v2, 0.0  ;;  %v5763_v2 = vpop.permute.xlu0 %5762 }
 0x550   : > { %v5929_v10 = vpop.f32.mrf.mxu1  ;;  %9889 = vmatprep.mubr.msk.f32.mxu1 %vm10654_vm4, %v14601_v1 }
 0x551   : > { %v5930_v59 = vadd.f32 %v5929_v10, %v5747_v5  ;;  %9825 = vmatmul.mubr.msk.f32.vlgmr.msra.gmra.mxu0 %vm4940_vm5, %v6018_v56 }
 0x552   : > { %v9764_v18 = vpop.f32.mrf.mxu1  ;;  %9827 = vmatprep.mubr.msk.f32.mxu0 %vm10654_vm4, %v14601_v1 }
 0x553   : > { %v6019_v61 = vmax.f32 %v5930_v59, 0.0  ;;  %v5765_v59 = vpop.permute.xlu1 %5764 }
 0x554   : > { %v5934_v13 = vpop.f32.mrf.mxu1 }
 0x555   : > { %v5935_v43 = vadd.f32 %v5934_v13, %v5749_v53  ;;  %9828 = vmatmul.mubr.msk.f32.gmra.mxu0 %vm4940_vm5, %v6019_v61 }
 0x556   : > { %v9767_v28 = vpop.f32.mrf.mxu1  ;;  %9830 = vmatprep.mubr.msk.f32.mxu0 %vm10654_vm4, %v14601_v1 }
 0x557   : > { %v6020_v55 = vmax.f32 %v5935_v43, 0.0  ;;  %v5767_v43 = vpop.permute.xlu0 %5766 }
 0x558   : > { %v5939_v35 = vpop.f32.mrf.mxu1 }
 0x559   : > { %v5940_v49 = vadd.f32 %v5939_v35, %v5751_v4  ;;  %9831 = vmatmul.mubr.msk.f32.gmra.mxu0 %vm4940_vm5, %v6020_v55 }
 0x55a   : > { %v9770_v48 = vpop.f32.mrf.mxu1  ;;  %9833 = vmatprep.mubr.msk.f32.mxu0 %vm10654_vm4, %v14601_v1 }
 0x55b   : > { %v6021_v3 = vmax.f32 %v5940_v49, 0.0  ;;  %v5769_v49 = vpop.permute.xlu1 %5768 }
 0x55c   : > { %v5944_v46 = vpop.f32.mrf.mxu1 }
 0x55d   : > { %v5945_v12 = vadd.f32 %v5944_v46, %v5753_v19  ;;  %9834 = vmatmul.mubr.msk.f32.gmra.mxu0 %vm4940_vm5, %v6021_v3 }
 0x55e   : > { %v9773_v62 = vpop.f32.mrf.mxu1  ;;  %9836 = vmatprep.mubr.msk.f32.mxu0 %vm10654_vm4, %v14601_v1 }
 0x55f   : > { %v6022_v14 = vmax.f32 %v5945_v12, 0.0  ;;  %v5771_v12 = vpop.permute.xlu0 %5770 }
 0x560   : > { %v5949_v54 = vpop.f32.mrf.mxu1 }
 0x561   : > { %v5950_v27 = vadd.f32 %v5949_v54, %v5755_v45  ;;  %9837 = vmatmul.mubr.msk.f32.gmra.mxu0 %vm4940_vm5, %v6022_v14 }
 0x562   : > { %v9776_v21 = vpop.f32.mrf.mxu1  ;;  %9839 = vmatprep.mubr.msk.f32.mxu0 %vm10654_vm4, %v14601_v1 }
 0x563   : > { %v6023_v24 = vmax.f32 %v5950_v27, 0.0  ;;  %v9036_v27 = vld [vmem:[%s14550_s5 + $0xb8] sm:$0xff]  ;;  %v9035_v21 = vld [vmem:[%s14550_s5 + $0xb0] sm:$0xff] }
 0x564   : > { %v5954_v33 = vpop.f32.mrf.mxu1  ;;  %9882 = vmatpush3.msra.mxu1 %v9036_v27 }
 0x565   : > { %v5955_v58 = vadd.f32 %v5954_v33, %v5757_v11  ;;  %9840 = vmatmul.mubr.msk.f32.gmra.mxu0 %vm4940_vm5, %v6023_v24  ;;  %9883 = vmatprep.subr.mxu1 %v14601_v1  ;;  %v9034_v24 = vld [vmem:[%s14550_s5 + $0xa8] sm:$0xff]  ;;  %v9033_v11 = vld [vmem:[%s14550_s5 + $0xa0] sm:$0xff]  ;;  %v5773_v33 = vpop.permute.xlu1 %5772 }
 0x566   : > { %v9779_v60 = vpop.f32.mrf.mxu1  ;;  %9842 = vmatprep.mubr.msk.f32.mxu0 %vm10654_vm4, %v14601_v1  ;;  %9884 = vmatpush3.msra.mxu1 %v9035_v21 }
 0x567   : > { %v6024_v38 = vmax.f32 %v5955_v58, 0.0  ;;  %9885 = vmatprep.subr.mxu1 %v14601_v1 }
 0x568   : > { %v5959_v23 = vpop.f32.mrf.mxu1  ;;  %9886 = vmatpush3.msra.mxu1 %v9034_v24 }
 0x569   : > { %v5960_v31 = vadd.f32 %v5959_v23, %v5759_v37  ;;  %9843 = vmatmul.mubr.msk.f32.gmra.mxu0 %vm4940_vm5, %v6024_v38  ;;  %9887 = vmatprep.subr.mxu1 %v14601_v1  ;;  %v5775_v23 = vpop.permute.xlu0 %5774 }
 0x56a   : > { %v9782_v51 = vpop.f32.mrf.mxu1  ;;  %9845 = vmatprep.mubr.msk.f32.mxu0 %vm10654_vm4, %v14601_v1  ;;  %9888 = vmatpush3.msra.mxu1 %v9033_v11 }
 0x56b   : > { %v6025_v36 = vmax.f32 %v5960_v31, 0.0  ;;  %10011 = vmatprep.subr.mxu1 %v14601_v1 }
 0x56c   : > { %v5964_v17 = vpop.f32.mrf.mxu1 }
 0x56d   : > { %v5965_v15 = vadd.f32 %v5964_v17, %v5761_v63  ;;  %9846 = vmatmul.mubr.msk.f32.gmra.mxu0 %vm4940_vm5, %v6025_v36  ;;  %v5777_v17 = vpop.permute.xlu1 %5776 }
 0x56e   : > { %v9785_v44 = vpop.f32.mrf.mxu1  ;;  %9848 = vmatprep.mubr.msk.f32.mxu0 %vm10654_vm4, %v14601_v1 }
 0x56f   : > { %v6026_v30 = vmax.f32 %v5965_v15, 0.0 }
 0x570   : > { %v5969_v9 = vpop.f32.mrf.mxu1 }
 0x571   : > { %v5970_v56 = vadd.f32 %v5969_v9, %v5763_v2  ;;  %9849 = vmatmul.mubr.msk.f32.gmra.mxu0 %vm4940_vm5, %v6026_v30  ;;  %v5779_v9 = vpop.permute.xlu0 %5778 }
 0x572   : > { %v9788_v5 = vpop.f32.mrf.mxu1  ;;  %9851 = vmatprep.mubr.msk.f32.mxu0 %vm10654_vm4, %v14601_v1 }
 0x573   : > { %v6027_v10 = vmax.f32 %v5970_v56, 0.0 }
 0x574   : > { %v5974_v18 = vpop.f32.mrf.mxu1 }
 0x575   : > { %v5975_v61 = vadd.f32 %v5974_v18, %v5765_v59  ;;  %9852 = vmatmul.mubr.msk.f32.gmra.mxu0 %vm4940_vm5, %v6027_v10  ;;  %v6044_v18 = vsub.s32 2, %v12716_v41 }
 0x576   : > { %v9791_v53 = vpop.f32.mrf.mxu1  ;;  %9854 = vmatprep.mubr.msk.f32.mxu0 %vm10654_vm4, %v14601_v1 }
 0x577   : > { %v6028_v13 = vmax.f32 %v5975_v61, 0.0  ;;  %v13721_v61 = vld [vmem:[%s14551_s6] sm:$0x3f] }
 0x578   : > { %v5979_v28 = vpop.f32.mrf.mxu1  ;;  %v13724_v53 = vrot.slane %v13721_v61, %v6044_v18 }
 0x579   : > { %v5980_v55 = vadd.f32 %v5979_v28, %v5767_v43  ;;  %9855 = vmatmul.mubr.msk.f32.gmra.mxu0 %vm4940_vm5, %v6028_v13  ;;  %v5781_v13 = vpop.permute.xlu1 %5780 }
 0x57a   : > { %v9794_v4 = vpop.f32.mrf.mxu1  ;;  %9857 = vmatprep.mubr.msk.f32.mxu0 %vm10654_vm4, %v14601_v1 }
 0x57b   : > { %v6029_v35 = vmax.f32 %v5980_v55, 0.0 }
 0x57c   : > { %v5984_v48 = vpop.f32.mrf.mxu1 }
 0x57d   : > { %v5985_v3 = vadd.f32 %v5984_v48, %v5769_v49  ;;  %9858 = vmatmul.mubr.msk.f32.gmra.mxu0 %vm4940_vm5, %v6029_v35 }
 0x57e   : > { %v9797_v19 = vpop.f32.mrf.mxu1  ;;  %9860 = vmatprep.mubr.msk.f32.mxu0 %vm10654_vm4, %v14601_v1 }
 0x57f   : > { %v6030_v46 = vmax.f32 %v5985_v3, 0.0 }
 0x581   : > { %9861 = vmatmul.mubr.msk.f32.gmra.mxu0 %vm4940_vm5, %v6030_v46 }
 0x582   : > { %9863 = vmatprep.mubr.msk.f32.mxu0 %vm10654_vm4, %v14601_v1 }
 0x58c   : > { %v5989_v62 = vpop.f32.mrf.mxu1 }
 0x58d   : > { %v5990_v14 = vadd.f32 %v5989_v62, %v5771_v12 }
 0x58e   : > { %v9800_v45 = vpop.f32.mrf.mxu1 }
 0x58f   : > { %v6031_v54 = vmax.f32 %v5990_v14, 0.0 }
 0x591   : > { %9864 = vmatmul.mubr.msk.f32.gmra.mxu0 %vm4940_vm5, %v6031_v54 }
 0x592   : > { %9866 = vmatprep.mubr.msk.f32.mxu0 %vm10654_vm4, %v14601_v1 }
 0x5a3   : > { %v5994_v58 = vpop.f32.mrf.mxu1 }
 0x5a4   : > { %v5995_v60 = vadd.f32 %v5994_v58, %v5773_v33 }
 0x5a5   : > { %v9803_v38 = vpop.f32.mrf.mxu1 }
 0x5a6   : > { %v6032_v37 = vmax.f32 %v5995_v60, 0.0 }
 0x5a8   : > { %9867 = vmatmul.mubr.msk.f32.gmra.mxu0 %vm4940_vm5, %v6032_v37 }
 0x5a9   : > { %9869 = vmatprep.mubr.msk.f32.mxu0 %vm10654_vm4, %v14601_v1 }
 0x5c2   : > { %v5999_v31 = vpop.f32.mrf.mxu1 }
 0x5c3   : > { %v6000_v51 = vadd.f32 %v5999_v31, %v5775_v23 }
 0x5c4   : > { %v9806_v36 = vpop.f32.mrf.mxu1 }
 0x5c5   : > { %v6033_v63 = vmax.f32 %v6000_v51, 0.0 }
 0x5c7   : > { %9870 = vmatmul.mubr.msk.f32.gmra.mxu0 %vm4940_vm5, %v6033_v63 }
 0x5c8   : > { %9872 = vmatprep.mubr.msk.f32.mxu0 %vm10654_vm4, %v14601_v1 }
 0x5db   : > { %v6004_v15 = vpop.f32.mrf.mxu1 }
 0x5dc   : > { %v6005_v44 = vadd.f32 %v6004_v15, %v5777_v17 }
 0x5dd   : > { %v9809_v30 = vpop.f32.mrf.mxu1 }
 0x5de   : > { %v6034_v2 = vmax.f32 %v6005_v44, 0.0 }
 0x5e0   : > { %9873 = vmatmul.mubr.msk.f32.gmra.mxu0 %vm4940_vm5, %v6034_v2 }
 0x5e1   : > { %9875 = vmatprep.mubr.msk.f32.mxu0 %vm10654_vm4, %v14601_v1 }
 0x5f6   : > { %v6009_v56 = vpop.f32.mrf.mxu1 }
 0x5f7   : > { %v6010_v5 = vadd.f32 %v6009_v56, %v5779_v9 }
 0x5f8   : > { %v9812_v10 = vpop.f32.mrf.mxu1 }
 0x5f9   : > { %v6035_v59 = vmax.f32 %v6010_v5, 0.0 }
 0x5fb   : > { %9876 = vmatmul.mubr.msk.f32.gmra.mxu0 %vm4940_vm5, %v6035_v59 }
 0x5fc   : > { %9878 = vmatprep.mubr.msk.f32.mxu0 %vm10654_vm4, %v14601_v1 }
 0x60f   : > { %v6014_v43 = vpop.f32.mrf.mxu1 }
 0x610   : > { %v6015_v28 = vadd.f32 %v6014_v43, %v5781_v13 }
 0x611   : > { %v9815_v55 = vpop.f32.mrf.mxu1  ;;  %v6169_v4 = vpop.f32.mrf.mxu0 }
 0x612   : > { %v6036_v35 = vmax.f32 %v6015_v28, 0.0  ;;  %v6170_v49 = vadd.f32 %v6169_v4, %v13724_v53 }
 0x613   : > { %v9826_v48 = vpop.f32.mrf.mxu0 }
 0x614   : > { %9879 = vmatmul.mubr.msk.f32.gmra.mxu0 %vm4940_vm5, %v6036_v35  ;;  %v6263_v3 = vmax.f32 %v6170_v49, 0.0 }
 0x615   : > { %v6174_v19 = vpop.f32.mrf.mxu0  ;;  %9954 = vmatprep.mubr.msk.f32.mxu0 %vm10654_vm4, %v14601_v1 }
 0x616   : > { %v6175_v46 = vadd.f32 %v6174_v19, %v13724_v53  ;;  %9890 = vmatmul.mubr.msk.f32.vlgmr.msra.gmra.mxu1 %vm4940_vm5, %v6263_v3 }
 0x617   : > { %v9829_v12 = vpop.f32.mrf.mxu0  ;;  %9892 = vmatprep.mubr.msk.f32.mxu1 %vm10654_vm4, %v14601_v1 }
 0x618   : > { %v6264_v62 = vmax.f32 %v6175_v46, 0.0 }
 0x619   : > { %v6179_v14 = vpop.f32.mrf.mxu0 }
 0x61a   : > { %v6180_v45 = vadd.f32 %v6179_v14, %v13724_v53  ;;  %9893 = vmatmul.mubr.msk.f32.gmra.mxu1 %vm4940_vm5, %v6264_v62 }
 0x61b   : > { %v9832_v54 = vpop.f32.mrf.mxu0  ;;  %9895 = vmatprep.mubr.msk.f32.mxu1 %vm10654_vm4, %v14601_v1 }
 0x61c   : > { %v6265_v27 = vmax.f32 %v6180_v45, 0.0 }
 0x61d   : > { %v6184_v21 = vpop.f32.mrf.mxu0 }
 0x61e   : > { %v6185_v24 = vadd.f32 %v6184_v21, %v13724_v53  ;;  %9896 = vmatmul.mubr.msk.f32.gmra.mxu1 %vm4940_vm5, %v6265_v27 }
 0x61f   : > { %v9835_v11 = vpop.f32.mrf.mxu0  ;;  %9898 = vmatprep.mubr.msk.f32.mxu1 %vm10654_vm4, %v14601_v1 }
 0x620   : > { %v6266_v33 = vmax.f32 %v6185_v24, 0.0 }
 0x621   : > { %v6189_v58 = vpop.f32.mrf.mxu0 }
 0x622   : > { %v6190_v60 = vadd.f32 %v6189_v58, %v13724_v53  ;;  %9899 = vmatmul.mubr.msk.f32.gmra.mxu1 %vm4940_vm5, %v6266_v33  ;;  %v9059_v33 = vld [vmem:[%s14550_s5 + $0xd8] sm:$0xff]  ;;  %v9058_v58 = vld [vmem:[%s14550_s5 + $0xd0] sm:$0xff] }
 0x623   : > { %v9838_v38 = vpop.f32.mrf.mxu0  ;;  %9901 = vmatprep.mubr.msk.f32.mxu1 %vm10654_vm4, %v14601_v1  ;;  %9947 = vmatpush3.msra.mxu0 %v9059_v33 }
 0x624   : > { %v6267_v37 = vmax.f32 %v6190_v60, 0.0  ;;  %9948 = vmatprep.subr.mxu0 %v14601_v1  ;;  %v9057_v60 = vld [vmem:[%s14550_s5 + $0xc8] sm:$0xff]  ;;  %v9056_v38 = vld [vmem:[%s14550_s5 + $0xc0] sm:$0xff] }
 0x625   : > { %v6194_v23 = vpop.f32.mrf.mxu0  ;;  %9949 = vmatpush3.msra.mxu0 %v9058_v58 }
 0x626   : > { %v6195_v31 = vadd.f32 %v6194_v23, %v13724_v53  ;;  %9902 = vmatmul.mubr.msk.f32.gmra.mxu1 %vm4940_vm5, %v6267_v37  ;;  %9950 = vmatprep.subr.mxu0 %v14601_v1 }
 0x627   : > { %v9841_v51 = vpop.f32.mrf.mxu0  ;;  %9904 = vmatprep.mubr.msk.f32.mxu1 %vm10654_vm4, %v14601_v1  ;;  %9951 = vmatpush3.msra.mxu0 %v9057_v60 }
 0x628   : > { %v6268_v36 = vmax.f32 %v6195_v31, 0.0  ;;  %9952 = vmatprep.subr.mxu0 %v14601_v1 }
 0x629   : > { %v6199_v63 = vpop.f32.mrf.mxu0  ;;  %9953 = vmatpush3.msra.mxu0 %v9056_v38 }
 0x62a   : > { %v6200_v17 = vadd.f32 %v6199_v63, %v13724_v53  ;;  %9905 = vmatmul.mubr.msk.f32.gmra.mxu1 %vm4940_vm5, %v6268_v36  ;;  %10076 = vmatprep.subr.mxu0 %v14601_v1 }
 0x62b   : > { %v9844_v15 = vpop.f32.mrf.mxu0  ;;  %9907 = vmatprep.mubr.msk.f32.mxu1 %vm10654_vm4, %v14601_v1 }
 0x62c   : > { %v6269_v44 = vmax.f32 %v6200_v17, 0.0 }
 0x62d   : > { %v6204_v30 = vpop.f32.mrf.mxu0 }
 0x62e   : > { %v6205_v2 = vadd.f32 %v6204_v30, %v13724_v53  ;;  %9908 = vmatmul.mubr.msk.f32.gmra.mxu1 %vm4940_vm5, %v6269_v44 }
 0x62f   : > { %v9847_v9 = vpop.f32.mrf.mxu0  ;;  %9910 = vmatprep.mubr.msk.f32.mxu1 %vm10654_vm4, %v14601_v1 }
 0x630   : > { %v6270_v56 = vmax.f32 %v6205_v2, 0.0 }
 0x631   : > { %v6209_v5 = vpop.f32.mrf.mxu0 }
 0x632   : > { %v6210_v10 = vadd.f32 %v6209_v5, %v13724_v53  ;;  %9911 = vmatmul.mubr.msk.f32.gmra.mxu1 %vm4940_vm5, %v6270_v56 }
 0x633   : > { %v9850_v59 = vpop.f32.mrf.mxu0  ;;  %9913 = vmatprep.mubr.msk.f32.mxu1 %vm10654_vm4, %v14601_v1 }
 0x634   : > { %v6271_v18 = vmax.f32 %v6210_v10, 0.0 }
 0x635   : > { %v6214_v13 = vpop.f32.mrf.mxu0 }
 0x636   : > { %v6215_v43 = vadd.f32 %v6214_v13, %v13724_v53  ;;  %9914 = vmatmul.mubr.msk.f32.gmra.mxu1 %vm4940_vm5, %v6271_v18  ;;  %v6288_v13 = vpop.permute.xlu0 %6287 }
 0x637   : > { %v9853_v28 = vpop.f32.mrf.mxu0  ;;  %9916 = vmatprep.mubr.msk.f32.mxu1 %vm10654_vm4, %v14601_v1 }
 0x638   : > { %v6272_v55 = vmax.f32 %v6215_v43, 0.0 }
 0x639   : > { %v6219_v4 = vpop.f32.mrf.mxu0 }
 0x63a   : > { %v6220_v35 = vadd.f32 %v6219_v4, %v13724_v53  ;;  %9917 = vmatmul.mubr.msk.f32.gmra.mxu1 %vm4940_vm5, %v6272_v55 }
 0x63b   : > { %v9856_v49 = vpop.f32.mrf.mxu0  ;;  %9919 = vmatprep.mubr.msk.f32.mxu1 %vm10654_vm4, %v14601_v1 }
 0x63c   : > { %v6273_v48 = vmax.f32 %v6220_v35, 0.0 }
 0x63d   : > { %v6224_v3 = vpop.f32.mrf.mxu0 }
 0x63e   : > { %v6225_v19 = vadd.f32 %v6224_v3, %v13724_v53  ;;  %9920 = vmatmul.mubr.msk.f32.gmra.mxu1 %vm4940_vm5, %v6273_v48  ;;  %v6290_v3 = vpop.permute.xlu1 %6289 }
 0x63f   : > { %v9859_v46 = vpop.f32.mrf.mxu0  ;;  %9922 = vmatprep.mubr.msk.f32.mxu1 %vm10654_vm4, %v14601_v1 }
 0x640   : > { %v6274_v12 = vmax.f32 %v6225_v19, 0.0 }
 0x641   : > { %v6229_v62 = vpop.f32.mrf.mxu0 }
 0x642   : > { %v6230_v14 = vadd.f32 %v6229_v62, %v13724_v53  ;;  %9923 = vmatmul.mubr.msk.f32.gmra.mxu1 %vm4940_vm5, %v6274_v12  ;;  %v6292_v62 = vpop.permute.xlu0 %6291 }
 0x643   : > { %v9862_v45 = vpop.f32.mrf.mxu0  ;;  %9925 = vmatprep.mubr.msk.f32.mxu1 %vm10654_vm4, %v14601_v1 }
 0x644   : > { %v6275_v54 = vmax.f32 %v6230_v14, 0.0 }
 0x646   : > { %9926 = vmatmul.mubr.msk.f32.gmra.mxu1 %vm4940_vm5, %v6275_v54  ;;  %v6296_v60 = vpop.permute.xlu0 %6295 }
 0x647   : > { %9928 = vmatprep.mubr.msk.f32.mxu1 %vm10654_vm4, %v14601_v1 }
 0x651   : > { %v6234_v27 = vpop.f32.mrf.mxu0 }
 0x652   : > { %v6235_v21 = vadd.f32 %v6234_v27, %v13724_v53 }
 0x653   : > { %v9865_v24 = vpop.f32.mrf.mxu0 }
 0x654   : > { %v6276_v11 = vmax.f32 %v6235_v21, 0.0  ;;  %v6294_v21 = vpop.permute.xlu1 %6293 }
 0x656   : > { %9929 = vmatmul.mubr.msk.f32.gmra.mxu1 %vm4940_vm5, %v6276_v11 }
 0x657   : > { %9931 = vmatprep.mubr.msk.f32.mxu1 %vm10654_vm4, %v14601_v1 }
 0x668   : > { %v6239_v37 = vpop.f32.mrf.mxu0 }
 0x669   : > { %v6240_v23 = vadd.f32 %v6239_v37, %v13724_v53 }
 0x66a   : > { %v9868_v31 = vpop.f32.mrf.mxu0 }
 0x66b   : > { %v6277_v51 = vmax.f32 %v6240_v23, 0.0 }
 0x66d   : > { %9932 = vmatmul.mubr.msk.f32.gmra.mxu1 %vm4940_vm5, %v6277_v51  ;;  %v6298_v51 = vpop.permute.xlu1 %6297 }
 0x66e   : > { %9934 = vmatprep.mubr.msk.f32.mxu1 %vm10654_vm4, %v14601_v1 }
 0x687   : > { %v6244_v36 = vpop.f32.mrf.mxu0 }
 0x688   : > { %v6245_v63 = vadd.f32 %v6244_v36, %v13724_v53 }
 0x689   : > { %v9871_v17 = vpop.f32.mrf.mxu0 }
 0x68a   : > { %v6278_v15 = vmax.f32 %v6245_v63, 0.0 }
 0x68c   : > { %9935 = vmatmul.mubr.msk.f32.gmra.mxu1 %vm4940_vm5, %v6278_v15 }
 0x68d   : > { %9937 = vmatprep.mubr.msk.f32.mxu1 %vm10654_vm4, %v14601_v1 }
 0x6a0   : > { %v6249_v44 = vpop.f32.mrf.mxu0 }
 0x6a1   : > { %v6250_v30 = vadd.f32 %v6249_v44, %v13724_v53  ;;  %v6300_v44 = vpop.permute.xlu0 %6299 }
 0x6a2   : > { %v9874_v2 = vpop.f32.mrf.mxu0 }
 0x6a3   : > { %v6279_v9 = vmax.f32 %v6250_v30, 0.0 }
 0x6a5   : > { %9938 = vmatmul.mubr.msk.f32.gmra.mxu1 %vm4940_vm5, %v6279_v9 }
 0x6a6   : > { %9940 = vmatprep.mubr.msk.f32.mxu1 %vm10654_vm4, %v14601_v1 }
 0x6bb   : > { %v6254_v56 = vpop.f32.mrf.mxu0 }
 0x6bc   : > { %v6255_v5 = vadd.f32 %v6254_v56, %v13724_v53 }
 0x6bd   : > { %v9877_v10 = vpop.f32.mrf.mxu0 }
 0x6be   : > { %v6280_v59 = vmax.f32 %v6255_v5, 0.0  ;;  %v6302_v5 = vpop.permute.xlu1 %6301 }
 0x6c0   : > { %9941 = vmatmul.mubr.msk.f32.gmra.mxu1 %vm4940_vm5, %v6280_v59 }
 0x6c1   : > { %9943 = vmatprep.mubr.msk.f32.mxu1 %vm10654_vm4, %v14601_v1 }
 0x6d4   : > { %v6259_v18 = vpop.f32.mrf.mxu0 }
 0x6d5   : > { %v6260_v43 = vadd.f32 %v6259_v18, %v13724_v53 }
 0x6d6   : > { %v9880_v28 = vpop.f32.mrf.mxu0  ;;  %v6467_v55 = vpop.f32.mrf.mxu1 }
 0x6d7   : > { %v6281_v4 = vmax.f32 %v6260_v43, 0.0  ;;  %v6468_v35 = vadd.f32 %v6467_v55, %v6288_v13  ;;  %v6304_v43 = vpop.permute.xlu0 %6303 }
 0x6d8   : > { %v9891_v49 = vpop.f32.mrf.mxu1 }
 0x6d9   : > { %9944 = vmatmul.mubr.msk.f32.gmra.mxu1 %vm4940_vm5, %v6281_v4  ;;  %v6561_v48 = vmax.f32 %v6468_v35, 0.0  ;;  %v6306_v49 = vpop.permute.xlu1 %6305 }
 0x6da   : > { %v6472_v19 = vpop.f32.mrf.mxu1  ;;  %10019 = vmatprep.mubr.msk.f32.mxu1 %vm10654_vm4, %v14601_v1 }
 0x6db   : > { %v6473_v46 = vadd.f32 %v6472_v19, %v6290_v3  ;;  %9955 = vmatmul.mubr.msk.f32.vlgmr.msra.gmra.mxu0 %vm4940_vm5, %v6561_v48 }
 0x6dc   : > { %v9894_v12 = vpop.f32.mrf.mxu1  ;;  %9957 = vmatprep.mubr.msk.f32.mxu0 %vm10654_vm4, %v14601_v1 }
 0x6dd   : > { %v6562_v53 = vmax.f32 %v6473_v46, 0.0  ;;  %v6308_v12 = vpop.permute.xlu0 %6307 }
 0x6de   : > { %v6477_v14 = vpop.f32.mrf.mxu1 }
 0x6df   : > { %v6478_v45 = vadd.f32 %v6477_v14, %v6292_v62  ;;  %9958 = vmatmul.mubr.msk.f32.gmra.mxu0 %vm4940_vm5, %v6562_v53 }
 0x6e0   : > { %v9897_v54 = vpop.f32.mrf.mxu1  ;;  %9960 = vmatprep.mubr.msk.f32.mxu0 %vm10654_vm4, %v14601_v1 }
 0x6e1   : > { %v6563_v27 = vmax.f32 %v6478_v45, 0.0  ;;  %v6310_v54 = vpop.permute.xlu1 %6309 }
 0x6e2   : > { %v6482_v24 = vpop.f32.mrf.mxu1 }
 0x6e3   : > { %v6483_v11 = vadd.f32 %v6482_v24, %v6294_v21  ;;  %9961 = vmatmul.mubr.msk.f32.gmra.mxu0 %vm4940_vm5, %v6563_v27 }
 0x6e4   : > { %v9900_v33 = vpop.f32.mrf.mxu1  ;;  %9963 = vmatprep.mubr.msk.f32.mxu0 %vm10654_vm4, %v14601_v1 }
 0x6e5   : > { %v6564_v58 = vmax.f32 %v6483_v11, 0.0  ;;  %v6312_v33 = vpop.permute.xlu0 %6311 }
 0x6e6   : > { %v6487_v38 = vpop.f32.mrf.mxu1 }
 0x6e7   : > { %v6488_v37 = vadd.f32 %v6487_v38, %v6296_v60  ;;  %9964 = vmatmul.mubr.msk.f32.gmra.mxu0 %vm4940_vm5, %v6564_v58 }
 0x6e8   : > { %v9903_v23 = vpop.f32.mrf.mxu1  ;;  %9966 = vmatprep.mubr.msk.f32.mxu0 %vm10654_vm4, %v14601_v1 }
 0x6e9   : > { %v6565_v31 = vmax.f32 %v6488_v37, 0.0  ;;  %v6314_v23 = vpop.permute.xlu1 %6313 }
 0x6ea   : > { %v6492_v36 = vpop.f32.mrf.mxu1 }
 0x6eb   : > { %v6493_v63 = vadd.f32 %v6492_v36, %v6298_v51  ;;  %9967 = vmatmul.mubr.msk.f32.gmra.mxu0 %vm4940_vm5, %v6565_v31 }
 0x6ec   : > { %v9906_v17 = vpop.f32.mrf.mxu1  ;;  %9969 = vmatprep.mubr.msk.f32.mxu0 %vm10654_vm4, %v14601_v1 }
 0x6ed   : > { %v6566_v15 = vmax.f32 %v6493_v63, 0.0  ;;  %v9082_v17 = vld [vmem:[%s14550_s5 + $0xf8] sm:$0xff] }
 0x6ee   : > { %v6497_v30 = vpop.f32.mrf.mxu1  ;;  %10012 = vmatpush3.msra.mxu1 %v9082_v17 }
 0x6ef   : > { %v6498_v2 = vadd.f32 %v6497_v30, %v6300_v44  ;;  %9970 = vmatmul.mubr.msk.f32.gmra.mxu0 %vm4940_vm5, %v6566_v15  ;;  %v9081_v15 = vld [vmem:[%s14550_s5 + $0xf0] sm:$0xff]  ;;  %10013 = vmatprep.subr.mxu1 %v14601_v1  ;;  %v9080_v44 = vld [vmem:[%s14550_s5 + $0xe8] sm:$0xff]  ;;  %v9079_v30 = vld [vmem:[%s14550_s5 + $0xe0] sm:$0xff] }
 0x6f0   : > { %v9909_v9 = vpop.f32.mrf.mxu1  ;;  %9972 = vmatprep.mubr.msk.f32.mxu0 %vm10654_vm4, %v14601_v1  ;;  %10014 = vmatpush3.msra.mxu1 %v9081_v15 }
 0x6f1   : > { %v6567_v56 = vmax.f32 %v6498_v2, 0.0  ;;  %10015 = vmatprep.subr.mxu1 %v14601_v1  ;;  %v6316_v2 = vpop.permute.xlu0 %6315 }
 0x6f2   : > { %v6502_v10 = vpop.f32.mrf.mxu1  ;;  %10016 = vmatpush3.msra.mxu1 %v9080_v44 }
 0x6f3   : > { %v6503_v59 = vadd.f32 %v6502_v10, %v6302_v5  ;;  %9973 = vmatmul.mubr.msk.f32.gmra.mxu0 %vm4940_vm5, %v6567_v56  ;;  %10017 = vmatprep.subr.mxu1 %v14601_v1 }
 0x6f4   : > { %v9912_v18 = vpop.f32.mrf.mxu1  ;;  %9975 = vmatprep.mubr.msk.f32.mxu0 %vm10654_vm4, %v14601_v1  ;;  %10018 = vmatpush3.msra.mxu1 %v9079_v30 }
 0x6f5   : > { %v6568_v13 = vmax.f32 %v6503_v59, 0.0  ;;  %10141 = vmatprep.subr.mxu1 %v14601_v1  ;;  %v6318_v59 = vpop.permute.xlu1 %6317 }
 0x6f6   : > { %v6507_v28 = vpop.f32.mrf.mxu1 }
 0x6f7   : > { %v6508_v55 = vadd.f32 %v6507_v28, %v6304_v43  ;;  %9976 = vmatmul.mubr.msk.f32.gmra.mxu0 %vm4940_vm5, %v6568_v13 }
 0x6f8   : > { %v9915_v4 = vpop.f32.mrf.mxu1  ;;  %9978 = vmatprep.mubr.msk.f32.mxu0 %vm10654_vm4, %v14601_v1 }
 0x6f9   : > { %v6569_v35 = vmax.f32 %v6508_v55, 0.0  ;;  %v6320_v55 = vpop.permute.xlu0 %6319 }
 0x6fa   : > { %v6512_v48 = vpop.f32.mrf.mxu1 }
 0x6fb   : > { %v6513_v3 = vadd.f32 %v6512_v48, %v6306_v49  ;;  %9979 = vmatmul.mubr.msk.f32.gmra.mxu0 %vm4940_vm5, %v6569_v35 }
 0x6fc   : > { %v9918_v19 = vpop.f32.mrf.mxu1  ;;  %9981 = vmatprep.mubr.msk.f32.mxu0 %vm10654_vm4, %v14601_v1 }
 0x6fd   : > { %v6570_v46 = vmax.f32 %v6513_v3, 0.0  ;;  %v6322_v3 = vpop.permute.xlu1 %6321 }
 0x6fe   : > { %v6517_v53 = vpop.f32.mrf.mxu1 }
 0x6ff   : > { %v6518_v62 = vadd.f32 %v6517_v53, %v6308_v12  ;;  %9982 = vmatmul.mubr.msk.f32.gmra.mxu0 %vm4940_vm5, %v6570_v46 }
 0x700   : > { %v9921_v14 = vpop.f32.mrf.mxu1  ;;  %9984 = vmatprep.mubr.msk.f32.mxu0 %vm10654_vm4, %v14601_v1 }
 0x701   : > { %v6571_v45 = vmax.f32 %v6518_v62, 0.0  ;;  %v6587_v62 = vsub.s32 3, %v12716_v41 }
 0x702   : > { %v6522_v27 = vpop.f32.mrf.mxu1 }
 0x703   : > { %v6523_v21 = vadd.f32 %v6522_v27, %v6310_v54  ;;  %9985 = vmatmul.mubr.msk.f32.gmra.mxu0 %vm4940_vm5, %v6571_v45  ;;  %v13893_v14 = vrot.slane %v13721_v61, %v6587_v62  ;;  %v6324_v45 = vpop.permute.xlu0 %6323 }
 0x704   : > { %v9924_v24 = vpop.f32.mrf.mxu1  ;;  %9987 = vmatprep.mubr.msk.f32.mxu0 %vm10654_vm4, %v14601_v1 }
 0x705   : > { %v6572_v11 = vmax.f32 %v6523_v21, 0.0 }
 0x706   : > { %v6527_v58 = vpop.f32.mrf.mxu1 }
 0x707   : > { %v6528_v60 = vadd.f32 %v6527_v58, %v6312_v33  ;;  %9988 = vmatmul.mubr.msk.f32.gmra.mxu0 %vm4940_vm5, %v6572_v11 }
 0x708   : > { %v9927_v38 = vpop.f32.mrf.mxu1  ;;  %9990 = vmatprep.mubr.msk.f32.mxu0 %vm10654_vm4, %v14601_v1 }
 0x709   : > { %v6573_v37 = vmax.f32 %v6528_v60, 0.0 }
 0x70b   : > { %9991 = vmatmul.mubr.msk.f32.gmra.mxu0 %vm4940_vm5, %v6573_v37 }
 0x70c   : > { %9993 = vmatprep.mubr.msk.f32.mxu0 %vm10654_vm4, %v14601_v1 }
 0x716   : > { %v6532_v31 = vpop.f32.mrf.mxu1 }
 0x717   : > { %v6533_v51 = vadd.f32 %v6532_v31, %v6314_v23 }
 0x718   : > { %v9930_v36 = vpop.f32.mrf.mxu1 }
 0x719   : > { %v6574_v63 = vmax.f32 %v6533_v51, 0.0 }
 0x71b   : > { %9994 = vmatmul.mubr.msk.f32.gmra.mxu0 %vm4940_vm5, %v6574_v63 }
 0x71c   : > { %9996 = vmatprep.mubr.msk.f32.mxu0 %vm10654_vm4, %v14601_v1 }
 0x72d   : > { %v6537_v9 = vpop.f32.mrf.mxu1 }
 0x72e   : > { %v6538_v56 = vadd.f32 %v6537_v9, %v6316_v2 }
 0x72f   : > { %v9933_v5 = vpop.f32.mrf.mxu1 }
 0x730   : > { %v6575_v10 = vmax.f32 %v6538_v56, 0.0 }
 0x732   : > { %9997 = vmatmul.mubr.msk.f32.gmra.mxu0 %vm4940_vm5, %v6575_v10 }
 0x733   : > { %9999 = vmatprep.mubr.msk.f32.mxu0 %vm10654_vm4, %v14601_v1 }
 0x74c   : > { %v6542_v18 = vpop.f32.mrf.mxu1 }
 0x74d   : > { %v6543_v13 = vadd.f32 %v6542_v18, %v6318_v59 }
 0x74e   : > { %v9936_v43 = vpop.f32.mrf.mxu1 }
 0x74f   : > { %v6576_v28 = vmax.f32 %v6543_v13, 0.0 }
 0x751   : > { %10000 = vmatmul.mubr.msk.f32.gmra.mxu0 %vm4940_vm5, %v6576_v28 }
 0x752   : > { %10002 = vmatprep.mubr.msk.f32.mxu0 %vm10654_vm4, %v14601_v1 }
 0x765   : > { %v6547_v4 = vpop.f32.mrf.mxu1 }
 0x766   : > { %v6548_v35 = vadd.f32 %v6547_v4, %v6320_v55 }
 0x767   : > { %v9939_v49 = vpop.f32.mrf.mxu1 }
 0x768   : > { %v6577_v48 = vmax.f32 %v6548_v35, 0.0 }
 0x76a   : > { %10003 = vmatmul.mubr.msk.f32.gmra.mxu0 %vm4940_vm5, %v6577_v48 }
 0x76b   : > { %10005 = vmatprep.mubr.msk.f32.mxu0 %vm10654_vm4, %v14601_v1 }
 0x780   : > { %v6552_v19 = vpop.f32.mrf.mxu1 }
 0x781   : > { %v6553_v46 = vadd.f32 %v6552_v19, %v6322_v3 }
 0x782   : > { %v9942_v12 = vpop.f32.mrf.mxu1 }
 0x783   : > { %v6578_v53 = vmax.f32 %v6553_v46, 0.0 }
 0x785   : > { %10006 = vmatmul.mubr.msk.f32.gmra.mxu0 %vm4940_vm5, %v6578_v53 }
 0x786   : > { %10008 = vmatprep.mubr.msk.f32.mxu0 %vm10654_vm4, %v14601_v1 }
 0x799   : > { %v6557_v54 = vpop.f32.mrf.mxu1 }
 0x79a   : > { %v6558_v27 = vadd.f32 %v6557_v54, %v6324_v45 }
 0x79b   : > { %v9945_v21 = vpop.f32.mrf.mxu1  ;;  %v6712_v24 = vpop.f32.mrf.mxu0 }
 0x79c   : > { %v6579_v11 = vmax.f32 %v6558_v27, 0.0  ;;  %v6713_v33 = vadd.f32 %v6712_v24, %v13893_v14 }
 0x79d   : > { %v9956_v58 = vpop.f32.mrf.mxu0 }
 0x79e   : > { %10009 = vmatmul.mubr.msk.f32.gmra.mxu0 %vm4940_vm5, %v6579_v11  ;;  %v6806_v60 = vmax.f32 %v6713_v33, 0.0 }
 0x79f   : > { %v6717_v38 = vpop.f32.mrf.mxu0  ;;  %10084 = vmatprep.mubr.msk.f32.mxu0 %vm10654_vm4, %v14601_v1 }
 0x7a0   : > { %v6718_v37 = vadd.f32 %v6717_v38, %v13893_v14  ;;  %10020 = vmatmul.mubr.msk.f32.vlgmr.msra.gmra.mxu1 %vm4940_vm5, %v6806_v60 }
 0x7a1   : > { %v9959_v61 = vpop.f32.mrf.mxu0  ;;  %10022 = vmatprep.mubr.msk.f32.mxu1 %vm10654_vm4, %v14601_v1 }
 0x7a2   : > { %v6807_v23 = vmax.f32 %v6718_v37, 0.0 }
 0x7a3   : > { %v6722_v31 = vpop.f32.mrf.mxu0 }
 0x7a4   : > { %v6723_v51 = vadd.f32 %v6722_v31, %v13893_v14  ;;  %10023 = vmatmul.mubr.msk.f32.gmra.mxu1 %vm4940_vm5, %v6807_v23 }
 0x7a5   : > { %v9962_v36 = vpop.f32.mrf.mxu0  ;;  %10025 = vmatprep.mubr.msk.f32.mxu1 %vm10654_vm4, %v14601_v1 }
 0x7a6   : > { %v6808_v63 = vmax.f32 %v6723_v51, 0.0 }
 0x7a7   : > { %v6727_v17 = vpop.f32.mrf.mxu0 }
 0x7a8   : > { %v6728_v15 = vadd.f32 %v6727_v17, %v13893_v14  ;;  %10026 = vmatmul.mubr.msk.f32.gmra.mxu1 %vm4940_vm5, %v6808_v63 }
 0x7a9   : > { %v9965_v44 = vpop.f32.mrf.mxu0  ;;  %10028 = vmatprep.mubr.msk.f32.mxu1 %vm10654_vm4, %v14601_v1 }
 0x7aa   : > { %v6809_v30 = vmax.f32 %v6728_v15, 0.0  ;;  %v9105_v44 = vld [vmem:[%s14550_s5 + $0x118] sm:$0xff] }
 0x7ab   : > { %v6732_v2 = vpop.f32.mrf.mxu0  ;;  %10077 = vmatpush3.msra.mxu0 %v9105_v44 }
 0x7ac   : > { %v6733_v9 = vadd.f32 %v6732_v2, %v13893_v14  ;;  %10029 = vmatmul.mubr.msk.f32.gmra.mxu1 %vm4940_vm5, %v6809_v30  ;;  %v9104_v30 = vld [vmem:[%s14550_s5 + $0x110] sm:$0xff]  ;;  %10078 = vmatprep.subr.mxu0 %v14601_v1  ;;  %v9103_v2 = vld [vmem:[%s14550_s5 + $0x108] sm:$0xff] }
 0x7ad   : > { %v9968_v56 = vpop.f32.mrf.mxu0  ;;  %10031 = vmatprep.mubr.msk.f32.mxu1 %vm10654_vm4, %v14601_v1  ;;  %10079 = vmatpush3.msra.mxu0 %v9104_v30 }
 0x7ae   : > { %v6810_v5 = vmax.f32 %v6733_v9, 0.0  ;;  %10080 = vmatprep.subr.mxu0 %v14601_v1  ;;  %v9102_v9 = vld [vmem:[%s14550_s5 + $0x100] sm:$0xff] }
 0x7af   : > { %v6737_v10 = vpop.f32.mrf.mxu0  ;;  %10081 = vmatpush3.msra.mxu0 %v9103_v2 }
 0x7b0   : > { %v6738_v59 = vadd.f32 %v6737_v10, %v13893_v14  ;;  %10032 = vmatmul.mubr.msk.f32.gmra.mxu1 %vm4940_vm5, %v6810_v5  ;;  %10082 = vmatprep.subr.mxu0 %v14601_v1 }
 0x7b1   : > { %v9971_v18 = vpop.f32.mrf.mxu0  ;;  %10034 = vmatprep.mubr.msk.f32.mxu1 %vm10654_vm4, %v14601_v1  ;;  %10083 = vmatpush3.msra.mxu0 %v9102_v9 }
 0x7b2   : > { %v6811_v13 = vmax.f32 %v6738_v59, 0.0  ;;  %10206 = vmatprep.subr.mxu0 %v14601_v1 }
 0x7b3   : > { %v6742_v43 = vpop.f32.mrf.mxu0 }
 0x7b4   : > { %v6743_v28 = vadd.f32 %v6742_v43, %v13893_v14  ;;  %10035 = vmatmul.mubr.msk.f32.gmra.mxu1 %vm4940_vm5, %v6811_v13 }
 0x7b5   : > { %v9974_v55 = vpop.f32.mrf.mxu0  ;;  %10037 = vmatprep.mubr.msk.f32.mxu1 %vm10654_vm4, %v14601_v1 }
 0x7b6   : > { %v6812_v4 = vmax.f32 %v6743_v28, 0.0 }
 0x7b7   : > { %v6747_v35 = vpop.f32.mrf.mxu0 }
 0x7b8   : > { %v6748_v49 = vadd.f32 %v6747_v35, %v13893_v14  ;;  %10038 = vmatmul.mubr.msk.f32.gmra.mxu1 %vm4940_vm5, %v6812_v4 }
 0x7b9   : > { %v9977_v48 = vpop.f32.mrf.mxu0  ;;  %10040 = vmatprep.mubr.msk.f32.mxu1 %vm10654_vm4, %v14601_v1 }
 0x7ba   : > { %v6813_v3 = vmax.f32 %v6748_v49, 0.0 }
 0x7bb   : > { %v6752_v19 = vpop.f32.mrf.mxu0 }
 0x7bc   : > { %v6753_v46 = vadd.f32 %v6752_v19, %v13893_v14  ;;  %10041 = vmatmul.mubr.msk.f32.gmra.mxu1 %vm4940_vm5, %v6813_v3 }
 0x7bd   : > { %v9980_v12 = vpop.f32.mrf.mxu0  ;;  %10043 = vmatprep.mubr.msk.f32.mxu1 %vm10654_vm4, %v14601_v1 }
 0x7be   : > { %v6814_v53 = vmax.f32 %v6753_v46, 0.0 }
 0x7bf   : > { %v6757_v62 = vpop.f32.mrf.mxu0 }
 0x7c0   : > { %v6758_v45 = vadd.f32 %v6757_v62, %v13893_v14  ;;  %10044 = vmatmul.mubr.msk.f32.gmra.mxu1 %vm4940_vm5, %v6814_v53 }
 0x7c1   : > { %v9983_v54 = vpop.f32.mrf.mxu0  ;;  %10046 = vmatprep.mubr.msk.f32.mxu1 %vm10654_vm4, %v14601_v1 }
 0x7c2   : > { %v6815_v27 = vmax.f32 %v6758_v45, 0.0 }
 0x7c3   : > { %v6762_v21 = vpop.f32.mrf.mxu0 }
 0x7c4   : > { %v6763_v24 = vadd.f32 %v6762_v21, %v13893_v14  ;;  %10047 = vmatmul.mubr.msk.f32.gmra.mxu1 %vm4940_vm5, %v6815_v27 }
 0x7c5   : > { %v9986_v11 = vpop.f32.mrf.mxu0  ;;  %10049 = vmatprep.mubr.msk.f32.mxu1 %vm10654_vm4, %v14601_v1 }
 0x7c6   : > { %v6816_v33 = vmax.f32 %v6763_v24, 0.0 }
 0x7c7   : > { %v6767_v58 = vpop.f32.mrf.mxu0 }
 0x7c8   : > { %v6768_v60 = vadd.f32 %v6767_v58, %v13893_v14  ;;  %10050 = vmatmul.mubr.msk.f32.gmra.mxu1 %vm4940_vm5, %v6816_v33 }
 0x7c9   : > { %v9989_v38 = vpop.f32.mrf.mxu0  ;;  %10052 = vmatprep.mubr.msk.f32.mxu1 %vm10654_vm4, %v14601_v1 }
 0x7ca   : > { %v6817_v37 = vmax.f32 %v6768_v60, 0.0 }
 0x7cb   : > { %v6772_v61 = vpop.f32.mrf.mxu0 }
 0x7cc   : > { %v6773_v23 = vadd.f32 %v6772_v61, %v13893_v14  ;;  %10053 = vmatmul.mubr.msk.f32.gmra.mxu1 %vm4940_vm5, %v6817_v37 }
 0x7cd   : > { %v9992_v31 = vpop.f32.mrf.mxu0  ;;  %10055 = vmatprep.mubr.msk.f32.mxu1 %vm10654_vm4, %v14601_v1 }
 0x7ce   : > { %v6818_v51 = vmax.f32 %v6773_v23, 0.0 }
 0x7d0   : > { %10056 = vmatmul.mubr.msk.f32.gmra.mxu1 %vm4940_vm5, %v6818_v51 }
 0x7d1   : > { %10058 = vmatprep.mubr.msk.f32.mxu1 %vm10654_vm4, %v14601_v1 }
 0x7db   : > { %v6777_v36 = vpop.f32.mrf.mxu0 }
 0x7dc   : > { %v6778_v63 = vadd.f32 %v6777_v36, %v13893_v14 }
 0x7dd   : > { %v9995_v17 = vpop.f32.mrf.mxu0 }
 0x7de   : > { %v6819_v15 = vmax.f32 %v6778_v63, 0.0 }
 0x7e0   : > { %10059 = vmatmul.mubr.msk.f32.gmra.mxu1 %vm4940_vm5, %v6819_v15 }
 0x7e1   : > { %10061 = vmatprep.mubr.msk.f32.mxu1 %vm10654_vm4, %v14601_v1 }
 0x7f2   : > { %v6782_v56 = vpop.f32.mrf.mxu0 }
 0x7f3   : > { %v6783_v5 = vadd.f32 %v6782_v56, %v13893_v14 }
 0x7f4   : > { %v9998_v10 = vpop.f32.mrf.mxu0 }
 0x7f5   : > { %v6820_v59 = vmax.f32 %v6783_v5, 0.0 }
 0x7f7   : > { %10062 = vmatmul.mubr.msk.f32.gmra.mxu1 %vm4940_vm5, %v6820_v59 }
 0x7f8   : > { %10064 = vmatprep.mubr.msk.f32.mxu1 %vm10654_vm4, %v14601_v1 }
 0x811   : > { %v6787_v18 = vpop.f32.mrf.mxu0 }
 0x812   : > { %v6788_v13 = vadd.f32 %v6787_v18, %v13893_v14 }
 0x813   : > { %v10001_v43 = vpop.f32.mrf.mxu0 }
 0x814   : > { %v6821_v28 = vmax.f32 %v6788_v13, 0.0 }
 0x816   : > { %10065 = vmatmul.mubr.msk.f32.gmra.mxu1 %vm4940_vm5, %v6821_v28 }
 0x817   : > { %10067 = vmatprep.mubr.msk.f32.mxu1 %vm10654_vm4, %v14601_v1 }
 0x82a   : > { %v6792_v55 = vpop.f32.mrf.mxu0 }
 0x82b   : > { %v6793_v4 = vadd.f32 %v6792_v55, %v13893_v14 }
 0x82c   : > { %v10004_v35 = vpop.f32.mrf.mxu0 }
 0x82d   : > { %v6822_v49 = vmax.f32 %v6793_v4, 0.0 }
 0x82f   : > { %10068 = vmatmul.mubr.msk.f32.gmra.mxu1 %vm4940_vm5, %v6822_v49 }
 0x830   : > { %10070 = vmatprep.mubr.msk.f32.mxu1 %vm10654_vm4, %v14601_v1 }
 0x845   : > { %v6797_v48 = vpop.f32.mrf.mxu0 }
 0x846   : > { %v6798_v3 = vadd.f32 %v6797_v48, %v13893_v14 }
 0x847   : > { %v10007_v19 = vpop.f32.mrf.mxu0 }
 0x848   : > { %v6823_v46 = vmax.f32 %v6798_v3, 0.0 }
 0x84a   : > { %10071 = vmatmul.mubr.msk.f32.gmra.mxu1 %vm4940_vm5, %v6823_v46 }
 0x84b   : > { %10073 = vmatprep.mubr.msk.f32.mxu1 %vm10654_vm4, %v14601_v1 }
 0x85e   : > { %v6802_v12 = vpop.f32.mrf.mxu0 }
 0x85f   : > { %v6803_v53 = vadd.f32 %v6802_v12, %v13893_v14 }
 0x860   : > { %v10010_v62 = vpop.f32.mrf.mxu0  ;;  %v6953_v45 = vpop.f32.mrf.mxu1 }
 0x861   : > { %v6824_v54 = vmax.f32 %v6803_v53, 0.0  ;;  %v6954_v27 = vadd.f32 %v6953_v45, %v13253_v47 }
 0x862   : > { %v10021_v21 = vpop.f32.mrf.mxu1 }
 0x863   : > { %10074 = vmatmul.mubr.msk.f32.gmra.mxu1 %vm4940_vm5, %v6824_v54  ;;  %v7047_v24 = vmax.f32 %v6954_v27, 0.0  ;;  %v9127_v27 = vld [vmem:[%s14550_s5 + $0x130] sm:$0xff]  ;;  %v9125_v21 = vld [vmem:[%s14550_s5 + $0x120] sm:$0xff] }
 0x864   : > { %v6958_v11 = vpop.f32.mrf.mxu1  ;;  %10149 = vmatprep.mubr.msk.f32.mxu1 %vm10654_vm4, %v14601_v1 }
 0x865   : > { %v6959_v33 = vadd.f32 %v6958_v11, %v13325_v20  ;;  %10085 = vmatmul.mubr.msk.f32.vlgmr.msra.gmra.mxu0 %vm4940_vm5, %v7047_v24 }
 0x866   : > { %v10024_v58 = vpop.f32.mrf.mxu1  ;;  %10087 = vmatprep.mubr.msk.f32.mxu0 %vm10654_vm4, %v14601_v1 }
 0x867   : > { %v7048_v14 = vmax.f32 %v6959_v33, 0.0 }
 0x868   : > { %v6963_v60 = vpop.f32.mrf.mxu1 }
 0x869   : > { %v6964_v47 = vadd.f32 %v6963_v60, %v13265_v26  ;;  %10088 = vmatmul.mubr.msk.f32.gmra.mxu0 %vm4940_vm5, %v7048_v14 }
 0x86a   : > { %v10027_v38 = vpop.f32.mrf.mxu1  ;;  %10090 = vmatprep.mubr.msk.f32.mxu0 %vm10654_vm4, %v14601_v1 }
 0x86b   : > { %v7049_v37 = vmax.f32 %v6964_v47, 0.0 }
 0x86c   : > { %v6968_v61 = vpop.f32.mrf.mxu1 }
 0x86d   : > { %v6969_v20 = vadd.f32 %v6968_v61, %v13339_v16  ;;  %10091 = vmatmul.mubr.msk.f32.gmra.mxu0 %vm4940_vm5, %v7049_v37 }
 0x86e   : > { %v10030_v23 = vpop.f32.mrf.mxu1  ;;  %10093 = vmatprep.mubr.msk.f32.mxu0 %vm10654_vm4, %v14601_v1 }
 0x86f   : > { %v7050_v31 = vmax.f32 %v6969_v20, 0.0 }
 0x870   : > { %v6973_v51 = vpop.f32.mrf.mxu1 }
 0x871   : > { %v6974_v26 = vadd.f32 %v6973_v51, %v13274_v29  ;;  %10094 = vmatmul.mubr.msk.f32.gmra.mxu0 %vm4940_vm5, %v7050_v31 }
 0x872   : > { %v10033_v36 = vpop.f32.mrf.mxu1  ;;  %10096 = vmatprep.mubr.msk.f32.mxu0 %vm10654_vm4, %v14601_v1 }
 0x873   : > { %v7051_v63 = vmax.f32 %v6974_v26, 0.0  ;;  %v7073_v26 = vsub.s32 4, %v12716_v41 }
 0x874   : > { %v6978_v17 = vpop.f32.mrf.mxu1 }
 0x875   : > { %v6979_v16 = vadd.f32 %v6978_v17, %v13353_v52  ;;  %10097 = vmatmul.mubr.msk.f32.gmra.mxu0 %vm4940_vm5, %v7051_v63 }
 0x876   : > { %v10036_v15 = vpop.f32.mrf.mxu1  ;;  %10099 = vmatprep.mubr.msk.f32.mxu0 %vm10654_vm4, %v14601_v1 }
 0x877   : > { %v7052_v44 = vmax.f32 %v6979_v16, 0.0 }
 0x878   : > { %v6983_v30 = vpop.f32.mrf.mxu1 }
 0x879   : > { %v6984_v29 = vadd.f32 %v6983_v30, %v13284_v22  ;;  %10100 = vmatmul.mubr.msk.f32.gmra.mxu0 %vm4940_vm5, %v7052_v44 }
 0x87a   : > { %v10039_v2 = vpop.f32.mrf.mxu1  ;;  %10102 = vmatprep.mubr.msk.f32.mxu0 %vm10654_vm4, %v14601_v1 }
 0x87b   : > { %v7053_v9 = vmax.f32 %v6984_v29, 0.0 }
 0x87c   : > { %v6988_v56 = vpop.f32.mrf.mxu1 }
 0x87d   : > { %v6989_v52 = vadd.f32 %v6988_v56, %v13368_v8  ;;  %10103 = vmatmul.mubr.msk.f32.gmra.mxu0 %vm4940_vm5, %v7053_v9 }
 0x87e   : > { %v10042_v5 = vpop.f32.mrf.mxu1  ;;  %10105 = vmatprep.mubr.msk.f32.mxu0 %vm10654_vm4, %v14601_v1 }
 0x87f   : > { %v7054_v10 = vmax.f32 %v6989_v52, 0.0 }
 0x880   : > { %v6993_v59 = vpop.f32.mrf.mxu1 }
 0x881   : > { %v6994_v22 = vadd.f32 %v6993_v59, %v13296_v50  ;;  %10106 = vmatmul.mubr.msk.f32.gmra.mxu0 %vm4940_vm5, %v7054_v10 }
 0x882   : > { %v10045_v18 = vpop.f32.mrf.mxu1  ;;  %10108 = vmatprep.mubr.msk.f32.mxu0 %vm10654_vm4, %v14601_v1 }
 0x883   : > { %v7055_v13 = vmax.f32 %v6994_v22, 0.0 }
 0x884   : > { %v6998_v43 = vpop.f32.mrf.mxu1 }
 0x885   : > { %v6999_v8 = vadd.f32 %v6998_v43, %v13377_v25  ;;  %10109 = vmatmul.mubr.msk.f32.gmra.mxu0 %vm4940_vm5, %v7055_v13 }
 0x886   : > { %v10048_v28 = vpop.f32.mrf.mxu1  ;;  %10111 = vmatprep.mubr.msk.f32.mxu0 %vm10654_vm4, %v14601_v1 }
 0x887   : > { %v7056_v55 = vmax.f32 %v6999_v8, 0.0 }
 0x888   : > { %v7003_v4 = vpop.f32.mrf.mxu1 }
 0x889   : > { %v7004_v50 = vadd.f32 %v7003_v4, %v13305_v40  ;;  %10112 = vmatmul.mubr.msk.f32.gmra.mxu0 %vm4940_vm5, %v7056_v55 }
 0x88a   : > { %v10051_v35 = vpop.f32.mrf.mxu1  ;;  %10114 = vmatprep.mubr.msk.f32.mxu0 %vm10654_vm4, %v14601_v1 }
 0x88b   : > { %v7057_v49 = vmax.f32 %v7004_v50, 0.0 }
 0x88c   : > { %v7008_v48 = vpop.f32.mrf.mxu1 }
 0x88d   : > { %v7009_v25 = vadd.f32 %v7008_v48, %v13386_v6  ;;  %10115 = vmatmul.mubr.msk.f32.gmra.mxu0 %vm4940_vm5, %v7057_v49 }
 0x88e   : > { %v10054_v3 = vpop.f32.mrf.mxu1  ;;  %10117 = vmatprep.mubr.msk.f32.mxu0 %vm10654_vm4, %v14601_v1 }
 0x88f   : > { %v7058_v19 = vmax.f32 %v7009_v25, 0.0 }
 0x890   : > { %v7013_v46 = vpop.f32.mrf.mxu1 }
 0x891   : > { %v7014_v40 = vadd.f32 %v7013_v46, %v13316_v7  ;;  %10118 = vmatmul.mubr.msk.f32.gmra.mxu0 %vm4940_vm5, %v7058_v19  ;;  %v9128_v7 = vld [vmem:[%s14550_s5 + $0x138] sm:$0xff] }
 0x892   : > { %v10057_v12 = vpop.f32.mrf.mxu1  ;;  %10120 = vmatprep.mubr.msk.f32.mxu0 %vm10654_vm4, %v14601_v1  ;;  %10142 = vmatpush3.msra.mxu1 %v9128_v7 }
 0x893   : > { %v7059_v53 = vmax.f32 %v7014_v40, 0.0  ;;  %10143 = vmatprep.subr.mxu1 %v14601_v1 }
 0x894   : > { %10144 = vmatpush3.msra.mxu1 %v9127_v27 }
 0x895   : > { %10121 = vmatmul.mubr.msk.f32.gmra.mxu0 %vm4940_vm5, %v7059_v53  ;;  %10145 = vmatprep.subr.mxu1 %v14601_v1 }
 0x896   : > { %10123 = vmatprep.mubr.msk.f32.mxu0 %vm10654_vm4, %v14601_v1 }
 0x8a0   : > { %v7018_v6 = vpop.f32.mrf.mxu1 }
 0x8a1   : > { %v7019_v62 = vadd.f32 %v7018_v6, %v13395_v34  ;;  %v9126_v34 = vld [vmem:[%s14550_s5 + $0x128] sm:$0xff] }
 0x8a2   : > { %v10060_v45 = vpop.f32.mrf.mxu1  ;;  %10146 = vmatpush3.msra.mxu1 %v9126_v34 }
 0x8a3   : > { %v7060_v54 = vmax.f32 %v7019_v62, 0.0  ;;  %10147 = vmatprep.subr.mxu1 %v14601_v1 }
 0x8a4   : > { %10148 = vmatpush3.msra.mxu1 %v9125_v21 }
 0x8a5   : > { %10124 = vmatmul.mubr.msk.f32.gmra.mxu0 %vm4940_vm5, %v7060_v54  ;;  %10271 = vmatprep.subr.mxu1 %v14601_v1 }
 0x8a6   : > { %10126 = vmatprep.mubr.msk.f32.mxu0 %vm10654_vm4, %v14601_v1 }
 0x8b7   : > { %v7023_v24 = vpop.f32.mrf.mxu1 }
 0x8b8   : > { %v7024_v11 = vadd.f32 %v7023_v24, %v13330_v0 }
 0x8b9   : > { %v10063_v33 = vpop.f32.mrf.mxu1 }
 0x8ba   : > { %v7061_v58 = vmax.f32 %v7024_v11, 0.0 }
 0x8bc   : > { %10127 = vmatmul.mubr.msk.f32.gmra.mxu0 %vm4940_vm5, %v7061_v58 }
 0x8bd   : > { %10129 = vmatprep.mubr.msk.f32.mxu0 %vm10654_vm4, %v14601_v1 }
 0x8d6   : > { %v7028_v14 = vpop.f32.mrf.mxu1 }
 0x8d7   : > { %v7029_v60 = vadd.f32 %v7028_v14, %v13404_v42 }
 0x8d8   : > { %v10066_v47 = vpop.f32.mrf.mxu1 }
 0x8d9   : > { %v7062_v38 = vmax.f32 %v7029_v60, 0.0 }
 0x8db   : > { %10130 = vmatmul.mubr.msk.f32.gmra.mxu0 %vm4940_vm5, %v7062_v38 }
 0x8dc   : > { %10132 = vmatprep.mubr.msk.f32.mxu0 %vm10654_vm4, %v14601_v1 }
 0x8ef   : > { %v7033_v37 = vpop.f32.mrf.mxu1 }
 0x8f0   : > { %v7034_v0 = vadd.f32 %v7033_v37, %v13344_v57  ;;  %v14082_v57 = vld [vmem:[%s14551_s6] sm:$0x3f] }
 0x8f1   : > { %v10069_v61 = vpop.f32.mrf.mxu1  ;;  %v14085_v36 = vrot.slane %v14082_v57, %v7073_v26 }
 0x8f2   : > { %v7063_v20 = vmax.f32 %v7034_v0, 0.0 }
 0x8f4   : > { %10133 = vmatmul.mubr.msk.f32.gmra.mxu0 %vm4940_vm5, %v7063_v20 }
 0x8f5   : > { %10135 = vmatprep.mubr.msk.f32.mxu0 %vm10654_vm4, %v14601_v1 }
 0x90a   : > { %v7038_v23 = vpop.f32.mrf.mxu1 }
 0x90b   : > { %v7039_v42 = vadd.f32 %v7038_v23, %v13413_v39 }
 0x90c   : > { %v10072_v31 = vpop.f32.mrf.mxu1 }
 0x90d   : > { %v7064_v51 = vmax.f32 %v7039_v42, 0.0 }
 0x90f   : > { %10136 = vmatmul.mubr.msk.f32.gmra.mxu0 %vm4940_vm5, %v7064_v51 }
 0x910   : > { %10138 = vmatprep.mubr.msk.f32.mxu0 %vm10654_vm4, %v14601_v1 }
 0x923   : > { %v7043_v63 = vpop.f32.mrf.mxu1 }
 0x924   : > { %v7044_v39 = vadd.f32 %v7043_v63, %v13358_v32  ;;  %v9151_v63 = vld [vmem:[%s14550_s5 + $0x158] sm:$0xff] }
 0x925   : > { %v10075_v17 = vpop.f32.mrf.mxu1  ;;  %v7198_v16 = vpop.f32.mrf.mxu0  ;;  %10207 = vmatpush3.msra.mxu0 %v9151_v63 }
 0x926   : > { %v7065_v15 = vmax.f32 %v7044_v39, 0.0  ;;  %v7199_v44 = vadd.f32 %v7198_v16, %v14085_v36  ;;  %v9150_v39 = vld [vmem:[%s14550_s5 + $0x150] sm:$0xff]  ;;  %10208 = vmatprep.subr.mxu0 %v14601_v1  ;;  %v9149_v17 = vld [vmem:[%s14550_s5 + $0x148] sm:$0xff]  ;;  %v9148_v16 = vld [vmem:[%s14550_s5 + $0x140] sm:$0xff] }
 0x927   : > { %v10086_v30 = vpop.f32.mrf.mxu0  ;;  %10209 = vmatpush3.msra.mxu0 %v9150_v39 }
 0x928   : > { %10139 = vmatmul.mubr.msk.f32.gmra.mxu0 %vm4940_vm5, %v7065_v15  ;;  %v7292_v29 = vmax.f32 %v7199_v44, 0.0  ;;  %10210 = vmatprep.subr.mxu0 %v14601_v1 }
 0x929   : > { %v7203_v2 = vpop.f32.mrf.mxu0  ;;  %10214 = vmatprep.mubr.msk.f32.mxu0 %vm10654_vm4, %v14601_v1  ;;  %10211 = vmatpush3.msra.mxu0 %v9149_v17 }
 0x92a   : > { %v7204_v9 = vadd.f32 %v7203_v2, %v14085_v36  ;;  %10150 = vmatmul.mubr.msk.f32.vlgmr.msra.gmra.mxu1 %vm4940_vm5, %v7292_v29  ;;  %10212 = vmatprep.subr.mxu0 %v14601_v1 }
 0x92b   : > { %v10089_v56 = vpop.f32.mrf.mxu0  ;;  %10152 = vmatprep.mubr.msk.f32.mxu1 %vm10654_vm4, %v14601_v1  ;;  %10213 = vmatpush3.msra.mxu0 %v9148_v16 }
 0x92c   : > { %v7293_v32 = vmax.f32 %v7204_v9, 0.0  ;;  %10336 = vmatprep.subr.mxu0 %v14601_v1 }
 0x92d   : > { %v7208_v52 = vpop.f32.mrf.mxu0 }
 0x92e   : > { %v7209_v5 = vadd.f32 %v7208_v52, %v14085_v36  ;;  %10153 = vmatmul.mubr.msk.f32.gmra.mxu1 %vm4940_vm5, %v7293_v32 }
 0x92f   : > { %v10092_v10 = vpop.f32.mrf.mxu0  ;;  %10155 = vmatprep.mubr.msk.f32.mxu1 %vm10654_vm4, %v14601_v1 }
 0x930   : > { %v7294_v59 = vmax.f32 %v7209_v5, 0.0 }
 0x931   : > { %v7213_v22 = vpop.f32.mrf.mxu0 }
 0x932   : > { %v7214_v18 = vadd.f32 %v7213_v22, %v14085_v36  ;;  %10156 = vmatmul.mubr.msk.f32.gmra.mxu1 %vm4940_vm5, %v7294_v59 }
 0x933   : > { %v10095_v13 = vpop.f32.mrf.mxu0  ;;  %10158 = vmatprep.mubr.msk.f32.mxu1 %vm10654_vm4, %v14601_v1 }
 0x934   : > { %v7295_v43 = vmax.f32 %v7214_v18, 0.0 }
 0x935   : > { %v7218_v8 = vpop.f32.mrf.mxu0 }
 0x936   : > { %v7219_v28 = vadd.f32 %v7218_v8, %v14085_v36  ;;  %10159 = vmatmul.mubr.msk.f32.gmra.mxu1 %vm4940_vm5, %v7295_v43 }
 0x937   : > { %v10098_v55 = vpop.f32.mrf.mxu0  ;;  %10161 = vmatprep.mubr.msk.f32.mxu1 %vm10654_vm4, %v14601_v1 }
 0x938   : > { %v7296_v4 = vmax.f32 %v7219_v28, 0.0  ;;  %v7336_v28 = vpop.permute.xlu1 %7335 }
 0x939   : > { %v7223_v50 = vpop.f32.mrf.mxu0 }
 0x93a   : > { %v7224_v35 = vadd.f32 %v7223_v50, %v14085_v36  ;;  %10162 = vmatmul.mubr.msk.f32.gmra.mxu1 %vm4940_vm5, %v7296_v4 }
 0x93b   : > { %v10101_v49 = vpop.f32.mrf.mxu0  ;;  %10164 = vmatprep.mubr.msk.f32.mxu1 %vm10654_vm4, %v14601_v1 }
 0x93c   : > { %v7297_v48 = vmax.f32 %v7224_v35, 0.0 }
 0x93d   : > { %v7228_v25 = vpop.f32.mrf.mxu0 }
 0x93e   : > { %v7229_v3 = vadd.f32 %v7228_v25, %v14085_v36  ;;  %10165 = vmatmul.mubr.msk.f32.gmra.mxu1 %vm4940_vm5, %v7297_v48 }
 0x93f   : > { %v10104_v19 = vpop.f32.mrf.mxu0  ;;  %10167 = vmatprep.mubr.msk.f32.mxu1 %vm10654_vm4, %v14601_v1 }
 0x940   : > { %v7298_v46 = vmax.f32 %v7229_v3, 0.0  ;;  %v7338_v3 = vpop.permute.xlu0 %7337 }
 0x941   : > { %v7233_v40 = vpop.f32.mrf.mxu0 }
 0x942   : > { %v7234_v12 = vadd.f32 %v7233_v40, %v14085_v36  ;;  %10168 = vmatmul.mubr.msk.f32.gmra.mxu1 %vm4940_vm5, %v7298_v46 }
 0x943   : > { %v10107_v53 = vpop.f32.mrf.mxu0  ;;  %10170 = vmatprep.mubr.msk.f32.mxu1 %vm10654_vm4, %v14601_v1 }
 0x944   : > { %v7299_v6 = vmax.f32 %v7234_v12, 0.0  ;;  %v7340_v12 = vpop.permute.xlu1 %7339 }
 0x945   : > { %v7238_v62 = vpop.f32.mrf.mxu0 }
 0x946   : > { %v7239_v45 = vadd.f32 %v7238_v62, %v14085_v36  ;;  %10171 = vmatmul.mubr.msk.f32.gmra.mxu1 %vm4940_vm5, %v7299_v6 }
 0x947   : > { %v10110_v54 = vpop.f32.mrf.mxu0  ;;  %10173 = vmatprep.mubr.msk.f32.mxu1 %vm10654_vm4, %v14601_v1 }
 0x948   : > { %v7300_v7 = vmax.f32 %v7239_v45, 0.0  ;;  %v7342_v54 = vpop.permute.xlu0 %7341 }
 0x949   : > { %v7243_v27 = vpop.f32.mrf.mxu0 }
 0x94a   : > { %v7244_v34 = vadd.f32 %v7243_v27, %v14085_v36  ;;  %10174 = vmatmul.mubr.msk.f32.gmra.mxu1 %vm4940_vm5, %v7300_v7 }
 0x94b   : > { %v10113_v21 = vpop.f32.mrf.mxu0  ;;  %10176 = vmatprep.mubr.msk.f32.mxu1 %vm10654_vm4, %v14601_v1 }
 0x94c   : > { %v7301_v24 = vmax.f32 %v7244_v34, 0.0 }
 0x94d   : > { %v7248_v11 = vpop.f32.mrf.mxu0 }
 0x94e   : > { %v7249_v33 = vadd.f32 %v7248_v11, %v14085_v36  ;;  %10177 = vmatmul.mubr.msk.f32.gmra.mxu1 %vm4940_vm5, %v7301_v24  ;;  %v7344_v24 = vpop.permute.xlu1 %7343 }
 0x94f   : > { %v10116_v58 = vpop.f32.mrf.mxu0  ;;  %10179 = vmatprep.mubr.msk.f32.mxu1 %vm10654_vm4, %v14601_v1 }
 0x950   : > { %v7302_v14 = vmax.f32 %v7249_v33, 0.0 }
 0x951   : > { %v7253_v60 = vpop.f32.mrf.mxu0 }
 0x952   : > { %v7254_v47 = vadd.f32 %v7253_v60, %v14085_v36  ;;  %10180 = vmatmul.mubr.msk.f32.gmra.mxu1 %vm4940_vm5, %v7302_v14  ;;  %v7346_v60 = vpop.permute.xlu0 %7345 }
 0x953   : > { %v10119_v38 = vpop.f32.mrf.mxu0  ;;  %10182 = vmatprep.mubr.msk.f32.mxu1 %vm10654_vm4, %v14601_v1 }
 0x954   : > { %v7303_v37 = vmax.f32 %v7254_v47, 0.0 }
 0x955   : > { %v7258_v0 = vpop.f32.mrf.mxu0 }
 0x956   : > { %v7259_v61 = vadd.f32 %v7258_v0, %v14085_v36  ;;  %10183 = vmatmul.mubr.msk.f32.gmra.mxu1 %vm4940_vm5, %v7303_v37 }
 0x957   : > { %v10122_v20 = vpop.f32.mrf.mxu0  ;;  %10185 = vmatprep.mubr.msk.f32.mxu1 %vm10654_vm4, %v14601_v1 }
 0x958   : > { %v7304_v23 = vmax.f32 %v7259_v61, 0.0  ;;  %v7348_v61 = vpop.permute.xlu1 %7347 }
 0x95a   : > { %10186 = vmatmul.mubr.msk.f32.gmra.mxu1 %vm4940_vm5, %v7304_v23 }
 0x95b   : > { %10188 = vmatprep.mubr.msk.f32.mxu1 %vm10654_vm4, %v14601_v1 }
 0x95c   : > { %v7352_v16 = vpop.permute.xlu1 %7351 }
 0x965   : > { %v7263_v42 = vpop.f32.mrf.mxu0 }
 0x966   : > { %v7264_v31 = vadd.f32 %v7263_v42, %v14085_v36 }
 0x967   : > { %v10125_v51 = vpop.f32.mrf.mxu0 }
 0x968   : > { %v7305_v26 = vmax.f32 %v7264_v31, 0.0  ;;  %v7350_v51 = vpop.permute.xlu0 %7349 }
 0x96a   : > { %10189 = vmatmul.mubr.msk.f32.gmra.mxu1 %vm4940_vm5, %v7305_v26 }
 0x96b   : > { %10191 = vmatprep.mubr.msk.f32.mxu1 %vm10654_vm4, %v14601_v1 }
 0x97c   : > { %v7268_v15 = vpop.f32.mrf.mxu0 }
 0x97d   : > { %v7269_v44 = vadd.f32 %v7268_v15, %v14085_v36 }
 0x97e   : > { %v10128_v30 = vpop.f32.mrf.mxu0 }
 0x97f   : > { %v7306_v29 = vmax.f32 %v7269_v44, 0.0 }
 0x981   : > { %10192 = vmatmul.mubr.msk.f32.gmra.mxu1 %vm4940_vm5, %v7306_v29 }
 0x982   : > { %10194 = vmatprep.mubr.msk.f32.mxu1 %vm10654_vm4, %v14601_v1 }
 0x99b   : > { %v7273_v2 = vpop.f32.mrf.mxu0 }
 0x99c   : > { %v7274_v9 = vadd.f32 %v7273_v2, %v14085_v36  ;;  %v7354_v2 = vpop.permute.xlu0 %7353 }
 0x99d   : > { %v10131_v56 = vpop.f32.mrf.mxu0 }
 0x99e   : > { %v7307_v32 = vmax.f32 %v7274_v9, 0.0 }
 0x9a0   : > { %10195 = vmatmul.mubr.msk.f32.gmra.mxu1 %vm4940_vm5, %v7307_v32 }
 0x9a1   : > { %10197 = vmatprep.mubr.msk.f32.mxu1 %vm10654_vm4, %v14601_v1 }
 0x9b4   : > { %v7278_v52 = vpop.f32.mrf.mxu0 }
 0x9b5   : > { %v7279_v5 = vadd.f32 %v7278_v52, %v14085_v36 }
 0x9b6   : > { %v10134_v10 = vpop.f32.mrf.mxu0 }
 0x9b7   : > { %v7308_v59 = vmax.f32 %v7279_v5, 0.0  ;;  %v7356_v5 = vpop.permute.xlu1 %7355 }
 0x9b9   : > { %10198 = vmatmul.mubr.msk.f32.gmra.mxu1 %vm4940_vm5, %v7308_v59 }
 0x9ba   : > { %10200 = vmatprep.mubr.msk.f32.mxu1 %vm10654_vm4, %v14601_v1 }
 0x9cf   : > { %v7283_v22 = vpop.f32.mrf.mxu0 }
 0x9d0   : > { %v7284_v18 = vadd.f32 %v7283_v22, %v14085_v36 }
 0x9d1   : > { %v10137_v13 = vpop.f32.mrf.mxu0 }
 0x9d2   : > { %v7309_v43 = vmax.f32 %v7284_v18, 0.0  ;;  %v7358_v13 = vpop.permute.xlu0 %7357 }
 0x9d4   : > { %10201 = vmatmul.mubr.msk.f32.gmra.mxu1 %vm4940_vm5, %v7309_v43 }
 0x9d5   : > { %10203 = vmatprep.mubr.msk.f32.mxu1 %vm10654_vm4, %v14601_v1 }
 0x9e8   : > { %v7288_v8 = vpop.f32.mrf.mxu0 }
 0x9e9   : > { %v7289_v55 = vadd.f32 %v7288_v8, %v14085_v36 }
 0x9ea   : > { %v10140_v4 = vpop.f32.mrf.mxu0  ;;  %v7515_v50 = vpop.f32.mrf.mxu1 }
 0x9eb   : > { %v7310_v35 = vmax.f32 %v7289_v55, 0.0  ;;  %v7516_v49 = vadd.f32 %v7515_v50, %v7336_v28  ;;  %v7360_v4 = vpop.permute.xlu1 %7359 }
 0x9ec   : > { %v10151_v48 = vpop.f32.mrf.mxu1 }
 0x9ed   : > { %10204 = vmatmul.mubr.msk.f32.gmra.mxu1 %vm4940_vm5, %v7310_v35  ;;  %v7609_v25 = vmax.f32 %v7516_v49, 0.0 }
 0x9ee   : > { %v7520_v19 = vpop.f32.mrf.mxu1  ;;  %10279 = vmatprep.mubr.msk.f32.mxu1 %vm10654_vm4, %v14601_v1 }
 0x9ef   : > { %v7521_v46 = vadd.f32 %v7520_v19, %v7338_v3  ;;  %10215 = vmatmul.mubr.msk.f32.vlgmr.msra.gmra.mxu0 %vm4940_vm5, %v7609_v25  ;;  %v7362_v25 = vpop.permute.xlu0 %7361 }
 0x9f0   : > { %v10154_v40 = vpop.f32.mrf.mxu1  ;;  %10217 = vmatprep.mubr.msk.f32.mxu0 %vm10654_vm4, %v14601_v1 }
 0x9f1   : > { %v7610_v36 = vmax.f32 %v7521_v46, 0.0 }
 0x9f2   : > { %v7525_v53 = vpop.f32.mrf.mxu1 }
 0x9f3   : > { %v7526_v6 = vadd.f32 %v7525_v53, %v7340_v12  ;;  %10218 = vmatmul.mubr.msk.f32.gmra.mxu0 %vm4940_vm5, %v7610_v36  ;;  %v9174_v36 = vld [vmem:[%s14550_s5 + $0x178] sm:$0xff]  ;;  %v9173_v12 = vld [vmem:[%s14550_s5 + $0x170] sm:$0xff]  ;;  %v9172_v53 = vld [vmem:[%s14550_s5 + $0x168] sm:$0xff] }
 0x9f4   : > { %v10157_v62 = vpop.f32.mrf.mxu1  ;;  %10220 = vmatprep.mubr.msk.f32.mxu0 %vm10654_vm4, %v14601_v1  ;;  %10272 = vmatpush3.msra.mxu1 %v9174_v36 }
 0x9f5   : > { %v7611_v45 = vmax.f32 %v7526_v6, 0.0  ;;  %10273 = vmatprep.subr.mxu1 %v14601_v1  ;;  %v9171_v6 = vld [vmem:[%s14550_s5 + $0x160] sm:$0xff]  ;;  %v7364_v62 = vpop.permute.xlu1 %7363 }
 0x9f6   : > { %v7530_v7 = vpop.f32.mrf.mxu1  ;;  %10274 = vmatpush3.msra.mxu1 %v9173_v12 }
 0x9f7   : > { %v7531_v27 = vadd.f32 %v7530_v7, %v7342_v54  ;;  %10221 = vmatmul.mubr.msk.f32.gmra.mxu0 %vm4940_vm5, %v7611_v45  ;;  %10275 = vmatprep.subr.mxu1 %v14601_v1 }
 0x9f8   : > { %v10160_v34 = vpop.f32.mrf.mxu1  ;;  %10223 = vmatprep.mubr.msk.f32.mxu0 %vm10654_vm4, %v14601_v1  ;;  %10276 = vmatpush3.msra.mxu1 %v9172_v53 }
 0x9f9   : > { %v7612_v21 = vmax.f32 %v7531_v27, 0.0  ;;  %10277 = vmatprep.subr.mxu1 %v14601_v1  ;;  %v7366_v34 = vpop.permute.xlu0 %7365 }
 0x9fa   : > { %v7535_v11 = vpop.f32.mrf.mxu1  ;;  %10278 = vmatpush3.msra.mxu1 %v9171_v6 }
 0x9fb   : > { %v7536_v33 = vadd.f32 %v7535_v11, %v7344_v24  ;;  %10224 = vmatmul.mubr.msk.f32.gmra.mxu0 %vm4940_vm5, %v7612_v21  ;;  %10401 = vmatprep.subr.mxu1 %v14601_v1 }
 0x9fc   : > { %v10163_v58 = vpop.f32.mrf.mxu1  ;;  %10226 = vmatprep.mubr.msk.f32.mxu0 %vm10654_vm4, %v14601_v1 }
 0x9fd   : > { %v7613_v14 = vmax.f32 %v7536_v33, 0.0  ;;  %v7368_v58 = vpop.permute.xlu1 %7367 }
 0x9fe   : > { %v7540_v47 = vpop.f32.mrf.mxu1 }
 0x9ff   : > { %v7541_v38 = vadd.f32 %v7540_v47, %v7346_v60  ;;  %10227 = vmatmul.mubr.msk.f32.gmra.mxu0 %vm4940_vm5, %v7613_v14 }
 0xa00   : > { %v10166_v37 = vpop.f32.mrf.mxu1  ;;  %10229 = vmatprep.mubr.msk.f32.mxu0 %vm10654_vm4, %v14601_v1 }
 0xa01   : > { %v7614_v0 = vmax.f32 %v7541_v38, 0.0  ;;  %v7370_v37 = vpop.permute.xlu0 %7369 }
 0xa02   : > { %v7545_v20 = vpop.f32.mrf.mxu1 }
 0xa03   : > { %v7546_v23 = vadd.f32 %v7545_v20, %v7348_v61  ;;  %10230 = vmatmul.mubr.msk.f32.gmra.mxu0 %vm4940_vm5, %v7614_v0 }
 0xa04   : > { %v10169_v42 = vpop.f32.mrf.mxu1  ;;  %10232 = vmatprep.mubr.msk.f32.mxu0 %vm10654_vm4, %v14601_v1 }
 0xa05   : > { %v7615_v31 = vmax.f32 %v7546_v23, 0.0  ;;  %v7635_v42 = vsub.s32 5, %v12716_v41 }
 0xa06   : > { %v7550_v26 = vpop.f32.mrf.mxu1 }
 0xa07   : > { %v7551_v63 = vadd.f32 %v7550_v26, %v7350_v51  ;;  %10233 = vmatmul.mubr.msk.f32.gmra.mxu0 %vm4940_vm5, %v7615_v31  ;;  %v14255_v31 = vrot.slane %v14082_v57, %v7635_v42  ;;  %v7372_v51 = vpop.permute.xlu1 %7371  ;;  %v8174_v42 = vld [vmem:[%s14552_s7 + $0x18] sm:$0xff] }
 0xa08   : > { %v10172_v39 = vpop.f32.mrf.mxu1  ;;  %10235 = vmatprep.mubr.msk.f32.mxu0 %vm10654_vm4, %v14601_v1  ;;  %10337 = vmatpush3.msra.mxu0 %v8174_v42 }
 0xa09   : > { %v7616_v17 = vmax.f32 %v7551_v63, 0.0  ;;  %10338 = vmatprep.subr.mxu0 %v14601_v1 }
 0xa0a   : > { %v7555_v15 = vpop.f32.mrf.mxu1 }
 0xa0b   : > { %v7556_v44 = vadd.f32 %v7555_v15, %v7352_v16  ;;  %10236 = vmatmul.mubr.msk.f32.gmra.mxu0 %vm4940_vm5, %v7616_v17 }
 0xa0c   : > { %v10175_v30 = vpop.f32.mrf.mxu1  ;;  %10238 = vmatprep.mubr.msk.f32.mxu0 %vm10654_vm4, %v14601_v1 }
 0xa0d   : > { %v7617_v29 = vmax.f32 %v7556_v44, 0.0 }
 0xa0e   : > { %v7560_v9 = vpop.f32.mrf.mxu1 }
 0xa0f   : > { %v7561_v56 = vadd.f32 %v7560_v9, %v7354_v2  ;;  %10239 = vmatmul.mubr.msk.f32.gmra.mxu0 %vm4940_vm5, %v7617_v29 }
 0xa10   : > { %v10178_v32 = vpop.f32.mrf.mxu1  ;;  %10241 = vmatprep.mubr.msk.f32.mxu0 %vm10654_vm4, %v14601_v1 }
 0xa11   : > { %v7618_v52 = vmax.f32 %v7561_v56, 0.0 }
 0xa12   : > { %v7565_v10 = vpop.f32.mrf.mxu1 }
 0xa13   : > { %v7566_v59 = vadd.f32 %v7565_v10, %v7356_v5  ;;  %10242 = vmatmul.mubr.msk.f32.gmra.mxu0 %vm4940_vm5, %v7618_v52 }
 0xa14   : > { %v10181_v22 = vpop.f32.mrf.mxu1  ;;  %10244 = vmatprep.mubr.msk.f32.mxu0 %vm10654_vm4, %v14601_v1 }
 0xa15   : > { %v7619_v18 = vmax.f32 %v7566_v59, 0.0 }
 0xa16   : > { %v7570_v43 = vpop.f32.mrf.mxu1 }
 0xa17   : > { %v7571_v8 = vadd.f32 %v7570_v43, %v7358_v13  ;;  %10245 = vmatmul.mubr.msk.f32.gmra.mxu0 %vm4940_vm5, %v7619_v18 }
 0xa18   : > { %v10184_v28 = vpop.f32.mrf.mxu1  ;;  %10247 = vmatprep.mubr.msk.f32.mxu0 %vm10654_vm4, %v14601_v1 }
 0xa19   : > { %v7620_v55 = vmax.f32 %v7571_v8, 0.0 }
 0xa1a   : > { %v7575_v50 = vpop.f32.mrf.mxu1 }
 0xa1b   : > { %v7576_v35 = vadd.f32 %v7575_v50, %v7360_v4  ;;  %10248 = vmatmul.mubr.msk.f32.gmra.mxu0 %vm4940_vm5, %v7620_v55 }
 0xa1c   : > { %v10187_v49 = vpop.f32.mrf.mxu1  ;;  %10250 = vmatprep.mubr.msk.f32.mxu0 %vm10654_vm4, %v14601_v1 }
 0xa1d   : > { %v7621_v48 = vmax.f32 %v7576_v35, 0.0 }
 0xa1f   : > { %10251 = vmatmul.mubr.msk.f32.gmra.mxu0 %vm4940_vm5, %v7621_v48 }
 0xa20   : > { %10253 = vmatprep.mubr.msk.f32.mxu0 %vm10654_vm4, %v14601_v1 }
 0xa2a   : > { %v7580_v3 = vpop.f32.mrf.mxu1 }
 0xa2b   : > { %v7581_v19 = vadd.f32 %v7580_v3, %v7362_v25 }
 0xa2c   : > { %v10190_v46 = vpop.f32.mrf.mxu1 }
 0xa2d   : > { %v7622_v40 = vmax.f32 %v7581_v19, 0.0 }
 0xa2f   : > { %10254 = vmatmul.mubr.msk.f32.gmra.mxu0 %vm4940_vm5, %v7622_v40 }
 0xa30   : > { %10256 = vmatprep.mubr.msk.f32.mxu0 %vm10654_vm4, %v14601_v1 }
 0xa41   : > { %v7585_v45 = vpop.f32.mrf.mxu1 }
 0xa42   : > { %v7586_v54 = vadd.f32 %v7585_v45, %v7364_v62 }
 0xa43   : > { %v10193_v7 = vpop.f32.mrf.mxu1 }
 0xa44   : > { %v7623_v27 = vmax.f32 %v7586_v54, 0.0 }
 0xa46   : > { %10257 = vmatmul.mubr.msk.f32.gmra.mxu0 %vm4940_vm5, %v7623_v27 }
 0xa47   : > { %10259 = vmatprep.mubr.msk.f32.mxu0 %vm10654_vm4, %v14601_v1 }
 0xa60   : > { %v7590_v21 = vpop.f32.mrf.mxu1 }
 0xa61   : > { %v7591_v24 = vadd.f32 %v7590_v21, %v7366_v34 }
 0xa62   : > { %v10196_v11 = vpop.f32.mrf.mxu1 }
 0xa63   : > { %v7624_v33 = vmax.f32 %v7591_v24, 0.0 }
 0xa65   : > { %10260 = vmatmul.mubr.msk.f32.gmra.mxu0 %vm4940_vm5, %v7624_v33 }
 0xa66   : > { %10262 = vmatprep.mubr.msk.f32.mxu0 %vm10654_vm4, %v14601_v1 }
 0xa79   : > { %v7595_v14 = vpop.f32.mrf.mxu1 }
 0xa7a   : > { %v7596_v60 = vadd.f32 %v7595_v14, %v7368_v58 }
 0xa7b   : > { %v10199_v47 = vpop.f32.mrf.mxu1 }
 0xa7c   : > { %v7625_v38 = vmax.f32 %v7596_v60, 0.0 }
 0xa7e   : > { %10263 = vmatmul.mubr.msk.f32.gmra.mxu0 %vm4940_vm5, %v7625_v38 }
 0xa7f   : > { %10265 = vmatprep.mubr.msk.f32.mxu0 %vm10654_vm4, %v14601_v1 }
 0xa94   : > { %v7600_v0 = vpop.f32.mrf.mxu1 }
 0xa95   : > { %v7601_v61 = vadd.f32 %v7600_v0, %v7370_v37 }
 0xa96   : > { %v10202_v20 = vpop.f32.mrf.mxu1 }
 0xa97   : > { %v7626_v23 = vmax.f32 %v7601_v61, 0.0 }
 0xa99   : > { %10266 = vmatmul.mubr.msk.f32.gmra.mxu0 %vm4940_vm5, %v7626_v23 }
 0xa9a   : > { %10268 = vmatprep.mubr.msk.f32.mxu0 %vm10654_vm4, %v14601_v1 }
 0xaad   : > { %v7605_v26 = vpop.f32.mrf.mxu1 }
 0xaae   : > { %v7606_v63 = vadd.f32 %v7605_v26, %v7372_v51  ;;  %v8173_v51 = vld [vmem:[%s14552_s7 + $0x10] sm:$0xff]  ;;  %v8172_v26 = vld [vmem:[%s14552_s7 + $0x8] sm:$0xff] }
 0xaaf   : > { %v10205_v39 = vpop.f32.mrf.mxu1  ;;  %v7760_v17 = vpop.f32.mrf.mxu0  ;;  %10339 = vmatpush3.msra.mxu0 %v8173_v51 }
 0xab0   : > { %v7627_v16 = vmax.f32 %v7606_v63, 0.0  ;;  %v7761_v15 = vadd.f32 %v7760_v17, %v14255_v31  ;;  %10340 = vmatprep.subr.mxu0 %v14601_v1  ;;  %v8171_v63 = vld [vmem:[%s14552_s7] sm:$0xff] }
 0xab1   : > { %v10216_v44 = vpop.f32.mrf.mxu0  ;;  %10341 = vmatpush3.msra.mxu0 %v8172_v26 }
 0xab2   : > { %10269 = vmatmul.mubr.msk.f32.gmra.mxu0 %vm4940_vm5, %v7627_v16  ;;  %v7854_v30 = vmax.f32 %v7761_v15, 0.0  ;;  %10342 = vmatprep.subr.mxu0 %v14601_v1 }
 0xab3   : > { %v7765_v29 = vpop.f32.mrf.mxu0  ;;  %10344 = vmatprep.mubr.msk.f32.mxu0 %vm10654_vm4, %v14601_v1  ;;  %10343 = vmatpush3.msra.mxu0 %v8171_v63 }
 0xab4   : > { %v7766_v41 = vadd.f32 %v7765_v29, %v14255_v31  ;;  %10280 = vmatmul.mubr.msk.f32.vlgmr.msra.gmra.mxu1 %vm4940_vm5, %v7854_v30 }
 0xab5   : > { %v10219_v57 = vpop.f32.mrf.mxu0  ;;  %10282 = vmatprep.mubr.msk.f32.mxu1 %vm10654_vm4, %v14601_v1 }
 0xab6   : > { %v7855_v2 = vmax.f32 %v7766_v41, 0.0 }
 0xab7   : > { %v7770_v9 = vpop.f32.mrf.mxu0 }
 0xab8   : > { %v7771_v56 = vadd.f32 %v7770_v9, %v14255_v31  ;;  %10283 = vmatmul.mubr.msk.f32.gmra.mxu1 %vm4940_vm5, %v7855_v2 }
 0xab9   : > { %v10222_v32 = vpop.f32.mrf.mxu0  ;;  %10285 = vmatprep.mubr.msk.f32.mxu1 %vm10654_vm4, %v14601_v1 }
 0xaba   : > { %v7856_v52 = vmax.f32 %v7771_v56, 0.0 }
 0xabb   : > { %v7775_v5 = vpop.f32.mrf.mxu0 }
 0xabc   : > { %v7776_v10 = vadd.f32 %v7775_v5, %v14255_v31  ;;  %10286 = vmatmul.mubr.msk.f32.gmra.mxu1 %vm4940_vm5, %v7856_v52 }
 0xabd   : > { %v10225_v59 = vpop.f32.mrf.mxu0  ;;  %10288 = vmatprep.mubr.msk.f32.mxu1 %vm10654_vm4, %v14601_v1 }
 0xabe   : > { %v7857_v22 = vmax.f32 %v7776_v10, 0.0 }
 0xabf   : > { %v7780_v18 = vpop.f32.mrf.mxu0 }
 0xac0   : > { %v7781_v13 = vadd.f32 %v7780_v18, %v14255_v31  ;;  %10289 = vmatmul.mubr.msk.f32.gmra.mxu1 %vm4940_vm5, %v7857_v22  ;;  %v7879_v22 = vpop.permute.xlu0 %7878 }
 0xac1   : > { %v10228_v43 = vpop.f32.mrf.mxu0  ;;  %10291 = vmatprep.mubr.msk.f32.mxu1 %vm10654_vm4, %v14601_v1 }
 0xac2   : > { %v7858_v8 = vmax.f32 %v7781_v13, 0.0 }
 0xac3   : > { %v7785_v28 = vpop.f32.mrf.mxu0 }
 0xac4   : > { %v7786_v55 = vadd.f32 %v7785_v28, %v14255_v31  ;;  %10292 = vmatmul.mubr.msk.f32.gmra.mxu1 %vm4940_vm5, %v7858_v8 }
 0xac5   : > { %v10231_v4 = vpop.f32.mrf.mxu0  ;;  %10294 = vmatprep.mubr.msk.f32.mxu1 %vm10654_vm4, %v14601_v1 }
 0xac6   : > { %v7859_v50 = vmax.f32 %v7786_v55, 0.0 }
 0xac7   : > { %v7790_v35 = vpop.f32.mrf.mxu0 }
 0xac8   : > { %v7791_v49 = vadd.f32 %v7790_v35, %v14255_v31  ;;  %10295 = vmatmul.mubr.msk.f32.gmra.mxu1 %vm4940_vm5, %v7859_v50  ;;  %v7881_v50 = vpop.permute.xlu1 %7880 }
 0xac9   : > { %v10234_v48 = vpop.f32.mrf.mxu0  ;;  %10297 = vmatprep.mubr.msk.f32.mxu1 %vm10654_vm4, %v14601_v1 }
 0xaca   : > { %v7860_v25 = vmax.f32 %v7791_v49, 0.0 }
 0xacb   : > { %v7795_v3 = vpop.f32.mrf.mxu0 }
 0xacc   : > { %v7796_v19 = vadd.f32 %v7795_v3, %v14255_v31  ;;  %10298 = vmatmul.mubr.msk.f32.gmra.mxu1 %vm4940_vm5, %v7860_v25  ;;  %v7883_v25 = vpop.permute.xlu0 %7882 }
 0xacd   : > { %v10237_v46 = vpop.f32.mrf.mxu0  ;;  %10300 = vmatprep.mubr.msk.f32.mxu1 %vm10654_vm4, %v14601_v1 }
 0xace   : > { %v7861_v40 = vmax.f32 %v7796_v19, 0.0 }
 0xacf   : > { %v7800_v36 = vpop.f32.mrf.mxu0 }
 0xad0   : > { %v7801_v12 = vadd.f32 %v7800_v36, %v14255_v31  ;;  %10301 = vmatmul.mubr.msk.f32.gmra.mxu1 %vm4940_vm5, %v7861_v40  ;;  %v7885_v36 = vpop.permute.xlu1 %7884 }
 0xad1   : > { %v10240_v53 = vpop.f32.mrf.mxu0  ;;  %10303 = vmatprep.mubr.msk.f32.mxu1 %vm10654_vm4, %v14601_v1 }
 0xad2   : > { %v7862_v6 = vmax.f32 %v7801_v12, 0.0 }
 0xad3   : > { %v7805_v62 = vpop.f32.mrf.mxu0 }
 0xad4   : > { %v7806_v45 = vadd.f32 %v7805_v62, %v14255_v31  ;;  %10304 = vmatmul.mubr.msk.f32.gmra.mxu1 %vm4940_vm5, %v7862_v6 }
 0xad5   : > { %v10243_v54 = vpop.f32.mrf.mxu0  ;;  %10306 = vmatprep.mubr.msk.f32.mxu1 %vm10654_vm4, %v14601_v1 }
 0xad6   : > { %v7863_v7 = vmax.f32 %v7806_v45, 0.0  ;;  %v7887_v45 = vpop.permute.xlu0 %7886 }
 0xad7   : > { %v7810_v27 = vpop.f32.mrf.mxu0 }
 0xad8   : > { %v7811_v34 = vadd.f32 %v7810_v27, %v14255_v31  ;;  %10307 = vmatmul.mubr.msk.f32.gmra.mxu1 %vm4940_vm5, %v7863_v7 }
 0xad9   : > { %v10246_v21 = vpop.f32.mrf.mxu0  ;;  %10309 = vmatprep.mubr.msk.f32.mxu1 %vm10654_vm4, %v14601_v1 }
 0xada   : > { %v7864_v24 = vmax.f32 %v7811_v34, 0.0  ;;  %v7889_v21 = vpop.permute.xlu1 %7888 }
 0xadb   : > { %v7815_v11 = vpop.f32.mrf.mxu0 }
 0xadc   : > { %v7816_v33 = vadd.f32 %v7815_v11, %v14255_v31  ;;  %10310 = vmatmul.mubr.msk.f32.gmra.mxu1 %vm4940_vm5, %v7864_v24 }
 0xadd   : > { %v10249_v58 = vpop.f32.mrf.mxu0  ;;  %10312 = vmatprep.mubr.msk.f32.mxu1 %vm10654_vm4, %v14601_v1 }
 0xade   : > { %v7865_v14 = vmax.f32 %v7816_v33, 0.0 }
 0xadf   : > { %v7820_v60 = vpop.f32.mrf.mxu0 }
 0xae0   : > { %v7821_v47 = vadd.f32 %v7820_v60, %v14255_v31  ;;  %10313 = vmatmul.mubr.msk.f32.gmra.mxu1 %vm4940_vm5, %v7865_v14  ;;  %v7891_v14 = vpop.permute.xlu0 %7890 }
 0xae1   : > { %v10252_v38 = vpop.f32.mrf.mxu0  ;;  %10315 = vmatprep.mubr.msk.f32.mxu1 %vm10654_vm4, %v14601_v1 }
 0xae2   : > { %v7866_v37 = vmax.f32 %v7821_v47, 0.0 }
 0xae4   : > { %10316 = vmatmul.mubr.msk.f32.gmra.mxu1 %vm4940_vm5, %v7866_v37  ;;  %v7895_v51 = vpop.permute.xlu0 %7894 }
 0xae5   : > { %10318 = vmatprep.mubr.msk.f32.mxu1 %vm10654_vm4, %v14601_v1 }
 0xaef   : > { %v7825_v0 = vpop.f32.mrf.mxu0 }
 0xaf0   : > { %v7826_v61 = vadd.f32 %v7825_v0, %v14255_v31  ;;  %v7893_v0 = vpop.permute.xlu1 %7892 }
 0xaf1   : > { %v10255_v20 = vpop.f32.mrf.mxu0 }
 0xaf2   : > { %v7867_v23 = vmax.f32 %v7826_v61, 0.0 }
 0xaf4   : > { %10319 = vmatmul.mubr.msk.f32.gmra.mxu1 %vm4940_vm5, %v7867_v23 }
 0xaf5   : > { %10321 = vmatprep.mubr.msk.f32.mxu1 %vm10654_vm4, %v14601_v1 }
 0xb06   : > { %v7830_v39 = vpop.f32.mrf.mxu0 }
 0xb07   : > { %v7831_v17 = vadd.f32 %v7830_v39, %v14255_v31 }
 0xb08   : > { %v10258_v16 = vpop.f32.mrf.mxu0 }
 0xb09   : > { %v7868_v15 = vmax.f32 %v7831_v17, 0.0  ;;  %v7897_v16 = vpop.permute.xlu1 %7896 }
 0xb0b   : > { %10322 = vmatmul.mubr.msk.f32.gmra.mxu1 %vm4940_vm5, %v7868_v15 }
 0xb0c   : > { %10324 = vmatprep.mubr.msk.f32.mxu1 %vm10654_vm4, %v14601_v1 }
 0xb25   : > { %v7835_v44 = vpop.f32.mrf.mxu0 }
 0xb26   : > { %v7836_v30 = vadd.f32 %v7835_v44, %v14255_v31 }
 0xb27   : > { %v10261_v29 = vpop.f32.mrf.mxu0 }
 0xb28   : > { %v7869_v41 = vmax.f32 %v7836_v30, 0.0 }
 0xb2a   : > { %10325 = vmatmul.mubr.msk.f32.gmra.mxu1 %vm4940_vm5, %v7869_v41  ;;  %v7899_v41 = vpop.permute.xlu0 %7898 }
 0xb2b   : > { %10327 = vmatprep.mubr.msk.f32.mxu1 %vm10654_vm4, %v14601_v1 }
 0xb3e   : > { %v7840_v57 = vpop.f32.mrf.mxu0 }
 0xb3f   : > { %v7841_v2 = vadd.f32 %v7840_v57, %v14255_v31 }
 0xb40   : > { %v10264_v9 = vpop.f32.mrf.mxu0 }
 0xb41   : > { %v7870_v56 = vmax.f32 %v7841_v2, 0.0 }
 0xb43   : > { %10328 = vmatmul.mubr.msk.f32.gmra.mxu1 %vm4940_vm5, %v7870_v56 }
 0xb44   : > { %10330 = vmatprep.mubr.msk.f32.mxu1 %vm10654_vm4, %v14601_v1 }
 0xb59   : > { %v7845_v32 = vpop.f32.mrf.mxu0 }
 0xb5a   : > { %v7846_v52 = vadd.f32 %v7845_v32, %v14255_v31  ;;  %v7901_v32 = vpop.permute.xlu1 %7900 }
 0xb5b   : > { %v10267_v5 = vpop.f32.mrf.mxu0 }
 0xb5c   : > { %v7871_v10 = vmax.f32 %v7846_v52, 0.0 }
 0xb5e   : > { %10331 = vmatmul.mubr.msk.f32.gmra.mxu1 %vm4940_vm5, %v7871_v10 }
 0xb5f   : > { %10333 = vmatprep.mubr.msk.f32.mxu1 %vm10654_vm4, %v14601_v1 }
 0xb72   : > { %v7850_v59 = vpop.f32.mrf.mxu0 }
 0xb73   : > { %v7851_v18 = vadd.f32 %v7850_v59, %v14255_v31 }
 0xb74   : > { %v10270_v13 = vpop.f32.mrf.mxu0  ;;  %v8058_v43 = vpop.f32.mrf.mxu1 }
 0xb75   : > { %v7872_v8 = vmax.f32 %v7851_v18, 0.0  ;;  %v8059_v28 = vadd.f32 %v8058_v43, %v7879_v22  ;;  %v7903_v22 = vpop.permute.xlu0 %7902 }
 0xb76   : > { %v10281_v55 = vpop.f32.mrf.mxu1 }
 0xb77   : > { %10334 = vmatmul.mubr.msk.f32.gmra.mxu1 %vm4940_vm5, %v7872_v8  ;;  %v8152_v4 = vmax.f32 %v8059_v28, 0.0  ;;  %v7905_v28 = vpop.permute.xlu1 %7904 }
 0xb78   : > { %v8063_v35 = vpop.f32.mrf.mxu1  ;;  %10405 = vmatprep.mubr.msk.f32.mxu1 %vm10654_vm4, %v14601_v1 }
 0xb79   : > { %v8064_v49 = vadd.f32 %v8063_v35, %v7881_v50  ;;  %10345 = vmatmul.mubr.msk.f32.vlgmr.msra.gmra.mxu0 %vm4940_vm5, %v8152_v4 }
 0xb7a   : > { %v10284_v48 = vpop.f32.mrf.mxu1  ;;  %10347 = vmatprep.mubr.msk.f32.mxu0 %vm10654_vm4, %v14601_v1 }
 0xb7b   : > { %v8153_v31 = vmax.f32 %v8064_v49, 0.0  ;;  %v8419_v49 = vld [vmem:[%s14554_s9 + $0x8] sm:$0xff]  ;;  %v8418_v48 = vld [vmem:[%s14554_s9] sm:$0xff] }
 0xb7c   : > { %v8068_v3 = vpop.f32.mrf.mxu1  ;;  %10402 = vmatpush3.msra.mxu1 %v8419_v49 }
 0xb7d   : > { %v8069_v19 = vadd.f32 %v8068_v3, %v7883_v25  ;;  %10348 = vmatmul.mubr.msk.f32.gmra.mxu0 %vm4940_vm5, %v8153_v31  ;;  %10403 = vmatprep.subr.mxu1 %v14601_v1  ;;  %v7907_v31 = vpop.permute.xlu0 %7906 }
 0xb7e   : > { %v10287_v46 = vpop.f32.mrf.mxu1  ;;  %10350 = vmatprep.mubr.msk.f32.mxu0 %vm10654_vm4, %v14601_v1  ;;  %10404 = vmatpush3.msra.mxu1 %v8418_v48 }
 0xb7f   : > { %v8154_v40 = vmax.f32 %v8069_v19, 0.0 }
 0xb80   : > { %v8073_v12 = vpop.f32.mrf.mxu1 }
 0xb81   : > { %v8074_v53 = vadd.f32 %v8073_v12, %v7885_v36  ;;  %10351 = vmatmul.mubr.msk.f32.gmra.mxu0 %vm4940_vm5, %v8154_v40  ;;  %v7909_v40 = vpop.permute.xlu1 %7908 }
 0xb82   : > { %v10290_v6 = vpop.f32.mrf.mxu1  ;;  %10353 = vmatprep.mubr.msk.f32.mxu0 %vm10654_vm4, %v14601_v1 }
 0xb83   : > { %v8155_v62 = vmax.f32 %v8074_v53, 0.0 }
 0xb84   : > { %v8078_v54 = vpop.f32.mrf.mxu1 }
 0xb85   : > { %v8079_v7 = vadd.f32 %v8078_v54, %v7887_v45  ;;  %10354 = vmatmul.mubr.msk.f32.gmra.mxu0 %vm4940_vm5, %v8155_v62  ;;  %v7911_v62 = vpop.permute.xlu0 %7910 }
 0xb86   : > { %v10293_v27 = vpop.f32.mrf.mxu1  ;;  %10356 = vmatprep.mubr.msk.f32.mxu0 %vm10654_vm4, %v14601_v1 }
 0xb87   : > { %v8156_v34 = vmax.f32 %v8079_v7, 0.0 }
 0xb88   : > { %v8083_v24 = vpop.f32.mrf.mxu1 }
 0xb89   : > { %v8084_v11 = vadd.f32 %v8083_v24, %v7889_v21  ;;  %10357 = vmatmul.mubr.msk.f32.gmra.mxu0 %vm4940_vm5, %v8156_v34  ;;  %v7913_v34 = vpop.permute.xlu1 %7912 }
 0xb8a   : > { %v10296_v33 = vpop.f32.mrf.mxu1  ;;  %10359 = vmatprep.mubr.msk.f32.mxu0 %vm10654_vm4, %v14601_v1 }
 0xb8b   : > { %v8157_v58 = vmax.f32 %v8084_v11, 0.0 }
 0xb8c   : > { %v8088_v60 = vpop.f32.mrf.mxu1 }
 0xb8d   : > { %v8089_v47 = vadd.f32 %v8088_v60, %v7891_v14  ;;  %10360 = vmatmul.mubr.msk.f32.gmra.mxu0 %vm4940_vm5, %v8157_v58  ;;  %v7915_v58 = vpop.permute.xlu0 %7914  ;;  %v14415_v60 = vld [vmem:[%s14553_s8] ss:$0 sm:$0xff] }
 0xb8e   : > { %v10299_v38 = vpop.f32.mrf.mxu1  ;;  %10362 = vmatprep.mubr.msk.f32.mxu0 %vm10654_vm4, %v14601_v1 }
 0xb8f   : > { %v8158_v37 = vmax.f32 %v8089_v47, 0.0 }
 0xb90   : > { %v8093_v61 = vpop.f32.mrf.mxu1 }
 0xb91   : > { %v8094_v20 = vadd.f32 %v8093_v61, %v7893_v0  ;;  %10363 = vmatmul.mubr.msk.f32.gmra.mxu0 %vm4940_vm5, %v8158_v37 }
 0xb92   : > { %v10302_v23 = vpop.f32.mrf.mxu1  ;;  %10365 = vmatprep.mubr.msk.f32.mxu0 %vm10654_vm4, %v14601_v1 }
 0xb93   : > { %v8159_v42 = vmax.f32 %v8094_v20, 0.0 }
 0xb94   : > { %v8098_v26 = vpop.f32.mrf.mxu1 }
 0xb95   : > { %v8099_v63 = vadd.f32 %v8098_v26, %v7895_v51  ;;  %10366 = vmatmul.mubr.msk.f32.gmra.mxu0 %vm4940_vm5, %v8159_v42 }
 0xb96   : > { %v10305_v39 = vpop.f32.mrf.mxu1  ;;  %10368 = vmatprep.mubr.msk.f32.mxu0 %vm10654_vm4, %v14601_v1 }
 0xb97   : > { %v8160_v17 = vmax.f32 %v8099_v63, 0.0 }
 0xb98   : > { %v8103_v15 = vpop.f32.mrf.mxu1 }
 0xb99   : > { %v8104_v44 = vadd.f32 %v8103_v15, %v7897_v16  ;;  %10369 = vmatmul.mubr.msk.f32.gmra.mxu0 %vm4940_vm5, %v8160_v17 }
 0xb9a   : > { %v10308_v30 = vpop.f32.mrf.mxu1  ;;  %10371 = vmatprep.mubr.msk.f32.mxu0 %vm10654_vm4, %v14601_v1 }
 0xb9b   : > { %v8161_v29 = vmax.f32 %v8104_v44, 0.0 }
 0xb9c   : > { %v8108_v57 = vpop.f32.mrf.mxu1 }
 0xb9d   : > { %v8109_v2 = vadd.f32 %v8108_v57, %v7899_v41  ;;  %10372 = vmatmul.mubr.msk.f32.gmra.mxu0 %vm4940_vm5, %v8161_v29 }
 0xb9e   : > { %v10311_v9 = vpop.f32.mrf.mxu1  ;;  %10374 = vmatprep.mubr.msk.f32.mxu0 %vm10654_vm4, %v14601_v1 }
 0xb9f   : > { %v8162_v56 = vmax.f32 %v8109_v2, 0.0 }
 0xba0   : > { %v8113_v52 = vpop.f32.mrf.mxu1 }
 0xba1   : > { %v8114_v5 = vadd.f32 %v8113_v52, %v7901_v32  ;;  %10375 = vmatmul.mubr.msk.f32.gmra.mxu0 %vm4940_vm5, %v8162_v56 }
 0xba2   : > { %v10314_v10 = vpop.f32.mrf.mxu1  ;;  %10377 = vmatprep.mubr.msk.f32.mxu0 %vm10654_vm4, %v14601_v1 }
 0xba3   : > { %v8163_v59 = vmax.f32 %v8114_v5, 0.0 }
 0xba4   : > { %v8118_v18 = vpop.f32.mrf.mxu1 }
 0xba5   : > { %v8119_v13 = vadd.f32 %v8118_v18, %v7903_v22  ;;  %10378 = vmatmul.mubr.msk.f32.gmra.mxu0 %vm4940_vm5, %v8163_v59 }
 0xba6   : > { %v10317_v43 = vpop.f32.mrf.mxu1  ;;  %10380 = vmatprep.mubr.msk.f32.mxu0 %vm10654_vm4, %v14601_v1 }
 0xba7   : > { %v8164_v8 = vmax.f32 %v8119_v13, 0.0 }
 0xba9   : > { %10381 = vmatmul.mubr.msk.f32.gmra.mxu0 %vm4940_vm5, %v8164_v8 }
 0xbaa   : > { %10383 = vmatprep.mubr.msk.f32.mxu0 %vm10654_vm4, %v14601_v1 }
 0xbb4   : > { %v8123_v55 = vpop.f32.mrf.mxu1 }
 0xbb5   : > { %v8124_v4 = vadd.f32 %v8123_v55, %v7905_v28 }
 0xbb6   : > { %v10320_v50 = vpop.f32.mrf.mxu1 }
 0xbb7   : > { %v8165_v35 = vmax.f32 %v8124_v4, 0.0 }
 0xbb9   : > { %10384 = vmatmul.mubr.msk.f32.gmra.mxu0 %vm4940_vm5, %v8165_v35 }
 0xbba   : > { %10386 = vmatprep.mubr.msk.f32.mxu0 %vm10654_vm4, %v14601_v1 }
 0xbcb   : > { %v8128_v25 = vpop.f32.mrf.mxu1 }
 0xbcc   : > { %v8129_v3 = vadd.f32 %v8128_v25, %v7907_v31 }
 0xbcd   : > { %v10323_v19 = vpop.f32.mrf.mxu1 }
 0xbce   : > { %v8166_v46 = vmax.f32 %v8129_v3, 0.0 }
 0xbd0   : > { %10387 = vmatmul.mubr.msk.f32.gmra.mxu0 %vm4940_vm5, %v8166_v46 }
 0xbd1   : > { %10389 = vmatprep.mubr.msk.f32.mxu0 %vm10654_vm4, %v14601_v1 }
 0xbea   : > { %v8133_v36 = vpop.f32.mrf.mxu1 }
 0xbeb   : > { %v8134_v12 = vadd.f32 %v8133_v36, %v7909_v40 }
 0xbec   : > { %v10326_v53 = vpop.f32.mrf.mxu1 }
 0xbed   : > { %v8167_v6 = vmax.f32 %v8134_v12, 0.0 }
 0xbef   : > { %10390 = vmatmul.mubr.msk.f32.gmra.mxu0 %vm4940_vm5, %v8167_v6 }
 0xbf0   : > { %10392 = vmatprep.mubr.msk.f32.mxu0 %vm10654_vm4, %v14601_v1 }
 0xc03   : > { %v8138_v45 = vpop.f32.mrf.mxu1 }
 0xc04   : > { %v8139_v54 = vadd.f32 %v8138_v45, %v7911_v62 }
 0xc05   : > { %v10329_v7 = vpop.f32.mrf.mxu1 }
 0xc06   : > { %v8168_v27 = vmax.f32 %v8139_v54, 0.0 }
 0xc08   : > { %10393 = vmatmul.mubr.msk.f32.gmra.mxu0 %vm4940_vm5, %v8168_v27 }
 0xc09   : > { %10395 = vmatprep.mubr.msk.f32.mxu0 %vm10654_vm4, %v14601_v1 }
 0xc1e   : > { %v8143_v21 = vpop.f32.mrf.mxu1 }
 0xc1f   : > { %v8144_v24 = vadd.f32 %v8143_v21, %v7913_v34 }
 0xc20   : > { %v10332_v11 = vpop.f32.mrf.mxu1 }
 0xc21   : > { %v8169_v33 = vmax.f32 %v8144_v24, 0.0 }
 0xc23   : > { %10396 = vmatmul.mubr.msk.f32.gmra.mxu0 %vm4940_vm5, %v8169_v33 }
 0xc24   : > { %10398 = vmatprep.mubr.msk.f32.mxu0 %vm10654_vm4, %v14601_v1 }
 0xc37   : > { %v8148_v14 = vpop.f32.mrf.mxu1 }
 0xc38   : > { %v8149_v47 = vadd.f32 %v8148_v14, %v7915_v58 }
 0xc39   : > { %v10335_v38 = vpop.f32.mrf.mxu1  ;;  %v8305_v37 = vpop.f32.mrf.mxu0 }
 0xc3a   : > { %v8170_v0 = vmax.f32 %v8149_v47, 0.0  ;;  %v8306_v61 = vadd.f32 %v14415_v60, %v8305_v37 }
 0xc3b   : > { %v10346_v20 = vpop.f32.mrf.mxu0 }
 0xc3c   : > { %10399 = vmatmul.mubr.msk.f32.gmra.mxu0 %vm4940_vm5, %v8170_v0  ;;  %v8399_v23 = vmax.f32 %v8306_v61, 0.0 }
 0xc3d   : > { %v8310_v42 = vpop.f32.mrf.mxu0 }
 0xc3e   : > { %v8311_v51 = vadd.f32 %v14415_v60, %v8310_v42  ;;  %10406 = vmatmul.mubr.msk.f32.vlgmr.msra.gmra.mxu1 %vm8427_vm2, %v8399_v23 }
 0xc3f   : > { %v10349_v26 = vpop.f32.mrf.mxu0  ;;  %10408 = vmatprep.mubr.msk.f32.mxu1 %vm10654_vm4, %v14601_v1 }
 0xc40   : > { %v8400_v63 = vmax.f32 %v8311_v51, 0.0 }
 0xc41   : > { %v8315_v39 = vpop.f32.mrf.mxu0 }
 0xc42   : > { %v8316_v17 = vadd.f32 %v14415_v60, %v8315_v39  ;;  %10409 = vmatmul.mubr.msk.f32.gmra.mxu1 %vm8427_vm2, %v8400_v63 }
 0xc43   : > { %v10352_v16 = vpop.f32.mrf.mxu0  ;;  %10411 = vmatprep.mubr.msk.f32.mxu1 %vm10654_vm4, %v14601_v1 }
 0xc44   : > { %v8401_v15 = vmax.f32 %v8316_v17, 0.0 }
 0xc45   : > { %v8320_v44 = vpop.f32.mrf.mxu0 }
 0xc46   : > { %v8321_v30 = vadd.f32 %v14415_v60, %v8320_v44  ;;  %10412 = vmatmul.mubr.msk.f32.gmra.mxu1 %vm8427_vm2, %v8401_v15  ;;  %v14493_v15 = vld [vmem:[%s14555_s10] ss:$0 sm:$0xff] }
 0xc47   : > { %v10355_v29 = vpop.f32.mrf.mxu0  ;;  %10414 = vmatprep.mubr.msk.f32.mxu1 %vm10654_vm4, %v14601_v1 }
 0xc48   : > { %v8402_v41 = vmax.f32 %v8321_v30, 0.0 }
 0xc49   : > { %v8325_v57 = vpop.f32.mrf.mxu0 }
 0xc4a   : > { %v8326_v2 = vadd.f32 %v14415_v60, %v8325_v57  ;;  %10415 = vmatmul.mubr.msk.f32.gmra.mxu1 %vm8427_vm2, %v8402_v41 }
 0xc4b   : > { %v10358_v9 = vpop.f32.mrf.mxu0  ;;  %10417 = vmatprep.mubr.msk.f32.mxu1 %vm10654_vm4, %v14601_v1 }
 0xc4c   : > { %v8403_v56 = vmax.f32 %v8326_v2, 0.0 }
 0xc4d   : > { %v8330_v32 = vpop.f32.mrf.mxu0 }
 0xc4e   : > { %v8331_v52 = vadd.f32 %v14415_v60, %v8330_v32  ;;  %10418 = vmatmul.mubr.msk.f32.gmra.mxu1 %vm8427_vm2, %v8403_v56 }
 0xc4f   : > { %v10361_v5 = vpop.f32.mrf.mxu0  ;;  %10420 = vmatprep.mubr.msk.f32.mxu1 %vm10654_vm4, %v14601_v1 }
 0xc50   : > { %v8404_v10 = vmax.f32 %v8331_v52, 0.0 }
 0xc51   : > { %v8335_v59 = vpop.f32.mrf.mxu0 }
 0xc52   : > { %v8336_v22 = vadd.f32 %v14415_v60, %v8335_v59  ;;  %10421 = vmatmul.mubr.msk.f32.gmra.mxu1 %vm8427_vm2, %v8404_v10 }
 0xc53   : > { %v10364_v18 = vpop.f32.mrf.mxu0  ;;  %10423 = vmatprep.mubr.msk.f32.mxu1 %vm10654_vm4, %v14601_v1 }
 0xc54   : > { %v8405_v13 = vmax.f32 %v8336_v22, 0.0 }
 0xc55   : > { %v8340_v43 = vpop.f32.mrf.mxu0 }
 0xc56   : > { %v8341_v8 = vadd.f32 %v14415_v60, %v8340_v43  ;;  %10424 = vmatmul.mubr.msk.f32.gmra.mxu1 %vm8427_vm2, %v8405_v13 }
 0xc57   : > { %v10367_v28 = vpop.f32.mrf.mxu0  ;;  %10426 = vmatprep.mubr.msk.f32.mxu1 %vm10654_vm4, %v14601_v1 }
 0xc58   : > { %v8406_v55 = vmax.f32 %v8341_v8, 0.0 }
 0xc59   : > { %v8345_v4 = vpop.f32.mrf.mxu0 }
 0xc5a   : > { %v8346_v50 = vadd.f32 %v14415_v60, %v8345_v4  ;;  %10427 = vmatmul.mubr.msk.f32.gmra.mxu1 %vm8427_vm2, %v8406_v55 }
 0xc5b   : > { %v10370_v35 = vpop.f32.mrf.mxu0  ;;  %10429 = vmatprep.mubr.msk.f32.mxu1 %vm10654_vm4, %v14601_v1 }
 0xc5c   : > { %v8407_v49 = vmax.f32 %v8346_v50, 0.0 }
 0xc5d   : > { %v8350_v48 = vpop.f32.mrf.mxu0 }
 0xc5e   : > { %v8351_v31 = vadd.f32 %v14415_v60, %v8350_v48  ;;  %10430 = vmatmul.mubr.msk.f32.gmra.mxu1 %vm8427_vm2, %v8407_v49 }
 0xc5f   : > { %v10373_v25 = vpop.f32.mrf.mxu0  ;;  %10432 = vmatprep.mubr.msk.f32.mxu1 %vm10654_vm4, %v14601_v1 }
 0xc60   : > { %v8408_v3 = vmax.f32 %v8351_v31, 0.0 }
 0xc61   : > { %v8355_v19 = vpop.f32.mrf.mxu0 }
 0xc62   : > { %v8356_v46 = vadd.f32 %v14415_v60, %v8355_v19  ;;  %10433 = vmatmul.mubr.msk.f32.gmra.mxu1 %vm8427_vm2, %v8408_v3 }
 0xc63   : > { %v10376_v40 = vpop.f32.mrf.mxu0  ;;  %10435 = vmatprep.mubr.msk.f32.mxu1 %vm10654_vm4, %v14601_v1 }
 0xc64   : > { %v8409_v36 = vmax.f32 %v8356_v46, 0.0 }
 0xc65   : > { %v8360_v12 = vpop.f32.mrf.mxu0 }
 0xc66   : > { %v8361_v53 = vadd.f32 %v14415_v60, %v8360_v12  ;;  %10436 = vmatmul.mubr.msk.f32.gmra.mxu1 %vm8427_vm2, %v8409_v36 }
 0xc67   : > { %v10379_v6 = vpop.f32.mrf.mxu0  ;;  %10438 = vmatprep.mubr.msk.f32.mxu1 %vm10654_vm4, %v14601_v1 }
 0xc68   : > { %v8410_v62 = vmax.f32 %v8361_v53, 0.0 }
 0xc69   : > { %v8365_v45 = vpop.f32.mrf.mxu0 }
 0xc6a   : > { %v8366_v54 = vadd.f32 %v14415_v60, %v8365_v45  ;;  %10439 = vmatmul.mubr.msk.f32.gmra.mxu1 %vm8427_vm2, %v8410_v62 }
 0xc6b   : > { %v10382_v7 = vpop.f32.mrf.mxu0  ;;  %10441 = vmatprep.mubr.msk.f32.mxu1 %vm10654_vm4, %v14601_v1 }
 0xc6c   : > { %v8411_v27 = vmax.f32 %v8366_v54, 0.0 }
 0xc6e   : > { %10442 = vmatmul.mubr.msk.f32.gmra.mxu1 %vm8427_vm2, %v8411_v27 }
 0xc6f   : > { %10444 = vmatprep.mubr.msk.f32.mxu1 %vm10654_vm4, %v14601_v1 }
 0xc79   : > { %v8370_v34 = vpop.f32.mrf.mxu0 }
 0xc7a   : > { %v8371_v21 = vadd.f32 %v14415_v60, %v8370_v34 }
 0xc7b   : > { %v10385_v24 = vpop.f32.mrf.mxu0 }
 0xc7c   : > { %v8412_v11 = vmax.f32 %v8371_v21, 0.0 }
 0xc7e   : > { %10445 = vmatmul.mubr.msk.f32.gmra.mxu1 %vm8427_vm2, %v8412_v11 }
 0xc7f   : > { %10447 = vmatprep.mubr.msk.f32.mxu1 %vm10654_vm4, %v14601_v1 }
 0xc90   : > { %v8375_v33 = vpop.f32.mrf.mxu0 }
 0xc91   : > { %v8376_v58 = vadd.f32 %v14415_v60, %v8375_v33 }
 0xc92   : > { %v10388_v14 = vpop.f32.mrf.mxu0 }
 0xc93   : > { %v8413_v47 = vmax.f32 %v8376_v58, 0.0 }
 0xc95   : > { %10448 = vmatmul.mubr.msk.f32.gmra.mxu1 %vm8427_vm2, %v8413_v47 }
 0xc96   : > { %10450 = vmatprep.mubr.msk.f32.mxu1 %vm10654_vm4, %v14601_v1 }
 0xcaf   : > { %v8380_v38 = vpop.f32.mrf.mxu0 }
 0xcb0   : > { %v8381_v37 = vadd.f32 %v14415_v60, %v8380_v38 }
 0xcb1   : > { %v10391_v0 = vpop.f32.mrf.mxu0 }
 0xcb2   : > { %v8414_v61 = vmax.f32 %v8381_v37, 0.0 }
 0xcb4   : > { %10451 = vmatmul.mubr.msk.f32.gmra.mxu1 %vm8427_vm2, %v8414_v61 }
 0xcb5   : > { %10453 = vmatprep.mubr.msk.f32.mxu1 %vm10654_vm4, %v14601_v1 }
 0xcc8   : > { %v8385_v20 = vpop.f32.mrf.mxu0 }
 0xcc9   : > { %v8386_v23 = vadd.f32 %v14415_v60, %v8385_v20 }
 0xcca   : > { %v10394_v42 = vpop.f32.mrf.mxu0 }
 0xccb   : > { %v8415_v51 = vmax.f32 %v8386_v23, 0.0 }
 0xccd   : > { %10454 = vmatmul.mubr.msk.f32.gmra.mxu1 %vm8427_vm2, %v8415_v51 }
 0xcce   : > { %10456 = vmatprep.mubr.msk.f32.mxu1 %vm10654_vm4, %v14601_v1 }
 0xce3   : > { %v8390_v26 = vpop.f32.mrf.mxu0 }
 0xce4   : > { %v8391_v63 = vadd.f32 %v14415_v60, %v8390_v26 }
 0xce5   : > { %v10397_v39 = vpop.f32.mrf.mxu0 }
 0xce6   : > { %v8416_v17 = vmax.f32 %v8391_v63, 0.0 }
 0xce8   : > { %10457 = vmatmul.mubr.msk.f32.gmra.mxu1 %vm8427_vm2, %v8416_v17 }
 0xce9   : > { %10459 = vmatprep.mubr.msk.f32.mxu1 %vm10654_vm4, %v14601_v1 }
 0xcfc   : > { %v8395_v16 = vpop.f32.mrf.mxu0 }
 0xcfd   : > { %v8396_v44 = vadd.f32 %v14415_v60, %v8395_v16 }
 0xcfe   : > { %v10400_v30 = vpop.f32.mrf.mxu0  ;;  %v8551_v29 = vpop.f32.mrf.mxu1 }
 0xcff   : > { %v8417_v1 = vmax.f32 %v8396_v44, 0.0  ;;  %v8552_v41 = vadd.f32 %v14493_v15, %v8551_v29 }
 0xd00   : > { %v10407_v57 = vpop.f32.mrf.mxu1 }
 0xd01   : > { %10460 = vmatmul.mubr.msk.f32.gmra.mxu1 %vm8427_vm2, %v8417_v1  ;;  %8645 = vst [vmem:[%s14501_s27] sm:$0xff] %v8552_v41 }
 0xd02   : > { %v8556_v60 = vpop.f32.mrf.mxu1 }
 0xd03   : > { %v8557_v2 = vadd.f32 %v14493_v15, %v8556_v60 }
 0xd04   : > { %v10410_v9 = vpop.f32.mrf.mxu1 }
 0xd05   : > { %8646 = vst [vmem:[%s14501_s27 + $0x8] sm:$0xff] %v8557_v2 }
 0xd06   : > { %v8561_v56 = vpop.f32.mrf.mxu1 }
 0xd07   : > { %v8562_v32 = vadd.f32 %v14493_v15, %v8561_v56 }
 0xd08   : > { %v10413_v52 = vpop.f32.mrf.mxu1 }
 0xd09   : > { %8647 = vst [vmem:[%s14501_s27 + $0x10] sm:$0xff] %v8562_v32 }
 0xd0a   : > { %v8566_v5 = vpop.f32.mrf.mxu1 }
 0xd0b   : > { %v8567_v10 = vadd.f32 %v14493_v15, %v8566_v5 }
 0xd0c   : > { %v10416_v59 = vpop.f32.mrf.mxu1 }
 0xd0d   : > { %8648 = vst [vmem:[%s14501_s27 + $0x18] sm:$0xff] %v8567_v10 }
 0xd0e   : > { %v8571_v22 = vpop.f32.mrf.mxu1 }
 0xd0f   : > { %v8572_v18 = vadd.f32 %v14493_v15, %v8571_v22 }
 0xd10   : > { %v10419_v13 = vpop.f32.mrf.mxu1 }
 0xd11   : > { %8649 = vst [vmem:[%s14501_s27 + $0x20] sm:$0xff] %v8572_v18 }
 0xd12   : > { %v8576_v43 = vpop.f32.mrf.mxu1 }
 0xd13   : > { %v8577_v8 = vadd.f32 %v14493_v15, %v8576_v43 }
 0xd14   : > { %v10422_v28 = vpop.f32.mrf.mxu1 }
 0xd15   : > { %8650 = vst [vmem:[%s14501_s27 + $0x28] sm:$0xff] %v8577_v8 }
 0xd16   : > { %v8581_v55 = vpop.f32.mrf.mxu1 }
 0xd17   : > { %v8582_v4 = vadd.f32 %v14493_v15, %v8581_v55 }
 0xd18   : > { %v10425_v50 = vpop.f32.mrf.mxu1 }
 0xd19   : > { %8651 = vst [vmem:[%s14501_s27 + $0x30] sm:$0xff] %v8582_v4 }
 0xd1a   : > { %v8586_v35 = vpop.f32.mrf.mxu1 }
 0xd1b   : > { %v8587_v49 = vadd.f32 %v14493_v15, %v8586_v35 }
 0xd1c   : > { %v10428_v48 = vpop.f32.mrf.mxu1 }
 0xd1d   : > { %8652 = vst [vmem:[%s14501_s27 + $0x38] sm:$0xff] %v8587_v49 }
 0xd1e   : > { %v8591_v31 = vpop.f32.mrf.mxu1 }
 0xd1f   : > { %v8592_v25 = vadd.f32 %v14493_v15, %v8591_v31 }
 0xd20   : > { %v10431_v3 = vpop.f32.mrf.mxu1 }
 0xd21   : > { %8653 = vst [vmem:[%s14501_s27 + $0x40] sm:$0xff] %v8592_v25 }
 0xd22   : > { %v8596_v19 = vpop.f32.mrf.mxu1 }
 0xd23   : > { %v8597_v46 = vadd.f32 %v14493_v15, %v8596_v19 }
 0xd24   : > { %v10434_v40 = vpop.f32.mrf.mxu1 }
 0xd25   : > { %8654 = vst [vmem:[%s14501_s27 + $0x48] sm:$0xff] %v8597_v46 }
 0xd26   : > { %v8601_v36 = vpop.f32.mrf.mxu1 }
 0xd27   : > { %v8602_v12 = vadd.f32 %v14493_v15, %v8601_v36 }
 0xd28   : > { %v10437_v53 = vpop.f32.mrf.mxu1 }
 0xd29   : > { %8655 = vst [vmem:[%s14501_s27 + $0x50] sm:$0xff] %v8602_v12 }
 0xd2a   : > { %v8606_v6 = vpop.f32.mrf.mxu1 }
 0xd2b   : > { %v8607_v62 = vadd.f32 %v14493_v15, %v8606_v6 }
 0xd2c   : > { %v10440_v45 = vpop.f32.mrf.mxu1 }
 0xd2d   : > { %8656 = vst [vmem:[%s14501_s27 + $0x58] sm:$0xff] %v8607_v62 }
 0xd2e   : > { %v8611_v54 = vpop.f32.mrf.mxu1 }
 0xd2f   : > { %v8612_v7 = vadd.f32 %v14493_v15, %v8611_v54 }
 0xd30   : > { %v10443_v27 = vpop.f32.mrf.mxu1 }
 0xd31   : > { %8657 = vst [vmem:[%s14501_s27 + $0x60] sm:$0xff] %v8612_v7 }
 0xd3e   : > { %v8616_v34 = vpop.f32.mrf.mxu1 }
 0xd3f   : > { %v8617_v21 = vadd.f32 %v14493_v15, %v8616_v34 }
 0xd40   : > { %v10446_v24 = vpop.f32.mrf.mxu1 }
 0xd41   : > { %8658 = vst [vmem:[%s14501_s27 + $0x68] sm:$0xff] %v8617_v21 }
 0xd55   : > { %v8621_v11 = vpop.f32.mrf.mxu1 }
 0xd56   : > { %v8622_v33 = vadd.f32 %v14493_v15, %v8621_v11 }
 0xd57   : > { %v10449_v58 = vpop.f32.mrf.mxu1 }
 0xd58   : > { %8659 = vst [vmem:[%s14501_s27 + $0x70] sm:$0xff] %v8622_v33 }
 0xd74   : > { %v8626_v14 = vpop.f32.mrf.mxu1 }
 0xd75   : > { %v8627_v47 = vadd.f32 %v14493_v15, %v8626_v14 }
 0xd76   : > { %v10452_v38 = vpop.f32.mrf.mxu1 }
 0xd77   : > { %8660 = vst [vmem:[%s14501_s27 + $0x78] sm:$0xff] %v8627_v47 }
 0xd8d   : > { %v8631_v37 = vpop.f32.mrf.mxu1 }
 0xd8e   : > { %v8632_v0 = vadd.f32 %v14493_v15, %v8631_v37 }
 0xd8f   : > { %v10455_v61 = vpop.f32.mrf.mxu1 }
 0xd90   : > { %8661 = vst [vmem:[%s14501_s27 + $0x80] sm:$0xff] %v8632_v0 }
 0xda8   : > { %v8636_v20 = vpop.f32.mrf.mxu1 }
 0xda9   : > { %v8637_v23 = vadd.f32 %v14493_v15, %v8636_v20 }
 0xdaa   : > { %v10458_v42 = vpop.f32.mrf.mxu1 }
 0xdab   : > { %8662 = vst [vmem:[%s14501_s27 + $0x88] sm:$0xff] %v8637_v23 }
 0xdc1   : > { %v8641_v51 = vpop.f32.mrf.mxu1 }
 0xdc2   : > { %v8642_v26 = vadd.f32 %v14493_v15, %v8641_v51 }
 0xdc3   : > { %v10461_v63 = vpop.f32.mrf.mxu1 }
 0xdc4   : > { %8663 = vst [vmem:[%s14501_s27 + $0x90] sm:$0xff] %v8642_v26 }
 0xdc5 PF: > { %s21_s17 = sadd.s32 1, %s10644_s17  }
 0xdc6   : > { %p18_p4 = scmp.ge.s32.totalorder %s21_s17, 4  }
 0xdc8   :  { %20 = sbr.rel (!%p18_p4) target bundleno = 1 (0x1), region = 105 }

</bundles_post_ra>
